<compile_context>
chip_gen: v7x
topology: tpu7x:2x2x1
jax: 0.10.0
libtpu: 0.0.40
codegen_flags: <defaults>
</compile_context>

<pallas_src>
import functools
import math

import jax
import jax.numpy as jnp
from jax import lax
from jax.experimental import pallas as pl
from jax.experimental.pallas import tpu as pltpu

_EPS = 1e-5
_GELU_C = 0.7978845608028654  # sqrt(2/pi)
_HI = lax.Precision.HIGHEST

_DN_GGT = (((1,), (1,)), ((), ()))  # A @ B^T  (contract last dim of both)
_DN_MM = (((1,), (0,)), ((), ()))   # A @ B


def _gelu_tanh(t):
    return 0.5 * t * (1.0 + jnp.tanh(_GELU_C * (t + 0.044715 * t * t * t)))


# ------------------------------ fused kernel --------------------------------

def _planar_fused_kernel(xp_ref, wrow_ref, selc_ref, g1_ref, b1_ref,
                         awbd_ref, g2_ref, b2_ref, o_ref, *,
                         B, Cin, Cout, H, W, inv_dim):
    """Whole PlanarConv2d forward, one VMEM-resident invocation.

    Working layout: (H, B*Cout*W) -- spatial rows in sublanes, (b, c, w)
    flattened along the 128 lanes (fully lane-dense at the test size).

    xp_ref   : (B, Cin, H+2, W+2)    zero-padded input               [VMEM]
    wrow_ref : (Cin*9, Cout*W)       conv weights, per-tap lane rows [VMEM]
    selc_ref : (Cout, B*Cout*W)      0/1 per-channel column masks    [VMEM]
    g1/b1    : (Cout,)               BN1 gamma / beta                [SMEM]
    awbd_ref : (B*Cout*H, B*Cout*H)  block-diag attention weights    [VMEM]
    g2/b2    : (Cout,)               BN2 gamma / beta                [SMEM]
    o_ref    : (H, B*Cout*W)         output slab                     [VMEM]
    """
    nblk = B * Cout
    inv_nhw = 1.0 / float(B * H * W)

    # ---- Conv2d 3x3, stride 1, pad 1 (VPU broadcast-FMA, lane-dense) -------
    # acc[b][h, c*W + w] accumulates output channel c at pixel (h, w).
    acc = [None] * B
    for ci in range(Cin):
        for kh in range(3):
            rows = [xp_ref[b, ci, kh:kh + H, :] for b in range(B)]   # (H, W+2)
            for kw in range(3):
                tap = ci * 9 + kh * 3 + kw
                wt = wrow_ref[tap:tap + 1, :]                        # (1, Cout*W)
                for b in range(B):
                    xs = jnp.tile(rows[b][:, kw:kw + W], (1, Cout))  # (H, Cout*W)
                    contrib = wt * xs
                    acc[b] = contrib if acc[b] is None else acc[b] + contrib
    y = jnp.concatenate(acc, axis=1)                    # (H, B*Cout*W)
    # Conv bias omitted: exactly cancelled by BN1's batch-mean subtraction.

    # ---- BatchNorm2d (training mode: batch stats, biased var), lane-dense --
    def batchnorm(t, g_ref, b_ref):
        colsum = jnp.sum(t, axis=0, keepdims=True)          # (1, nblk*W)
        colsq = jnp.sum(t * t, axis=0, keepdims=True)       # (1, nblk*W)
        scale_cols = None
        shift_cols = None
        for c in range(Cout):
            ind = selc_ref[c:c + 1, :]                      # (1, nblk*W)
            s = jnp.sum(colsum * ind, axis=1, keepdims=True)     # (1, 1)
            sq = jnp.sum(colsq * ind, axis=1, keepdims=True)     # (1, 1)
            mean = s * inv_nhw
            var = sq * inv_nhw - mean * mean                # single-pass stats
            sc = g_ref[c] * lax.rsqrt(var + _EPS)
            sh = b_ref[c] - mean * sc
            scale_cols = sc * ind if scale_cols is None else scale_cols + sc * ind
            shift_cols = sh * ind if shift_cols is None else shift_cols + sh * ind
        return t * scale_cols + shift_cols

    g = _gelu_tanh(batchnorm(y, g1_ref, b1_ref))            # (H, B*Cout*W)

    # ---- DirectionalAttention, batched over all (b, c) on the MXU ----------
    # Stack all (H, W) planes along sublanes: (nblk*H, W).
    g_all = jnp.concatenate(
        [g[:, blk * W:(blk + 1) * W] for blk in range(nblk)], axis=0)
    s_all = lax.dot_general(g_all, g_all, _DN_GGT, precision=_HI,
                            preferred_element_type=jnp.float32)   # (nblk*H, nblk*H)
    z_all = lax.dot_general(s_all, awbd_ref[...], _DN_MM, precision=_HI,
                            preferred_element_type=jnp.float32)   # (nblk*H, nblk*H)
    # Keep only the diagonal (b, c) blocks, back into the lane-dense layout.
    z = jnp.concatenate(
        [z_all[blk * H:(blk + 1) * H, blk * H:(blk + 1) * H]
         for blk in range(nblk)], axis=1)                   # (H, nblk*W)
    z = z * inv_dim + g                                     # residual add

    # ---- BatchNorm2d #2 + single dense store --------------------------------
    o_ref[...] = batchnorm(z, g2_ref, b2_ref)


# ------------------------------ Python wrapper -------------------------------

@jax.jit
def planar_conv2d(x, params):
    B, Cin, H, W = x.shape
    Cout = params['conv_w'].shape[0]
    assert H == W, "DirectionalAttention residual add requires square spatial dims"
    nblk = B * Cout

    xp = jnp.pad(x, ((0, 0), (0, 0), (1, 1), (1, 1))).astype(jnp.float32)

    # Conv weights as per-tap lane rows:
    #   wrow[ci*9 + kh*3 + kw, c*W + w] = conv_w[c, ci, kh, kw]
    w_t = jnp.transpose(params['conv_w'].astype(jnp.float32), (1, 2, 3, 0))
    wrow = jnp.repeat(w_t.reshape(Cin * 9, Cout), W, axis=1)      # (Cin*9, Cout*W)

    # Per-channel 0/1 column masks over the (b, c, w) lane layout.
    col_ch = (jnp.arange(nblk * W) // W) % Cout
    selc = (col_ch[None, :] == jnp.arange(Cout)[:, None]).astype(jnp.float32)

    # Block-diagonal attention weights, block order = (b, c).
    awbd = jnp.zeros((nblk * H, nblk * H), jnp.float32)
    for blk in range(nblk):
        awbd = awbd.at[blk * H:(blk + 1) * H, blk * H:(blk + 1) * H].set(
            params['att_w'][blk % Cout].astype(jnp.float32))

    inv_dim = 1.0 / math.sqrt(float(W))                           # sqrt(midshape[-1])

    kernel = functools.partial(_planar_fused_kernel, B=B, Cin=Cin, Cout=Cout,
                               H=H, W=W, inv_dim=inv_dim)
    smem = pl.BlockSpec(memory_space=pltpu.MemorySpace.SMEM)

    flops = int(2 * B * Cout * Cin * 9 * H * W        # conv
                + 2 * (nblk * H) ** 2 * W             # batched G G^T
                + 2 * (nblk * H) ** 3                 # batched (..)@att_w (block-diag)
                + 16 * B * Cout * H * W)              # BN / GELU / residual
    bytes_accessed = int(4 * (xp.size + wrow.size + selc.size + awbd.size
                              + 4 * Cout + H * nblk * W))
    cost = pl.CostEstimate(flops=flops,
                           transcendentals=int(B * Cout * H * W),
                           bytes_accessed=bytes_accessed)

    out_flat = pl.pallas_call(
        kernel,
        out_shape=jax.ShapeDtypeStruct((H, nblk * W), jnp.float32),
        grid=(1,),  # single step; all operands (<100 KB) are VMEM-resident
        in_specs=[
            pl.BlockSpec((B, Cin, H + 2, W + 2), lambda i: (0, 0, 0, 0)),
            pl.BlockSpec((Cin * 9, Cout * W), lambda i: (0, 0)),
            pl.BlockSpec((Cout, nblk * W), lambda i: (0, 0)),
            smem, smem,
            pl.BlockSpec((nblk * H, nblk * H), lambda i: (0, 0)),
            smem, smem,
        ],
        out_specs=pl.BlockSpec((H, nblk * W), lambda i: (0, 0)),
        compiler_params=pltpu.CompilerParams(
            dimension_semantics=("arbitrary",)),
        cost_estimate=cost,
    )(xp, wrow, selc, params['bn1_g'], params['bn1_b'], awbd,
      params['bn2_g'], params['bn2_b'])

    # (H, B*Cout*W) -> (B, Cout, H, W)
    return jnp.transpose(out_flat.reshape(H, B, Cout, W), (1, 2, 0, 3))


# ------------------------- Pure-JAX reference (check) ------------------------

def planar_conv2d_ref(x, params):
    y = jax.lax.conv_general_dilated(
        x, params['conv_w'], window_strides=(1, 1), padding=((1, 1), (1, 1)),
        dimension_numbers=('NCHW', 'OIHW', 'NCHW'), precision=_HI)
    y = y + params['conv_b'][None, :, None, None]

    m1 = y.mean(axis=(0, 2, 3), keepdims=True)
    v1 = y.var(axis=(0, 2, 3), keepdims=True)
    y = ((y - m1) / jnp.sqrt(v1 + _EPS) * params['bn1_g'][None, :, None, None]
         + params['bn1_b'][None, :, None, None])
    y = 0.5 * y * (1.0 + jnp.tanh(_GELU_C * (y + 0.044715 * y ** 3)))

    identity = y
    s = jnp.einsum('bchw,bcvw->bchv', y, y, precision=_HI)
    s = jnp.einsum('bchv,cvk->bchk', s, params['att_w'], precision=_HI)
    z = s / math.sqrt(float(x.shape[-1])) + identity

    m2 = z.mean(axis=(0, 2, 3), keepdims=True)
    v2 = z.var(axis=(0, 2, 3), keepdims=True)
    return ((z - m2) / jnp.sqrt(v2 + _EPS) * params['bn2_g'][None, :, None, None]
            + params['bn2_b'][None, :, None, None])


# ------------------------------------ main -----------------------------------

if __name__ == "__main__":
    B, Cin, Cout, H, W = 2, 4, 4, 16, 16  # pooling = (16, 16)
    key = jax.random.PRNGKey(0)
    k_x, k_w, k_b, k_a = jax.random.split(key, 4)

    x = jax.random.normal(k_x, (B, Cin, H, W), jnp.float32)
    fan_in = Cin * 9
    params = dict(
        conv_w=jax.random.normal(k_w, (Cout, Cin, 3, 3), jnp.float32)
               * math.sqrt(2.0 / fan_in),                      # kaiming_normal-like
        conv_b=jax.random.uniform(k_b, (Cout,), jnp.float32,
                                  -1.0 / math.sqrt(fan_in), 1.0 / math.sqrt(fan_in)),
        bn1_g=jnp.ones((Cout,), jnp.float32),
        bn1_b=jnp.zeros((Cout,), jnp.float32),
        att_w=jax.random.normal(k_a, (Cout, H, H), jnp.float32)
              * math.sqrt(2.0 / (H * H)),                      # kaiming_normal-like
        bn2_g=jnp.ones((Cout,), jnp.float32),
        bn2_b=jnp.zeros((Cout,), jnp.float32),
    )

    out = jax.block_until_ready(planar_conv2d(x, params))
    ref = jax.block_until_ready(planar_conv2d_ref(x, params))

    assert out.shape == (B, Cout, H, W), out.shape
    max_err = float(jnp.max(jnp.abs(out - ref)))
    assert jnp.allclose(out, ref, atol=1e-3, rtol=1e-3), f"max abs err = {max_err}"
    print("KERNEL_OK")
</pallas_src>

<mosaic_0001>
module attributes {stable_mosaic.version = 11 : i64} {
  func.func @_planar_fused_kernel(%arg0: i32, %arg1: memref<2x4x18x18xf32, #tpu.memory_space<vmem>>, %arg2: memref<36x64xf32, #tpu.memory_space<vmem>>, %arg3: memref<4x128xf32, #tpu.memory_space<vmem>>, %arg4: memref<4xf32, #tpu.memory_space<smem>>, %arg5: memref<4xf32, #tpu.memory_space<smem>>, %arg6: memref<128x128xf32, #tpu.memory_space<vmem>>, %arg7: memref<4xf32, #tpu.memory_space<smem>>, %arg8: memref<4xf32, #tpu.memory_space<smem>>, %arg9: memref<16x128xf32, #tpu.memory_space<vmem>>) attributes {dimension_semantics = [#tpu.dimension_semantics<arbitrary>], iteration_bounds = array<i64: 1>, scalar_prefetch = 0 : i64, scratch_operands = 0 : i64, tpu.core_type = #tpu.core_type<tc>, window_params = [{pipeline_mode = #tpu.pipeline_mode<synchronous>, transform_indices = @transform_0, window_bounds = array<i64: 2, 4, 18, 18>}, {pipeline_mode = #tpu.pipeline_mode<synchronous>, transform_indices = @transform_1, window_bounds = array<i64: 36, 64>}, {pipeline_mode = #tpu.pipeline_mode<synchronous>, transform_indices = @transform_2, window_bounds = array<i64: 4, 128>}, {transform_indices = @transform_3, window_bounds = array<i64: 4>}, {transform_indices = @transform_4, window_bounds = array<i64: 4>}, {pipeline_mode = #tpu.pipeline_mode<synchronous>, transform_indices = @transform_5, window_bounds = array<i64: 128, 128>}, {transform_indices = @transform_6, window_bounds = array<i64: 4>}, {transform_indices = @transform_7, window_bounds = array<i64: 4>}, {pipeline_mode = #tpu.pipeline_mode<synchronous>, transform_indices = @transform_8, window_bounds = array<i64: 16, 128>}]} {
    %c0 = arith.constant 0 : index
    %c0_0 = arith.constant 0 : index
    %c0_1 = arith.constant 0 : index
    %c0_2 = arith.constant 0 : index
    %0 = vector.load %arg1[%c0, %c0_0, %c0_1, %c0_2] : memref<2x4x18x18xf32, #tpu.memory_space<vmem>>, vector<1x1x16x18xf32>
    %1 = vector.shape_cast %0 : vector<1x1x16x18xf32> to vector<16x18xf32>
    %c1 = arith.constant 1 : index
    %c0_3 = arith.constant 0 : index
    %c0_4 = arith.constant 0 : index
    %c0_5 = arith.constant 0 : index
    %2 = vector.load %arg1[%c1, %c0_3, %c0_4, %c0_5] : memref<2x4x18x18xf32, #tpu.memory_space<vmem>>, vector<1x1x16x18xf32>
    %3 = vector.shape_cast %2 : vector<1x1x16x18xf32> to vector<16x18xf32>
    %c0_6 = arith.constant 0 : index
    %c0_7 = arith.constant 0 : index
    %4 = vector.load %arg2[%c0_6, %c0_7] : memref<36x64xf32, #tpu.memory_space<vmem>>, vector<1x64xf32>
    %5 = vector.extract_strided_slice %1 {offsets = [0, 0], sizes = [16, 16], strides = [1, 1]} : vector<16x18xf32> to vector<16x16xf32>
    %6 = tpu.concatenate %5, %5, %5, %5 in 1 : vector<16x16xf32>, vector<16x16xf32>, vector<16x16xf32>, vector<16x16xf32> -> vector<16x64xf32>
    %7 = vector.broadcast %4 : vector<1x64xf32> to vector<16x64xf32>
    %8 = arith.mulf %7, %6 : vector<16x64xf32>
    %9 = vector.extract_strided_slice %3 {offsets = [0, 0], sizes = [16, 16], strides = [1, 1]} : vector<16x18xf32> to vector<16x16xf32>
    %10 = tpu.concatenate %9, %9, %9, %9 in 1 : vector<16x16xf32>, vector<16x16xf32>, vector<16x16xf32>, vector<16x16xf32> -> vector<16x64xf32>
    %11 = vector.broadcast %4 : vector<1x64xf32> to vector<16x64xf32>
    %12 = arith.mulf %11, %10 : vector<16x64xf32>
    %c1_8 = arith.constant 1 : index
    %c0_9 = arith.constant 0 : index
    %13 = vector.load %arg2[%c1_8, %c0_9] : memref<36x64xf32, #tpu.memory_space<vmem>>, vector<1x64xf32>
    %14 = vector.extract_strided_slice %1 {offsets = [0, 1], sizes = [16, 16], strides = [1, 1]} : vector<16x18xf32> to vector<16x16xf32>
    %15 = tpu.concatenate %14, %14, %14, %14 in 1 : vector<16x16xf32>, vector<16x16xf32>, vector<16x16xf32>, vector<16x16xf32> -> vector<16x64xf32>
    %16 = vector.broadcast %13 : vector<1x64xf32> to vector<16x64xf32>
    %17 = arith.mulf %16, %15 : vector<16x64xf32>
    %18 = arith.addf %8, %17 : vector<16x64xf32>
    %19 = vector.extract_strided_slice %3 {offsets = [0, 1], sizes = [16, 16], strides = [1, 1]} : vector<16x18xf32> to vector<16x16xf32>
    %20 = tpu.concatenate %19, %19, %19, %19 in 1 : vector<16x16xf32>, vector<16x16xf32>, vector<16x16xf32>, vector<16x16xf32> -> vector<16x64xf32>
    %21 = vector.broadcast %13 : vector<1x64xf32> to vector<16x64xf32>
    %22 = arith.mulf %21, %20 : vector<16x64xf32>
    %23 = arith.addf %12, %22 : vector<16x64xf32>
    %c2 = arith.constant 2 : index
    %c0_10 = arith.constant 0 : index
    %24 = vector.load %arg2[%c2, %c0_10] : memref<36x64xf32, #tpu.memory_space<vmem>>, vector<1x64xf32>
    %25 = vector.extract_strided_slice %1 {offsets = [0, 2], sizes = [16, 16], strides = [1, 1]} : vector<16x18xf32> to vector<16x16xf32>
    %26 = tpu.concatenate %25, %25, %25, %25 in 1 : vector<16x16xf32>, vector<16x16xf32>, vector<16x16xf32>, vector<16x16xf32> -> vector<16x64xf32>
    %27 = vector.broadcast %24 : vector<1x64xf32> to vector<16x64xf32>
    %28 = arith.mulf %27, %26 : vector<16x64xf32>
    %29 = arith.addf %18, %28 : vector<16x64xf32>
    %30 = vector.extract_strided_slice %3 {offsets = [0, 2], sizes = [16, 16], strides = [1, 1]} : vector<16x18xf32> to vector<16x16xf32>
    %31 = tpu.concatenate %30, %30, %30, %30 in 1 : vector<16x16xf32>, vector<16x16xf32>, vector<16x16xf32>, vector<16x16xf32> -> vector<16x64xf32>
    %32 = vector.broadcast %24 : vector<1x64xf32> to vector<16x64xf32>
    %33 = arith.mulf %32, %31 : vector<16x64xf32>
    %34 = arith.addf %23, %33 : vector<16x64xf32>
    %c0_11 = arith.constant 0 : index
    %c0_12 = arith.constant 0 : index
    %c1_13 = arith.constant 1 : index
    %c0_14 = arith.constant 0 : index
    %35 = vector.load %arg1[%c0_11, %c0_12, %c1_13, %c0_14] : memref<2x4x18x18xf32, #tpu.memory_space<vmem>>, vector<1x1x16x18xf32>
    %36 = vector.shape_cast %35 : vector<1x1x16x18xf32> to vector<16x18xf32>
    %c1_15 = arith.constant 1 : index
    %c0_16 = arith.constant 0 : index
    %c1_17 = arith.constant 1 : index
    %c0_18 = arith.constant 0 : index
    %37 = vector.load %arg1[%c1_15, %c0_16, %c1_17, %c0_18] : memref<2x4x18x18xf32, #tpu.memory_space<vmem>>, vector<1x1x16x18xf32>
    %38 = vector.shape_cast %37 : vector<1x1x16x18xf32> to vector<16x18xf32>
    %c3 = arith.constant 3 : index
    %c0_19 = arith.constant 0 : index
    %39 = vector.load %arg2[%c3, %c0_19] : memref<36x64xf32, #tpu.memory_space<vmem>>, vector<1x64xf32>
    %40 = vector.extract_strided_slice %36 {offsets = [0, 0], sizes = [16, 16], strides = [1, 1]} : vector<16x18xf32> to vector<16x16xf32>
    %41 = tpu.concatenate %40, %40, %40, %40 in 1 : vector<16x16xf32>, vector<16x16xf32>, vector<16x16xf32>, vector<16x16xf32> -> vector<16x64xf32>
    %42 = vector.broadcast %39 : vector<1x64xf32> to vector<16x64xf32>
    %43 = arith.mulf %42, %41 : vector<16x64xf32>
    %44 = arith.addf %29, %43 : vector<16x64xf32>
    %45 = vector.extract_strided_slice %38 {offsets = [0, 0], sizes = [16, 16], strides = [1, 1]} : vector<16x18xf32> to vector<16x16xf32>
    %46 = tpu.concatenate %45, %45, %45, %45 in 1 : vector<16x16xf32>, vector<16x16xf32>, vector<16x16xf32>, vector<16x16xf32> -> vector<16x64xf32>
    %47 = vector.broadcast %39 : vector<1x64xf32> to vector<16x64xf32>
    %48 = arith.mulf %47, %46 : vector<16x64xf32>
    %49 = arith.addf %34, %48 : vector<16x64xf32>
    %c4 = arith.constant 4 : index
    %c0_20 = arith.constant 0 : index
    %50 = vector.load %arg2[%c4, %c0_20] : memref<36x64xf32, #tpu.memory_space<vmem>>, vector<1x64xf32>
    %51 = vector.extract_strided_slice %36 {offsets = [0, 1], sizes = [16, 16], strides = [1, 1]} : vector<16x18xf32> to vector<16x16xf32>
    %52 = tpu.concatenate %51, %51, %51, %51 in 1 : vector<16x16xf32>, vector<16x16xf32>, vector<16x16xf32>, vector<16x16xf32> -> vector<16x64xf32>
    %53 = vector.broadcast %50 : vector<1x64xf32> to vector<16x64xf32>
    %54 = arith.mulf %53, %52 : vector<16x64xf32>
    %55 = arith.addf %44, %54 : vector<16x64xf32>
    %56 = vector.extract_strided_slice %38 {offsets = [0, 1], sizes = [16, 16], strides = [1, 1]} : vector<16x18xf32> to vector<16x16xf32>
    %57 = tpu.concatenate %56, %56, %56, %56 in 1 : vector<16x16xf32>, vector<16x16xf32>, vector<16x16xf32>, vector<16x16xf32> -> vector<16x64xf32>
    %58 = vector.broadcast %50 : vector<1x64xf32> to vector<16x64xf32>
    %59 = arith.mulf %58, %57 : vector<16x64xf32>
    %60 = arith.addf %49, %59 : vector<16x64xf32>
    %c5 = arith.constant 5 : index
    %c0_21 = arith.constant 0 : index
    %61 = vector.load %arg2[%c5, %c0_21] : memref<36x64xf32, #tpu.memory_space<vmem>>, vector<1x64xf32>
    %62 = vector.extract_strided_slice %36 {offsets = [0, 2], sizes = [16, 16], strides = [1, 1]} : vector<16x18xf32> to vector<16x16xf32>
    %63 = tpu.concatenate %62, %62, %62, %62 in 1 : vector<16x16xf32>, vector<16x16xf32>, vector<16x16xf32>, vector<16x16xf32> -> vector<16x64xf32>
    %64 = vector.broadcast %61 : vector<1x64xf32> to vector<16x64xf32>
    %65 = arith.mulf %64, %63 : vector<16x64xf32>
    %66 = arith.addf %55, %65 : vector<16x64xf32>
    %67 = vector.extract_strided_slice %38 {offsets = [0, 2], sizes = [16, 16], strides = [1, 1]} : vector<16x18xf32> to vector<16x16xf32>
    %68 = tpu.concatenate %67, %67, %67, %67 in 1 : vector<16x16xf32>, vector<16x16xf32>, vector<16x16xf32>, vector<16x16xf32> -> vector<16x64xf32>
    %69 = vector.broadcast %61 : vector<1x64xf32> to vector<16x64xf32>
    %70 = arith.mulf %69, %68 : vector<16x64xf32>
    %71 = arith.addf %60, %70 : vector<16x64xf32>
    %c0_22 = arith.constant 0 : index
    %c0_23 = arith.constant 0 : index
    %c2_24 = arith.constant 2 : index
    %c0_25 = arith.constant 0 : index
    %72 = vector.load %arg1[%c0_22, %c0_23, %c2_24, %c0_25] : memref<2x4x18x18xf32, #tpu.memory_space<vmem>>, vector<1x1x16x18xf32>
    %73 = vector.shape_cast %72 : vector<1x1x16x18xf32> to vector<16x18xf32>
    %c1_26 = arith.constant 1 : index
    %c0_27 = arith.constant 0 : index
    %c2_28 = arith.constant 2 : index
    %c0_29 = arith.constant 0 : index
    %74 = vector.load %arg1[%c1_26, %c0_27, %c2_28, %c0_29] : memref<2x4x18x18xf32, #tpu.memory_space<vmem>>, vector<1x1x16x18xf32>
    %75 = vector.shape_cast %74 : vector<1x1x16x18xf32> to vector<16x18xf32>
    %c6 = arith.constant 6 : index
    %c0_30 = arith.constant 0 : index
    %76 = vector.load %arg2[%c6, %c0_30] : memref<36x64xf32, #tpu.memory_space<vmem>>, vector<1x64xf32>
    %77 = vector.extract_strided_slice %73 {offsets = [0, 0], sizes = [16, 16], strides = [1, 1]} : vector<16x18xf32> to vector<16x16xf32>
    %78 = tpu.concatenate %77, %77, %77, %77 in 1 : vector<16x16xf32>, vector<16x16xf32>, vector<16x16xf32>, vector<16x16xf32> -> vector<16x64xf32>
    %79 = vector.broadcast %76 : vector<1x64xf32> to vector<16x64xf32>
    %80 = arith.mulf %79, %78 : vector<16x64xf32>
    %81 = arith.addf %66, %80 : vector<16x64xf32>
    %82 = vector.extract_strided_slice %75 {offsets = [0, 0], sizes = [16, 16], strides = [1, 1]} : vector<16x18xf32> to vector<16x16xf32>
    %83 = tpu.concatenate %82, %82, %82, %82 in 1 : vector<16x16xf32>, vector<16x16xf32>, vector<16x16xf32>, vector<16x16xf32> -> vector<16x64xf32>
    %84 = vector.broadcast %76 : vector<1x64xf32> to vector<16x64xf32>
    %85 = arith.mulf %84, %83 : vector<16x64xf32>
    %86 = arith.addf %71, %85 : vector<16x64xf32>
    %c7 = arith.constant 7 : index
    %c0_31 = arith.constant 0 : index
    %87 = vector.load %arg2[%c7, %c0_31] : memref<36x64xf32, #tpu.memory_space<vmem>>, vector<1x64xf32>
    %88 = vector.extract_strided_slice %73 {offsets = [0, 1], sizes = [16, 16], strides = [1, 1]} : vector<16x18xf32> to vector<16x16xf32>
    %89 = tpu.concatenate %88, %88, %88, %88 in 1 : vector<16x16xf32>, vector<16x16xf32>, vector<16x16xf32>, vector<16x16xf32> -> vector<16x64xf32>
    %90 = vector.broadcast %87 : vector<1x64xf32> to vector<16x64xf32>
    %91 = arith.mulf %90, %89 : vector<16x64xf32>
    %92 = arith.addf %81, %91 : vector<16x64xf32>
    %93 = vector.extract_strided_slice %75 {offsets = [0, 1], sizes = [16, 16], strides = [1, 1]} : vector<16x18xf32> to vector<16x16xf32>
    %94 = tpu.concatenate %93, %93, %93, %93 in 1 : vector<16x16xf32>, vector<16x16xf32>, vector<16x16xf32>, vector<16x16xf32> -> vector<16x64xf32>
    %95 = vector.broadcast %87 : vector<1x64xf32> to vector<16x64xf32>
    %96 = arith.mulf %95, %94 : vector<16x64xf32>
    %97 = arith.addf %86, %96 : vector<16x64xf32>
    %c8 = arith.constant 8 : index
    %c0_32 = arith.constant 0 : index
    %98 = vector.load %arg2[%c8, %c0_32] : memref<36x64xf32, #tpu.memory_space<vmem>>, vector<1x64xf32>
    %99 = vector.extract_strided_slice %73 {offsets = [0, 2], sizes = [16, 16], strides = [1, 1]} : vector<16x18xf32> to vector<16x16xf32>
    %100 = tpu.concatenate %99, %99, %99, %99 in 1 : vector<16x16xf32>, vector<16x16xf32>, vector<16x16xf32>, vector<16x16xf32> -> vector<16x64xf32>
    %101 = vector.broadcast %98 : vector<1x64xf32> to vector<16x64xf32>
    %102 = arith.mulf %101, %100 : vector<16x64xf32>
    %103 = arith.addf %92, %102 : vector<16x64xf32>
    %104 = vector.extract_strided_slice %75 {offsets = [0, 2], sizes = [16, 16], strides = [1, 1]} : vector<16x18xf32> to vector<16x16xf32>
    %105 = tpu.concatenate %104, %104, %104, %104 in 1 : vector<16x16xf32>, vector<16x16xf32>, vector<16x16xf32>, vector<16x16xf32> -> vector<16x64xf32>
    %106 = vector.broadcast %98 : vector<1x64xf32> to vector<16x64xf32>
    %107 = arith.mulf %106, %105 : vector<16x64xf32>
    %108 = arith.addf %97, %107 : vector<16x64xf32>
    %c0_33 = arith.constant 0 : index
    %c1_34 = arith.constant 1 : index
    %c0_35 = arith.constant 0 : index
    %c0_36 = arith.constant 0 : index
    %109 = vector.load %arg1[%c0_33, %c1_34, %c0_35, %c0_36] : memref<2x4x18x18xf32, #tpu.memory_space<vmem>>, vector<1x1x16x18xf32>
    %110 = vector.shape_cast %109 : vector<1x1x16x18xf32> to vector<16x18xf32>
    %c1_37 = arith.constant 1 : index
    %c1_38 = arith.constant 1 : index
    %c0_39 = arith.constant 0 : index
    %c0_40 = arith.constant 0 : index
    %111 = vector.load %arg1[%c1_37, %c1_38, %c0_39, %c0_40] : memref<2x4x18x18xf32, #tpu.memory_space<vmem>>, vector<1x1x16x18xf32>
    %112 = vector.shape_cast %111 : vector<1x1x16x18xf32> to vector<16x18xf32>
    %c9 = arith.constant 9 : index
    %c0_41 = arith.constant 0 : index
    %113 = vector.load %arg2[%c9, %c0_41] : memref<36x64xf32, #tpu.memory_space<vmem>>, vector<1x64xf32>
    %114 = vector.extract_strided_slice %110 {offsets = [0, 0], sizes = [16, 16], strides = [1, 1]} : vector<16x18xf32> to vector<16x16xf32>
    %115 = tpu.concatenate %114, %114, %114, %114 in 1 : vector<16x16xf32>, vector<16x16xf32>, vector<16x16xf32>, vector<16x16xf32> -> vector<16x64xf32>
    %116 = vector.broadcast %113 : vector<1x64xf32> to vector<16x64xf32>
    %117 = arith.mulf %116, %115 : vector<16x64xf32>
    %118 = arith.addf %103, %117 : vector<16x64xf32>
    %119 = vector.extract_strided_slice %112 {offsets = [0, 0], sizes = [16, 16], strides = [1, 1]} : vector<16x18xf32> to vector<16x16xf32>
    %120 = tpu.concatenate %119, %119, %119, %119 in 1 : vector<16x16xf32>, vector<16x16xf32>, vector<16x16xf32>, vector<16x16xf32> -> vector<16x64xf32>
    %121 = vector.broadcast %113 : vector<1x64xf32> to vector<16x64xf32>
    %122 = arith.mulf %121, %120 : vector<16x64xf32>
    %123 = arith.addf %108, %122 : vector<16x64xf32>
    %c10 = arith.constant 10 : index
    %c0_42 = arith.constant 0 : index
    %124 = vector.load %arg2[%c10, %c0_42] : memref<36x64xf32, #tpu.memory_space<vmem>>, vector<1x64xf32>
    %125 = vector.extract_strided_slice %110 {offsets = [0, 1], sizes = [16, 16], strides = [1, 1]} : vector<16x18xf32> to vector<16x16xf32>
    %126 = tpu.concatenate %125, %125, %125, %125 in 1 : vector<16x16xf32>, vector<16x16xf32>, vector<16x16xf32>, vector<16x16xf32> -> vector<16x64xf32>
    %127 = vector.broadcast %124 : vector<1x64xf32> to vector<16x64xf32>
    %128 = arith.mulf %127, %126 : vector<16x64xf32>
    %129 = arith.addf %118, %128 : vector<16x64xf32>
    %130 = vector.extract_strided_slice %112 {offsets = [0, 1], sizes = [16, 16], strides = [1, 1]} : vector<16x18xf32> to vector<16x16xf32>
    %131 = tpu.concatenate %130, %130, %130, %130 in 1 : vector<16x16xf32>, vector<16x16xf32>, vector<16x16xf32>, vector<16x16xf32> -> vector<16x64xf32>
    %132 = vector.broadcast %124 : vector<1x64xf32> to vector<16x64xf32>
    %133 = arith.mulf %132, %131 : vector<16x64xf32>
    %134 = arith.addf %123, %133 : vector<16x64xf32>
    %c11 = arith.constant 11 : index
    %c0_43 = arith.constant 0 : index
    %135 = vector.load %arg2[%c11, %c0_43] : memref<36x64xf32, #tpu.memory_space<vmem>>, vector<1x64xf32>
    %136 = vector.extract_strided_slice %110 {offsets = [0, 2], sizes = [16, 16], strides = [1, 1]} : vector<16x18xf32> to vector<16x16xf32>
    %137 = tpu.concatenate %136, %136, %136, %136 in 1 : vector<16x16xf32>, vector<16x16xf32>, vector<16x16xf32>, vector<16x16xf32> -> vector<16x64xf32>
    %138 = vector.broadcast %135 : vector<1x64xf32> to vector<16x64xf32>
    %139 = arith.mulf %138, %137 : vector<16x64xf32>
    %140 = arith.addf %129, %139 : vector<16x64xf32>
    %141 = vector.extract_strided_slice %112 {offsets = [0, 2], sizes = [16, 16], strides = [1, 1]} : vector<16x18xf32> to vector<16x16xf32>
    %142 = tpu.concatenate %141, %141, %141, %141 in 1 : vector<16x16xf32>, vector<16x16xf32>, vector<16x16xf32>, vector<16x16xf32> -> vector<16x64xf32>
    %143 = vector.broadcast %135 : vector<1x64xf32> to vector<16x64xf32>
    %144 = arith.mulf %143, %142 : vector<16x64xf32>
    %145 = arith.addf %134, %144 : vector<16x64xf32>
    %c0_44 = arith.constant 0 : index
    %c1_45 = arith.constant 1 : index
    %c1_46 = arith.constant 1 : index
    %c0_47 = arith.constant 0 : index
    %146 = vector.load %arg1[%c0_44, %c1_45, %c1_46, %c0_47] : memref<2x4x18x18xf32, #tpu.memory_space<vmem>>, vector<1x1x16x18xf32>
    %147 = vector.shape_cast %146 : vector<1x1x16x18xf32> to vector<16x18xf32>
    %c1_48 = arith.constant 1 : index
    %c1_49 = arith.constant 1 : index
    %c1_50 = arith.constant 1 : index
    %c0_51 = arith.constant 0 : index
    %148 = vector.load %arg1[%c1_48, %c1_49, %c1_50, %c0_51] : memref<2x4x18x18xf32, #tpu.memory_space<vmem>>, vector<1x1x16x18xf32>
    %149 = vector.shape_cast %148 : vector<1x1x16x18xf32> to vector<16x18xf32>
    %c12 = arith.constant 12 : index
    %c0_52 = arith.constant 0 : index
    %150 = vector.load %arg2[%c12, %c0_52] : memref<36x64xf32, #tpu.memory_space<vmem>>, vector<1x64xf32>
    %151 = vector.extract_strided_slice %147 {offsets = [0, 0], sizes = [16, 16], strides = [1, 1]} : vector<16x18xf32> to vector<16x16xf32>
    %152 = tpu.concatenate %151, %151, %151, %151 in 1 : vector<16x16xf32>, vector<16x16xf32>, vector<16x16xf32>, vector<16x16xf32> -> vector<16x64xf32>
    %153 = vector.broadcast %150 : vector<1x64xf32> to vector<16x64xf32>
    %154 = arith.mulf %153, %152 : vector<16x64xf32>
    %155 = arith.addf %140, %154 : vector<16x64xf32>
    %156 = vector.extract_strided_slice %149 {offsets = [0, 0], sizes = [16, 16], strides = [1, 1]} : vector<16x18xf32> to vector<16x16xf32>
    %157 = tpu.concatenate %156, %156, %156, %156 in 1 : vector<16x16xf32>, vector<16x16xf32>, vector<16x16xf32>, vector<16x16xf32> -> vector<16x64xf32>
    %158 = vector.broadcast %150 : vector<1x64xf32> to vector<16x64xf32>
    %159 = arith.mulf %158, %157 : vector<16x64xf32>
    %160 = arith.addf %145, %159 : vector<16x64xf32>
    %c13 = arith.constant 13 : index
    %c0_53 = arith.constant 0 : index
    %161 = vector.load %arg2[%c13, %c0_53] : memref<36x64xf32, #tpu.memory_space<vmem>>, vector<1x64xf32>
    %162 = vector.extract_strided_slice %147 {offsets = [0, 1], sizes = [16, 16], strides = [1, 1]} : vector<16x18xf32> to vector<16x16xf32>
    %163 = tpu.concatenate %162, %162, %162, %162 in 1 : vector<16x16xf32>, vector<16x16xf32>, vector<16x16xf32>, vector<16x16xf32> -> vector<16x64xf32>
    %164 = vector.broadcast %161 : vector<1x64xf32> to vector<16x64xf32>
    %165 = arith.mulf %164, %163 : vector<16x64xf32>
    %166 = arith.addf %155, %165 : vector<16x64xf32>
    %167 = vector.extract_strided_slice %149 {offsets = [0, 1], sizes = [16, 16], strides = [1, 1]} : vector<16x18xf32> to vector<16x16xf32>
    %168 = tpu.concatenate %167, %167, %167, %167 in 1 : vector<16x16xf32>, vector<16x16xf32>, vector<16x16xf32>, vector<16x16xf32> -> vector<16x64xf32>
    %169 = vector.broadcast %161 : vector<1x64xf32> to vector<16x64xf32>
    %170 = arith.mulf %169, %168 : vector<16x64xf32>
    %171 = arith.addf %160, %170 : vector<16x64xf32>
    %c14 = arith.constant 14 : index
    %c0_54 = arith.constant 0 : index
    %172 = vector.load %arg2[%c14, %c0_54] : memref<36x64xf32, #tpu.memory_space<vmem>>, vector<1x64xf32>
    %173 = vector.extract_strided_slice %147 {offsets = [0, 2], sizes = [16, 16], strides = [1, 1]} : vector<16x18xf32> to vector<16x16xf32>
    %174 = tpu.concatenate %173, %173, %173, %173 in 1 : vector<16x16xf32>, vector<16x16xf32>, vector<16x16xf32>, vector<16x16xf32> -> vector<16x64xf32>
    %175 = vector.broadcast %172 : vector<1x64xf32> to vector<16x64xf32>
    %176 = arith.mulf %175, %174 : vector<16x64xf32>
    %177 = arith.addf %166, %176 : vector<16x64xf32>
    %178 = vector.extract_strided_slice %149 {offsets = [0, 2], sizes = [16, 16], strides = [1, 1]} : vector<16x18xf32> to vector<16x16xf32>
    %179 = tpu.concatenate %178, %178, %178, %178 in 1 : vector<16x16xf32>, vector<16x16xf32>, vector<16x16xf32>, vector<16x16xf32> -> vector<16x64xf32>
    %180 = vector.broadcast %172 : vector<1x64xf32> to vector<16x64xf32>
    %181 = arith.mulf %180, %179 : vector<16x64xf32>
    %182 = arith.addf %171, %181 : vector<16x64xf32>
    %c0_55 = arith.constant 0 : index
    %c1_56 = arith.constant 1 : index
    %c2_57 = arith.constant 2 : index
    %c0_58 = arith.constant 0 : index
    %183 = vector.load %arg1[%c0_55, %c1_56, %c2_57, %c0_58] : memref<2x4x18x18xf32, #tpu.memory_space<vmem>>, vector<1x1x16x18xf32>
    %184 = vector.shape_cast %183 : vector<1x1x16x18xf32> to vector<16x18xf32>
    %c1_59 = arith.constant 1 : index
    %c1_60 = arith.constant 1 : index
    %c2_61 = arith.constant 2 : index
    %c0_62 = arith.constant 0 : index
    %185 = vector.load %arg1[%c1_59, %c1_60, %c2_61, %c0_62] : memref<2x4x18x18xf32, #tpu.memory_space<vmem>>, vector<1x1x16x18xf32>
    %186 = vector.shape_cast %185 : vector<1x1x16x18xf32> to vector<16x18xf32>
    %c15 = arith.constant 15 : index
    %c0_63 = arith.constant 0 : index
    %187 = vector.load %arg2[%c15, %c0_63] : memref<36x64xf32, #tpu.memory_space<vmem>>, vector<1x64xf32>
    %188 = vector.extract_strided_slice %184 {offsets = [0, 0], sizes = [16, 16], strides = [1, 1]} : vector<16x18xf32> to vector<16x16xf32>
    %189 = tpu.concatenate %188, %188, %188, %188 in 1 : vector<16x16xf32>, vector<16x16xf32>, vector<16x16xf32>, vector<16x16xf32> -> vector<16x64xf32>
    %190 = vector.broadcast %187 : vector<1x64xf32> to vector<16x64xf32>
    %191 = arith.mulf %190, %189 : vector<16x64xf32>
    %192 = arith.addf %177, %191 : vector<16x64xf32>
    %193 = vector.extract_strided_slice %186 {offsets = [0, 0], sizes = [16, 16], strides = [1, 1]} : vector<16x18xf32> to vector<16x16xf32>
    %194 = tpu.concatenate %193, %193, %193, %193 in 1 : vector<16x16xf32>, vector<16x16xf32>, vector<16x16xf32>, vector<16x16xf32> -> vector<16x64xf32>
    %195 = vector.broadcast %187 : vector<1x64xf32> to vector<16x64xf32>
    %196 = arith.mulf %195, %194 : vector<16x64xf32>
    %197 = arith.addf %182, %196 : vector<16x64xf32>
    %c16 = arith.constant 16 : index
    %c0_64 = arith.constant 0 : index
    %198 = vector.load %arg2[%c16, %c0_64] : memref<36x64xf32, #tpu.memory_space<vmem>>, vector<1x64xf32>
    %199 = vector.extract_strided_slice %184 {offsets = [0, 1], sizes = [16, 16], strides = [1, 1]} : vector<16x18xf32> to vector<16x16xf32>
    %200 = tpu.concatenate %199, %199, %199, %199 in 1 : vector<16x16xf32>, vector<16x16xf32>, vector<16x16xf32>, vector<16x16xf32> -> vector<16x64xf32>
    %201 = vector.broadcast %198 : vector<1x64xf32> to vector<16x64xf32>
    %202 = arith.mulf %201, %200 : vector<16x64xf32>
    %203 = arith.addf %192, %202 : vector<16x64xf32>
    %204 = vector.extract_strided_slice %186 {offsets = [0, 1], sizes = [16, 16], strides = [1, 1]} : vector<16x18xf32> to vector<16x16xf32>
    %205 = tpu.concatenate %204, %204, %204, %204 in 1 : vector<16x16xf32>, vector<16x16xf32>, vector<16x16xf32>, vector<16x16xf32> -> vector<16x64xf32>
    %206 = vector.broadcast %198 : vector<1x64xf32> to vector<16x64xf32>
    %207 = arith.mulf %206, %205 : vector<16x64xf32>
    %208 = arith.addf %197, %207 : vector<16x64xf32>
    %c17 = arith.constant 17 : index
    %c0_65 = arith.constant 0 : index
    %209 = vector.load %arg2[%c17, %c0_65] : memref<36x64xf32, #tpu.memory_space<vmem>>, vector<1x64xf32>
    %210 = vector.extract_strided_slice %184 {offsets = [0, 2], sizes = [16, 16], strides = [1, 1]} : vector<16x18xf32> to vector<16x16xf32>
    %211 = tpu.concatenate %210, %210, %210, %210 in 1 : vector<16x16xf32>, vector<16x16xf32>, vector<16x16xf32>, vector<16x16xf32> -> vector<16x64xf32>
    %212 = vector.broadcast %209 : vector<1x64xf32> to vector<16x64xf32>
    %213 = arith.mulf %212, %211 : vector<16x64xf32>
    %214 = arith.addf %203, %213 : vector<16x64xf32>
    %215 = vector.extract_strided_slice %186 {offsets = [0, 2], sizes = [16, 16], strides = [1, 1]} : vector<16x18xf32> to vector<16x16xf32>
    %216 = tpu.concatenate %215, %215, %215, %215 in 1 : vector<16x16xf32>, vector<16x16xf32>, vector<16x16xf32>, vector<16x16xf32> -> vector<16x64xf32>
    %217 = vector.broadcast %209 : vector<1x64xf32> to vector<16x64xf32>
    %218 = arith.mulf %217, %216 : vector<16x64xf32>
    %219 = arith.addf %208, %218 : vector<16x64xf32>
    %c0_66 = arith.constant 0 : index
    %c2_67 = arith.constant 2 : index
    %c0_68 = arith.constant 0 : index
    %c0_69 = arith.constant 0 : index
    %220 = vector.load %arg1[%c0_66, %c2_67, %c0_68, %c0_69] : memref<2x4x18x18xf32, #tpu.memory_space<vmem>>, vector<1x1x16x18xf32>
    %221 = vector.shape_cast %220 : vector<1x1x16x18xf32> to vector<16x18xf32>
    %c1_70 = arith.constant 1 : index
    %c2_71 = arith.constant 2 : index
    %c0_72 = arith.constant 0 : index
    %c0_73 = arith.constant 0 : index
    %222 = vector.load %arg1[%c1_70, %c2_71, %c0_72, %c0_73] : memref<2x4x18x18xf32, #tpu.memory_space<vmem>>, vector<1x1x16x18xf32>
    %223 = vector.shape_cast %222 : vector<1x1x16x18xf32> to vector<16x18xf32>
    %c18 = arith.constant 18 : index
    %c0_74 = arith.constant 0 : index
    %224 = vector.load %arg2[%c18, %c0_74] : memref<36x64xf32, #tpu.memory_space<vmem>>, vector<1x64xf32>
    %225 = vector.extract_strided_slice %221 {offsets = [0, 0], sizes = [16, 16], strides = [1, 1]} : vector<16x18xf32> to vector<16x16xf32>
    %226 = tpu.concatenate %225, %225, %225, %225 in 1 : vector<16x16xf32>, vector<16x16xf32>, vector<16x16xf32>, vector<16x16xf32> -> vector<16x64xf32>
    %227 = vector.broadcast %224 : vector<1x64xf32> to vector<16x64xf32>
    %228 = arith.mulf %227, %226 : vector<16x64xf32>
    %229 = arith.addf %214, %228 : vector<16x64xf32>
    %230 = vector.extract_strided_slice %223 {offsets = [0, 0], sizes = [16, 16], strides = [1, 1]} : vector<16x18xf32> to vector<16x16xf32>
    %231 = tpu.concatenate %230, %230, %230, %230 in 1 : vector<16x16xf32>, vector<16x16xf32>, vector<16x16xf32>, vector<16x16xf32> -> vector<16x64xf32>
    %232 = vector.broadcast %224 : vector<1x64xf32> to vector<16x64xf32>
    %233 = arith.mulf %232, %231 : vector<16x64xf32>
    %234 = arith.addf %219, %233 : vector<16x64xf32>
    %c19 = arith.constant 19 : index
    %c0_75 = arith.constant 0 : index
    %235 = vector.load %arg2[%c19, %c0_75] : memref<36x64xf32, #tpu.memory_space<vmem>>, vector<1x64xf32>
    %236 = vector.extract_strided_slice %221 {offsets = [0, 1], sizes = [16, 16], strides = [1, 1]} : vector<16x18xf32> to vector<16x16xf32>
    %237 = tpu.concatenate %236, %236, %236, %236 in 1 : vector<16x16xf32>, vector<16x16xf32>, vector<16x16xf32>, vector<16x16xf32> -> vector<16x64xf32>
    %238 = vector.broadcast %235 : vector<1x64xf32> to vector<16x64xf32>
    %239 = arith.mulf %238, %237 : vector<16x64xf32>
    %240 = arith.addf %229, %239 : vector<16x64xf32>
    %241 = vector.extract_strided_slice %223 {offsets = [0, 1], sizes = [16, 16], strides = [1, 1]} : vector<16x18xf32> to vector<16x16xf32>
    %242 = tpu.concatenate %241, %241, %241, %241 in 1 : vector<16x16xf32>, vector<16x16xf32>, vector<16x16xf32>, vector<16x16xf32> -> vector<16x64xf32>
    %243 = vector.broadcast %235 : vector<1x64xf32> to vector<16x64xf32>
    %244 = arith.mulf %243, %242 : vector<16x64xf32>
    %245 = arith.addf %234, %244 : vector<16x64xf32>
    %c20 = arith.constant 20 : index
    %c0_76 = arith.constant 0 : index
    %246 = vector.load %arg2[%c20, %c0_76] : memref<36x64xf32, #tpu.memory_space<vmem>>, vector<1x64xf32>
    %247 = vector.extract_strided_slice %221 {offsets = [0, 2], sizes = [16, 16], strides = [1, 1]} : vector<16x18xf32> to vector<16x16xf32>
    %248 = tpu.concatenate %247, %247, %247, %247 in 1 : vector<16x16xf32>, vector<16x16xf32>, vector<16x16xf32>, vector<16x16xf32> -> vector<16x64xf32>
    %249 = vector.broadcast %246 : vector<1x64xf32> to vector<16x64xf32>
    %250 = arith.mulf %249, %248 : vector<16x64xf32>
    %251 = arith.addf %240, %250 : vector<16x64xf32>
    %252 = vector.extract_strided_slice %223 {offsets = [0, 2], sizes = [16, 16], strides = [1, 1]} : vector<16x18xf32> to vector<16x16xf32>
    %253 = tpu.concatenate %252, %252, %252, %252 in 1 : vector<16x16xf32>, vector<16x16xf32>, vector<16x16xf32>, vector<16x16xf32> -> vector<16x64xf32>
    %254 = vector.broadcast %246 : vector<1x64xf32> to vector<16x64xf32>
    %255 = arith.mulf %254, %253 : vector<16x64xf32>
    %256 = arith.addf %245, %255 : vector<16x64xf32>
    %c0_77 = arith.constant 0 : index
    %c2_78 = arith.constant 2 : index
    %c1_79 = arith.constant 1 : index
    %c0_80 = arith.constant 0 : index
    %257 = vector.load %arg1[%c0_77, %c2_78, %c1_79, %c0_80] : memref<2x4x18x18xf32, #tpu.memory_space<vmem>>, vector<1x1x16x18xf32>
    %258 = vector.shape_cast %257 : vector<1x1x16x18xf32> to vector<16x18xf32>
    %c1_81 = arith.constant 1 : index
    %c2_82 = arith.constant 2 : index
    %c1_83 = arith.constant 1 : index
    %c0_84 = arith.constant 0 : index
    %259 = vector.load %arg1[%c1_81, %c2_82, %c1_83, %c0_84] : memref<2x4x18x18xf32, #tpu.memory_space<vmem>>, vector<1x1x16x18xf32>
    %260 = vector.shape_cast %259 : vector<1x1x16x18xf32> to vector<16x18xf32>
    %c21 = arith.constant 21 : index
    %c0_85 = arith.constant 0 : index
    %261 = vector.load %arg2[%c21, %c0_85] : memref<36x64xf32, #tpu.memory_space<vmem>>, vector<1x64xf32>
    %262 = vector.extract_strided_slice %258 {offsets = [0, 0], sizes = [16, 16], strides = [1, 1]} : vector<16x18xf32> to vector<16x16xf32>
    %263 = tpu.concatenate %262, %262, %262, %262 in 1 : vector<16x16xf32>, vector<16x16xf32>, vector<16x16xf32>, vector<16x16xf32> -> vector<16x64xf32>
    %264 = vector.broadcast %261 : vector<1x64xf32> to vector<16x64xf32>
    %265 = arith.mulf %264, %263 : vector<16x64xf32>
    %266 = arith.addf %251, %265 : vector<16x64xf32>
    %267 = vector.extract_strided_slice %260 {offsets = [0, 0], sizes = [16, 16], strides = [1, 1]} : vector<16x18xf32> to vector<16x16xf32>
    %268 = tpu.concatenate %267, %267, %267, %267 in 1 : vector<16x16xf32>, vector<16x16xf32>, vector<16x16xf32>, vector<16x16xf32> -> vector<16x64xf32>
    %269 = vector.broadcast %261 : vector<1x64xf32> to vector<16x64xf32>
    %270 = arith.mulf %269, %268 : vector<16x64xf32>
    %271 = arith.addf %256, %270 : vector<16x64xf32>
    %c22 = arith.constant 22 : index
    %c0_86 = arith.constant 0 : index
    %272 = vector.load %arg2[%c22, %c0_86] : memref<36x64xf32, #tpu.memory_space<vmem>>, vector<1x64xf32>
    %273 = vector.extract_strided_slice %258 {offsets = [0, 1], sizes = [16, 16], strides = [1, 1]} : vector<16x18xf32> to vector<16x16xf32>
    %274 = tpu.concatenate %273, %273, %273, %273 in 1 : vector<16x16xf32>, vector<16x16xf32>, vector<16x16xf32>, vector<16x16xf32> -> vector<16x64xf32>
    %275 = vector.broadcast %272 : vector<1x64xf32> to vector<16x64xf32>
    %276 = arith.mulf %275, %274 : vector<16x64xf32>
    %277 = arith.addf %266, %276 : vector<16x64xf32>
    %278 = vector.extract_strided_slice %260 {offsets = [0, 1], sizes = [16, 16], strides = [1, 1]} : vector<16x18xf32> to vector<16x16xf32>
    %279 = tpu.concatenate %278, %278, %278, %278 in 1 : vector<16x16xf32>, vector<16x16xf32>, vector<16x16xf32>, vector<16x16xf32> -> vector<16x64xf32>
    %280 = vector.broadcast %272 : vector<1x64xf32> to vector<16x64xf32>
    %281 = arith.mulf %280, %279 : vector<16x64xf32>
    %282 = arith.addf %271, %281 : vector<16x64xf32>
    %c23 = arith.constant 23 : index
    %c0_87 = arith.constant 0 : index
    %283 = vector.load %arg2[%c23, %c0_87] : memref<36x64xf32, #tpu.memory_space<vmem>>, vector<1x64xf32>
    %284 = vector.extract_strided_slice %258 {offsets = [0, 2], sizes = [16, 16], strides = [1, 1]} : vector<16x18xf32> to vector<16x16xf32>
    %285 = tpu.concatenate %284, %284, %284, %284 in 1 : vector<16x16xf32>, vector<16x16xf32>, vector<16x16xf32>, vector<16x16xf32> -> vector<16x64xf32>
    %286 = vector.broadcast %283 : vector<1x64xf32> to vector<16x64xf32>
    %287 = arith.mulf %286, %285 : vector<16x64xf32>
    %288 = arith.addf %277, %287 : vector<16x64xf32>
    %289 = vector.extract_strided_slice %260 {offsets = [0, 2], sizes = [16, 16], strides = [1, 1]} : vector<16x18xf32> to vector<16x16xf32>
    %290 = tpu.concatenate %289, %289, %289, %289 in 1 : vector<16x16xf32>, vector<16x16xf32>, vector<16x16xf32>, vector<16x16xf32> -> vector<16x64xf32>
    %291 = vector.broadcast %283 : vector<1x64xf32> to vector<16x64xf32>
    %292 = arith.mulf %291, %290 : vector<16x64xf32>
    %293 = arith.addf %282, %292 : vector<16x64xf32>
    %c0_88 = arith.constant 0 : index
    %c2_89 = arith.constant 2 : index
    %c2_90 = arith.constant 2 : index
    %c0_91 = arith.constant 0 : index
    %294 = vector.load %arg1[%c0_88, %c2_89, %c2_90, %c0_91] : memref<2x4x18x18xf32, #tpu.memory_space<vmem>>, vector<1x1x16x18xf32>
    %295 = vector.shape_cast %294 : vector<1x1x16x18xf32> to vector<16x18xf32>
    %c1_92 = arith.constant 1 : index
    %c2_93 = arith.constant 2 : index
    %c2_94 = arith.constant 2 : index
    %c0_95 = arith.constant 0 : index
    %296 = vector.load %arg1[%c1_92, %c2_93, %c2_94, %c0_95] : memref<2x4x18x18xf32, #tpu.memory_space<vmem>>, vector<1x1x16x18xf32>
    %297 = vector.shape_cast %296 : vector<1x1x16x18xf32> to vector<16x18xf32>
    %c24 = arith.constant 24 : index
    %c0_96 = arith.constant 0 : index
    %298 = vector.load %arg2[%c24, %c0_96] : memref<36x64xf32, #tpu.memory_space<vmem>>, vector<1x64xf32>
    %299 = vector.extract_strided_slice %295 {offsets = [0, 0], sizes = [16, 16], strides = [1, 1]} : vector<16x18xf32> to vector<16x16xf32>
    %300 = tpu.concatenate %299, %299, %299, %299 in 1 : vector<16x16xf32>, vector<16x16xf32>, vector<16x16xf32>, vector<16x16xf32> -> vector<16x64xf32>
    %301 = vector.broadcast %298 : vector<1x64xf32> to vector<16x64xf32>
    %302 = arith.mulf %301, %300 : vector<16x64xf32>
    %303 = arith.addf %288, %302 : vector<16x64xf32>
    %304 = vector.extract_strided_slice %297 {offsets = [0, 0], sizes = [16, 16], strides = [1, 1]} : vector<16x18xf32> to vector<16x16xf32>
    %305 = tpu.concatenate %304, %304, %304, %304 in 1 : vector<16x16xf32>, vector<16x16xf32>, vector<16x16xf32>, vector<16x16xf32> -> vector<16x64xf32>
    %306 = vector.broadcast %298 : vector<1x64xf32> to vector<16x64xf32>
    %307 = arith.mulf %306, %305 : vector<16x64xf32>
    %308 = arith.addf %293, %307 : vector<16x64xf32>
    %c25 = arith.constant 25 : index
    %c0_97 = arith.constant 0 : index
    %309 = vector.load %arg2[%c25, %c0_97] : memref<36x64xf32, #tpu.memory_space<vmem>>, vector<1x64xf32>
    %310 = vector.extract_strided_slice %295 {offsets = [0, 1], sizes = [16, 16], strides = [1, 1]} : vector<16x18xf32> to vector<16x16xf32>
    %311 = tpu.concatenate %310, %310, %310, %310 in 1 : vector<16x16xf32>, vector<16x16xf32>, vector<16x16xf32>, vector<16x16xf32> -> vector<16x64xf32>
    %312 = vector.broadcast %309 : vector<1x64xf32> to vector<16x64xf32>
    %313 = arith.mulf %312, %311 : vector<16x64xf32>
    %314 = arith.addf %303, %313 : vector<16x64xf32>
    %315 = vector.extract_strided_slice %297 {offsets = [0, 1], sizes = [16, 16], strides = [1, 1]} : vector<16x18xf32> to vector<16x16xf32>
    %316 = tpu.concatenate %315, %315, %315, %315 in 1 : vector<16x16xf32>, vector<16x16xf32>, vector<16x16xf32>, vector<16x16xf32> -> vector<16x64xf32>
    %317 = vector.broadcast %309 : vector<1x64xf32> to vector<16x64xf32>
    %318 = arith.mulf %317, %316 : vector<16x64xf32>
    %319 = arith.addf %308, %318 : vector<16x64xf32>
    %c26 = arith.constant 26 : index
    %c0_98 = arith.constant 0 : index
    %320 = vector.load %arg2[%c26, %c0_98] : memref<36x64xf32, #tpu.memory_space<vmem>>, vector<1x64xf32>
    %321 = vector.extract_strided_slice %295 {offsets = [0, 2], sizes = [16, 16], strides = [1, 1]} : vector<16x18xf32> to vector<16x16xf32>
    %322 = tpu.concatenate %321, %321, %321, %321 in 1 : vector<16x16xf32>, vector<16x16xf32>, vector<16x16xf32>, vector<16x16xf32> -> vector<16x64xf32>
    %323 = vector.broadcast %320 : vector<1x64xf32> to vector<16x64xf32>
    %324 = arith.mulf %323, %322 : vector<16x64xf32>
    %325 = arith.addf %314, %324 : vector<16x64xf32>
    %326 = vector.extract_strided_slice %297 {offsets = [0, 2], sizes = [16, 16], strides = [1, 1]} : vector<16x18xf32> to vector<16x16xf32>
    %327 = tpu.concatenate %326, %326, %326, %326 in 1 : vector<16x16xf32>, vector<16x16xf32>, vector<16x16xf32>, vector<16x16xf32> -> vector<16x64xf32>
    %328 = vector.broadcast %320 : vector<1x64xf32> to vector<16x64xf32>
    %329 = arith.mulf %328, %327 : vector<16x64xf32>
    %330 = arith.addf %319, %329 : vector<16x64xf32>
    %c0_99 = arith.constant 0 : index
    %c3_100 = arith.constant 3 : index
    %c0_101 = arith.constant 0 : index
    %c0_102 = arith.constant 0 : index
    %331 = vector.load %arg1[%c0_99, %c3_100, %c0_101, %c0_102] : memref<2x4x18x18xf32, #tpu.memory_space<vmem>>, vector<1x1x16x18xf32>
    %332 = vector.shape_cast %331 : vector<1x1x16x18xf32> to vector<16x18xf32>
    %c1_103 = arith.constant 1 : index
    %c3_104 = arith.constant 3 : index
    %c0_105 = arith.constant 0 : index
    %c0_106 = arith.constant 0 : index
    %333 = vector.load %arg1[%c1_103, %c3_104, %c0_105, %c0_106] : memref<2x4x18x18xf32, #tpu.memory_space<vmem>>, vector<1x1x16x18xf32>
    %334 = vector.shape_cast %333 : vector<1x1x16x18xf32> to vector<16x18xf32>
    %c27 = arith.constant 27 : index
    %c0_107 = arith.constant 0 : index
    %335 = vector.load %arg2[%c27, %c0_107] : memref<36x64xf32, #tpu.memory_space<vmem>>, vector<1x64xf32>
    %336 = vector.extract_strided_slice %332 {offsets = [0, 0], sizes = [16, 16], strides = [1, 1]} : vector<16x18xf32> to vector<16x16xf32>
    %337 = tpu.concatenate %336, %336, %336, %336 in 1 : vector<16x16xf32>, vector<16x16xf32>, vector<16x16xf32>, vector<16x16xf32> -> vector<16x64xf32>
    %338 = vector.broadcast %335 : vector<1x64xf32> to vector<16x64xf32>
    %339 = arith.mulf %338, %337 : vector<16x64xf32>
    %340 = arith.addf %325, %339 : vector<16x64xf32>
    %341 = vector.extract_strided_slice %334 {offsets = [0, 0], sizes = [16, 16], strides = [1, 1]} : vector<16x18xf32> to vector<16x16xf32>
    %342 = tpu.concatenate %341, %341, %341, %341 in 1 : vector<16x16xf32>, vector<16x16xf32>, vector<16x16xf32>, vector<16x16xf32> -> vector<16x64xf32>
    %343 = vector.broadcast %335 : vector<1x64xf32> to vector<16x64xf32>
    %344 = arith.mulf %343, %342 : vector<16x64xf32>
    %345 = arith.addf %330, %344 : vector<16x64xf32>
    %c28 = arith.constant 28 : index
    %c0_108 = arith.constant 0 : index
    %346 = vector.load %arg2[%c28, %c0_108] : memref<36x64xf32, #tpu.memory_space<vmem>>, vector<1x64xf32>
    %347 = vector.extract_strided_slice %332 {offsets = [0, 1], sizes = [16, 16], strides = [1, 1]} : vector<16x18xf32> to vector<16x16xf32>
    %348 = tpu.concatenate %347, %347, %347, %347 in 1 : vector<16x16xf32>, vector<16x16xf32>, vector<16x16xf32>, vector<16x16xf32> -> vector<16x64xf32>
    %349 = vector.broadcast %346 : vector<1x64xf32> to vector<16x64xf32>
    %350 = arith.mulf %349, %348 : vector<16x64xf32>
    %351 = arith.addf %340, %350 : vector<16x64xf32>
    %352 = vector.extract_strided_slice %334 {offsets = [0, 1], sizes = [16, 16], strides = [1, 1]} : vector<16x18xf32> to vector<16x16xf32>
    %353 = tpu.concatenate %352, %352, %352, %352 in 1 : vector<16x16xf32>, vector<16x16xf32>, vector<16x16xf32>, vector<16x16xf32> -> vector<16x64xf32>
    %354 = vector.broadcast %346 : vector<1x64xf32> to vector<16x64xf32>
    %355 = arith.mulf %354, %353 : vector<16x64xf32>
    %356 = arith.addf %345, %355 : vector<16x64xf32>
    %c29 = arith.constant 29 : index
    %c0_109 = arith.constant 0 : index
    %357 = vector.load %arg2[%c29, %c0_109] : memref<36x64xf32, #tpu.memory_space<vmem>>, vector<1x64xf32>
    %358 = vector.extract_strided_slice %332 {offsets = [0, 2], sizes = [16, 16], strides = [1, 1]} : vector<16x18xf32> to vector<16x16xf32>
    %359 = tpu.concatenate %358, %358, %358, %358 in 1 : vector<16x16xf32>, vector<16x16xf32>, vector<16x16xf32>, vector<16x16xf32> -> vector<16x64xf32>
    %360 = vector.broadcast %357 : vector<1x64xf32> to vector<16x64xf32>
    %361 = arith.mulf %360, %359 : vector<16x64xf32>
    %362 = arith.addf %351, %361 : vector<16x64xf32>
    %363 = vector.extract_strided_slice %334 {offsets = [0, 2], sizes = [16, 16], strides = [1, 1]} : vector<16x18xf32> to vector<16x16xf32>
    %364 = tpu.concatenate %363, %363, %363, %363 in 1 : vector<16x16xf32>, vector<16x16xf32>, vector<16x16xf32>, vector<16x16xf32> -> vector<16x64xf32>
    %365 = vector.broadcast %357 : vector<1x64xf32> to vector<16x64xf32>
    %366 = arith.mulf %365, %364 : vector<16x64xf32>
    %367 = arith.addf %356, %366 : vector<16x64xf32>
    %c0_110 = arith.constant 0 : index
    %c3_111 = arith.constant 3 : index
    %c1_112 = arith.constant 1 : index
    %c0_113 = arith.constant 0 : index
    %368 = vector.load %arg1[%c0_110, %c3_111, %c1_112, %c0_113] : memref<2x4x18x18xf32, #tpu.memory_space<vmem>>, vector<1x1x16x18xf32>
    %369 = vector.shape_cast %368 : vector<1x1x16x18xf32> to vector<16x18xf32>
    %c1_114 = arith.constant 1 : index
    %c3_115 = arith.constant 3 : index
    %c1_116 = arith.constant 1 : index
    %c0_117 = arith.constant 0 : index
    %370 = vector.load %arg1[%c1_114, %c3_115, %c1_116, %c0_117] : memref<2x4x18x18xf32, #tpu.memory_space<vmem>>, vector<1x1x16x18xf32>
    %371 = vector.shape_cast %370 : vector<1x1x16x18xf32> to vector<16x18xf32>
    %c30 = arith.constant 30 : index
    %c0_118 = arith.constant 0 : index
    %372 = vector.load %arg2[%c30, %c0_118] : memref<36x64xf32, #tpu.memory_space<vmem>>, vector<1x64xf32>
    %373 = vector.extract_strided_slice %369 {offsets = [0, 0], sizes = [16, 16], strides = [1, 1]} : vector<16x18xf32> to vector<16x16xf32>
    %374 = tpu.concatenate %373, %373, %373, %373 in 1 : vector<16x16xf32>, vector<16x16xf32>, vector<16x16xf32>, vector<16x16xf32> -> vector<16x64xf32>
    %375 = vector.broadcast %372 : vector<1x64xf32> to vector<16x64xf32>
    %376 = arith.mulf %375, %374 : vector<16x64xf32>
    %377 = arith.addf %362, %376 : vector<16x64xf32>
    %378 = vector.extract_strided_slice %371 {offsets = [0, 0], sizes = [16, 16], strides = [1, 1]} : vector<16x18xf32> to vector<16x16xf32>
    %379 = tpu.concatenate %378, %378, %378, %378 in 1 : vector<16x16xf32>, vector<16x16xf32>, vector<16x16xf32>, vector<16x16xf32> -> vector<16x64xf32>
    %380 = vector.broadcast %372 : vector<1x64xf32> to vector<16x64xf32>
    %381 = arith.mulf %380, %379 : vector<16x64xf32>
    %382 = arith.addf %367, %381 : vector<16x64xf32>
    %c31 = arith.constant 31 : index
    %c0_119 = arith.constant 0 : index
    %383 = vector.load %arg2[%c31, %c0_119] : memref<36x64xf32, #tpu.memory_space<vmem>>, vector<1x64xf32>
    %384 = vector.extract_strided_slice %369 {offsets = [0, 1], sizes = [16, 16], strides = [1, 1]} : vector<16x18xf32> to vector<16x16xf32>
    %385 = tpu.concatenate %384, %384, %384, %384 in 1 : vector<16x16xf32>, vector<16x16xf32>, vector<16x16xf32>, vector<16x16xf32> -> vector<16x64xf32>
    %386 = vector.broadcast %383 : vector<1x64xf32> to vector<16x64xf32>
    %387 = arith.mulf %386, %385 : vector<16x64xf32>
    %388 = arith.addf %377, %387 : vector<16x64xf32>
    %389 = vector.extract_strided_slice %371 {offsets = [0, 1], sizes = [16, 16], strides = [1, 1]} : vector<16x18xf32> to vector<16x16xf32>
    %390 = tpu.concatenate %389, %389, %389, %389 in 1 : vector<16x16xf32>, vector<16x16xf32>, vector<16x16xf32>, vector<16x16xf32> -> vector<16x64xf32>
    %391 = vector.broadcast %383 : vector<1x64xf32> to vector<16x64xf32>
    %392 = arith.mulf %391, %390 : vector<16x64xf32>
    %393 = arith.addf %382, %392 : vector<16x64xf32>
    %c32 = arith.constant 32 : index
    %c0_120 = arith.constant 0 : index
    %394 = vector.load %arg2[%c32, %c0_120] : memref<36x64xf32, #tpu.memory_space<vmem>>, vector<1x64xf32>
    %395 = vector.extract_strided_slice %369 {offsets = [0, 2], sizes = [16, 16], strides = [1, 1]} : vector<16x18xf32> to vector<16x16xf32>
    %396 = tpu.concatenate %395, %395, %395, %395 in 1 : vector<16x16xf32>, vector<16x16xf32>, vector<16x16xf32>, vector<16x16xf32> -> vector<16x64xf32>
    %397 = vector.broadcast %394 : vector<1x64xf32> to vector<16x64xf32>
    %398 = arith.mulf %397, %396 : vector<16x64xf32>
    %399 = arith.addf %388, %398 : vector<16x64xf32>
    %400 = vector.extract_strided_slice %371 {offsets = [0, 2], sizes = [16, 16], strides = [1, 1]} : vector<16x18xf32> to vector<16x16xf32>
    %401 = tpu.concatenate %400, %400, %400, %400 in 1 : vector<16x16xf32>, vector<16x16xf32>, vector<16x16xf32>, vector<16x16xf32> -> vector<16x64xf32>
    %402 = vector.broadcast %394 : vector<1x64xf32> to vector<16x64xf32>
    %403 = arith.mulf %402, %401 : vector<16x64xf32>
    %404 = arith.addf %393, %403 : vector<16x64xf32>
    %c0_121 = arith.constant 0 : index
    %c3_122 = arith.constant 3 : index
    %c2_123 = arith.constant 2 : index
    %c0_124 = arith.constant 0 : index
    %405 = vector.load %arg1[%c0_121, %c3_122, %c2_123, %c0_124] : memref<2x4x18x18xf32, #tpu.memory_space<vmem>>, vector<1x1x16x18xf32>
    %406 = vector.shape_cast %405 : vector<1x1x16x18xf32> to vector<16x18xf32>
    %c1_125 = arith.constant 1 : index
    %c3_126 = arith.constant 3 : index
    %c2_127 = arith.constant 2 : index
    %c0_128 = arith.constant 0 : index
    %407 = vector.load %arg1[%c1_125, %c3_126, %c2_127, %c0_128] : memref<2x4x18x18xf32, #tpu.memory_space<vmem>>, vector<1x1x16x18xf32>
    %408 = vector.shape_cast %407 : vector<1x1x16x18xf32> to vector<16x18xf32>
    %c33 = arith.constant 33 : index
    %c0_129 = arith.constant 0 : index
    %409 = vector.load %arg2[%c33, %c0_129] : memref<36x64xf32, #tpu.memory_space<vmem>>, vector<1x64xf32>
    %410 = vector.extract_strided_slice %406 {offsets = [0, 0], sizes = [16, 16], strides = [1, 1]} : vector<16x18xf32> to vector<16x16xf32>
    %411 = tpu.concatenate %410, %410, %410, %410 in 1 : vector<16x16xf32>, vector<16x16xf32>, vector<16x16xf32>, vector<16x16xf32> -> vector<16x64xf32>
    %412 = vector.broadcast %409 : vector<1x64xf32> to vector<16x64xf32>
    %413 = arith.mulf %412, %411 : vector<16x64xf32>
    %414 = arith.addf %399, %413 : vector<16x64xf32>
    %415 = vector.extract_strided_slice %408 {offsets = [0, 0], sizes = [16, 16], strides = [1, 1]} : vector<16x18xf32> to vector<16x16xf32>
    %416 = tpu.concatenate %415, %415, %415, %415 in 1 : vector<16x16xf32>, vector<16x16xf32>, vector<16x16xf32>, vector<16x16xf32> -> vector<16x64xf32>
    %417 = vector.broadcast %409 : vector<1x64xf32> to vector<16x64xf32>
    %418 = arith.mulf %417, %416 : vector<16x64xf32>
    %419 = arith.addf %404, %418 : vector<16x64xf32>
    %c34 = arith.constant 34 : index
    %c0_130 = arith.constant 0 : index
    %420 = vector.load %arg2[%c34, %c0_130] : memref<36x64xf32, #tpu.memory_space<vmem>>, vector<1x64xf32>
    %421 = vector.extract_strided_slice %406 {offsets = [0, 1], sizes = [16, 16], strides = [1, 1]} : vector<16x18xf32> to vector<16x16xf32>
    %422 = tpu.concatenate %421, %421, %421, %421 in 1 : vector<16x16xf32>, vector<16x16xf32>, vector<16x16xf32>, vector<16x16xf32> -> vector<16x64xf32>
    %423 = vector.broadcast %420 : vector<1x64xf32> to vector<16x64xf32>
    %424 = arith.mulf %423, %422 : vector<16x64xf32>
    %425 = arith.addf %414, %424 : vector<16x64xf32>
    %426 = vector.extract_strided_slice %408 {offsets = [0, 1], sizes = [16, 16], strides = [1, 1]} : vector<16x18xf32> to vector<16x16xf32>
    %427 = tpu.concatenate %426, %426, %426, %426 in 1 : vector<16x16xf32>, vector<16x16xf32>, vector<16x16xf32>, vector<16x16xf32> -> vector<16x64xf32>
    %428 = vector.broadcast %420 : vector<1x64xf32> to vector<16x64xf32>
    %429 = arith.mulf %428, %427 : vector<16x64xf32>
    %430 = arith.addf %419, %429 : vector<16x64xf32>
    %c35 = arith.constant 35 : index
    %c0_131 = arith.constant 0 : index
    %431 = vector.load %arg2[%c35, %c0_131] : memref<36x64xf32, #tpu.memory_space<vmem>>, vector<1x64xf32>
    %432 = vector.extract_strided_slice %406 {offsets = [0, 2], sizes = [16, 16], strides = [1, 1]} : vector<16x18xf32> to vector<16x16xf32>
    %433 = tpu.concatenate %432, %432, %432, %432 in 1 : vector<16x16xf32>, vector<16x16xf32>, vector<16x16xf32>, vector<16x16xf32> -> vector<16x64xf32>
    %434 = vector.broadcast %431 : vector<1x64xf32> to vector<16x64xf32>
    %435 = arith.mulf %434, %433 : vector<16x64xf32>
    %436 = arith.addf %425, %435 : vector<16x64xf32>
    %437 = vector.extract_strided_slice %408 {offsets = [0, 2], sizes = [16, 16], strides = [1, 1]} : vector<16x18xf32> to vector<16x16xf32>
    %438 = tpu.concatenate %437, %437, %437, %437 in 1 : vector<16x16xf32>, vector<16x16xf32>, vector<16x16xf32>, vector<16x16xf32> -> vector<16x64xf32>
    %439 = vector.broadcast %431 : vector<1x64xf32> to vector<16x64xf32>
    %440 = arith.mulf %439, %438 : vector<16x64xf32>
    %441 = arith.addf %430, %440 : vector<16x64xf32>
    %442 = tpu.concatenate %436, %441 in 1 : vector<16x64xf32>, vector<16x64xf32> -> vector<16x128xf32>
    %cst = arith.constant dense<0.000000e+00> : vector<128xf32>
    %443 = vector.multi_reduction <add>, %442, %cst [0] : vector<16x128xf32> to vector<128xf32>
    %444 = vector.shape_cast %443 : vector<128xf32> to vector<1x128xf32>
    %445 = arith.mulf %442, %442 : vector<16x128xf32>
    %cst_132 = arith.constant dense<0.000000e+00> : vector<128xf32>
    %446 = vector.multi_reduction <add>, %445, %cst_132 [0] : vector<16x128xf32> to vector<128xf32>
    %447 = vector.shape_cast %446 : vector<128xf32> to vector<1x128xf32>
    %c0_133 = arith.constant 0 : index
    %c0_134 = arith.constant 0 : index
    %448 = vector.load %arg3[%c0_133, %c0_134] : memref<4x128xf32, #tpu.memory_space<vmem>>, vector<1x128xf32>
    %449 = arith.mulf %444, %448 : vector<1x128xf32>
    %cst_135 = arith.constant dense<0.000000e+00> : vector<1xf32>
    %450 = vector.multi_reduction <add>, %449, %cst_135 [1] : vector<1x128xf32> to vector<1xf32>
    %451 = vector.shape_cast %450 : vector<1xf32> to vector<1x1xf32>
    %452 = arith.mulf %447, %448 : vector<1x128xf32>
    %cst_136 = arith.constant dense<0.000000e+00> : vector<1xf32>
    %453 = vector.multi_reduction <add>, %452, %cst_136 [1] : vector<1x128xf32> to vector<1xf32>
    %454 = vector.shape_cast %453 : vector<1xf32> to vector<1x1xf32>
    %cst_137 = arith.constant 0.001953125 : f32
    %455 = vector.broadcast %cst_137 : f32 to vector<1x1xf32>
    %456 = arith.mulf %451, %455 : vector<1x1xf32>
    %cst_138 = arith.constant 0.001953125 : f32
    %457 = vector.broadcast %cst_138 : f32 to vector<1x1xf32>
    %458 = arith.mulf %454, %457 : vector<1x1xf32>
    %459 = arith.mulf %456, %456 : vector<1x1xf32>
    %460 = arith.subf %458, %459 : vector<1x1xf32>
    %c0_139 = arith.constant 0 : index
    %461 = memref.load %arg4[%c0_139] : memref<4xf32, #tpu.memory_space<smem>>
    %cst_140 = arith.constant 9.99999974E-6 : f32
    %462 = vector.broadcast %cst_140 : f32 to vector<1x1xf32>
    %463 = arith.addf %460, %462 : vector<1x1xf32>
    %464 = math.rsqrt %463 : vector<1x1xf32>
    %465 = vector.broadcast %461 : f32 to vector<1x1xf32>
    %466 = arith.mulf %465, %464 : vector<1x1xf32>
    %c0_141 = arith.constant 0 : index
    %467 = memref.load %arg5[%c0_141] : memref<4xf32, #tpu.memory_space<smem>>
    %468 = arith.mulf %456, %466 : vector<1x1xf32>
    %469 = vector.broadcast %467 : f32 to vector<1x1xf32>
    %470 = arith.subf %469, %468 : vector<1x1xf32>
    %471 = vector.broadcast %466 : vector<1x1xf32> to vector<1x128xf32>
    %472 = arith.mulf %471, %448 : vector<1x128xf32>
    %473 = vector.broadcast %470 : vector<1x1xf32> to vector<1x128xf32>
    %474 = arith.mulf %473, %448 : vector<1x128xf32>
    %c1_142 = arith.constant 1 : index
    %c0_143 = arith.constant 0 : index
    %475 = vector.load %arg3[%c1_142, %c0_143] : memref<4x128xf32, #tpu.memory_space<vmem>>, vector<1x128xf32>
    %476 = arith.mulf %444, %475 : vector<1x128xf32>
    %cst_144 = arith.constant dense<0.000000e+00> : vector<1xf32>
    %477 = vector.multi_reduction <add>, %476, %cst_144 [1] : vector<1x128xf32> to vector<1xf32>
    %478 = vector.shape_cast %477 : vector<1xf32> to vector<1x1xf32>
    %479 = arith.mulf %447, %475 : vector<1x128xf32>
    %cst_145 = arith.constant dense<0.000000e+00> : vector<1xf32>
    %480 = vector.multi_reduction <add>, %479, %cst_145 [1] : vector<1x128xf32> to vector<1xf32>
    %481 = vector.shape_cast %480 : vector<1xf32> to vector<1x1xf32>
    %cst_146 = arith.constant 0.001953125 : f32
    %482 = vector.broadcast %cst_146 : f32 to vector<1x1xf32>
    %483 = arith.mulf %478, %482 : vector<1x1xf32>
    %cst_147 = arith.constant 0.001953125 : f32
    %484 = vector.broadcast %cst_147 : f32 to vector<1x1xf32>
    %485 = arith.mulf %481, %484 : vector<1x1xf32>
    %486 = arith.mulf %483, %483 : vector<1x1xf32>
    %487 = arith.subf %485, %486 : vector<1x1xf32>
    %c1_148 = arith.constant 1 : index
    %488 = memref.load %arg4[%c1_148] : memref<4xf32, #tpu.memory_space<smem>>
    %cst_149 = arith.constant 9.99999974E-6 : f32
    %489 = vector.broadcast %cst_149 : f32 to vector<1x1xf32>
    %490 = arith.addf %487, %489 : vector<1x1xf32>
    %491 = math.rsqrt %490 : vector<1x1xf32>
    %492 = vector.broadcast %488 : f32 to vector<1x1xf32>
    %493 = arith.mulf %492, %491 : vector<1x1xf32>
    %c1_150 = arith.constant 1 : index
    %494 = memref.load %arg5[%c1_150] : memref<4xf32, #tpu.memory_space<smem>>
    %495 = arith.mulf %483, %493 : vector<1x1xf32>
    %496 = vector.broadcast %494 : f32 to vector<1x1xf32>
    %497 = arith.subf %496, %495 : vector<1x1xf32>
    %498 = vector.broadcast %493 : vector<1x1xf32> to vector<1x128xf32>
    %499 = arith.mulf %498, %475 : vector<1x128xf32>
    %500 = arith.addf %472, %499 : vector<1x128xf32>
    %501 = vector.broadcast %497 : vector<1x1xf32> to vector<1x128xf32>
    %502 = arith.mulf %501, %475 : vector<1x128xf32>
    %503 = arith.addf %474, %502 : vector<1x128xf32>
    %c2_151 = arith.constant 2 : index
    %c0_152 = arith.constant 0 : index
    %504 = vector.load %arg3[%c2_151, %c0_152] : memref<4x128xf32, #tpu.memory_space<vmem>>, vector<1x128xf32>
    %505 = arith.mulf %444, %504 : vector<1x128xf32>
    %cst_153 = arith.constant dense<0.000000e+00> : vector<1xf32>
    %506 = vector.multi_reduction <add>, %505, %cst_153 [1] : vector<1x128xf32> to vector<1xf32>
    %507 = vector.shape_cast %506 : vector<1xf32> to vector<1x1xf32>
    %508 = arith.mulf %447, %504 : vector<1x128xf32>
    %cst_154 = arith.constant dense<0.000000e+00> : vector<1xf32>
    %509 = vector.multi_reduction <add>, %508, %cst_154 [1] : vector<1x128xf32> to vector<1xf32>
    %510 = vector.shape_cast %509 : vector<1xf32> to vector<1x1xf32>
    %cst_155 = arith.constant 0.001953125 : f32
    %511 = vector.broadcast %cst_155 : f32 to vector<1x1xf32>
    %512 = arith.mulf %507, %511 : vector<1x1xf32>
    %cst_156 = arith.constant 0.001953125 : f32
    %513 = vector.broadcast %cst_156 : f32 to vector<1x1xf32>
    %514 = arith.mulf %510, %513 : vector<1x1xf32>
    %515 = arith.mulf %512, %512 : vector<1x1xf32>
    %516 = arith.subf %514, %515 : vector<1x1xf32>
    %c2_157 = arith.constant 2 : index
    %517 = memref.load %arg4[%c2_157] : memref<4xf32, #tpu.memory_space<smem>>
    %cst_158 = arith.constant 9.99999974E-6 : f32
    %518 = vector.broadcast %cst_158 : f32 to vector<1x1xf32>
    %519 = arith.addf %516, %518 : vector<1x1xf32>
    %520 = math.rsqrt %519 : vector<1x1xf32>
    %521 = vector.broadcast %517 : f32 to vector<1x1xf32>
    %522 = arith.mulf %521, %520 : vector<1x1xf32>
    %c2_159 = arith.constant 2 : index
    %523 = memref.load %arg5[%c2_159] : memref<4xf32, #tpu.memory_space<smem>>
    %524 = arith.mulf %512, %522 : vector<1x1xf32>
    %525 = vector.broadcast %523 : f32 to vector<1x1xf32>
    %526 = arith.subf %525, %524 : vector<1x1xf32>
    %527 = vector.broadcast %522 : vector<1x1xf32> to vector<1x128xf32>
    %528 = arith.mulf %527, %504 : vector<1x128xf32>
    %529 = arith.addf %500, %528 : vector<1x128xf32>
    %530 = vector.broadcast %526 : vector<1x1xf32> to vector<1x128xf32>
    %531 = arith.mulf %530, %504 : vector<1x128xf32>
    %532 = arith.addf %503, %531 : vector<1x128xf32>
    %c3_160 = arith.constant 3 : index
    %c0_161 = arith.constant 0 : index
    %533 = vector.load %arg3[%c3_160, %c0_161] : memref<4x128xf32, #tpu.memory_space<vmem>>, vector<1x128xf32>
    %534 = arith.mulf %444, %533 : vector<1x128xf32>
    %cst_162 = arith.constant dense<0.000000e+00> : vector<1xf32>
    %535 = vector.multi_reduction <add>, %534, %cst_162 [1] : vector<1x128xf32> to vector<1xf32>
    %536 = vector.shape_cast %535 : vector<1xf32> to vector<1x1xf32>
    %537 = arith.mulf %447, %533 : vector<1x128xf32>
    %cst_163 = arith.constant dense<0.000000e+00> : vector<1xf32>
    %538 = vector.multi_reduction <add>, %537, %cst_163 [1] : vector<1x128xf32> to vector<1xf32>
    %539 = vector.shape_cast %538 : vector<1xf32> to vector<1x1xf32>
    %cst_164 = arith.constant 0.001953125 : f32
    %540 = vector.broadcast %cst_164 : f32 to vector<1x1xf32>
    %541 = arith.mulf %536, %540 : vector<1x1xf32>
    %cst_165 = arith.constant 0.001953125 : f32
    %542 = vector.broadcast %cst_165 : f32 to vector<1x1xf32>
    %543 = arith.mulf %539, %542 : vector<1x1xf32>
    %544 = arith.mulf %541, %541 : vector<1x1xf32>
    %545 = arith.subf %543, %544 : vector<1x1xf32>
    %c3_166 = arith.constant 3 : index
    %546 = memref.load %arg4[%c3_166] : memref<4xf32, #tpu.memory_space<smem>>
    %cst_167 = arith.constant 9.99999974E-6 : f32
    %547 = vector.broadcast %cst_167 : f32 to vector<1x1xf32>
    %548 = arith.addf %545, %547 : vector<1x1xf32>
    %549 = math.rsqrt %548 : vector<1x1xf32>
    %550 = vector.broadcast %546 : f32 to vector<1x1xf32>
    %551 = arith.mulf %550, %549 : vector<1x1xf32>
    %c3_168 = arith.constant 3 : index
    %552 = memref.load %arg5[%c3_168] : memref<4xf32, #tpu.memory_space<smem>>
    %553 = arith.mulf %541, %551 : vector<1x1xf32>
    %554 = vector.broadcast %552 : f32 to vector<1x1xf32>
    %555 = arith.subf %554, %553 : vector<1x1xf32>
    %556 = vector.broadcast %551 : vector<1x1xf32> to vector<1x128xf32>
    %557 = arith.mulf %556, %533 : vector<1x128xf32>
    %558 = arith.addf %529, %557 : vector<1x128xf32>
    %559 = vector.broadcast %555 : vector<1x1xf32> to vector<1x128xf32>
    %560 = arith.mulf %559, %533 : vector<1x128xf32>
    %561 = arith.addf %532, %560 : vector<1x128xf32>
    %562 = vector.broadcast %558 : vector<1x128xf32> to vector<16x128xf32>
    %563 = arith.mulf %442, %562 : vector<16x128xf32>
    %564 = vector.broadcast %561 : vector<1x128xf32> to vector<16x128xf32>
    %565 = arith.addf %563, %564 : vector<16x128xf32>
    %cst_169 = arith.constant 5.000000e-01 : f32
    %566 = vector.broadcast %cst_169 : f32 to vector<16x128xf32>
    %567 = arith.mulf %566, %565 : vector<16x128xf32>
    %cst_170 = arith.constant 4.471500e-02 : f32
    %568 = vector.broadcast %cst_170 : f32 to vector<16x128xf32>
    %569 = arith.mulf %568, %565 : vector<16x128xf32>
    %570 = arith.mulf %569, %565 : vector<16x128xf32>
    %571 = arith.mulf %570, %565 : vector<16x128xf32>
    %572 = arith.addf %565, %571 : vector<16x128xf32>
    %cst_171 = arith.constant 0.797884583 : f32
    %573 = vector.broadcast %cst_171 : f32 to vector<16x128xf32>
    %574 = arith.mulf %573, %572 : vector<16x128xf32>
    %575 = math.tanh %574 : vector<16x128xf32>
    %cst_172 = arith.constant 1.000000e+00 : f32
    %576 = vector.broadcast %cst_172 : f32 to vector<16x128xf32>
    %577 = arith.addf %576, %575 : vector<16x128xf32>
    %578 = arith.mulf %567, %577 : vector<16x128xf32>
    %579 = vector.extract_strided_slice %578 {offsets = [0, 0], sizes = [16, 16], strides = [1, 1]} : vector<16x128xf32> to vector<16x16xf32>
    %580 = vector.extract_strided_slice %578 {offsets = [0, 16], sizes = [16, 16], strides = [1, 1]} : vector<16x128xf32> to vector<16x16xf32>
    %581 = vector.extract_strided_slice %578 {offsets = [0, 32], sizes = [16, 16], strides = [1, 1]} : vector<16x128xf32> to vector<16x16xf32>
    %582 = vector.extract_strided_slice %578 {offsets = [0, 48], sizes = [16, 16], strides = [1, 1]} : vector<16x128xf32> to vector<16x16xf32>
    %583 = vector.extract_strided_slice %578 {offsets = [0, 64], sizes = [16, 16], strides = [1, 1]} : vector<16x128xf32> to vector<16x16xf32>
    %584 = vector.extract_strided_slice %578 {offsets = [0, 80], sizes = [16, 16], strides = [1, 1]} : vector<16x128xf32> to vector<16x16xf32>
    %585 = vector.extract_strided_slice %578 {offsets = [0, 96], sizes = [16, 16], strides = [1, 1]} : vector<16x128xf32> to vector<16x16xf32>
    %586 = vector.extract_strided_slice %578 {offsets = [0, 112], sizes = [16, 16], strides = [1, 1]} : vector<16x128xf32> to vector<16x16xf32>
    %587 = tpu.concatenate %579, %580, %581, %582, %583, %584, %585, %586 in 0 : vector<16x16xf32>, vector<16x16xf32>, vector<16x16xf32>, vector<16x16xf32>, vector<16x16xf32>, vector<16x16xf32>, vector<16x16xf32>, vector<16x16xf32> -> vector<128x16xf32>
    %cst_173 = arith.constant dense<0.000000e+00> : vector<128x128xf32>
    %588 = tpu.matmul %587, %587, %cst_173 {dimension_numbers = #tpu.dot_dimension_numbers<[1], [1], [0], [0], [0, 0, 1, 0], [], []>, precision = #tpu.contract_precision<fp32>} : vector<128x16xf32>, vector<128x16xf32>, vector<128x128xf32> -> vector<128x128xf32>
    %c0_174 = arith.constant 0 : index
    %c0_175 = arith.constant 0 : index
    %589 = vector.load %arg6[%c0_174, %c0_175] : memref<128x128xf32, #tpu.memory_space<vmem>>, vector<128x128xf32>
    %cst_176 = arith.constant dense<0.000000e+00> : vector<128x128xf32>
    %590 = tpu.matmul %588, %589, %cst_176 {dimension_numbers = #tpu.dot_dimension_numbers<[1], [0], [0], [1], [0, 0, 1, 1], [], []>, precision = #tpu.contract_precision<fp32>} : vector<128x128xf32>, vector<128x128xf32>, vector<128x128xf32> -> vector<128x128xf32>
    %591 = vector.extract_strided_slice %590 {offsets = [0, 0], sizes = [16, 16], strides = [1, 1]} : vector<128x128xf32> to vector<16x16xf32>
    %592 = vector.extract_strided_slice %590 {offsets = [16, 16], sizes = [16, 16], strides = [1, 1]} : vector<128x128xf32> to vector<16x16xf32>
    %593 = vector.extract_strided_slice %590 {offsets = [32, 32], sizes = [16, 16], strides = [1, 1]} : vector<128x128xf32> to vector<16x16xf32>
    %594 = vector.extract_strided_slice %590 {offsets = [48, 48], sizes = [16, 16], strides = [1, 1]} : vector<128x128xf32> to vector<16x16xf32>
    %595 = vector.extract_strided_slice %590 {offsets = [64, 64], sizes = [16, 16], strides = [1, 1]} : vector<128x128xf32> to vector<16x16xf32>
    %596 = vector.extract_strided_slice %590 {offsets = [80, 80], sizes = [16, 16], strides = [1, 1]} : vector<128x128xf32> to vector<16x16xf32>
    %597 = vector.extract_strided_slice %590 {offsets = [96, 96], sizes = [16, 16], strides = [1, 1]} : vector<128x128xf32> to vector<16x16xf32>
    %598 = vector.extract_strided_slice %590 {offsets = [112, 112], sizes = [16, 16], strides = [1, 1]} : vector<128x128xf32> to vector<16x16xf32>
    %599 = tpu.concatenate %591, %592, %593, %594, %595, %596, %597, %598 in 1 : vector<16x16xf32>, vector<16x16xf32>, vector<16x16xf32>, vector<16x16xf32>, vector<16x16xf32>, vector<16x16xf32>, vector<16x16xf32>, vector<16x16xf32> -> vector<16x128xf32>
    %cst_177 = arith.constant 2.500000e-01 : f32
    %600 = vector.broadcast %cst_177 : f32 to vector<16x128xf32>
    %601 = arith.mulf %599, %600 : vector<16x128xf32>
    %602 = arith.addf %601, %578 : vector<16x128xf32>
    %cst_178 = arith.constant dense<0.000000e+00> : vector<128xf32>
    %603 = vector.multi_reduction <add>, %602, %cst_178 [0] : vector<16x128xf32> to vector<128xf32>
    %604 = vector.shape_cast %603 : vector<128xf32> to vector<1x128xf32>
    %605 = arith.mulf %602, %602 : vector<16x128xf32>
    %cst_179 = arith.constant dense<0.000000e+00> : vector<128xf32>
    %606 = vector.multi_reduction <add>, %605, %cst_179 [0] : vector<16x128xf32> to vector<128xf32>
    %607 = vector.shape_cast %606 : vector<128xf32> to vector<1x128xf32>
    %c0_180 = arith.constant 0 : index
    %c0_181 = arith.constant 0 : index
    %608 = vector.load %arg3[%c0_180, %c0_181] : memref<4x128xf32, #tpu.memory_space<vmem>>, vector<1x128xf32>
    %609 = arith.mulf %604, %608 : vector<1x128xf32>
    %cst_182 = arith.constant dense<0.000000e+00> : vector<1xf32>
    %610 = vector.multi_reduction <add>, %609, %cst_182 [1] : vector<1x128xf32> to vector<1xf32>
    %611 = vector.shape_cast %610 : vector<1xf32> to vector<1x1xf32>
    %612 = arith.mulf %607, %608 : vector<1x128xf32>
    %cst_183 = arith.constant dense<0.000000e+00> : vector<1xf32>
    %613 = vector.multi_reduction <add>, %612, %cst_183 [1] : vector<1x128xf32> to vector<1xf32>
    %614 = vector.shape_cast %613 : vector<1xf32> to vector<1x1xf32>
    %cst_184 = arith.constant 0.001953125 : f32
    %615 = vector.broadcast %cst_184 : f32 to vector<1x1xf32>
    %616 = arith.mulf %611, %615 : vector<1x1xf32>
    %cst_185 = arith.constant 0.001953125 : f32
    %617 = vector.broadcast %cst_185 : f32 to vector<1x1xf32>
    %618 = arith.mulf %614, %617 : vector<1x1xf32>
    %619 = arith.mulf %616, %616 : vector<1x1xf32>
    %620 = arith.subf %618, %619 : vector<1x1xf32>
    %c0_186 = arith.constant 0 : index
    %621 = memref.load %arg7[%c0_186] : memref<4xf32, #tpu.memory_space<smem>>
    %cst_187 = arith.constant 9.99999974E-6 : f32
    %622 = vector.broadcast %cst_187 : f32 to vector<1x1xf32>
    %623 = arith.addf %620, %622 : vector<1x1xf32>
    %624 = math.rsqrt %623 : vector<1x1xf32>
    %625 = vector.broadcast %621 : f32 to vector<1x1xf32>
    %626 = arith.mulf %625, %624 : vector<1x1xf32>
    %c0_188 = arith.constant 0 : index
    %627 = memref.load %arg8[%c0_188] : memref<4xf32, #tpu.memory_space<smem>>
    %628 = arith.mulf %616, %626 : vector<1x1xf32>
    %629 = vector.broadcast %627 : f32 to vector<1x1xf32>
    %630 = arith.subf %629, %628 : vector<1x1xf32>
    %631 = vector.broadcast %626 : vector<1x1xf32> to vector<1x128xf32>
    %632 = arith.mulf %631, %608 : vector<1x128xf32>
    %633 = vector.broadcast %630 : vector<1x1xf32> to vector<1x128xf32>
    %634 = arith.mulf %633, %608 : vector<1x128xf32>
    %c1_189 = arith.constant 1 : index
    %c0_190 = arith.constant 0 : index
    %635 = vector.load %arg3[%c1_189, %c0_190] : memref<4x128xf32, #tpu.memory_space<vmem>>, vector<1x128xf32>
    %636 = arith.mulf %604, %635 : vector<1x128xf32>
    %cst_191 = arith.constant dense<0.000000e+00> : vector<1xf32>
    %637 = vector.multi_reduction <add>, %636, %cst_191 [1] : vector<1x128xf32> to vector<1xf32>
    %638 = vector.shape_cast %637 : vector<1xf32> to vector<1x1xf32>
    %639 = arith.mulf %607, %635 : vector<1x128xf32>
    %cst_192 = arith.constant dense<0.000000e+00> : vector<1xf32>
    %640 = vector.multi_reduction <add>, %639, %cst_192 [1] : vector<1x128xf32> to vector<1xf32>
    %641 = vector.shape_cast %640 : vector<1xf32> to vector<1x1xf32>
    %cst_193 = arith.constant 0.001953125 : f32
    %642 = vector.broadcast %cst_193 : f32 to vector<1x1xf32>
    %643 = arith.mulf %638, %642 : vector<1x1xf32>
    %cst_194 = arith.constant 0.001953125 : f32
    %644 = vector.broadcast %cst_194 : f32 to vector<1x1xf32>
    %645 = arith.mulf %641, %644 : vector<1x1xf32>
    %646 = arith.mulf %643, %643 : vector<1x1xf32>
    %647 = arith.subf %645, %646 : vector<1x1xf32>
    %c1_195 = arith.constant 1 : index
    %648 = memref.load %arg7[%c1_195] : memref<4xf32, #tpu.memory_space<smem>>
    %cst_196 = arith.constant 9.99999974E-6 : f32
    %649 = vector.broadcast %cst_196 : f32 to vector<1x1xf32>
    %650 = arith.addf %647, %649 : vector<1x1xf32>
    %651 = math.rsqrt %650 : vector<1x1xf32>
    %652 = vector.broadcast %648 : f32 to vector<1x1xf32>
    %653 = arith.mulf %652, %651 : vector<1x1xf32>
    %c1_197 = arith.constant 1 : index
    %654 = memref.load %arg8[%c1_197] : memref<4xf32, #tpu.memory_space<smem>>
    %655 = arith.mulf %643, %653 : vector<1x1xf32>
    %656 = vector.broadcast %654 : f32 to vector<1x1xf32>
    %657 = arith.subf %656, %655 : vector<1x1xf32>
    %658 = vector.broadcast %653 : vector<1x1xf32> to vector<1x128xf32>
    %659 = arith.mulf %658, %635 : vector<1x128xf32>
    %660 = arith.addf %632, %659 : vector<1x128xf32>
    %661 = vector.broadcast %657 : vector<1x1xf32> to vector<1x128xf32>
    %662 = arith.mulf %661, %635 : vector<1x128xf32>
    %663 = arith.addf %634, %662 : vector<1x128xf32>
    %c2_198 = arith.constant 2 : index
    %c0_199 = arith.constant 0 : index
    %664 = vector.load %arg3[%c2_198, %c0_199] : memref<4x128xf32, #tpu.memory_space<vmem>>, vector<1x128xf32>
    %665 = arith.mulf %604, %664 : vector<1x128xf32>
    %cst_200 = arith.constant dense<0.000000e+00> : vector<1xf32>
    %666 = vector.multi_reduction <add>, %665, %cst_200 [1] : vector<1x128xf32> to vector<1xf32>
    %667 = vector.shape_cast %666 : vector<1xf32> to vector<1x1xf32>
    %668 = arith.mulf %607, %664 : vector<1x128xf32>
    %cst_201 = arith.constant dense<0.000000e+00> : vector<1xf32>
    %669 = vector.multi_reduction <add>, %668, %cst_201 [1] : vector<1x128xf32> to vector<1xf32>
    %670 = vector.shape_cast %669 : vector<1xf32> to vector<1x1xf32>
    %cst_202 = arith.constant 0.001953125 : f32
    %671 = vector.broadcast %cst_202 : f32 to vector<1x1xf32>
    %672 = arith.mulf %667, %671 : vector<1x1xf32>
    %cst_203 = arith.constant 0.001953125 : f32
    %673 = vector.broadcast %cst_203 : f32 to vector<1x1xf32>
    %674 = arith.mulf %670, %673 : vector<1x1xf32>
    %675 = arith.mulf %672, %672 : vector<1x1xf32>
    %676 = arith.subf %674, %675 : vector<1x1xf32>
    %c2_204 = arith.constant 2 : index
    %677 = memref.load %arg7[%c2_204] : memref<4xf32, #tpu.memory_space<smem>>
    %cst_205 = arith.constant 9.99999974E-6 : f32
    %678 = vector.broadcast %cst_205 : f32 to vector<1x1xf32>
    %679 = arith.addf %676, %678 : vector<1x1xf32>
    %680 = math.rsqrt %679 : vector<1x1xf32>
    %681 = vector.broadcast %677 : f32 to vector<1x1xf32>
    %682 = arith.mulf %681, %680 : vector<1x1xf32>
    %c2_206 = arith.constant 2 : index
    %683 = memref.load %arg8[%c2_206] : memref<4xf32, #tpu.memory_space<smem>>
    %684 = arith.mulf %672, %682 : vector<1x1xf32>
    %685 = vector.broadcast %683 : f32 to vector<1x1xf32>
    %686 = arith.subf %685, %684 : vector<1x1xf32>
    %687 = vector.broadcast %682 : vector<1x1xf32> to vector<1x128xf32>
    %688 = arith.mulf %687, %664 : vector<1x128xf32>
    %689 = arith.addf %660, %688 : vector<1x128xf32>
    %690 = vector.broadcast %686 : vector<1x1xf32> to vector<1x128xf32>
    %691 = arith.mulf %690, %664 : vector<1x128xf32>
    %692 = arith.addf %663, %691 : vector<1x128xf32>
    %c3_207 = arith.constant 3 : index
    %c0_208 = arith.constant 0 : index
    %693 = vector.load %arg3[%c3_207, %c0_208] : memref<4x128xf32, #tpu.memory_space<vmem>>, vector<1x128xf32>
    %694 = arith.mulf %604, %693 : vector<1x128xf32>
    %cst_209 = arith.constant dense<0.000000e+00> : vector<1xf32>
    %695 = vector.multi_reduction <add>, %694, %cst_209 [1] : vector<1x128xf32> to vector<1xf32>
    %696 = vector.shape_cast %695 : vector<1xf32> to vector<1x1xf32>
    %697 = arith.mulf %607, %693 : vector<1x128xf32>
    %cst_210 = arith.constant dense<0.000000e+00> : vector<1xf32>
    %698 = vector.multi_reduction <add>, %697, %cst_210 [1] : vector<1x128xf32> to vector<1xf32>
    %699 = vector.shape_cast %698 : vector<1xf32> to vector<1x1xf32>
    %cst_211 = arith.constant 0.001953125 : f32
    %700 = vector.broadcast %cst_211 : f32 to vector<1x1xf32>
    %701 = arith.mulf %696, %700 : vector<1x1xf32>
    %cst_212 = arith.constant 0.001953125 : f32
    %702 = vector.broadcast %cst_212 : f32 to vector<1x1xf32>
    %703 = arith.mulf %699, %702 : vector<1x1xf32>
    %704 = arith.mulf %701, %701 : vector<1x1xf32>
    %705 = arith.subf %703, %704 : vector<1x1xf32>
    %c3_213 = arith.constant 3 : index
    %706 = memref.load %arg7[%c3_213] : memref<4xf32, #tpu.memory_space<smem>>
    %cst_214 = arith.constant 9.99999974E-6 : f32
    %707 = vector.broadcast %cst_214 : f32 to vector<1x1xf32>
    %708 = arith.addf %705, %707 : vector<1x1xf32>
    %709 = math.rsqrt %708 : vector<1x1xf32>
    %710 = vector.broadcast %706 : f32 to vector<1x1xf32>
    %711 = arith.mulf %710, %709 : vector<1x1xf32>
    %c3_215 = arith.constant 3 : index
    %712 = memref.load %arg8[%c3_215] : memref<4xf32, #tpu.memory_space<smem>>
    %713 = arith.mulf %701, %711 : vector<1x1xf32>
    %714 = vector.broadcast %712 : f32 to vector<1x1xf32>
    %715 = arith.subf %714, %713 : vector<1x1xf32>
    %716 = vector.broadcast %711 : vector<1x1xf32> to vector<1x128xf32>
    %717 = arith.mulf %716, %693 : vector<1x128xf32>
    %718 = arith.addf %689, %717 : vector<1x128xf32>
    %719 = vector.broadcast %715 : vector<1x1xf32> to vector<1x128xf32>
    %720 = arith.mulf %719, %693 : vector<1x128xf32>
    %721 = arith.addf %692, %720 : vector<1x128xf32>
    %722 = vector.broadcast %718 : vector<1x128xf32> to vector<16x128xf32>
    %723 = arith.mulf %602, %722 : vector<16x128xf32>
    %724 = vector.broadcast %721 : vector<1x128xf32> to vector<16x128xf32>
    %725 = arith.addf %723, %724 : vector<16x128xf32>
    %c0_216 = arith.constant 0 : index
    %c0_217 = arith.constant 0 : index
    %726 = vector.load %arg9[%c0_216, %c0_217] : memref<16x128xf32, #tpu.memory_space<vmem>>, vector<16x128xf32>
    tpu.vector_store %arg9[%c0_216, %c0_217], %725 {strides = array<i32>} : memref<16x128xf32, #tpu.memory_space<vmem>>, vector<16x128xf32>,
    return
  }
  func.func @transform_0(%arg0: i32) -> (i32, i32, i32, i32) {
    %c0_i32 = arith.constant 0 : i32
    %c0_i32_0 = arith.constant 0 : i32
    %c0_i32_1 = arith.constant 0 : i32
    %c0_i32_2 = arith.constant 0 : i32
    %c0_i32_3 = arith.constant 0 : i32
    return %c0_i32, %c0_i32_0, %c0_i32_1, %c0_i32_2 : i32, i32, i32, i32
  }
  func.func @transform_1(%arg0: i32) -> (i32, i32) {
    %c0_i32 = arith.constant 0 : i32
    %c0_i32_0 = arith.constant 0 : i32
    %c0_i32_1 = arith.constant 0 : i32
    return %c0_i32, %c0_i32_0 : i32, i32
  }
  func.func @transform_2(%arg0: i32) -> (i32, i32) {
    %c0_i32 = arith.constant 0 : i32
    %c0_i32_0 = arith.constant 0 : i32
    %c0_i32_1 = arith.constant 0 : i32
    return %c0_i32, %c0_i32_0 : i32, i32
  }
  func.func @transform_3(%arg0: i32) -> i32 {
    %c0_i32 = arith.constant 0 : i32
    %c0_i32_0 = arith.constant 0 : i32
    return %c0_i32 : i32
  }
  func.func @transform_4(%arg0: i32) -> i32 {
    %c0_i32 = arith.constant 0 : i32
    %c0_i32_0 = arith.constant 0 : i32
    return %c0_i32 : i32
  }
  func.func @transform_5(%arg0: i32) -> (i32, i32) {
    %c0_i32 = arith.constant 0 : i32
    %c0_i32_0 = arith.constant 0 : i32
    %c0_i32_1 = arith.constant 0 : i32
    return %c0_i32, %c0_i32_0 : i32, i32
  }
  func.func @transform_6(%arg0: i32) -> i32 {
    %c0_i32 = arith.constant 0 : i32
    %c0_i32_0 = arith.constant 0 : i32
    return %c0_i32 : i32
  }
  func.func @transform_7(%arg0: i32) -> i32 {
    %c0_i32 = arith.constant 0 : i32
    %c0_i32_0 = arith.constant 0 : i32
    return %c0_i32 : i32
  }
  func.func @transform_8(%arg0: i32) -> (i32, i32) {
    %c0_i32 = arith.constant 0 : i32
    %c0_i32_0 = arith.constant 0 : i32
    %c0_i32_1 = arith.constant 0 : i32
    return %c0_i32, %c0_i32_0 : i32, i32
  }
}

</mosaic_0001>

<bundles_post_ra>
// kernel: planar_conv2d.1
= control target key start
LH: loop header
LB: loop body
LE: loop exit
PB: predicated region body
PF: predicated region fallthrough
CT: control target
= control target key end

     0   :  { %13 = vsyncpa [#allocation3], 0  ;;  %s12018_s0 = inlined_call_operand.vmem [shape: f32[2,4,18,18], index: 0, kind: input, shape index: {}]   ;;  %s12019_s1 = inlined_call_operand.vmem [shape: f32[36,64], index: 1, kind: input, shape index: {}]   ;;  %s12020_s2 = inlined_call_operand.vmem [shape: f32[4,128], index: 2, kind: input, shape index: {}]   ;;  %s12021_s3 = inlined_call_operand.vmem [shape: f32[4], index: 3, kind: input, shape index: {}]   ;;  %s12022_s4 = inlined_call_operand.vmem [shape: f32[4], index: 4, kind: input, shape index: {}]   ;;  %s12023_s5 = inlined_call_operand.vmem [shape: f32[128,128], index: 5, kind: input, shape index: {}]   ;;  %s12024_s6 = inlined_call_operand.vmem [shape: f32[4], index: 6, kind: input, shape index: {}]   ;;  %s12025_s7 = inlined_call_operand.vmem [shape: f32[4], index: 7, kind: input, shape index: {}]   ;;  %s12026_s8 = inlined_call_operand.vmem [shape: f32[16,128], index: 8, kind: output, shape index: {}]  }
   0x1   :  { %14 = vsyncpa [#allocation5], 0  ;;  %s38_s29 = sshll.u32 %s12022_s4, 4  ;;  %s39_s29 = int_to_ptr.vmem [resolvable:$true] %s38_s29 }
   0x2   :  { %15 = vsyncpa [#allocation8], 0  ;;  %s28_s10 = sshll.u32 %s12021_s3, 4  ;;  %s7413_s11 = scalar_lea.vmem %s39_s29, 16  ;;  %s29_s10 = int_to_ptr.vmem [resolvable:$true] %s28_s10 }
   0x3   :  { %p7414_p0 = scmp.ne.s32.totalorder %s39_s29, %s7413_s11  ;;  %p7418_p1 = scmp.lt.s32.totalorder %s39_s29, %s39_s29 }
   0x4   :  { %p7419_p2 = scmp.lt.s32.totalorder %s7413_s11, %s7413_s11 }
   0x6   :  { %p7420_p3 = por %p7419_p2, %p7418_p1 }
   0x8   :  { %p7421_p4 = pnand %p7420_p3, %p7414_p0 }
   0xa   :  { %7424 = shalt.err (!%p7421_p4)
}
   0xb   :  { %s7467_s12 = smov [#allocation4]   ;;  %s7425_s13 = scalar_lea.vmem %s29_s10, 16 }
   0xc   :  { %41 = dma.vmem_to_smem %s39_s29, 16, %s7467_s12, [#allocation5]  }
   0xd   :  { %p7426_p5 = scmp.ne.s32.totalorder %s29_s10, %s7425_s13  ;;  %p7430_p6 = scmp.lt.s32.totalorder %s29_s10, %s29_s10 }
   0xe   :  { %p7431_p7 = scmp.lt.s32.totalorder %s7425_s13, %s7425_s13 }
  0x10   :  { %p7432_p8 = por %p7431_p7, %p7430_p6 }
  0x12   :  { %p7433_p9 = pnand %p7432_p8, %p7426_p5 }
  0x14   :  { %7436 = shalt.err (!%p7433_p9)
}
  0x15   :  { %s7468_s4 = smov [#allocation2]   ;;  %s50_s15 = sshll.u32 %s12024_s6, 4  ;;  %s51_s15 = int_to_ptr.vmem [resolvable:$true] %s50_s15 }
  0x16   :  { %31 = dma.vmem_to_smem %s29_s10, 16, %s7468_s4, [#allocation3]  }
  0x17   :  { %s60_s18 = sshll.u32 %s12025_s7, 4  ;;  %s7437_s19 = scalar_lea.vmem %s51_s15, 16  ;;  %s61_s18 = int_to_ptr.vmem [resolvable:$true] %s60_s18 }
  0x18   :  { %p7438_p10 = scmp.ne.s32.totalorder %s51_s15, %s7437_s19  ;;  %p7442_p11 = scmp.lt.s32.totalorder %s51_s15, %s51_s15 }
  0x19   :  { %p7443_p12 = scmp.lt.s32.totalorder %s7437_s19, %s7437_s19 }
  0x1b   :  { %p7444_p13 = por %p7443_p12, %p7442_p11 }
  0x1d   :  { %p7445_p0 = pnand %p7444_p13, %p7438_p10 }
  0x1f   :  { %7448 = shalt.err (!%p7445_p0)
}
  0x20   :  { %s7469_s20 = smov [#allocation6]   ;;  %s7449_s21 = scalar_lea.vmem %s61_s18, 16 }
  0x21   :  { %53 = dma.vmem_to_smem %s51_s15, 16, %s7469_s20, [#allocation5]  }
  0x22   :  { %p7450_p1 = scmp.ne.s32.totalorder %s61_s18, %s7449_s21  ;;  %p7454_p2 = scmp.lt.s32.totalorder %s61_s18, %s61_s18 }
  0x23   :  { %p7455_p3 = scmp.lt.s32.totalorder %s7449_s21, %s7449_s21 }
  0x25   :  { %p7456_p4 = por %p7455_p3, %p7454_p2 }
  0x27   :  { %p7457_p5 = pnand %p7456_p4, %p7450_p1 }
  0x29   :  { %7460 = shalt.err (!%p7457_p5)
}
  0x2a   :  { %s7470_s6 = smov [#allocation7]  }
  0x2b   :  { %63 = dma.vmem_to_smem %s61_s18, 16, %s7470_s6, [#allocation8]  }
  0x2c   :  { %7461 = dma.done.wait [#allocation3], 16  }
  0x2d   :  { %7462 = vsyncadd [#allocation3], 4294967280 }
  0x2e   :  { %7463 = dma.done.wait [#allocation5], 32  }
  0x2f   :  { %7464 = vsyncadd [#allocation5], 4294967264 }
  0x30   :  { %7465 = dma.done.wait [#allocation8], 16  }
  0x31   :  { %7466 = vsyncadd [#allocation8], 4294967280 }
  0x32   :  { %76 = sfence }
  0x33   :  { %v5629_v0 = vld [vmem:[%s12018_s0 + $0x60] sm:$0xff]  ;;  %s7471_s23 = smov 127   ;;  %s7472_s24 = smov 16   ;;  %v5630_v1 = vld [vmem:[%s12018_s0 + $0x68] sm:$0xff]  ;;  %v5646_v15 = vld [vmem:[%s12018_s0 + $0x78] sm:$0xff]  ;;  %vm103_vm0 = vcmask 130048  }
  0x34   :  { %185 = vrot.lane.b32.xlu1 %v5629_v0, %s7471_s23  ;;  %120 = vrot.lane.b32.xlu0 %v5629_v0, %s7472_s24  ;;  %s7473_s27 = smov 15   ;;  %s7474_s28 = smov 32   ;;  %v5635_v2 = vld [vmem:[%s12018_s0 + $0x69] sm:$0xff]  ;;  %v5634_v3 = vld [vmem:[%s12018_s0 + $0x61] sm:$0xff]  ;;  %vm106_vm1 = vcmask 261120   ;;  %vm109_vm2 = vcmask 392192  }
  0x35   :  { %s7475_s29 = smov 31   ;;  %s7476_s30 = smov 48   ;;  %v5640_v4 = vld [vmem:[%s12018_s0 + $0x6a] sm:$0xff]  ;;  %v5639_v5 = vld [vmem:[%s12018_s0 + $0x62] sm:$0xff]  ;;  %v5653_v39 = vld [vmem:[%s12018_s0 + $0x79] sm:$0xff]  ;;  %vm2671_vm3 = vcmask 523264  }
  0x36   :  { %s7477_s9 = smov 47   ;;  %s7478_s10 = smov 126   ;;  %v5647_v14 = vld [vmem:[%s12018_s0 + $0x80] sm:$0xff]  ;;  %vm2692_vm4 = vcmask 1040384   ;;  %vm5481_vm5 = vcmask 654336   ;;  %vm5484_vm6 = vcmask 785408  }
  0x37   :  { %s7479_s11 = smov 14   ;;  %s7480_s12 = smov 30   ;;  %v5654_v38 = vld [vmem:[%s12018_s0 + $0x81] sm:$0xff]  ;;  %vm5487_vm7 = vcmask 916480  }
  0x38   :  { %187 = vrot.lane.b32.xlu1 %v5630_v1, %s7471_s23  ;;  %122 = vrot.lane.b32.xlu0 %v5630_v1, %s7472_s24  ;;  %s7481_s13 = smov 46   ;;  %v5661_v62 = vld [vmem:[%s12018_s0 + $0x82] sm:$0xff]  ;;  %v5660_v63 = vld [vmem:[%s12018_s0 + $0x7a] sm:$0xff]  ;;  %s2704_s17 = sld [smem:[#allocation2]] }
  0x39   :  { %s5707_s18 = sld [smem:[#allocation2 + $0x1]]  ;;  %s5709_s20 = sld [smem:[#allocation2 + $0x2]] }
  0x3a   :  { %s5708_s19 = sld [smem:[#allocation4 + $0x1]]  ;;  %s2709_s21 = sld [smem:[#allocation4]] }
  0x3b   :  { %s5710_s6 = sld [smem:[#allocation4 + $0x2]]  ;;  %s7483_s7 = smov 112  }
  0x3c   :  { %193 = vrot.lane.b32.xlu1 %v5630_v1, %s7473_s27  ;;  %191 = vrot.lane.b32.xlu0 %v5629_v0, %s7473_s27  ;;  %s7485_s22 = smov 80   ;;  %s5713_s4 = sld [smem:[#allocation6 + $0x1]] }
  0x3d   :  { %s5714_s3 = sld [smem:[#allocation7 + $0x1]]  ;;  %s5715_s14 = sld [smem:[#allocation6 + $0x2]] }
  0x3e   :  { %s5527_s15 = sld [smem:[#allocation7]]  ;;  %s5717_s16 = sld [smem:[#allocation6 + $0x3]] }
  0x40   :  { %128 = vrot.lane.b32.xlu1 %v5630_v1, %s7474_s28  ;;  %126 = vrot.lane.b32.xlu0 %v5629_v0, %s7474_s28 }
  0x44   :  { %199 = vrot.lane.b32.xlu1 %v5630_v1, %s7475_s29  ;;  %197 = vrot.lane.b32.xlu0 %v5629_v0, %s7475_s29 }
  0x48   :  { %134 = vrot.lane.b32.xlu1 %v5630_v1, %s7476_s30  ;;  %132 = vrot.lane.b32.xlu0 %v5629_v0, %s7476_s30 }
  0x4c   :  { %205 = vrot.lane.b32.xlu1 %v5630_v1, %s7477_s9  ;;  %203 = vrot.lane.b32.xlu0 %v5629_v0, %s7477_s9 }
  0x50   :  { %260 = vrot.lane.b32.xlu1 %v5630_v1, %s7478_s10  ;;  %258 = vrot.lane.b32.xlu0 %v5629_v0, %s7478_s10 }
  0x54   :  { %266 = vrot.lane.b32.xlu1 %v5630_v1, %s7479_s11  ;;  %264 = vrot.lane.b32.xlu0 %v5629_v0, %s7479_s11 }
  0x58   :  { %272 = vrot.lane.b32.xlu1 %v5630_v1, %s7480_s12  ;;  %270 = vrot.lane.b32.xlu0 %v5629_v0, %s7480_s12 }
  0x5c   :  { %278 = vrot.lane.b32.xlu1 %v5630_v1, %s7481_s13  ;;  %276 = vrot.lane.b32.xlu0 %v5629_v0, %s7481_s13 }
  0x60   :  { %335 = vrot.lane.b32.xlu1 %v5635_v2, %s7472_s24  ;;  %333 = vrot.lane.b32.xlu0 %v5634_v3, %s7472_s24 }
  0x64   :  { %341 = vrot.lane.b32.xlu1 %v5635_v2, %s7474_s28  ;;  %339 = vrot.lane.b32.xlu0 %v5634_v3, %s7474_s28 }
  0x68   :  { %347 = vrot.lane.b32.xlu1 %v5635_v2, %s7476_s30  ;;  %345 = vrot.lane.b32.xlu0 %v5634_v3, %s7476_s30 }
  0x6c   :  { %402 = vrot.lane.b32.xlu1 %v5635_v2, %s7471_s23  ;;  %400 = vrot.lane.b32.xlu0 %v5634_v3, %s7471_s23 }
  0x70   :  { %408 = vrot.lane.b32.xlu1 %v5635_v2, %s7473_s27  ;;  %406 = vrot.lane.b32.xlu0 %v5634_v3, %s7473_s27 }
  0x74   :  { %414 = vrot.lane.b32.xlu1 %v5635_v2, %s7475_s29  ;;  %412 = vrot.lane.b32.xlu0 %v5634_v3, %s7475_s29 }
  0x78   :  { %420 = vrot.lane.b32.xlu1 %v5635_v2, %s7477_s9  ;;  %418 = vrot.lane.b32.xlu0 %v5634_v3, %s7477_s9 }
  0x7c   :  { %475 = vrot.lane.b32.xlu1 %v5635_v2, %s7478_s10  ;;  %473 = vrot.lane.b32.xlu0 %v5634_v3, %s7478_s10 }
  0x80   :  { %481 = vrot.lane.b32.xlu1 %v5635_v2, %s7479_s11  ;;  %479 = vrot.lane.b32.xlu0 %v5634_v3, %s7479_s11 }
  0x84   :  { %487 = vrot.lane.b32.xlu1 %v5635_v2, %s7480_s12  ;;  %485 = vrot.lane.b32.xlu0 %v5634_v3, %s7480_s12 }
  0x88   :  { %493 = vrot.lane.b32.xlu1 %v5635_v2, %s7481_s13  ;;  %491 = vrot.lane.b32.xlu0 %v5634_v3, %s7481_s13 }
  0x8c   :  { %550 = vrot.lane.b32.xlu1 %v5640_v4, %s7472_s24  ;;  %548 = vrot.lane.b32.xlu0 %v5639_v5, %s7472_s24 }
  0x90   :  { %556 = vrot.lane.b32.xlu1 %v5640_v4, %s7474_s28  ;;  %554 = vrot.lane.b32.xlu0 %v5639_v5, %s7474_s28 }
  0x94   :  { %562 = vrot.lane.b32.xlu1 %v5640_v4, %s7476_s30  ;;  %560 = vrot.lane.b32.xlu0 %v5639_v5, %s7476_s30 }
  0x98   :  { %617 = vrot.lane.b32.xlu1 %v5640_v4, %s7471_s23  ;;  %615 = vrot.lane.b32.xlu0 %v5639_v5, %s7471_s23 }
  0x9c   :  { %623 = vrot.lane.b32.xlu1 %v5640_v4, %s7473_s27  ;;  %621 = vrot.lane.b32.xlu0 %v5639_v5, %s7473_s27 }
  0xa0   :  { %629 = vrot.lane.b32.xlu1 %v5640_v4, %s7475_s29  ;;  %627 = vrot.lane.b32.xlu0 %v5639_v5, %s7475_s29 }
  0xa4   :  { %635 = vrot.lane.b32.xlu1 %v5640_v4, %s7477_s9  ;;  %633 = vrot.lane.b32.xlu0 %v5639_v5, %s7477_s9 }
  0xa6   :  { %v7619_v6 = vpop.permute.xlu1 %185  ;;  %v7621_v7 = vpop.permute.xlu0 %120 }
  0xa8   :  { %690 = vrot.lane.b32.xlu1 %v5640_v4, %s7478_s10  ;;  %688 = vrot.lane.b32.xlu0 %v5639_v5, %s7478_s10 }
  0xaa   :  { %v7625_v8 = vpop.permute.xlu1 %187  ;;  %v7627_v9 = vpop.permute.xlu0 %122 }
  0xac   :  { %696 = vrot.lane.b32.xlu1 %v5640_v4, %s7479_s11  ;;  %694 = vrot.lane.b32.xlu0 %v5639_v5, %s7479_s11 }
  0xae   :  { %v7631_v10 = vpop.permute.xlu1 %193  ;;  %v7633_v11 = vpop.permute.xlu0 %191 }
  0xb0   :  { %702 = vrot.lane.b32.xlu1 %v5640_v4, %s7480_s12  ;;  %700 = vrot.lane.b32.xlu0 %v5639_v5, %s7480_s12 }
  0xb2   :  { %v7637_v12 = vpop.permute.xlu1 %128  ;;  %v7639_v13 = vpop.permute.xlu0 %126 }
  0xb4   :  { %708 = vrot.lane.b32.xlu1 %v5640_v4, %s7481_s13  ;;  %706 = vrot.lane.b32.xlu0 %v5639_v5, %s7481_s13 }
  0xb6   :  { %v7649_v16 = vpop.permute.xlu1 %199  ;;  %v7651_v17 = vpop.permute.xlu0 %197 }
  0xb8   :  { %767 = vrot.lane.b32.xlu1 %v5647_v14, %s7472_s24  ;;  %765 = vrot.lane.b32.xlu0 %v5646_v15, %s7472_s24 }
  0xba   :  { %v7655_v18 = vpop.permute.xlu1 %134  ;;  %v7657_v19 = vpop.permute.xlu0 %132 }
  0xbc   :  { %773 = vrot.lane.b32.xlu1 %v5647_v14, %s7474_s28  ;;  %771 = vrot.lane.b32.xlu0 %v5646_v15, %s7474_s28 }
  0xbe   :  { %v7661_v20 = vpop.permute.xlu1 %205  ;;  %v7663_v21 = vpop.permute.xlu0 %203 }
  0xc0   :  { %779 = vrot.lane.b32.xlu1 %v5647_v14, %s7476_s30  ;;  %777 = vrot.lane.b32.xlu0 %v5646_v15, %s7476_s30 }
  0xc2   :  { %v7667_v22 = vpop.permute.xlu1 %260  ;;  %v7669_v23 = vpop.permute.xlu0 %258 }
  0xc4   :  { %834 = vrot.lane.b32.xlu1 %v5647_v14, %s7471_s23  ;;  %832 = vrot.lane.b32.xlu0 %v5646_v15, %s7471_s23 }
  0xc6   :  { %v7673_v24 = vpop.permute.xlu1 %266  ;;  %v7675_v25 = vpop.permute.xlu0 %264 }
  0xc8   :  { %840 = vrot.lane.b32.xlu1 %v5647_v14, %s7473_s27  ;;  %838 = vrot.lane.b32.xlu0 %v5646_v15, %s7473_s27 }
  0xca   :  { %v7679_v26 = vpop.permute.xlu1 %272  ;;  %v7681_v27 = vpop.permute.xlu0 %270 }
  0xcc   :  { %846 = vrot.lane.b32.xlu1 %v5647_v14, %s7475_s29  ;;  %844 = vrot.lane.b32.xlu0 %v5646_v15, %s7475_s29 }
  0xce   :  { %v7685_v28 = vpop.permute.xlu1 %278  ;;  %v7687_v29 = vpop.permute.xlu0 %276 }
  0xd0   :  { %852 = vrot.lane.b32.xlu1 %v5647_v14, %s7477_s9  ;;  %850 = vrot.lane.b32.xlu0 %v5646_v15, %s7477_s9 }
  0xd2   :  { %v7691_v30 = vpop.permute.xlu1 %335  ;;  %v7693_v31 = vpop.permute.xlu0 %333 }
  0xd4   :  { %907 = vrot.lane.b32.xlu1 %v5647_v14, %s7478_s10  ;;  %905 = vrot.lane.b32.xlu0 %v5646_v15, %s7478_s10 }
  0xd6   :  { %v7697_v32 = vpop.permute.xlu1 %341  ;;  %v7699_v33 = vpop.permute.xlu0 %339 }
  0xd8   :  { %913 = vrot.lane.b32.xlu1 %v5647_v14, %s7479_s11  ;;  %911 = vrot.lane.b32.xlu0 %v5646_v15, %s7479_s11 }
  0xda   :  { %v7703_v34 = vpop.permute.xlu1 %347  ;;  %v7705_v35 = vpop.permute.xlu0 %345 }
  0xdc   :  { %919 = vrot.lane.b32.xlu1 %v5647_v14, %s7480_s12  ;;  %917 = vrot.lane.b32.xlu0 %v5646_v15, %s7480_s12 }
  0xde   :  { %v7709_v36 = vpop.permute.xlu1 %402  ;;  %v7711_v37 = vpop.permute.xlu0 %400 }
  0xe0   :  { %925 = vrot.lane.b32.xlu1 %v5647_v14, %s7481_s13  ;;  %923 = vrot.lane.b32.xlu0 %v5646_v15, %s7481_s13 }
  0xe2   :  { %v7721_v40 = vpop.permute.xlu1 %408  ;;  %v7723_v41 = vpop.permute.xlu0 %406 }
  0xe4   :  { %982 = vrot.lane.b32.xlu1 %v5654_v38, %s7472_s24  ;;  %980 = vrot.lane.b32.xlu0 %v5653_v39, %s7472_s24 }
  0xe6   :  { %v7727_v42 = vpop.permute.xlu1 %414  ;;  %v7729_v43 = vpop.permute.xlu0 %412 }
  0xe8   :  { %988 = vrot.lane.b32.xlu1 %v5654_v38, %s7474_s28  ;;  %986 = vrot.lane.b32.xlu0 %v5653_v39, %s7474_s28 }
  0xea   :  { %v7733_v44 = vpop.permute.xlu1 %420  ;;  %v7735_v45 = vpop.permute.xlu0 %418 }
  0xec   :  { %994 = vrot.lane.b32.xlu1 %v5654_v38, %s7476_s30  ;;  %992 = vrot.lane.b32.xlu0 %v5653_v39, %s7476_s30 }
  0xee   :  { %v7739_v46 = vpop.permute.xlu1 %475  ;;  %v7741_v47 = vpop.permute.xlu0 %473 }
  0xf0   :  { %1049 = vrot.lane.b32.xlu1 %v5654_v38, %s7471_s23  ;;  %1047 = vrot.lane.b32.xlu0 %v5653_v39, %s7471_s23 }
  0xf2   :  { %v7745_v48 = vpop.permute.xlu1 %481  ;;  %v7747_v49 = vpop.permute.xlu0 %479 }
  0xf4   :  { %1055 = vrot.lane.b32.xlu1 %v5654_v38, %s7473_s27  ;;  %1053 = vrot.lane.b32.xlu0 %v5653_v39, %s7473_s27 }
  0xf6   :  { %v7751_v50 = vpop.permute.xlu1 %487  ;;  %v7753_v51 = vpop.permute.xlu0 %485 }
  0xf8   :  { %1061 = vrot.lane.b32.xlu1 %v5654_v38, %s7475_s29  ;;  %1059 = vrot.lane.b32.xlu0 %v5653_v39, %s7475_s29 }
  0xfa   :  { %v7757_v52 = vpop.permute.xlu1 %493  ;;  %v7759_v53 = vpop.permute.xlu0 %491 }
  0xfc   :  { %1067 = vrot.lane.b32.xlu1 %v5654_v38, %s7477_s9  ;;  %1065 = vrot.lane.b32.xlu0 %v5653_v39, %s7477_s9 }
  0xfe   :  { %v7763_v54 = vpop.permute.xlu1 %550  ;;  %v7765_v55 = vpop.permute.xlu0 %548 }
 0x100   :  { %1122 = vrot.lane.b32.xlu1 %v5654_v38, %s7478_s10  ;;  %1120 = vrot.lane.b32.xlu0 %v5653_v39, %s7478_s10 }
 0x102   :  { %v7769_v56 = vpop.permute.xlu1 %556  ;;  %v7771_v57 = vpop.permute.xlu0 %554 }
 0x104   :  { %1128 = vrot.lane.b32.xlu1 %v5654_v38, %s7479_s11  ;;  %1126 = vrot.lane.b32.xlu0 %v5653_v39, %s7479_s11 }
 0x106   :  { %v7775_v58 = vpop.permute.xlu1 %562  ;;  %v7777_v59 = vpop.permute.xlu0 %560 }
 0x108   :  { %1134 = vrot.lane.b32.xlu1 %v5654_v38, %s7480_s12  ;;  %1132 = vrot.lane.b32.xlu0 %v5653_v39, %s7480_s12 }
 0x10a   :  { %v7781_v60 = vpop.permute.xlu1 %617  ;;  %v7783_v61 = vpop.permute.xlu0 %615 }
 0x10c   :  { %1140 = vrot.lane.b32.xlu1 %v5654_v38, %s7481_s13  ;;  %1138 = vrot.lane.b32.xlu0 %v5653_v39, %s7481_s13 }
 0x10e   :  { %v7793_v0 = vpop.permute.xlu1 %623  ;;  %v7795_v1 = vpop.permute.xlu0 %621 }
 0x110   :  { %1197 = vrot.lane.b32.xlu1 %v5661_v62, %s7472_s24  ;;  %1195 = vrot.lane.b32.xlu0 %v5660_v63, %s7472_s24 }
 0x112   :  { %v7799_v2 = vpop.permute.xlu1 %629  ;;  %v7801_v3 = vpop.permute.xlu0 %627 }
 0x113   :  { %12124 = vst [vmem:[#allocation12_spill] sm:$0xff] %v7799_v2  ;;  %12125 = vst [vmem:[#allocation13_spill] sm:$0xff] %v7801_v3 }
 0x114   :  { %1203 = vrot.lane.b32.xlu1 %v5661_v62, %s7474_s28  ;;  %1201 = vrot.lane.b32.xlu0 %v5660_v63, %s7474_s28 }
 0x116   :  { %v7805_v4 = vpop.permute.xlu1 %635  ;;  %v7807_v5 = vpop.permute.xlu0 %633 }
 0x117   :  { %12126 = vst [vmem:[#allocation14_spill] sm:$0xff] %v7805_v4  ;;  %12127 = vst [vmem:[#allocation15_spill] sm:$0xff] %v7807_v5 }
 0x118   :  { %1209 = vrot.lane.b32.xlu1 %v5661_v62, %s7476_s30  ;;  %1207 = vrot.lane.b32.xlu0 %v5660_v63, %s7476_s30 }
 0x11a   :  { %v7811_v14 = vpop.permute.xlu1 %690  ;;  %v7813_v15 = vpop.permute.xlu0 %688 }
 0x11b   :  { %12128 = vst [vmem:[#allocation16_spill] sm:$0xff] %v7811_v14  ;;  %12129 = vst [vmem:[#allocation17_spill] sm:$0xff] %v7813_v15 }
 0x11c   :  { %1264 = vrot.lane.b32.xlu1 %v5661_v62, %s7471_s23  ;;  %1262 = vrot.lane.b32.xlu0 %v5660_v63, %s7471_s23 }
 0x11e   :  { %v7817_v38 = vpop.permute.xlu1 %696  ;;  %v7819_v39 = vpop.permute.xlu0 %694 }
 0x11f   :  { %12130 = vst [vmem:[#allocation18_spill] sm:$0xff] %v7817_v38  ;;  %12131 = vst [vmem:[#allocation19_spill] sm:$0xff] %v7819_v39 }
 0x120   :  { %1270 = vrot.lane.b32.xlu1 %v5661_v62, %s7473_s27  ;;  %1268 = vrot.lane.b32.xlu0 %v5660_v63, %s7473_s27 }
 0x122   :  { %v7823_v5 = vpop.permute.xlu1 %702  ;;  %v7825_v4 = vpop.permute.xlu0 %700 }
 0x123   :  { %12132 = vst [vmem:[#allocation20_spill] sm:$0xff] %v7823_v5  ;;  %12133 = vst [vmem:[#allocation21_spill] sm:$0xff] %v7825_v4 }
 0x124   :  { %1276 = vrot.lane.b32.xlu1 %v5661_v62, %s7475_s29  ;;  %1274 = vrot.lane.b32.xlu0 %v5660_v63, %s7475_s29 }
 0x126   :  { %v7829_v15 = vpop.permute.xlu1 %708  ;;  %v7831_v14 = vpop.permute.xlu0 %706 }
 0x127   :  { %12134 = vst [vmem:[#allocation22_spill] sm:$0xff] %v7829_v15  ;;  %12135 = vst [vmem:[#allocation23_spill] sm:$0xff] %v7831_v14 }
 0x128   :  { %1282 = vrot.lane.b32.xlu1 %v5661_v62, %s7477_s9  ;;  %1280 = vrot.lane.b32.xlu0 %v5660_v63, %s7477_s9 }
 0x12a   :  { %v7835_v39 = vpop.permute.xlu1 %767  ;;  %v7837_v38 = vpop.permute.xlu0 %765 }
 0x12b   :  { %12136 = vst [vmem:[#allocation24_spill] sm:$0xff] %v7835_v39  ;;  %12137 = vst [vmem:[#allocation25_spill] sm:$0xff] %v7837_v38 }
 0x12c   :  { %1337 = vrot.lane.b32.xlu1 %v5661_v62, %s7478_s10  ;;  %1335 = vrot.lane.b32.xlu0 %v5660_v63, %s7478_s10 }
 0x12e   :  { %v7841_v4 = vpop.permute.xlu1 %773  ;;  %v7843_v5 = vpop.permute.xlu0 %771 }
 0x12f   :  { %12138 = vst [vmem:[#allocation26_spill] sm:$0xff] %v7841_v4  ;;  %12139 = vst [vmem:[#allocation27_spill] sm:$0xff] %v7843_v5  ;;  %v5668_v5 = vld [vmem:[%s12018_s0 + $0x98] sm:$0xff] }
 0x130   :  { %1343 = vrot.lane.b32.xlu1 %v5661_v62, %s7479_s11  ;;  %1341 = vrot.lane.b32.xlu0 %v5660_v63, %s7479_s11 }
 0x132   :  { %v7847_v14 = vpop.permute.xlu1 %779  ;;  %v7849_v15 = vpop.permute.xlu0 %777 }
 0x133   :  { %12140 = vst [vmem:[#allocation28_spill] sm:$0xff] %v7847_v14  ;;  %12141 = vst [vmem:[#allocation29_spill] sm:$0xff] %v7849_v15  ;;  %v5667_v15 = vld [vmem:[%s12018_s0 + $0x90] sm:$0xff] }
 0x134   :  { %1349 = vrot.lane.b32.xlu1 %v5661_v62, %s7480_s12  ;;  %1347 = vrot.lane.b32.xlu0 %v5660_v63, %s7480_s12 }
 0x136   :  { %v7853_v38 = vpop.permute.xlu1 %834  ;;  %v7855_v39 = vpop.permute.xlu0 %832 }
 0x137   :  { %12142 = vst [vmem:[#allocation30_spill] sm:$0xff] %v7853_v38  ;;  %12143 = vst [vmem:[#allocation31_spill] sm:$0xff] %v7855_v39 }
 0x138   :  { %1355 = vrot.lane.b32.xlu1 %v5661_v62, %s7481_s13  ;;  %1353 = vrot.lane.b32.xlu0 %v5660_v63, %s7481_s13 }
 0x13a   :  { %v7865_v14 = vpop.permute.xlu1 %840  ;;  %v7867_v4 = vpop.permute.xlu0 %838 }
 0x13b   :  { %12144 = vst [vmem:[#allocation32_spill] sm:$0xff] %v7865_v14  ;;  %12145 = vst [vmem:[#allocation33_spill] sm:$0xff] %v7867_v4 }
 0x13c   :  { %1414 = vrot.lane.b32.xlu1 %v5668_v5, %s7472_s24  ;;  %1412 = vrot.lane.b32.xlu0 %v5667_v15, %s7472_s24 }
 0x13e   :  { %v7871_v39 = vpop.permute.xlu1 %846  ;;  %v7873_v62 = vpop.permute.xlu0 %844 }
 0x13f   :  { %12146 = vst [vmem:[#allocation34_spill] sm:$0xff] %v7871_v39  ;;  %12147 = vst [vmem:[#allocation35_spill] sm:$0xff] %v7873_v62 }
 0x140   :  { %1420 = vrot.lane.b32.xlu1 %v5668_v5, %s7474_s28  ;;  %1418 = vrot.lane.b32.xlu0 %v5667_v15, %s7474_s28 }
 0x142   :  { %v7877_v63 = vpop.permute.xlu1 %852  ;;  %v7879_v38 = vpop.permute.xlu0 %850 }
 0x143   :  { %12148 = vst [vmem:[#allocation36_spill] sm:$0xff] %v7877_v63  ;;  %12149 = vst [vmem:[#allocation37_spill] sm:$0xff] %v7879_v38 }
 0x144   :  { %1426 = vrot.lane.b32.xlu1 %v5668_v5, %s7476_s30  ;;  %1424 = vrot.lane.b32.xlu0 %v5667_v15, %s7476_s30 }
 0x146   :  { %v7883_v4 = vpop.permute.xlu1 %907  ;;  %v7885_v14 = vpop.permute.xlu0 %905 }
 0x147   :  { %12150 = vst [vmem:[#allocation38_spill] sm:$0xff] %v7883_v4  ;;  %12151 = vst [vmem:[#allocation39_spill] sm:$0xff] %v7885_v14 }
 0x148   :  { %1481 = vrot.lane.b32.xlu1 %v5668_v5, %s7471_s23  ;;  %1479 = vrot.lane.b32.xlu0 %v5667_v15, %s7471_s23 }
 0x14a   :  { %v7889_v62 = vpop.permute.xlu1 %913  ;;  %v7891_v39 = vpop.permute.xlu0 %911 }
 0x14b   :  { %12152 = vst [vmem:[#allocation40_spill] sm:$0xff] %v7889_v62  ;;  %12153 = vst [vmem:[#allocation41_spill] sm:$0xff] %v7891_v39 }
 0x14c   :  { %1487 = vrot.lane.b32.xlu1 %v5668_v5, %s7473_s27  ;;  %1485 = vrot.lane.b32.xlu0 %v5667_v15, %s7473_s27 }
 0x14e   :  { %v7895_v38 = vpop.permute.xlu1 %919  ;;  %v7897_v63 = vpop.permute.xlu0 %917 }
 0x14f   :  { %12154 = vst [vmem:[#allocation42_spill] sm:$0xff] %v7895_v38  ;;  %12155 = vst [vmem:[#allocation43_spill] sm:$0xff] %v7897_v63 }
 0x150   :  { %1493 = vrot.lane.b32.xlu1 %v5668_v5, %s7475_s29  ;;  %1491 = vrot.lane.b32.xlu0 %v5667_v15, %s7475_s29 }
 0x152   :  { %v7901_v14 = vpop.permute.xlu1 %925  ;;  %v7903_v4 = vpop.permute.xlu0 %923 }
 0x153   :  { %12156 = vst [vmem:[#allocation44_spill] sm:$0xff] %v7901_v14  ;;  %12157 = vst [vmem:[#allocation45_spill] sm:$0xff] %v7903_v4 }
 0x154   :  { %1499 = vrot.lane.b32.xlu1 %v5668_v5, %s7477_s9  ;;  %1497 = vrot.lane.b32.xlu0 %v5667_v15, %s7477_s9 }
 0x156   :  { %v7907_v39 = vpop.permute.xlu1 %982  ;;  %v7909_v62 = vpop.permute.xlu0 %980 }
 0x157   :  { %12158 = vst [vmem:[#allocation46_spill] sm:$0xff] %v7907_v39  ;;  %12159 = vst [vmem:[#allocation47_spill] sm:$0xff] %v7909_v62 }
 0x158   :  { %1554 = vrot.lane.b32.xlu1 %v5668_v5, %s7478_s10  ;;  %1552 = vrot.lane.b32.xlu0 %v5667_v15, %s7478_s10 }
 0x15a   :  { %v7913_v63 = vpop.permute.xlu1 %988  ;;  %v7915_v38 = vpop.permute.xlu0 %986 }
 0x15b   :  { %12160 = vst [vmem:[#allocation48_spill] sm:$0xff] %v7913_v63  ;;  %12161 = vst [vmem:[#allocation49_spill] sm:$0xff] %v7915_v38  ;;  %v5675_v38 = vld [vmem:[%s12018_s0 + $0x99] sm:$0xff] }
 0x15c   :  { %1560 = vrot.lane.b32.xlu1 %v5668_v5, %s7479_s11  ;;  %1558 = vrot.lane.b32.xlu0 %v5667_v15, %s7479_s11 }
 0x15e   :  { %v7919_v4 = vpop.permute.xlu1 %994  ;;  %v7921_v14 = vpop.permute.xlu0 %992 }
 0x15f   :  { %12162 = vst [vmem:[#allocation50_spill] sm:$0xff] %v7919_v4  ;;  %12163 = vst [vmem:[#allocation51_spill] sm:$0xff] %v7921_v14  ;;  %v5674_v14 = vld [vmem:[%s12018_s0 + $0x91] sm:$0xff] }
 0x160   :  { %1566 = vrot.lane.b32.xlu1 %v5668_v5, %s7480_s12  ;;  %1564 = vrot.lane.b32.xlu0 %v5667_v15, %s7480_s12 }
 0x162   :  { %v7925_v62 = vpop.permute.xlu1 %1049  ;;  %v7927_v39 = vpop.permute.xlu0 %1047 }
 0x163   :  { %12164 = vst [vmem:[#allocation52_spill] sm:$0xff] %v7925_v62  ;;  %12165 = vst [vmem:[#allocation53_spill] sm:$0xff] %v7927_v39 }
 0x164   :  { %1572 = vrot.lane.b32.xlu1 %v5668_v5, %s7481_s13  ;;  %1570 = vrot.lane.b32.xlu0 %v5667_v15, %s7481_s13 }
 0x166   :  { %v7937_v4 = vpop.permute.xlu1 %1055  ;;  %v7939_v63 = vpop.permute.xlu0 %1053 }
 0x167   :  { %12166 = vst [vmem:[#allocation54_spill] sm:$0xff] %v7937_v4  ;;  %12167 = vst [vmem:[#allocation55_spill] sm:$0xff] %v7939_v63 }
 0x168   :  { %1629 = vrot.lane.b32.xlu1 %v5675_v38, %s7472_s24  ;;  %1627 = vrot.lane.b32.xlu0 %v5674_v14, %s7472_s24 }
 0x16a   :  { %v7943_v39 = vpop.permute.xlu1 %1061  ;;  %v7945_v5 = vpop.permute.xlu0 %1059 }
 0x16b   :  { %12168 = vst [vmem:[#allocation56_spill] sm:$0xff] %v7943_v39  ;;  %12169 = vst [vmem:[#allocation57_spill] sm:$0xff] %v7945_v5 }
 0x16c   :  { %1635 = vrot.lane.b32.xlu1 %v5675_v38, %s7474_s28  ;;  %1633 = vrot.lane.b32.xlu0 %v5674_v14, %s7474_s28 }
 0x16e   :  { %v7949_v15 = vpop.permute.xlu1 %1067  ;;  %v7951_v62 = vpop.permute.xlu0 %1065 }
 0x16f   :  { %12170 = vst [vmem:[#allocation58_spill] sm:$0xff] %v7949_v15  ;;  %12171 = vst [vmem:[#allocation59_spill] sm:$0xff] %v7951_v62 }
 0x170   :  { %1641 = vrot.lane.b32.xlu1 %v5675_v38, %s7476_s30  ;;  %1639 = vrot.lane.b32.xlu0 %v5674_v14, %s7476_s30 }
 0x172   :  { %v7955_v63 = vpop.permute.xlu1 %1122  ;;  %v7957_v4 = vpop.permute.xlu0 %1120 }
 0x173   :  { %12172 = vst [vmem:[#allocation60_spill] sm:$0xff] %v7955_v63  ;;  %12173 = vst [vmem:[#allocation61_spill] sm:$0xff] %v7957_v4 }
 0x174   :  { %1696 = vrot.lane.b32.xlu1 %v5675_v38, %s7471_s23  ;;  %1694 = vrot.lane.b32.xlu0 %v5674_v14, %s7471_s23 }
 0x176   :  { %v7961_v5 = vpop.permute.xlu1 %1128  ;;  %v7963_v39 = vpop.permute.xlu0 %1126 }
 0x177   :  { %12174 = vst [vmem:[#allocation62_spill] sm:$0xff] %v7961_v5  ;;  %12175 = vst [vmem:[#allocation63_spill] sm:$0xff] %v7963_v39 }
 0x178   :  { %1702 = vrot.lane.b32.xlu1 %v5675_v38, %s7473_s27  ;;  %1700 = vrot.lane.b32.xlu0 %v5674_v14, %s7473_s27 }
 0x17a   :  { %v7967_v62 = vpop.permute.xlu1 %1134  ;;  %v7969_v15 = vpop.permute.xlu0 %1132 }
 0x17b   :  { %12176 = vst [vmem:[#allocation64_spill] sm:$0xff] %v7967_v62  ;;  %12177 = vst [vmem:[#allocation65_spill] sm:$0xff] %v7969_v15 }
 0x17c   :  { %1708 = vrot.lane.b32.xlu1 %v5675_v38, %s7475_s29  ;;  %1706 = vrot.lane.b32.xlu0 %v5674_v14, %s7475_s29 }
 0x17e   :  { %v7973_v4 = vpop.permute.xlu1 %1140  ;;  %v7975_v63 = vpop.permute.xlu0 %1138 }
 0x17f   :  { %12178 = vst [vmem:[#allocation66_spill] sm:$0xff] %v7973_v4  ;;  %12179 = vst [vmem:[#allocation67_spill] sm:$0xff] %v7975_v63 }
 0x180   :  { %1714 = vrot.lane.b32.xlu1 %v5675_v38, %s7477_s9  ;;  %1712 = vrot.lane.b32.xlu0 %v5674_v14, %s7477_s9 }
 0x182   :  { %v7979_v39 = vpop.permute.xlu1 %1197  ;;  %v7981_v5 = vpop.permute.xlu0 %1195 }
 0x183   :  { %12180 = vst [vmem:[#allocation68_spill] sm:$0xff] %v7979_v39  ;;  %12181 = vst [vmem:[#allocation69_spill] sm:$0xff] %v7981_v5 }
 0x184   :  { %1769 = vrot.lane.b32.xlu1 %v5675_v38, %s7478_s10  ;;  %1767 = vrot.lane.b32.xlu0 %v5674_v14, %s7478_s10 }
 0x186   :  { %v7985_v15 = vpop.permute.xlu1 %1203  ;;  %v7987_v62 = vpop.permute.xlu0 %1201 }
 0x187   :  { %12182 = vst [vmem:[#allocation70_spill] sm:$0xff] %v7985_v15  ;;  %12183 = vst [vmem:[#allocation71_spill] sm:$0xff] %v7987_v62  ;;  %v5682_v62 = vld [vmem:[%s12018_s0 + $0x9a] sm:$0xff] }
 0x188   :  { %1775 = vrot.lane.b32.xlu1 %v5675_v38, %s7479_s11  ;;  %1773 = vrot.lane.b32.xlu0 %v5674_v14, %s7479_s11 }
 0x18a   :  { %v7991_v63 = vpop.permute.xlu1 %1209  ;;  %v7993_v4 = vpop.permute.xlu0 %1207 }
 0x18b   :  { %12184 = vst [vmem:[#allocation72_spill] sm:$0xff] %v7991_v63  ;;  %12185 = vst [vmem:[#allocation73_spill] sm:$0xff] %v7993_v4  ;;  %v5681_v4 = vld [vmem:[%s12018_s0 + $0x92] sm:$0xff] }
 0x18c   :  { %1781 = vrot.lane.b32.xlu1 %v5675_v38, %s7480_s12  ;;  %1779 = vrot.lane.b32.xlu0 %v5674_v14, %s7480_s12 }
 0x18e   :  { %v7997_v5 = vpop.permute.xlu1 %1264  ;;  %v7999_v39 = vpop.permute.xlu0 %1262 }
 0x18f   :  { %12186 = vst [vmem:[#allocation74_spill] sm:$0xff] %v7997_v5  ;;  %12187 = vst [vmem:[#allocation75_spill] sm:$0xff] %v7999_v39 }
 0x190   :  { %1787 = vrot.lane.b32.xlu1 %v5675_v38, %s7481_s13  ;;  %1785 = vrot.lane.b32.xlu0 %v5674_v14, %s7481_s13 }
 0x192   :  { %v8009_v63 = vpop.permute.xlu1 %1270  ;;  %v8011_v15 = vpop.permute.xlu0 %1268 }
 0x193   :  { %12188 = vst [vmem:[#allocation76_spill] sm:$0xff] %v8009_v63  ;;  %12189 = vst [vmem:[#allocation77_spill] sm:$0xff] %v8011_v15 }
 0x194   :  { %1844 = vrot.lane.b32.xlu1 %v5682_v62, %s7472_s24  ;;  %1842 = vrot.lane.b32.xlu0 %v5681_v4, %s7472_s24 }
 0x196   :  { %v8015_v39 = vpop.permute.xlu1 %1276  ;;  %v8017_v38 = vpop.permute.xlu0 %1274 }
 0x197   :  { %12190 = vst [vmem:[#allocation78_spill] sm:$0xff] %v8015_v39  ;;  %12191 = vst [vmem:[#allocation79_spill] sm:$0xff] %v8017_v38 }
 0x198   :  { %1850 = vrot.lane.b32.xlu1 %v5682_v62, %s7474_s28  ;;  %1848 = vrot.lane.b32.xlu0 %v5681_v4, %s7474_s28 }
 0x19a   :  { %v8021_v14 = vpop.permute.xlu1 %1282  ;;  %v8023_v5 = vpop.permute.xlu0 %1280 }
 0x19b   :  { %12192 = vst [vmem:[#allocation80_spill] sm:$0xff] %v8021_v14  ;;  %12193 = vst [vmem:[#allocation81_spill] sm:$0xff] %v8023_v5 }
 0x19c   :  { %1856 = vrot.lane.b32.xlu1 %v5682_v62, %s7476_s30  ;;  %1854 = vrot.lane.b32.xlu0 %v5681_v4, %s7476_s30 }
 0x19e   :  { %v8027_v15 = vpop.permute.xlu1 %1337  ;;  %v8029_v63 = vpop.permute.xlu0 %1335 }
 0x19f   :  { %12194 = vst [vmem:[#allocation82_spill] sm:$0xff] %v8027_v15  ;;  %12195 = vst [vmem:[#allocation83_spill] sm:$0xff] %v8029_v63 }
 0x1a0   :  { %1911 = vrot.lane.b32.xlu1 %v5682_v62, %s7471_s23  ;;  %1909 = vrot.lane.b32.xlu0 %v5681_v4, %s7471_s23 }
 0x1a2   :  { %v8033_v38 = vpop.permute.xlu1 %1343  ;;  %v8035_v39 = vpop.permute.xlu0 %1341 }
 0x1a3   :  { %12196 = vst [vmem:[#allocation84_spill] sm:$0xff] %v8033_v38  ;;  %12197 = vst [vmem:[#allocation85_spill] sm:$0xff] %v8035_v39 }
 0x1a4   :  { %1917 = vrot.lane.b32.xlu1 %v5682_v62, %s7473_s27  ;;  %1915 = vrot.lane.b32.xlu0 %v5681_v4, %s7473_s27 }
 0x1a6   :  { %v8039_v5 = vpop.permute.xlu1 %1349  ;;  %v8041_v14 = vpop.permute.xlu0 %1347 }
 0x1a7   :  { %12198 = vst [vmem:[#allocation86_spill] sm:$0xff] %v8039_v5  ;;  %12199 = vst [vmem:[#allocation87_spill] sm:$0xff] %v8041_v14 }
 0x1a8   :  { %1923 = vrot.lane.b32.xlu1 %v5682_v62, %s7475_s29  ;;  %1921 = vrot.lane.b32.xlu0 %v5681_v4, %s7475_s29 }
 0x1aa   :  { %v8045_v63 = vpop.permute.xlu1 %1355  ;;  %v8047_v15 = vpop.permute.xlu0 %1353 }
 0x1ab   :  { %12200 = vst [vmem:[#allocation88_spill] sm:$0xff] %v8045_v63  ;;  %12201 = vst [vmem:[#allocation89_spill] sm:$0xff] %v8047_v15 }
 0x1ac   :  { %1929 = vrot.lane.b32.xlu1 %v5682_v62, %s7477_s9  ;;  %1927 = vrot.lane.b32.xlu0 %v5681_v4, %s7477_s9 }
 0x1ae   :  { %v8051_v39 = vpop.permute.xlu1 %1414  ;;  %v8053_v38 = vpop.permute.xlu0 %1412 }
 0x1af   :  { %12202 = vst [vmem:[#allocation90_spill] sm:$0xff] %v8051_v39  ;;  %12203 = vst [vmem:[#allocation91_spill] sm:$0xff] %v8053_v38 }
 0x1b0   :  { %1984 = vrot.lane.b32.xlu1 %v5682_v62, %s7478_s10  ;;  %1982 = vrot.lane.b32.xlu0 %v5681_v4, %s7478_s10 }
 0x1b2   :  { %v8057_v14 = vpop.permute.xlu1 %1420  ;;  %v8059_v5 = vpop.permute.xlu0 %1418 }
 0x1b3   :  { %12204 = vst [vmem:[#allocation92_spill] sm:$0xff] %v8057_v14  ;;  %12205 = vst [vmem:[#allocation93_spill] sm:$0xff] %v8059_v5  ;;  %v5689_v5 = vld [vmem:[%s12018_s0 + $0xb0] sm:$0xff] }
 0x1b4   :  { %1990 = vrot.lane.b32.xlu1 %v5682_v62, %s7479_s11  ;;  %1988 = vrot.lane.b32.xlu0 %v5681_v4, %s7479_s11 }
 0x1b6   :  { %v8063_v15 = vpop.permute.xlu1 %1426  ;;  %v8065_v63 = vpop.permute.xlu0 %1424 }
 0x1b7   :  { %12206 = vst [vmem:[#allocation94_spill] sm:$0xff] %v8063_v15  ;;  %12207 = vst [vmem:[#allocation95_spill] sm:$0xff] %v8065_v63  ;;  %v5688_v63 = vld [vmem:[%s12018_s0 + $0xa8] sm:$0xff] }
 0x1b8   :  { %1996 = vrot.lane.b32.xlu1 %v5682_v62, %s7480_s12  ;;  %1994 = vrot.lane.b32.xlu0 %v5681_v4, %s7480_s12 }
 0x1ba   :  { %v8069_v38 = vpop.permute.xlu1 %1481  ;;  %v8071_v39 = vpop.permute.xlu0 %1479 }
 0x1bb   :  { %12208 = vst [vmem:[#allocation96_spill] sm:$0xff] %v8069_v38  ;;  %12209 = vst [vmem:[#allocation97_spill] sm:$0xff] %v8071_v39 }
 0x1bc   :  { %2002 = vrot.lane.b32.xlu1 %v5682_v62, %s7481_s13  ;;  %2000 = vrot.lane.b32.xlu0 %v5681_v4, %s7481_s13 }
 0x1be   :  { %v8081_v15 = vpop.permute.xlu1 %1487  ;;  %v8083_v14 = vpop.permute.xlu0 %1485 }
 0x1bf   :  { %12210 = vst [vmem:[#allocation98_spill] sm:$0xff] %v8081_v15  ;;  %12211 = vst [vmem:[#allocation99_spill] sm:$0xff] %v8083_v14 }
 0x1c0   :  { %2061 = vrot.lane.b32.xlu1 %v5689_v5, %s7472_s24  ;;  %2059 = vrot.lane.b32.xlu0 %v5688_v63, %s7472_s24 }
 0x1c2   :  { %v8087_v39 = vpop.permute.xlu1 %1493  ;;  %v8089_v62 = vpop.permute.xlu0 %1491 }
 0x1c3   :  { %12212 = vst [vmem:[#allocation100_spill] sm:$0xff] %v8087_v39  ;;  %12213 = vst [vmem:[#allocation101_spill] sm:$0xff] %v8089_v62 }
 0x1c4   :  { %2067 = vrot.lane.b32.xlu1 %v5689_v5, %s7474_s28  ;;  %2065 = vrot.lane.b32.xlu0 %v5688_v63, %s7474_s28 }
 0x1c6   :  { %v8093_v4 = vpop.permute.xlu1 %1499  ;;  %v8095_v38 = vpop.permute.xlu0 %1497 }
 0x1c7   :  { %12214 = vst [vmem:[#allocation102_spill] sm:$0xff] %v8093_v4  ;;  %12215 = vst [vmem:[#allocation103_spill] sm:$0xff] %v8095_v38 }
 0x1c8   :  { %2073 = vrot.lane.b32.xlu1 %v5689_v5, %s7476_s30  ;;  %2071 = vrot.lane.b32.xlu0 %v5688_v63, %s7476_s30 }
 0x1ca   :  { %v8099_v14 = vpop.permute.xlu1 %1554  ;;  %v8101_v15 = vpop.permute.xlu0 %1552 }
 0x1cb   :  { %12216 = vst [vmem:[#allocation104_spill] sm:$0xff] %v8099_v14  ;;  %12217 = vst [vmem:[#allocation105_spill] sm:$0xff] %v8101_v15 }
 0x1cc   :  { %2128 = vrot.lane.b32.xlu1 %v5689_v5, %s7471_s23  ;;  %2126 = vrot.lane.b32.xlu0 %v5688_v63, %s7471_s23 }
 0x1ce   :  { %v8105_v62 = vpop.permute.xlu1 %1560  ;;  %v8107_v39 = vpop.permute.xlu0 %1558 }
 0x1cf   :  { %12218 = vst [vmem:[#allocation106_spill] sm:$0xff] %v8105_v62  ;;  %12219 = vst [vmem:[#allocation107_spill] sm:$0xff] %v8107_v39 }
 0x1d0   :  { %2134 = vrot.lane.b32.xlu1 %v5689_v5, %s7473_s27  ;;  %2132 = vrot.lane.b32.xlu0 %v5688_v63, %s7473_s27 }
 0x1d2   :  { %v8111_v38 = vpop.permute.xlu1 %1566  ;;  %v8113_v4 = vpop.permute.xlu0 %1564 }
 0x1d3   :  { %12220 = vst [vmem:[#allocation108_spill] sm:$0xff] %v8111_v38  ;;  %12221 = vst [vmem:[#allocation109_spill] sm:$0xff] %v8113_v4 }
 0x1d4   :  { %2140 = vrot.lane.b32.xlu1 %v5689_v5, %s7475_s29  ;;  %2138 = vrot.lane.b32.xlu0 %v5688_v63, %s7475_s29 }
 0x1d6   :  { %v8117_v15 = vpop.permute.xlu1 %1572  ;;  %v8119_v14 = vpop.permute.xlu0 %1570 }
 0x1d7   :  { %12222 = vst [vmem:[#allocation110_spill] sm:$0xff] %v8117_v15  ;;  %12223 = vst [vmem:[#allocation111_spill] sm:$0xff] %v8119_v14 }
 0x1d8   :  { %2146 = vrot.lane.b32.xlu1 %v5689_v5, %s7477_s9  ;;  %2144 = vrot.lane.b32.xlu0 %v5688_v63, %s7477_s9 }
 0x1da   :  { %v8123_v39 = vpop.permute.xlu1 %1629  ;;  %v8125_v62 = vpop.permute.xlu0 %1627 }
 0x1db   :  { %12224 = vst [vmem:[#allocation112_spill] sm:$0xff] %v8123_v39  ;;  %12225 = vst [vmem:[#allocation113_spill] sm:$0xff] %v8125_v62  ;;  %v8144_v62 = vld [vmem:[%s12018_s0 + $0x8] sm:$0xff] }
 0x1dc   :  { %2201 = vrot.lane.b32.xlu1 %v5689_v5, %s7478_s10  ;;  %2199 = vrot.lane.b32.xlu0 %v5688_v63, %s7478_s10 }
 0x1de   :  { %v8129_v4 = vpop.permute.xlu1 %1635  ;;  %v8131_v38 = vpop.permute.xlu0 %1633 }
 0x1df   :  { %12226 = vst [vmem:[#allocation114_spill] sm:$0xff] %v8129_v4  ;;  %12227 = vst [vmem:[#allocation115_spill] sm:$0xff] %v8131_v38  ;;  %v8149_v38 = vld [vmem:[%s12018_s0] sm:$0xff] }
 0x1e0   :  { %2207 = vrot.lane.b32.xlu1 %v5689_v5, %s7479_s11  ;;  %2205 = vrot.lane.b32.xlu0 %v5688_v63, %s7479_s11 }
 0x1e2   :  { %v8135_v14 = vpop.permute.xlu1 %1641  ;;  %v8137_v15 = vpop.permute.xlu0 %1639 }
 0x1e3   :  { %12228 = vst [vmem:[#allocation116_spill] sm:$0xff] %v8135_v14  ;;  %12229 = vst [vmem:[#allocation117_spill] sm:$0xff] %v8137_v15 }
 0x1e4   :  { %2213 = vrot.lane.b32.xlu1 %v5689_v5, %s7480_s12  ;;  %2211 = vrot.lane.b32.xlu0 %v5688_v63, %s7480_s12 }
 0x1e6   :  { %v8151_v4 = vpop.permute.xlu1 %1696  ;;  %v8153_v39 = vpop.permute.xlu0 %1694 }
 0x1e7   :  { %12230 = vst [vmem:[#allocation118_spill] sm:$0xff] %v8151_v4  ;;  %12231 = vst [vmem:[#allocation119_spill] sm:$0xff] %v8153_v39 }
 0x1e8   :  { %87 = vrot.lane.b32.xlu1 %v8144_v62, %s7472_s24  ;;  %85 = vrot.lane.b32.xlu0 %v8149_v38, %s7472_s24 }
 0x1ea   :  { %v8159_v15 = vpop.permute.xlu1 %1702  ;;  %v8161_v14 = vpop.permute.xlu0 %1700 }
 0x1eb   :  { %12232 = vst [vmem:[#allocation120_spill] sm:$0xff] %v8159_v15  ;;  %12233 = vst [vmem:[#allocation121_spill] sm:$0xff] %v8161_v14 }
 0x1ec   :  { %149 = vrot.lane.b32.xlu1 %v8144_v62, %s7471_s23  ;;  %147 = vrot.lane.b32.xlu0 %v8149_v38, %s7471_s23 }
 0x1ee   :  { %v8167_v3 = vpop.permute.xlu1 %1708  ;;  %v8169_v4 = vpop.permute.xlu0 %1706 }
 0x1ef   :  { %12234 = vst [vmem:[#allocation122_spill] sm:$0xff] %v8167_v3  ;;  %12235 = vst [vmem:[#allocation123_spill] sm:$0xff] %v8169_v4  ;;  %v8184_v3 = vld [vmem:[%s12018_s0 + $0xb1] sm:$0xff]  ;;  %v8189_v4 = vld [vmem:[%s12018_s0 + $0xa9] sm:$0xff] }
 0x1f0   :  { %155 = vrot.lane.b32.xlu1 %v8144_v62, %s7473_s27  ;;  %153 = vrot.lane.b32.xlu0 %v8149_v38, %s7473_s27 }
 0x1f2   :  { %v8175_v39 = vpop.permute.xlu1 %1714  ;;  %v8177_v15 = vpop.permute.xlu0 %1712 }
 0x1f3   :  { %12236 = vst [vmem:[#allocation124_spill] sm:$0xff] %v8175_v39  ;;  %12237 = vst [vmem:[#allocation125_spill] sm:$0xff] %v8177_v15 }
 0x1f4   :  { %2219 = vrot.lane.b32.xlu1 %v5689_v5, %s7481_s13  ;;  %2217 = vrot.lane.b32.xlu0 %v5688_v63, %s7481_s13 }
 0x1f6   :  { %v8191_v14 = vpop.permute.xlu1 %1769  ;;  %v8193_v2 = vpop.permute.xlu0 %1767 }
 0x1f7   :  { %12238 = vst [vmem:[#allocation126_spill] sm:$0xff] %v8191_v14  ;;  %12239 = vst [vmem:[#allocation127_spill] sm:$0xff] %v8193_v2 }
 0x1f8   :  { %2276 = vrot.lane.b32.xlu1 %v8184_v3, %s7472_s24  ;;  %2274 = vrot.lane.b32.xlu0 %v8189_v4, %s7472_s24 }
 0x1fa   :  { %v8199_v63 = vpop.permute.xlu1 %1775  ;;  %v8201_v5 = vpop.permute.xlu0 %1773 }
 0x1fb   :  { %12240 = vst [vmem:[#allocation128_spill] sm:$0xff] %v8199_v63  ;;  %12241 = vst [vmem:[#allocation129_spill] sm:$0xff] %v8201_v5 }
 0x1fc   :  { %93 = vrot.lane.b32.xlu1 %v8144_v62, %s7474_s28  ;;  %91 = vrot.lane.b32.xlu0 %v8149_v38, %s7474_s28 }
 0x1fe   :  { %v8207_v15 = vpop.permute.xlu1 %1781  ;;  %v8209_v14 = vpop.permute.xlu0 %1779 }
 0x1ff   :  { %12242 = vst [vmem:[#allocation130_spill] sm:$0xff] %v8207_v15  ;;  %12243 = vst [vmem:[#allocation131_spill] sm:$0xff] %v8209_v14 }
 0x200   :  { %161 = vrot.lane.b32.xlu1 %v8144_v62, %s7475_s29  ;;  %159 = vrot.lane.b32.xlu0 %v8149_v38, %s7475_s29 }
 0x202   :  { %v8215_v2 = vpop.permute.xlu1 %1787  ;;  %v8217_v63 = vpop.permute.xlu0 %1785 }
 0x203   :  { %12244 = vst [vmem:[#allocation132_spill] sm:$0xff] %v8215_v2  ;;  %12245 = vst [vmem:[#allocation133_spill] sm:$0xff] %v8217_v63 }
 0x204   :  { %2282 = vrot.lane.b32.xlu1 %v8184_v3, %s7474_s28  ;;  %2280 = vrot.lane.b32.xlu0 %v8189_v4, %s7474_s28 }
 0x206   :  { %v8223_v5 = vpop.permute.xlu1 %1844  ;;  %v8225_v15 = vpop.permute.xlu0 %1842 }
 0x207   :  { %12246 = vst [vmem:[#allocation134_spill] sm:$0xff] %v8223_v5  ;;  %12247 = vst [vmem:[#allocation135_spill] sm:$0xff] %v8225_v15 }
 0x208   :  { %99 = vrot.lane.b32.xlu1 %v8144_v62, %s7476_s30  ;;  %97 = vrot.lane.b32.xlu0 %v8149_v38, %s7476_s30 }
 0x20a   :  { %v8231_v14 = vpop.permute.xlu1 %1850  ;;  %v8233_v2 = vpop.permute.xlu0 %1848 }
 0x20b   :  { %12248 = vst [vmem:[#allocation136_spill] sm:$0xff] %v8231_v14  ;;  %12249 = vst [vmem:[#allocation137_spill] sm:$0xff] %v8233_v2 }
 0x20c   :  { %167 = vrot.lane.b32.xlu1 %v8144_v62, %s7477_s9  ;;  %165 = vrot.lane.b32.xlu0 %v8149_v38, %s7477_s9 }
 0x20e   :  { %v8239_v63 = vpop.permute.xlu1 %1856  ;;  %v8241_v5 = vpop.permute.xlu0 %1854 }
 0x20f   :  { %12250 = vst [vmem:[#allocation138_spill] sm:$0xff] %v8239_v63  ;;  %12251 = vst [vmem:[#allocation139_spill] sm:$0xff] %v8241_v5 }
 0x210   :  { %222 = vrot.lane.b32.xlu1 %v8144_v62, %s7478_s10  ;;  %220 = vrot.lane.b32.xlu0 %v8149_v38, %s7478_s10 }
 0x212   :  { %v8247_v15 = vpop.permute.xlu1 %1911  ;;  %v8249_v14 = vpop.permute.xlu0 %1909 }
 0x213   :  { %12252 = vst [vmem:[#allocation140_spill] sm:$0xff] %v8247_v15  ;;  %12253 = vst [vmem:[#allocation141_spill] sm:$0xff] %v8249_v14 }
 0x214   :  { %228 = vrot.lane.b32.xlu1 %v8144_v62, %s7479_s11  ;;  %226 = vrot.lane.b32.xlu0 %v8149_v38, %s7479_s11 }
 0x216   :  { %v8255_v2 = vpop.permute.xlu1 %1917  ;;  %v8257_v63 = vpop.permute.xlu0 %1915 }
 0x217   :  { %12254 = vst [vmem:[#allocation142_spill] sm:$0xff] %v8255_v2  ;;  %12255 = vst [vmem:[#allocation143_spill] sm:$0xff] %v8257_v63 }
 0x218   :  { %2288 = vrot.lane.b32.xlu1 %v8184_v3, %s7476_s30  ;;  %2286 = vrot.lane.b32.xlu0 %v8189_v4, %s7476_s30 }
 0x21a   :  { %v8263_v5 = vpop.permute.xlu1 %1923  ;;  %v8265_v15 = vpop.permute.xlu0 %1921 }
 0x21b   :  { %12256 = vst [vmem:[#allocation144_spill] sm:$0xff] %v8263_v5  ;;  %12257 = vst [vmem:[#allocation145_spill] sm:$0xff] %v8265_v15 }
 0x21c   :  { %2343 = vrot.lane.b32.xlu1 %v8184_v3, %s7471_s23  ;;  %2341 = vrot.lane.b32.xlu0 %v8189_v4, %s7471_s23 }
 0x21e   :  { %v8271_v14 = vpop.permute.xlu1 %1929  ;;  %v8273_v2 = vpop.permute.xlu0 %1927 }
 0x21f   :  { %12258 = vst [vmem:[#allocation146_spill] sm:$0xff] %v8271_v14  ;;  %12259 = vst [vmem:[#allocation147_spill] sm:$0xff] %v8273_v2 }
 0x220   :  { %2349 = vrot.lane.b32.xlu1 %v8184_v3, %s7473_s27  ;;  %2347 = vrot.lane.b32.xlu0 %v8189_v4, %s7473_s27 }
 0x222   :  { %v8279_v63 = vpop.permute.xlu1 %1984  ;;  %v8281_v5 = vpop.permute.xlu0 %1982 }
 0x223   :  { %12260 = vst [vmem:[#allocation148_spill] sm:$0xff] %v8279_v63  ;;  %12261 = vst [vmem:[#allocation149_spill] sm:$0xff] %v8281_v5  ;;  %v8306_v5 = vld [vmem:[%s12018_s0 + $0x9] sm:$0xff] }
 0x224   :  { %234 = vrot.lane.b32.xlu1 %v8144_v62, %s7480_s12  ;;  %232 = vrot.lane.b32.xlu0 %v8149_v38, %s7480_s12 }
 0x226   :  { %v8287_v15 = vpop.permute.xlu1 %1990  ;;  %v8289_v14 = vpop.permute.xlu0 %1988 }
 0x227   :  { %12262 = vst [vmem:[#allocation150_spill] sm:$0xff] %v8287_v15  ;;  %12263 = vst [vmem:[#allocation151_spill] sm:$0xff] %v8289_v14  ;;  %v8311_v14 = vld [vmem:[%s12018_s0 + $0x1] sm:$0xff] }
 0x228   :  { %2355 = vrot.lane.b32.xlu1 %v8184_v3, %s7475_s29  ;;  %2353 = vrot.lane.b32.xlu0 %v8189_v4, %s7475_s29 }
 0x22a   :  { %v8295_v2 = vpop.permute.xlu1 %1996  ;;  %v8297_v63 = vpop.permute.xlu0 %1994 }
 0x22b   :  { %12264 = vst [vmem:[#allocation152_spill] sm:$0xff] %v8295_v2  ;;  %12265 = vst [vmem:[#allocation153_spill] sm:$0xff] %v8297_v63 }
 0x22c   :  { %240 = vrot.lane.b32.xlu1 %v8144_v62, %s7481_s13  ;;  %238 = vrot.lane.b32.xlu0 %v8149_v38, %s7481_s13 }
 0x22e   :  { %v8313_v15 = vpop.permute.xlu1 %2002  ;;  %v8315_v2 = vpop.permute.xlu0 %2000 }
 0x22f   :  { %12266 = vst [vmem:[#allocation154_spill] sm:$0xff] %v8313_v15  ;;  %12267 = vst [vmem:[#allocation155_spill] sm:$0xff] %v8315_v2 }
 0x230   :  { %301 = vrot.lane.b32.xlu1 %v8306_v5, %s7472_s24  ;;  %299 = vrot.lane.b32.xlu0 %v8311_v14, %s7472_s24 }
 0x232   :  { %v8321_v38 = vpop.permute.xlu1 %2061  ;;  %v8323_v62 = vpop.permute.xlu0 %2059 }
 0x233   :  { %12268 = vst [vmem:[#allocation156_spill] sm:$0xff] %v8321_v38  ;;  %12269 = vst [vmem:[#allocation157_spill] sm:$0xff] %v8323_v62 }
 0x234   :  { %2361 = vrot.lane.b32.xlu1 %v8184_v3, %s7477_s9  ;;  %2359 = vrot.lane.b32.xlu0 %v8189_v4, %s7477_s9 }
 0x236   :  { %v8329_v63 = vpop.permute.xlu1 %2067  ;;  %v8331_v15 = vpop.permute.xlu0 %2065 }
 0x237   :  { %12270 = vst [vmem:[#allocation158_spill] sm:$0xff] %v8329_v63  ;;  %12271 = vst [vmem:[#allocation159_spill] sm:$0xff] %v8331_v15 }
 0x238   :  { %2416 = vrot.lane.b32.xlu1 %v8184_v3, %s7478_s10  ;;  %2414 = vrot.lane.b32.xlu0 %v8189_v4, %s7478_s10 }
 0x23a   :  { %v8337_v2 = vpop.permute.xlu1 %2073  ;;  %v8339_v38 = vpop.permute.xlu0 %2071 }
 0x23b   :  { %12272 = vst [vmem:[#allocation160_spill] sm:$0xff] %v8337_v2  ;;  %12273 = vst [vmem:[#allocation161_spill] sm:$0xff] %v8339_v38 }
 0x23c   :  { %2422 = vrot.lane.b32.xlu1 %v8184_v3, %s7479_s11  ;;  %2420 = vrot.lane.b32.xlu0 %v8189_v4, %s7479_s11 }
 0x23e   :  { %v8345_v62 = vpop.permute.xlu1 %2128  ;;  %v8347_v63 = vpop.permute.xlu0 %2126 }
 0x23f   :  { %12274 = vst [vmem:[#allocation162_spill] sm:$0xff] %v8345_v62  ;;  %12275 = vst [vmem:[#allocation163_spill] sm:$0xff] %v8347_v63 }
 0x240   :  { %307 = vrot.lane.b32.xlu1 %v8306_v5, %s7474_s28  ;;  %305 = vrot.lane.b32.xlu0 %v8311_v14, %s7474_s28 }
 0x242   :  { %v8353_v15 = vpop.permute.xlu1 %2134  ;;  %v8355_v2 = vpop.permute.xlu0 %2132 }
 0x243   :  { %12276 = vst [vmem:[#allocation164_spill] sm:$0xff] %v8353_v15  ;;  %12277 = vst [vmem:[#allocation165_spill] sm:$0xff] %v8355_v2 }
 0x244   :  { %2428 = vrot.lane.b32.xlu1 %v8184_v3, %s7480_s12  ;;  %2426 = vrot.lane.b32.xlu0 %v8189_v4, %s7480_s12 }
 0x246   :  { %v8361_v38 = vpop.permute.xlu1 %2140  ;;  %v8363_v62 = vpop.permute.xlu0 %2138 }
 0x247   :  { %12278 = vst [vmem:[#allocation166_spill] sm:$0xff] %v8361_v38  ;;  %12279 = vst [vmem:[#allocation167_spill] sm:$0xff] %v8363_v62 }
 0x248   :  { %313 = vrot.lane.b32.xlu1 %v8306_v5, %s7476_s30  ;;  %311 = vrot.lane.b32.xlu0 %v8311_v14, %s7476_s30 }
 0x24a   :  { %v8369_v63 = vpop.permute.xlu1 %2146  ;;  %v8371_v15 = vpop.permute.xlu0 %2144 }
 0x24b   :  { %12280 = vst [vmem:[#allocation168_spill] sm:$0xff] %v8369_v63  ;;  %12281 = vst [vmem:[#allocation169_spill] sm:$0xff] %v8371_v15 }
 0x24c   :  { %364 = vrot.lane.b32.xlu1 %v8306_v5, %s7471_s23  ;;  %362 = vrot.lane.b32.xlu0 %v8311_v14, %s7471_s23 }
 0x24e   :  { %v8377_v2 = vpop.permute.xlu1 %2201  ;;  %v8379_v38 = vpop.permute.xlu0 %2199 }
 0x24f   :  { %12282 = vst [vmem:[#allocation170_spill] sm:$0xff] %v8377_v2  ;;  %12283 = vst [vmem:[#allocation171_spill] sm:$0xff] %v8379_v38  ;;  %v8396_v38 = vld [vmem:[%s12018_s0 + $0xb2] sm:$0xff]  ;;  %v8401_v2 = vld [vmem:[%s12018_s0 + $0xaa] sm:$0xff] }
 0x250   :  { %370 = vrot.lane.b32.xlu1 %v8306_v5, %s7473_s27  ;;  %368 = vrot.lane.b32.xlu0 %v8311_v14, %s7473_s27 }
 0x252   :  { %v8385_v62 = vpop.permute.xlu1 %2207  ;;  %v8387_v63 = vpop.permute.xlu0 %2205 }
 0x253   :  { %12284 = vst [vmem:[#allocation172_spill] sm:$0xff] %v8385_v62  ;;  %12285 = vst [vmem:[#allocation173_spill] sm:$0xff] %v8387_v63 }
 0x254   :  { %2434 = vrot.lane.b32.xlu1 %v8184_v3, %s7481_s13  ;;  %2432 = vrot.lane.b32.xlu0 %v8189_v4, %s7481_s13 }
 0x256   :  { %v8403_v15 = vpop.permute.xlu1 %2213  ;;  %v8405_v62 = vpop.permute.xlu0 %2211 }
 0x257   :  { %12286 = vst [vmem:[#allocation174_spill] sm:$0xff] %v8403_v15  ;;  %12287 = vst [vmem:[#allocation175_spill] sm:$0xff] %v8405_v62 }
 0x258   :  { %2491 = vrot.lane.b32.xlu1 %v8396_v38, %s7472_s24  ;;  %2489 = vrot.lane.b32.xlu0 %v8401_v2, %s7472_s24 }
 0x25a   :  { %v8411_v3 = vpop.permute.xlu1 %87  ;;  %v8413_v4 = vpop.permute.xlu0 %85 }
 0x25b   :  { %12288 = vst [vmem:[#allocation176_spill] sm:$0xff] %v8411_v3  ;;  %12289 = vst [vmem:[#allocation177_spill] sm:$0xff] %v8413_v4 }
 0x25c   :  { %376 = vrot.lane.b32.xlu1 %v8306_v5, %s7475_s29  ;;  %374 = vrot.lane.b32.xlu0 %v8311_v14, %s7475_s29 }
 0x25e   :  { %v8419_v63 = vpop.permute.xlu1 %149  ;;  %v8421_v15 = vpop.permute.xlu0 %147 }
 0x25f   :  { %12290 = vst [vmem:[#allocation178_spill] sm:$0xff] %v8419_v63  ;;  %12291 = vst [vmem:[#allocation179_spill] sm:$0xff] %v8421_v15 }
 0x260   :  { %2497 = vrot.lane.b32.xlu1 %v8396_v38, %s7474_s28  ;;  %2495 = vrot.lane.b32.xlu0 %v8401_v2, %s7474_s28 }
 0x262   :  { %v8427_v62 = vpop.permute.xlu1 %155  ;;  %v8429_v3 = vpop.permute.xlu0 %153 }
 0x263   :  { %12292 = vst [vmem:[#allocation180_spill] sm:$0xff] %v8427_v62  ;;  %12293 = vst [vmem:[#allocation181_spill] sm:$0xff] %v8429_v3 }
 0x264   :  { %382 = vrot.lane.b32.xlu1 %v8306_v5, %s7477_s9  ;;  %380 = vrot.lane.b32.xlu0 %v8311_v14, %s7477_s9 }
 0x266   :  { %v8435_v4 = vpop.permute.xlu1 %2219  ;;  %v8437_v63 = vpop.permute.xlu0 %2217 }
 0x267   :  { %12294 = vst [vmem:[#allocation182_spill] sm:$0xff] %v8435_v4  ;;  %12295 = vst [vmem:[#allocation183_spill] sm:$0xff] %v8437_v63 }
 0x268   :  { %437 = vrot.lane.b32.xlu1 %v8306_v5, %s7478_s10  ;;  %435 = vrot.lane.b32.xlu0 %v8311_v14, %s7478_s10 }
 0x26a   :  { %v8443_v15 = vpop.permute.xlu1 %2276  ;;  %v8445_v62 = vpop.permute.xlu0 %2274 }
 0x26b   :  { %12296 = vst [vmem:[#allocation184_spill] sm:$0xff] %v8443_v15  ;;  %12297 = vst [vmem:[#allocation185_spill] sm:$0xff] %v8445_v62 }
 0x26c   :  { %443 = vrot.lane.b32.xlu1 %v8306_v5, %s7479_s11  ;;  %441 = vrot.lane.b32.xlu0 %v8311_v14, %s7479_s11 }
 0x26e   :  { %v8451_v3 = vpop.permute.xlu1 %93  ;;  %v8453_v4 = vpop.permute.xlu0 %91 }
 0x26f   :  { %12298 = vst [vmem:[#allocation186_spill] sm:$0xff] %v8451_v3  ;;  %12299 = vst [vmem:[#allocation187_spill] sm:$0xff] %v8453_v4 }
 0x270   :  { %2503 = vrot.lane.b32.xlu1 %v8396_v38, %s7476_s30  ;;  %2501 = vrot.lane.b32.xlu0 %v8401_v2, %s7476_s30 }
 0x272   :  { %v8459_v63 = vpop.permute.xlu1 %161  ;;  %v8461_v15 = vpop.permute.xlu0 %159 }
 0x273   :  { %12300 = vst [vmem:[#allocation188_spill] sm:$0xff] %v8459_v63  ;;  %12301 = vst [vmem:[#allocation189_spill] sm:$0xff] %v8461_v15 }
 0x274   :  { %2558 = vrot.lane.b32.xlu1 %v8396_v38, %s7471_s23  ;;  %2556 = vrot.lane.b32.xlu0 %v8401_v2, %s7471_s23 }
 0x276   :  { %v8467_v62 = vpop.permute.xlu1 %2282  ;;  %v8469_v3 = vpop.permute.xlu0 %2280 }
 0x277   :  { %12302 = vst [vmem:[#allocation190_spill] sm:$0xff] %v8467_v62  ;;  %12303 = vst [vmem:[#allocation191_spill] sm:$0xff] %v8469_v3 }
 0x278   :  { %2564 = vrot.lane.b32.xlu1 %v8396_v38, %s7473_s27  ;;  %2562 = vrot.lane.b32.xlu0 %v8401_v2, %s7473_s27 }
 0x27a   :  { %v8475_v4 = vpop.permute.xlu1 %99  ;;  %v8477_v63 = vpop.permute.xlu0 %97 }
 0x27b   :  { %12304 = vst [vmem:[#allocation192_spill] sm:$0xff] %v8475_v4  ;;  %12305 = vst [vmem:[#allocation193_spill] sm:$0xff] %v8477_v63 }
 0x27c   :  { %449 = vrot.lane.b32.xlu1 %v8306_v5, %s7480_s12  ;;  %447 = vrot.lane.b32.xlu0 %v8311_v14, %s7480_s12 }
 0x27e   :  { %v8483_v15 = vpop.permute.xlu1 %167  ;;  %v8485_v62 = vpop.permute.xlu0 %165 }
 0x27f   :  { %12306 = vst [vmem:[#allocation194_spill] sm:$0xff] %v8483_v15  ;;  %12307 = vst [vmem:[#allocation195_spill] sm:$0xff] %v8485_v62  ;;  %v8502_v62 = vld [vmem:[%s12018_s0 + $0xa] sm:$0xff]  ;;  %v8507_v15 = vld [vmem:[%s12018_s0 + $0x2] sm:$0xff] }
 0x280   :  { %2570 = vrot.lane.b32.xlu1 %v8396_v38, %s7475_s29  ;;  %2568 = vrot.lane.b32.xlu0 %v8401_v2, %s7475_s29 }
 0x282   :  { %v8491_v3 = vpop.permute.xlu1 %222  ;;  %v8493_v4 = vpop.permute.xlu0 %220 }
 0x283   :  { %12308 = vst [vmem:[#allocation196_spill] sm:$0xff] %v8491_v3  ;;  %12309 = vst [vmem:[#allocation197_spill] sm:$0xff] %v8493_v4 }
 0x284   :  { %455 = vrot.lane.b32.xlu1 %v8306_v5, %s7481_s13  ;;  %453 = vrot.lane.b32.xlu0 %v8311_v14, %s7481_s13 }
 0x286   :  { %v8509_v63 = vpop.permute.xlu1 %228  ;;  %v8511_v3 = vpop.permute.xlu0 %226 }
 0x287   :  { %12310 = vst [vmem:[#allocation198_spill] sm:$0xff] %v8509_v63  ;;  %12311 = vst [vmem:[#allocation199_spill] sm:$0xff] %v8511_v3 }
 0x288   :  { %516 = vrot.lane.b32.xlu1 %v8502_v62, %s7472_s24  ;;  %514 = vrot.lane.b32.xlu0 %v8507_v15, %s7472_s24 }
 0x28a   :  { %v8517_v14 = vpop.permute.xlu1 %2288  ;;  %v8519_v5 = vpop.permute.xlu0 %2286 }
 0x28b   :  { %12312 = vst [vmem:[#allocation200_spill] sm:$0xff] %v8517_v14  ;;  %12313 = vst [vmem:[#allocation201_spill] sm:$0xff] %v8519_v5 }
 0x28c   :  { %2576 = vrot.lane.b32.xlu1 %v8396_v38, %s7477_s9  ;;  %2574 = vrot.lane.b32.xlu0 %v8401_v2, %s7477_s9 }
 0x28e   :  { %v8525_v4 = vpop.permute.xlu1 %2343  ;;  %v8527_v63 = vpop.permute.xlu0 %2341 }
 0x28f   :  { %12314 = vst [vmem:[#allocation202_spill] sm:$0xff] %v8525_v4  ;;  %12315 = vst [vmem:[#allocation203_spill] sm:$0xff] %v8527_v63 }
 0x290   :  { %2631 = vrot.lane.b32.xlu1 %v8396_v38, %s7478_s10  ;;  %2629 = vrot.lane.b32.xlu0 %v8401_v2, %s7478_s10 }
 0x292   :  { %v8533_v3 = vpop.permute.xlu1 %2349  ;;  %v8535_v14 = vpop.permute.xlu0 %2347 }
 0x293   :  { %12316 = vst [vmem:[#allocation204_spill] sm:$0xff] %v8533_v3  ;;  %12317 = vst [vmem:[#allocation205_spill] sm:$0xff] %v8535_v14 }
 0x294   :  { %2637 = vrot.lane.b32.xlu1 %v8396_v38, %s7479_s11  ;;  %2635 = vrot.lane.b32.xlu0 %v8401_v2, %s7479_s11 }
 0x296   :  { %v8541_v5 = vpop.permute.xlu1 %234  ;;  %v8543_v4 = vpop.permute.xlu0 %232 }
 0x297   :  { %12318 = vst [vmem:[#allocation206_spill] sm:$0xff] %v8541_v5  ;;  %12319 = vst [vmem:[#allocation207_spill] sm:$0xff] %v8543_v4 }
 0x298   :  { %522 = vrot.lane.b32.xlu1 %v8502_v62, %s7474_s28  ;;  %520 = vrot.lane.b32.xlu0 %v8507_v15, %s7474_s28 }
 0x29a   :  { %v8549_v63 = vpop.permute.xlu1 %2355  ;;  %v8551_v3 = vpop.permute.xlu0 %2353 }
 0x29b   :  { %12320 = vst [vmem:[#allocation208_spill] sm:$0xff] %v8549_v63  ;;  %12321 = vst [vmem:[#allocation209_spill] sm:$0xff] %v8551_v3 }
 0x29c   :  { %2643 = vrot.lane.b32.xlu1 %v8396_v38, %s7480_s12  ;;  %2641 = vrot.lane.b32.xlu0 %v8401_v2, %s7480_s12 }
 0x29e   :  { %v8557_v14 = vpop.permute.xlu1 %240  ;;  %v8559_v5 = vpop.permute.xlu0 %238 }
 0x29f   :  { %12322 = vst [vmem:[#allocation210_spill] sm:$0xff] %v8557_v14  ;;  %12323 = vst [vmem:[#allocation211_spill] sm:$0xff] %v8559_v5 }
 0x2a0   :  { %528 = vrot.lane.b32.xlu1 %v8502_v62, %s7476_s30  ;;  %526 = vrot.lane.b32.xlu0 %v8507_v15, %s7476_s30 }
 0x2a2   :  { %v8565_v4 = vpop.permute.xlu1 %301  ;;  %v8567_v63 = vpop.permute.xlu0 %299 }
 0x2a3   :  { %12324 = vst [vmem:[#allocation212_spill] sm:$0xff] %v8565_v4  ;;  %12325 = vst [vmem:[#allocation213_spill] sm:$0xff] %v8567_v63 }
 0x2a4   :  { %579 = vrot.lane.b32.xlu1 %v8502_v62, %s7471_s23  ;;  %577 = vrot.lane.b32.xlu0 %v8507_v15, %s7471_s23 }
 0x2a6   :  { %v8573_v3 = vpop.permute.xlu1 %2361  ;;  %v8575_v14 = vpop.permute.xlu0 %2359 }
 0x2a7   :  { %12326 = vst [vmem:[#allocation214_spill] sm:$0xff] %v8573_v3  ;;  %12327 = vst [vmem:[#allocation215_spill] sm:$0xff] %v8575_v14 }
 0x2a8   :  { %585 = vrot.lane.b32.xlu1 %v8502_v62, %s7473_s27  ;;  %583 = vrot.lane.b32.xlu0 %v8507_v15, %s7473_s27 }
 0x2aa   :  { %v8581_v5 = vpop.permute.xlu1 %2416  ;;  %v8583_v4 = vpop.permute.xlu0 %2414 }
 0x2ab   :  { %12328 = vst [vmem:[#allocation216_spill] sm:$0xff] %v8581_v5  ;;  %12329 = vst [vmem:[#allocation217_spill] sm:$0xff] %v8583_v4 }
 0x2ac   :  { %2649 = vrot.lane.b32.xlu1 %v8396_v38, %s7481_s13  ;;  %2647 = vrot.lane.b32.xlu0 %v8401_v2, %s7481_s13 }
 0x2ae   :  { %v8589_v63 = vpop.permute.xlu1 %2422  ;;  %v8591_v3 = vpop.permute.xlu0 %2420 }
 0x2af   :  { %12330 = vst [vmem:[#allocation218_spill] sm:$0xff] %v8589_v63  ;;  %12331 = vst [vmem:[#allocation219_spill] sm:$0xff] %v8591_v3 }
 0x2b0   :  { %591 = vrot.lane.b32.xlu1 %v8502_v62, %s7475_s29  ;;  %589 = vrot.lane.b32.xlu0 %v8507_v15, %s7475_s29 }
 0x2b2   :  { %v8597_v14 = vpop.permute.xlu1 %307  ;;  %v8599_v5 = vpop.permute.xlu0 %305 }
 0x2b3   :  { %12332 = vst [vmem:[#allocation220_spill] sm:$0xff] %v8597_v14  ;;  %12333 = vst [vmem:[#allocation221_spill] sm:$0xff] %v8599_v5 }
 0x2b4   :  { %597 = vrot.lane.b32.xlu1 %v8502_v62, %s7477_s9  ;;  %595 = vrot.lane.b32.xlu0 %v8507_v15, %s7477_s9 }
 0x2b6   :  { %v8605_v2 = vpop.permute.xlu1 %2428  ;;  %v8607_v38 = vpop.permute.xlu0 %2426 }
 0x2b7   :  { %12334 = vst [vmem:[#allocation222_spill] sm:$0xff] %v8605_v2  ;;  %12335 = vst [vmem:[#allocation223_spill] sm:$0xff] %v8607_v38 }
 0x2b8   :  { %652 = vrot.lane.b32.xlu1 %v8502_v62, %s7478_s10  ;;  %650 = vrot.lane.b32.xlu0 %v8507_v15, %s7478_s10 }
 0x2ba   :  { %v8613_v4 = vpop.permute.xlu1 %313  ;;  %v8615_v14 = vpop.permute.xlu0 %311 }
 0x2bb   :  { %12336 = vst [vmem:[#allocation224_spill] sm:$0xff] %v8613_v4  ;;  %12337 = vst [vmem:[#allocation225_spill] sm:$0xff] %v8615_v14 }
 0x2bc   :  { %658 = vrot.lane.b32.xlu1 %v8502_v62, %s7479_s11  ;;  %656 = vrot.lane.b32.xlu0 %v8507_v15, %s7479_s11 }
 0x2be   :  { %v8621_v5 = vpop.permute.xlu1 %364  ;;  %v8623_v2 = vpop.permute.xlu0 %362 }
 0x2bf   :  { %12338 = vst [vmem:[#allocation226_spill] sm:$0xff] %v8621_v5  ;;  %12339 = vst [vmem:[#allocation227_spill] sm:$0xff] %v8623_v2  ;;  %v5645_v2 = vld [vmem:[%s12018_s0 + $0x20] sm:$0xff]  ;;  %v5644_v5 = vld [vmem:[%s12018_s0 + $0x18] sm:$0xff] }
 0x2c0   :  { %664 = vrot.lane.b32.xlu1 %v8502_v62, %s7480_s12  ;;  %662 = vrot.lane.b32.xlu0 %v8507_v15, %s7480_s12 }
 0x2c2   :  { %v8629_v38 = vpop.permute.xlu1 %370  ;;  %v8631_v4 = vpop.permute.xlu0 %368 }
 0x2c3   :  { %12340 = vst [vmem:[#allocation228_spill] sm:$0xff] %v8629_v38  ;;  %12341 = vst [vmem:[#allocation229_spill] sm:$0xff] %v8631_v4 }
 0x2c4   :  { %670 = vrot.lane.b32.xlu1 %v8502_v62, %s7481_s13  ;;  %668 = vrot.lane.b32.xlu0 %v8507_v15, %s7481_s13 }
 0x2c6   :  { %v8643_v14 = vpop.permute.xlu1 %2434  ;;  %v8645_v3 = vpop.permute.xlu0 %2432 }
 0x2c7   :  { %12342 = vst [vmem:[#allocation230_spill] sm:$0xff] %v8643_v14  ;;  %12343 = vst [vmem:[#allocation231_spill] sm:$0xff] %v8645_v3 }
 0x2c8   :  { %733 = vrot.lane.b32.xlu1 %v5645_v2, %s7472_s24  ;;  %731 = vrot.lane.b32.xlu0 %v5644_v5, %s7472_s24 }
 0x2ca   :  { %v8649_v62 = vpop.permute.xlu1 %2491  ;;  %v8651_v4 = vpop.permute.xlu0 %2489 }
 0x2cb   :  { %12344 = vst [vmem:[#allocation232_spill] sm:$0xff] %v8649_v62  ;;  %12345 = vst [vmem:[#allocation233_spill] sm:$0xff] %v8651_v4 }
 0x2cc   :  { %739 = vrot.lane.b32.xlu1 %v5645_v2, %s7474_s28  ;;  %737 = vrot.lane.b32.xlu0 %v5644_v5, %s7474_s28 }
 0x2ce   :  { %v8655_v15 = vpop.permute.xlu1 %376  ;;  %v8657_v38 = vpop.permute.xlu0 %374 }
 0x2cf   :  { %12346 = vst [vmem:[#allocation234_spill] sm:$0xff] %v8655_v15  ;;  %12347 = vst [vmem:[#allocation235_spill] sm:$0xff] %v8657_v38 }
 0x2d0   :  { %745 = vrot.lane.b32.xlu1 %v5645_v2, %s7476_s30  ;;  %743 = vrot.lane.b32.xlu0 %v5644_v5, %s7476_s30 }
 0x2d2   :  { %v8661_v3 = vpop.permute.xlu1 %2497  ;;  %v8663_v14 = vpop.permute.xlu0 %2495 }
 0x2d3   :  { %12348 = vst [vmem:[#allocation236_spill] sm:$0xff] %v8661_v3  ;;  %12349 = vst [vmem:[#allocation237_spill] sm:$0xff] %v8663_v14 }
 0x2d4   :  { %796 = vrot.lane.b32.xlu1 %v5645_v2, %s7471_s23  ;;  %794 = vrot.lane.b32.xlu0 %v5644_v5, %s7471_s23 }
 0x2d6   :  { %v8667_v4 = vpop.permute.xlu1 %382  ;;  %v8669_v62 = vpop.permute.xlu0 %380 }
 0x2d7   :  { %12350 = vst [vmem:[#allocation238_spill] sm:$0xff] %v8667_v4  ;;  %12351 = vst [vmem:[#allocation239_spill] sm:$0xff] %v8669_v62 }
 0x2d8   :  { %802 = vrot.lane.b32.xlu1 %v5645_v2, %s7473_s27  ;;  %800 = vrot.lane.b32.xlu0 %v5644_v5, %s7473_s27 }
 0x2da   :  { %v8673_v38 = vpop.permute.xlu1 %437  ;;  %v8675_v15 = vpop.permute.xlu0 %435 }
 0x2db   :  { %12352 = vst [vmem:[#allocation240_spill] sm:$0xff] %v8673_v38  ;;  %12353 = vst [vmem:[#allocation241_spill] sm:$0xff] %v8675_v15 }
 0x2dc   :  { %808 = vrot.lane.b32.xlu1 %v5645_v2, %s7475_s29  ;;  %806 = vrot.lane.b32.xlu0 %v5644_v5, %s7475_s29 }
 0x2de   :  { %v8679_v14 = vpop.permute.xlu1 %443  ;;  %v8681_v3 = vpop.permute.xlu0 %441 }
 0x2df   :  { %12354 = vst [vmem:[#allocation242_spill] sm:$0xff] %v8679_v14  ;;  %12355 = vst [vmem:[#allocation243_spill] sm:$0xff] %v8681_v3 }
 0x2e0   :  { %814 = vrot.lane.b32.xlu1 %v5645_v2, %s7477_s9  ;;  %812 = vrot.lane.b32.xlu0 %v5644_v5, %s7477_s9 }
 0x2e2   :  { %v8685_v62 = vpop.permute.xlu1 %2503  ;;  %v8687_v4 = vpop.permute.xlu0 %2501 }
 0x2e3   :  { %12356 = vst [vmem:[#allocation244_spill] sm:$0xff] %v8685_v62  ;;  %12357 = vst [vmem:[#allocation245_spill] sm:$0xff] %v8687_v4 }
 0x2e4   :  { %869 = vrot.lane.b32.xlu1 %v5645_v2, %s7478_s10  ;;  %867 = vrot.lane.b32.xlu0 %v5644_v5, %s7478_s10 }
 0x2e6   :  { %v8691_v15 = vpop.permute.xlu1 %2558  ;;  %v8693_v38 = vpop.permute.xlu0 %2556 }
 0x2e7   :  { %12358 = vst [vmem:[#allocation246_spill] sm:$0xff] %v8691_v15  ;;  %12359 = vst [vmem:[#allocation247_spill] sm:$0xff] %v8693_v38  ;;  %v5652_v38 = vld [vmem:[%s12018_s0 + $0x21] sm:$0xff] }
 0x2e8   :  { %875 = vrot.lane.b32.xlu1 %v5645_v2, %s7479_s11  ;;  %873 = vrot.lane.b32.xlu0 %v5644_v5, %s7479_s11 }
 0x2ea   :  { %v8697_v3 = vpop.permute.xlu1 %2564  ;;  %v8699_v14 = vpop.permute.xlu0 %2562 }
 0x2eb   :  { %12360 = vst [vmem:[#allocation248_spill] sm:$0xff] %v8697_v3  ;;  %12361 = vst [vmem:[#allocation249_spill] sm:$0xff] %v8699_v14  ;;  %v5651_v14 = vld [vmem:[%s12018_s0 + $0x19] sm:$0xff] }
 0x2ec   :  { %881 = vrot.lane.b32.xlu1 %v5645_v2, %s7480_s12  ;;  %879 = vrot.lane.b32.xlu0 %v5644_v5, %s7480_s12 }
 0x2ee   :  { %v8703_v4 = vpop.permute.xlu1 %449  ;;  %v8705_v62 = vpop.permute.xlu0 %447 }
 0x2ef   :  { %12362 = vst [vmem:[#allocation250_spill] sm:$0xff] %v8703_v4  ;;  %12363 = vst [vmem:[#allocation251_spill] sm:$0xff] %v8705_v62 }
 0x2f0   :  { %887 = vrot.lane.b32.xlu1 %v5645_v2, %s7481_s13  ;;  %885 = vrot.lane.b32.xlu0 %v5644_v5, %s7481_s13 }
 0x2f2   :  { %v8715_v15 = vpop.permute.xlu1 %2570  ;;  %v8717_v3 = vpop.permute.xlu0 %2568 }
 0x2f3   :  { %12364 = vst [vmem:[#allocation252_spill] sm:$0xff] %v8715_v15  ;;  %12365 = vst [vmem:[#allocation253_spill] sm:$0xff] %v8717_v3 }
 0x2f4   :  { %948 = vrot.lane.b32.xlu1 %v5652_v38, %s7472_s24  ;;  %946 = vrot.lane.b32.xlu0 %v5651_v14, %s7472_s24 }
 0x2f6   :  { %v8721_v62 = vpop.permute.xlu1 %455  ;;  %v8723_v2 = vpop.permute.xlu0 %453 }
 0x2f7   :  { %12366 = vst [vmem:[#allocation254_spill] sm:$0xff] %v8721_v62  ;;  %12367 = vst [vmem:[#allocation255_spill] sm:$0xff] %v8723_v2 }
 0x2f8   :  { %954 = vrot.lane.b32.xlu1 %v5652_v38, %s7474_s28  ;;  %952 = vrot.lane.b32.xlu0 %v5651_v14, %s7474_s28 }
 0x2fa   :  { %v8727_v5 = vpop.permute.xlu1 %516  ;;  %v8729_v4 = vpop.permute.xlu0 %514 }
 0x2fb   :  { %12368 = vst [vmem:[#allocation256_spill] sm:$0xff] %v8727_v5  ;;  %12369 = vst [vmem:[#allocation257_spill] sm:$0xff] %v8729_v4 }
 0x2fc   :  { %960 = vrot.lane.b32.xlu1 %v5652_v38, %s7476_s30  ;;  %958 = vrot.lane.b32.xlu0 %v5651_v14, %s7476_s30 }
 0x2fe   :  { %v8733_v3 = vpop.permute.xlu1 %2576  ;;  %v8735_v15 = vpop.permute.xlu0 %2574 }
 0x2ff   :  { %12370 = vst [vmem:[#allocation258_spill] sm:$0xff] %v8733_v3  ;;  %12371 = vst [vmem:[#allocation259_spill] sm:$0xff] %v8735_v15 }
 0x300   :  { %1011 = vrot.lane.b32.xlu1 %v5652_v38, %s7471_s23  ;;  %1009 = vrot.lane.b32.xlu0 %v5651_v14, %s7471_s23 }
 0x302   :  { %v8739_v2 = vpop.permute.xlu1 %2631  ;;  %v8741_v62 = vpop.permute.xlu0 %2629 }
 0x303   :  { %12372 = vst [vmem:[#allocation260_spill] sm:$0xff] %v8739_v2  ;;  %12373 = vst [vmem:[#allocation261_spill] sm:$0xff] %v8741_v62 }
 0x304   :  { %1017 = vrot.lane.b32.xlu1 %v5652_v38, %s7473_s27  ;;  %1015 = vrot.lane.b32.xlu0 %v5651_v14, %s7473_s27 }
 0x306   :  { %v8745_v4 = vpop.permute.xlu1 %2637  ;;  %v8747_v5 = vpop.permute.xlu0 %2635 }
 0x307   :  { %12374 = vst [vmem:[#allocation262_spill] sm:$0xff] %v8745_v4  ;;  %12375 = vst [vmem:[#allocation263_spill] sm:$0xff] %v8747_v5 }
 0x308   :  { %1023 = vrot.lane.b32.xlu1 %v5652_v38, %s7475_s29  ;;  %1021 = vrot.lane.b32.xlu0 %v5651_v14, %s7475_s29 }
 0x30a   :  { %v8751_v15 = vpop.permute.xlu1 %522  ;;  %v8753_v3 = vpop.permute.xlu0 %520 }
 0x30b   :  { %12376 = vst [vmem:[#allocation264_spill] sm:$0xff] %v8751_v15  ;;  %12377 = vst [vmem:[#allocation265_spill] sm:$0xff] %v8753_v3 }
 0x30c   :  { %1029 = vrot.lane.b32.xlu1 %v5652_v38, %s7477_s9  ;;  %1027 = vrot.lane.b32.xlu0 %v5651_v14, %s7477_s9 }
 0x30e   :  { %v8757_v62 = vpop.permute.xlu1 %2643  ;;  %v8759_v2 = vpop.permute.xlu0 %2641 }
 0x30f   :  { %12378 = vst [vmem:[#allocation266_spill] sm:$0xff] %v8757_v62  ;;  %12379 = vst [vmem:[#allocation267_spill] sm:$0xff] %v8759_v2 }
 0x310   :  { %1084 = vrot.lane.b32.xlu1 %v5652_v38, %s7478_s10  ;;  %1082 = vrot.lane.b32.xlu0 %v5651_v14, %s7478_s10 }
 0x312   :  { %v8763_v5 = vpop.permute.xlu1 %528  ;;  %v8765_v4 = vpop.permute.xlu0 %526 }
 0x313   :  { %12380 = vst [vmem:[#allocation268_spill] sm:$0xff] %v8763_v5  ;;  %12381 = vst [vmem:[#allocation269_spill] sm:$0xff] %v8765_v4  ;;  %v5659_v4 = vld [vmem:[%s12018_s0 + $0x22] sm:$0xff] }
 0x314   :  { %1090 = vrot.lane.b32.xlu1 %v5652_v38, %s7479_s11  ;;  %1088 = vrot.lane.b32.xlu0 %v5651_v14, %s7479_s11 }
 0x316   :  { %v8769_v3 = vpop.permute.xlu1 %579  ;;  %v8771_v15 = vpop.permute.xlu0 %577 }
 0x317   :  { %12382 = vst [vmem:[#allocation270_spill] sm:$0xff] %v8769_v3  ;;  %12383 = vst [vmem:[#allocation271_spill] sm:$0xff] %v8771_v15  ;;  %v5658_v15 = vld [vmem:[%s12018_s0 + $0x1a] sm:$0xff] }
 0x318   :  { %1096 = vrot.lane.b32.xlu1 %v5652_v38, %s7480_s12  ;;  %1094 = vrot.lane.b32.xlu0 %v5651_v14, %s7480_s12 }
 0x31a   :  { %v8775_v2 = vpop.permute.xlu1 %585  ;;  %v8777_v62 = vpop.permute.xlu0 %583 }
 0x31b   :  { %12384 = vst [vmem:[#allocation272_spill] sm:$0xff] %v8775_v2  ;;  %12385 = vst [vmem:[#allocation273_spill] sm:$0xff] %v8777_v62 }
 0x31c   :  { %1102 = vrot.lane.b32.xlu1 %v5652_v38, %s7481_s13  ;;  %1100 = vrot.lane.b32.xlu0 %v5651_v14, %s7481_s13 }
 0x31e   :  { %v8787_v3 = vpop.permute.xlu1 %2649  ;;  %v8789_v5 = vpop.permute.xlu0 %2647 }
 0x31f   :  { %12386 = vst [vmem:[#allocation274_spill] sm:$0xff] %v8787_v3  ;;  %12387 = vst [vmem:[#allocation275_spill] sm:$0xff] %v8789_v5 }
 0x320   :  { %1163 = vrot.lane.b32.xlu1 %v5659_v4, %s7472_s24  ;;  %1161 = vrot.lane.b32.xlu0 %v5658_v15, %s7472_s24 }
 0x322   :  { %v8793_v62 = vpop.permute.xlu1 %591  ;;  %v8795_v38 = vpop.permute.xlu0 %589 }
 0x323   :  { %12388 = vst [vmem:[#allocation276_spill] sm:$0xff] %v8793_v62  ;;  %12389 = vst [vmem:[#allocation277_spill] sm:$0xff] %v8795_v38 }
 0x324   :  { %1169 = vrot.lane.b32.xlu1 %v5659_v4, %s7474_s28  ;;  %1167 = vrot.lane.b32.xlu0 %v5658_v15, %s7474_s28 }
 0x326   :  { %v8799_v14 = vpop.permute.xlu1 %597  ;;  %v8801_v2 = vpop.permute.xlu0 %595 }
 0x327   :  { %12390 = vst [vmem:[#allocation278_spill] sm:$0xff] %v8799_v14  ;;  %12391 = vst [vmem:[#allocation279_spill] sm:$0xff] %v8801_v2 }
 0x328   :  { %1175 = vrot.lane.b32.xlu1 %v5659_v4, %s7476_s30  ;;  %1173 = vrot.lane.b32.xlu0 %v5658_v15, %s7476_s30 }
 0x32a   :  { %v8805_v5 = vpop.permute.xlu1 %652  ;;  %v8807_v3 = vpop.permute.xlu0 %650 }
 0x32b   :  { %12392 = vst [vmem:[#allocation280_spill] sm:$0xff] %v8805_v5  ;;  %12393 = vst [vmem:[#allocation281_spill] sm:$0xff] %v8807_v3 }
 0x32c   :  { %1226 = vrot.lane.b32.xlu1 %v5659_v4, %s7471_s23  ;;  %1224 = vrot.lane.b32.xlu0 %v5658_v15, %s7471_s23 }
 0x32e   :  { %v8811_v38 = vpop.permute.xlu1 %658  ;;  %v8813_v62 = vpop.permute.xlu0 %656 }
 0x32f   :  { %12394 = vst [vmem:[#allocation282_spill] sm:$0xff] %v8811_v38  ;;  %12395 = vst [vmem:[#allocation283_spill] sm:$0xff] %v8813_v62 }
 0x330   :  { %1232 = vrot.lane.b32.xlu1 %v5659_v4, %s7473_s27  ;;  %1230 = vrot.lane.b32.xlu0 %v5658_v15, %s7473_s27 }
 0x332   :  { %v8817_v2 = vpop.permute.xlu1 %664  ;;  %v8819_v14 = vpop.permute.xlu0 %662 }
 0x333   :  { %12396 = vst [vmem:[#allocation284_spill] sm:$0xff] %v8817_v2  ;;  %12397 = vst [vmem:[#allocation285_spill] sm:$0xff] %v8819_v14 }
 0x334   :  { %1238 = vrot.lane.b32.xlu1 %v5659_v4, %s7475_s29  ;;  %1236 = vrot.lane.b32.xlu0 %v5658_v15, %s7475_s29 }
 0x336   :  { %v8823_v3 = vpop.permute.xlu1 %670  ;;  %v8825_v5 = vpop.permute.xlu0 %668 }
 0x337   :  { %12398 = vst [vmem:[#allocation286_spill] sm:$0xff] %v8823_v3  ;;  %12399 = vst [vmem:[#allocation287_spill] sm:$0xff] %v8825_v5 }
 0x338   :  { %1244 = vrot.lane.b32.xlu1 %v5659_v4, %s7477_s9  ;;  %1242 = vrot.lane.b32.xlu0 %v5658_v15, %s7477_s9 }
 0x33a   :  { %v8829_v62 = vpop.permute.xlu1 %733  ;;  %v8831_v38 = vpop.permute.xlu0 %731 }
 0x33b   :  { %12400 = vst [vmem:[#allocation288_spill] sm:$0xff] %v8829_v62  ;;  %12401 = vst [vmem:[#allocation289_spill] sm:$0xff] %v8831_v38 }
 0x33c   :  { %1299 = vrot.lane.b32.xlu1 %v5659_v4, %s7478_s10  ;;  %1297 = vrot.lane.b32.xlu0 %v5658_v15, %s7478_s10 }
 0x33e   :  { %v8835_v14 = vpop.permute.xlu1 %739  ;;  %v8837_v2 = vpop.permute.xlu0 %737 }
 0x33f   :  { %12402 = vst [vmem:[#allocation290_spill] sm:$0xff] %v8835_v14  ;;  %12403 = vst [vmem:[#allocation291_spill] sm:$0xff] %v8837_v2  ;;  %v5666_v2 = vld [vmem:[%s12018_s0 + $0x38] sm:$0xff] }
 0x340   :  { %1305 = vrot.lane.b32.xlu1 %v5659_v4, %s7479_s11  ;;  %1303 = vrot.lane.b32.xlu0 %v5658_v15, %s7479_s11 }
 0x342   :  { %v8841_v5 = vpop.permute.xlu1 %745  ;;  %v8843_v3 = vpop.permute.xlu0 %743 }
 0x343   :  { %12404 = vst [vmem:[#allocation292_spill] sm:$0xff] %v8841_v5  ;;  %12405 = vst [vmem:[#allocation293_spill] sm:$0xff] %v8843_v3  ;;  %v5665_v3 = vld [vmem:[%s12018_s0 + $0x30] sm:$0xff] }
 0x344   :  { %1311 = vrot.lane.b32.xlu1 %v5659_v4, %s7480_s12  ;;  %1309 = vrot.lane.b32.xlu0 %v5658_v15, %s7480_s12 }
 0x346   :  { %v8847_v38 = vpop.permute.xlu1 %796  ;;  %v8849_v62 = vpop.permute.xlu0 %794 }
 0x347   :  { %12406 = vst [vmem:[#allocation294_spill] sm:$0xff] %v8847_v38  ;;  %12407 = vst [vmem:[#allocation295_spill] sm:$0xff] %v8849_v62 }
 0x348   :  { %1317 = vrot.lane.b32.xlu1 %v5659_v4, %s7481_s13  ;;  %1315 = vrot.lane.b32.xlu0 %v5658_v15, %s7481_s13 }
 0x34a   :  { %v8859_v5 = vpop.permute.xlu1 %802  ;;  %v8861_v14 = vpop.permute.xlu0 %800 }
 0x34b   :  { %12408 = vst [vmem:[#allocation296_spill] sm:$0xff] %v8859_v5  ;;  %12409 = vst [vmem:[#allocation297_spill] sm:$0xff] %v8861_v14 }
 0x34c   :  { %1380 = vrot.lane.b32.xlu1 %v5666_v2, %s7472_s24  ;;  %1378 = vrot.lane.b32.xlu0 %v5665_v3, %s7472_s24 }
 0x34e   :  { %v8865_v62 = vpop.permute.xlu1 %808  ;;  %v8867_v4 = vpop.permute.xlu0 %806 }
 0x34f   :  { %12410 = vst [vmem:[#allocation298_spill] sm:$0xff] %v8865_v62  ;;  %12411 = vst [vmem:[#allocation299_spill] sm:$0xff] %v8867_v4 }
 0x350   :  { %1386 = vrot.lane.b32.xlu1 %v5666_v2, %s7474_s28  ;;  %1384 = vrot.lane.b32.xlu0 %v5665_v3, %s7474_s28 }
 0x352   :  { %v8871_v15 = vpop.permute.xlu1 %814  ;;  %v8873_v38 = vpop.permute.xlu0 %812 }
 0x353   :  { %12412 = vst [vmem:[#allocation300_spill] sm:$0xff] %v8871_v15  ;;  %12413 = vst [vmem:[#allocation301_spill] sm:$0xff] %v8873_v38 }
 0x354   :  { %1392 = vrot.lane.b32.xlu1 %v5666_v2, %s7476_s30  ;;  %1390 = vrot.lane.b32.xlu0 %v5665_v3, %s7476_s30 }
 0x356   :  { %v8877_v14 = vpop.permute.xlu1 %869  ;;  %v8879_v5 = vpop.permute.xlu0 %867 }
 0x357   :  { %12414 = vst [vmem:[#allocation302_spill] sm:$0xff] %v8877_v14  ;;  %12415 = vst [vmem:[#allocation303_spill] sm:$0xff] %v8879_v5 }
 0x358   :  { %1443 = vrot.lane.b32.xlu1 %v5666_v2, %s7471_s23  ;;  %1441 = vrot.lane.b32.xlu0 %v5665_v3, %s7471_s23 }
 0x35a   :  { %v8883_v4 = vpop.permute.xlu1 %875  ;;  %v8885_v62 = vpop.permute.xlu0 %873 }
 0x35b   :  { %12416 = vst [vmem:[#allocation304_spill] sm:$0xff] %v8883_v4  ;;  %12417 = vst [vmem:[#allocation305_spill] sm:$0xff] %v8885_v62 }
 0x35c   :  { %1449 = vrot.lane.b32.xlu1 %v5666_v2, %s7473_s27  ;;  %1447 = vrot.lane.b32.xlu0 %v5665_v3, %s7473_s27 }
 0x35e   :  { %v8889_v38 = vpop.permute.xlu1 %881  ;;  %v8891_v15 = vpop.permute.xlu0 %879 }
 0x35f   :  { %12418 = vst [vmem:[#allocation306_spill] sm:$0xff] %v8889_v38  ;;  %12419 = vst [vmem:[#allocation307_spill] sm:$0xff] %v8891_v15 }
 0x360   :  { %1455 = vrot.lane.b32.xlu1 %v5666_v2, %s7475_s29  ;;  %1453 = vrot.lane.b32.xlu0 %v5665_v3, %s7475_s29 }
 0x362   :  { %v8895_v5 = vpop.permute.xlu1 %887  ;;  %v8897_v14 = vpop.permute.xlu0 %885 }
 0x363   :  { %12420 = vst [vmem:[#allocation308_spill] sm:$0xff] %v8895_v5  ;;  %12421 = vst [vmem:[#allocation309_spill] sm:$0xff] %v8897_v14 }
 0x364   :  { %1461 = vrot.lane.b32.xlu1 %v5666_v2, %s7477_s9  ;;  %1459 = vrot.lane.b32.xlu0 %v5665_v3, %s7477_s9 }
 0x366   :  { %v8901_v62 = vpop.permute.xlu1 %948  ;;  %v8903_v4 = vpop.permute.xlu0 %946 }
 0x367   :  { %12422 = vst [vmem:[#allocation310_spill] sm:$0xff] %v8901_v62  ;;  %12423 = vst [vmem:[#allocation311_spill] sm:$0xff] %v8903_v4 }
 0x368   :  { %1516 = vrot.lane.b32.xlu1 %v5666_v2, %s7478_s10  ;;  %1514 = vrot.lane.b32.xlu0 %v5665_v3, %s7478_s10 }
 0x36a   :  { %v8907_v15 = vpop.permute.xlu1 %954  ;;  %v8909_v38 = vpop.permute.xlu0 %952 }
 0x36b   :  { %12424 = vst [vmem:[#allocation312_spill] sm:$0xff] %v8907_v15  ;;  %12425 = vst [vmem:[#allocation313_spill] sm:$0xff] %v8909_v38  ;;  %v8928_v38 = vld [vmem:[%s12018_s0 + $0x39] sm:$0xff] }
 0x36c   :  { %1522 = vrot.lane.b32.xlu1 %v5666_v2, %s7479_s11  ;;  %1520 = vrot.lane.b32.xlu0 %v5665_v3, %s7479_s11 }
 0x36e   :  { %v8913_v14 = vpop.permute.xlu1 %960  ;;  %v8915_v5 = vpop.permute.xlu0 %958 }
 0x36f   :  { %12426 = vst [vmem:[#allocation314_spill] sm:$0xff] %v8913_v14  ;;  %12427 = vst [vmem:[#allocation315_spill] sm:$0xff] %v8915_v5  ;;  %v8933_v5 = vld [vmem:[%s12018_s0 + $0x31] sm:$0xff] }
 0x370   :  { %1528 = vrot.lane.b32.xlu1 %v5666_v2, %s7480_s12  ;;  %1526 = vrot.lane.b32.xlu0 %v5665_v3, %s7480_s12 }
 0x372   :  { %v8919_v4 = vpop.permute.xlu1 %1011  ;;  %v8921_v62 = vpop.permute.xlu0 %1009 }
 0x373   :  { %12428 = vst [vmem:[#allocation316_spill] sm:$0xff] %v8919_v4  ;;  %12429 = vst [vmem:[#allocation317_spill] sm:$0xff] %v8921_v62 }
 0x374   :  { %1534 = vrot.lane.b32.xlu1 %v5666_v2, %s7481_s13  ;;  %1532 = vrot.lane.b32.xlu0 %v5665_v3, %s7481_s13 }
 0x376   :  { %v8935_v14 = vpop.permute.xlu1 %1017  ;;  %v8937_v15 = vpop.permute.xlu0 %1015 }
 0x377   :  { %12430 = vst [vmem:[#allocation318_spill] sm:$0xff] %v8935_v14  ;;  %12431 = vst [vmem:[#allocation319_spill] sm:$0xff] %v8937_v15 }
 0x378   :  { %1595 = vrot.lane.b32.xlu1 %v8928_v38, %s7472_s24  ;;  %1593 = vrot.lane.b32.xlu0 %v8933_v5, %s7472_s24 }
 0x37a   :  { %v8943_v3 = vpop.permute.xlu1 %1023  ;;  %v8945_v2 = vpop.permute.xlu0 %1021 }
 0x37b   :  { %12432 = vst [vmem:[#allocation320_spill] sm:$0xff] %v8943_v3  ;;  %12433 = vst [vmem:[#allocation321_spill] sm:$0xff] %v8945_v2 }
 0x37c   :  { %1601 = vrot.lane.b32.xlu1 %v8928_v38, %s7474_s28  ;;  %1599 = vrot.lane.b32.xlu0 %v8933_v5, %s7474_s28 }
 0x37e   :  { %v8951_v62 = vpop.permute.xlu1 %1029  ;;  %v8953_v4 = vpop.permute.xlu0 %1027 }
 0x37f   :  { %12434 = vst [vmem:[#allocation322_spill] sm:$0xff] %v8951_v62  ;;  %12435 = vst [vmem:[#allocation323_spill] sm:$0xff] %v8953_v4 }
 0x380   :  { %1607 = vrot.lane.b32.xlu1 %v8928_v38, %s7476_s30  ;;  %1605 = vrot.lane.b32.xlu0 %v8933_v5, %s7476_s30 }
 0x382   :  { %v8959_v15 = vpop.permute.xlu1 %1084  ;;  %v8961_v3 = vpop.permute.xlu0 %1082 }
 0x383   :  { %12436 = vst [vmem:[#allocation324_spill] sm:$0xff] %v8959_v15  ;;  %12437 = vst [vmem:[#allocation325_spill] sm:$0xff] %v8961_v3 }
 0x384   :  { %1658 = vrot.lane.b32.xlu1 %v8928_v38, %s7471_s23  ;;  %1656 = vrot.lane.b32.xlu0 %v8933_v5, %s7471_s23 }
 0x386   :  { %v8967_v2 = vpop.permute.xlu1 %1090  ;;  %v8969_v62 = vpop.permute.xlu0 %1088 }
 0x387   :  { %12438 = vst [vmem:[#allocation326_spill] sm:$0xff] %v8967_v2  ;;  %12439 = vst [vmem:[#allocation327_spill] sm:$0xff] %v8969_v62 }
 0x388   :  { %1664 = vrot.lane.b32.xlu1 %v8928_v38, %s7473_s27  ;;  %1662 = vrot.lane.b32.xlu0 %v8933_v5, %s7473_s27 }
 0x38a   :  { %v8975_v4 = vpop.permute.xlu1 %1096  ;;  %v8977_v15 = vpop.permute.xlu0 %1094 }
 0x38b   :  { %12440 = vst [vmem:[#allocation328_spill] sm:$0xff] %v8975_v4  ;;  %12441 = vst [vmem:[#allocation329_spill] sm:$0xff] %v8977_v15 }
 0x38c   :  { %1670 = vrot.lane.b32.xlu1 %v8928_v38, %s7475_s29  ;;  %1668 = vrot.lane.b32.xlu0 %v8933_v5, %s7475_s29 }
 0x38e   :  { %v8983_v3 = vpop.permute.xlu1 %1102  ;;  %v8985_v2 = vpop.permute.xlu0 %1100 }
 0x38f   :  { %12442 = vst [vmem:[#allocation330_spill] sm:$0xff] %v8983_v3  ;;  %12443 = vst [vmem:[#allocation331_spill] sm:$0xff] %v8985_v2 }
 0x390   :  { %1676 = vrot.lane.b32.xlu1 %v8928_v38, %s7477_s9  ;;  %1674 = vrot.lane.b32.xlu0 %v8933_v5, %s7477_s9 }
 0x392   :  { %v8991_v62 = vpop.permute.xlu1 %1163  ;;  %v8993_v4 = vpop.permute.xlu0 %1161 }
 0x393   :  { %12444 = vst [vmem:[#allocation332_spill] sm:$0xff] %v8991_v62  ;;  %12445 = vst [vmem:[#allocation333_spill] sm:$0xff] %v8993_v4  ;;  %v7358_v4 = vld [vmem:[%s12018_s0 + $0x60] sm:$0xff]  ;;  %v210_v62 = vsel %vm103_vm0, %v7625_v8, %v7631_v10 }
 0x394   :  { %1731 = vrot.lane.b32.xlu1 %v8928_v38, %s7478_s10  ;;  %1729 = vrot.lane.b32.xlu0 %v8933_v5, %s7478_s10  ;;  %v138_v2 = vsel %vm103_vm0, %v7358_v4, %v7621_v7  ;;  %v209_v7 = vsel %vm103_vm0, %v7619_v6, %v7633_v11  ;;  %v9038_v10 = vld [vmem:[%s12019_s1 + $0x1] ss:$0 sm:$0xff]  ;;  %v283_v11 = vsel %vm103_vm0, %v7667_v22, %v7673_v24 }
 0x395   :  { %v140_v39 = vsel %vm106_vm1, %v138_v2, %v7639_v13  ;;  %v211_v8 = vsel %vm106_vm1, %v209_v7, %v7651_v17  ;;  %v282_v17 = vsel %vm103_vm0, %v7669_v23, %v7675_v25 }
 0x396   :  { %v8999_v15 = vpop.permute.xlu1 %1169  ;;  %v9001_v3 = vpop.permute.xlu0 %1167  ;;  %v142_v22 = vsel %vm109_vm2, %v140_v39, %v7657_v19  ;;  %v284_v24 = vsel %vm106_vm1, %v282_v17, %v7681_v27  ;;  %v7360_v39 = vld [vmem:[%s12018_s0 + $0x69] sm:$0xff] }
 0x397   :  { %12446 = vst [vmem:[#allocation334_spill] sm:$0xff] %v8999_v15  ;;  %12447 = vst [vmem:[#allocation335_spill] sm:$0xff] %v9001_v3  ;;  %v7359_v15 = vld [vmem:[%s12018_s0 + $0x68] sm:$0xff]  ;;  %v286_v19 = vsel %vm109_vm2, %v284_v24, %v7687_v29 }
 0x398   :  { %1737 = vrot.lane.b32.xlu1 %v8928_v38, %s7479_s11  ;;  %1735 = vrot.lane.b32.xlu0 %v8933_v5, %s7479_s11  ;;  %v139_v3 = vsel %vm103_vm0, %v7359_v15, %v7627_v9  ;;  %v212_v9 = vsel %vm106_vm1, %v210_v62, %v7649_v16  ;;  %v213_v16 = vsel %vm109_vm2, %v211_v8, %v7663_v21 }
 0x399   :  { %v141_v4 = vsel %vm106_vm1, %v139_v3, %v7637_v12  ;;  %v214_v6 = vsel %vm109_vm2, %v212_v9, %v7661_v20  ;;  %v9052_v12 = vld [vmem:[%s12019_s1] ss:$0 sm:$0xff]  ;;  %v285_v20 = vsel %vm106_vm1, %v283_v11, %v7679_v26  ;;  %v215_v27 = vmul.f32 %v9038_v10, %v213_v16  ;;  %v7361_v3 = vld [vmem:[%s12018_s0 + $0x61] sm:$0xff] }
 0x39a   :  { %v9020_v14 = vpop.permute.xlu1 %1175  ;;  %v9022_v63 = vpop.permute.xlu0 %1173  ;;  %v143_v13 = vsel %vm109_vm2, %v141_v4, %v7655_v18  ;;  %v9070_v18 = vld [vmem:[%s12019_s1 + $0x2] ss:$0 sm:$0xff]  ;;  %v287_v21 = vsel %vm109_vm2, %v285_v20, %v7685_v28  ;;  %v216_v25 = vmul.f32 %v9038_v10, %v214_v6  ;;  %v352_v28 = vsel %vm103_vm0, %v7360_v39, %v7691_v30 }
 0x39b   :  { %v145_v26 = vmul.f32 %v9052_v12, %v143_v13  ;;  %v144_v15 = vmul.f32 %v9052_v12, %v142_v22  ;;  %v289_v29 = vmul.f32 %v9070_v18, %v287_v21  ;;  %v351_v2 = vsel %vm103_vm0, %v7361_v3, %v7693_v31  ;;  %v9117_v31 = vld [vmem:[%s12019_s1 + $0x3] ss:$0 sm:$0xff] }
 0x39c   :  { %1743 = vrot.lane.b32.xlu1 %v8928_v38, %s7480_s12  ;;  %1741 = vrot.lane.b32.xlu0 %v8933_v5, %s7480_s12  ;;  %v354_v30 = vsel %vm106_vm1, %v352_v28, %v7697_v32  ;;  %v288_v7 = vmul.f32 %v9070_v18, %v286_v19  ;;  %v353_v4 = vsel %vm106_vm1, %v351_v2, %v7699_v33 }
 0x39d   :  { %v356_v32 = vsel %vm109_vm2, %v354_v30, %v7703_v34  ;;  %v425_v9 = vsel %vm103_vm0, %v7709_v36, %v7721_v40  ;;  %v218_v11 = vadd.f32 %v216_v25, %v145_v26  ;;  %v355_v33 = vsel %vm109_vm2, %v353_v4, %v7705_v35  ;;  %v9135_v34 = vld [vmem:[%s12019_s1 + $0x4] ss:$0 sm:$0xff]  ;;  %v9190_v26 = vld [vmem:[%s12019_s1 + $0x6] ss:$0 sm:$0xff] }
 0x39e   :  { %v9074_v62 = vpop.permute.xlu1 %1226  ;;  %v9076_v23 = vpop.permute.xlu0 %1224  ;;  %v427_v13 = vsel %vm106_vm1, %v425_v9, %v7727_v42  ;;  %v217_v16 = vadd.f32 %v215_v27, %v144_v15  ;;  %v358_v35 = vmul.f32 %v9117_v31, %v356_v32  ;;  %v424_v42 = vsel %vm103_vm0, %v7711_v37, %v7723_v41  ;;  %v12449_v32 = vld [vmem:[#allocation13_spill] sm:$0xff]  ;;  %v12450_v9 = vld [vmem:[#allocation14_spill] sm:$0xff] }
 0x39f   :  { %v429_v36 = vsel %vm109_vm2, %v427_v13, %v7733_v44  ;;  %v291_v40 = vadd.f32 %v289_v29, %v218_v11  ;;  %v357_v20 = vmul.f32 %v9117_v31, %v355_v33  ;;  %v426_v22 = vsel %vm106_vm1, %v424_v42, %v7729_v43  ;;  %v12451_v33 = vld [vmem:[#allocation18_spill] sm:$0xff]  ;;  %v12455_v42 = vld [vmem:[#allocation20_spill] sm:$0xff] }
 0x3a0   :  { %1749 = vrot.lane.b32.xlu1 %v8928_v38, %s7481_s13  ;;  %1747 = vrot.lane.b32.xlu0 %v8933_v5, %s7481_s13  ;;  %v9104_v38 = vld [vmem:[%s12018_s0 + $0x3a] sm:$0xff]  ;;  %v9109_v5 = vld [vmem:[%s12018_s0 + $0x32] sm:$0xff]  ;;  %v290_v17 = vadd.f32 %v288_v7, %v217_v16  ;;  %v498_v44 = vsel %vm103_vm0, %v7739_v46, %v7745_v48  ;;  %v431_v25 = vmul.f32 %v9135_v34, %v429_v36 }
 0x3a1   :  { %v428_v19 = vsel %vm109_vm2, %v426_v22, %v7735_v45  ;;  %v497_v37 = vsel %vm103_vm0, %v7741_v47, %v7747_v49  ;;  %v500_v41 = vsel %vm106_vm1, %v498_v44, %v7751_v50  ;;  %v9170_v46 = vld [vmem:[%s12019_s1 + $0x5] ss:$0 sm:$0xff]  ;;  %v7362_v45 = vld [vmem:[%s12018_s0 + $0x6a] sm:$0xff]  ;;  %v360_v49 = vadd.f32 %v358_v35, %v291_v40  ;;  %v12454_v40 = vld [vmem:[#allocation15_spill] sm:$0xff] }
 0x3a2   :  { %v9124_v8 = vpop.permute.xlu1 %1232  ;;  %v9126_v6 = vpop.permute.xlu0 %1230  ;;  %v499_v43 = vsel %vm106_vm1, %v497_v37, %v7753_v51  ;;  %v502_v48 = vsel %vm109_vm2, %v500_v41, %v7757_v52  ;;  %v567_v47 = vsel %vm103_vm0, %v7362_v45, %v7763_v54  ;;  %v359_v52 = vadd.f32 %v357_v20, %v290_v17  ;;  %v9247_v22 = vld [vmem:[%s12019_s1 + $0x8] ss:$0 sm:$0xff]  ;;  %v12456_v44 = vld [vmem:[#allocation22_spill] sm:$0xff] }
 0x3a3   :  { %v501_v50 = vsel %vm109_vm2, %v499_v43, %v7759_v53  ;;  %v569_v51 = vsel %vm106_vm1, %v567_v47, %v7769_v56  ;;  %v433_v28 = vadd.f32 %v431_v25, %v360_v49  ;;  %v430_v15 = vmul.f32 %v9135_v34, %v428_v19  ;;  %v7363_v56 = vld [vmem:[%s12018_s0 + $0x62] sm:$0xff]  ;;  %v12457_v43 = vld [vmem:[#allocation19_spill] sm:$0xff] }
 0x3a4   :  { %1810 = vrot.lane.b32.xlu1 %v9104_v38, %s7472_s24  ;;  %1808 = vrot.lane.b32.xlu0 %v9109_v5, %s7472_s24  ;;  %v571_v54 = vsel %vm109_vm2, %v569_v51, %v7775_v58  ;;  %v504_v53 = vmul.f32 %v9170_v46, %v502_v48  ;;  %v566_v29 = vsel %vm103_vm0, %v7363_v56, %v7765_v55  ;;  %v12458_v48 = vld [vmem:[#allocation17_spill] sm:$0xff]  ;;  %v7364_v51 = vld [vmem:[%s12018_s0 + $0x80] sm:$0xff] }
 0x3a5   :  { %v503_v3 = vmul.f32 %v9170_v46, %v501_v50  ;;  %v568_v58 = vsel %vm106_vm1, %v566_v29, %v7771_v57  ;;  %v640_v2 = vsel %vm103_vm0, %v7781_v60, %v7793_v0  ;;  %v573_v30 = vmul.f32 %v9190_v26, %v571_v54  ;;  %v12448_v57 = vld [vmem:[#allocation12_spill] sm:$0xff]  ;;  %v12459_v49 = vld [vmem:[#allocation21_spill] sm:$0xff] }
 0x3a6   :  { %v9153_v24 = vpop.permute.xlu1 %1238  ;;  %v9155_v21 = vpop.permute.xlu0 %1236  ;;  %v570_v55 = vsel %vm109_vm2, %v568_v58, %v7777_v59  ;;  %v639_v7 = vsel %vm103_vm0, %v7783_v61, %v7795_v1  ;;  %v642_v4 = vsel %vm106_vm1, %v640_v2, %v12448_v57  ;;  %v9228_v0 = vld [vmem:[%s12019_s1 + $0x7] ss:$0 sm:$0xff]  ;;  %v432_v1 = vadd.f32 %v430_v15, %v359_v52  ;;  %v12461_v15 = vld [vmem:[#allocation25_spill] sm:$0xff]  ;;  %v12463_v58 = vld [vmem:[#allocation23_spill] sm:$0xff] }
 0x3a7   :  { %v641_v60 = vsel %vm106_vm1, %v639_v7, %v12449_v32  ;;  %v644_v11 = vsel %vm109_vm2, %v642_v4, %v12450_v9  ;;  %v12452_v59 = vld [vmem:[#allocation16_spill] sm:$0xff]  ;;  %v506_v36 = vadd.f32 %v504_v53, %v433_v28  ;;  %v572_v20 = vmul.f32 %v9190_v26, %v570_v55  ;;  %v7365_v28 = vld [vmem:[%s12018_s0 + $0x78] sm:$0xff]  ;;  %v9286_v32 = vld [vmem:[%s12019_s1 + $0x9] ss:$0 sm:$0xff] }
 0x3a8   :  { %1816 = vrot.lane.b32.xlu1 %v9104_v38, %s7474_s28  ;;  %1814 = vrot.lane.b32.xlu0 %v9109_v5, %s7474_s28  ;;  %v713_v13 = vsel %vm103_vm0, %v12452_v59, %v12451_v33  ;;  %v643_v35 = vsel %vm109_vm2, %v641_v60, %v12454_v40  ;;  %v505_v19 = vadd.f32 %v503_v3, %v432_v1  ;;  %v12460_v52 = vld [vmem:[#allocation24_spill] sm:$0xff]  ;;  %v12465_v7 = vld [vmem:[#allocation27_spill] sm:$0xff] }
 0x3a9   :  { %v715_v17 = vsel %vm106_vm1, %v713_v13, %v12455_v42  ;;  %v575_v37 = vadd.f32 %v573_v30, %v506_v36  ;;  %v646_v41 = vmul.f32 %v9228_v0, %v644_v11  ;;  %v712_v45 = vsel %vm103_vm0, %v12458_v48, %v12457_v43  ;;  %v12464_v30 = vld [vmem:[#allocation26_spill] sm:$0xff]  ;;  %v12466_v60 = vld [vmem:[#allocation28_spill] sm:$0xff]  ;;  %v12467_v11 = vld [vmem:[#allocation29_spill] sm:$0xff] }
 0x3aa   :  { %v9194_v27 = vpop.permute.xlu1 %1244  ;;  %v9196_v39 = vpop.permute.xlu0 %1242  ;;  %v717_v25 = vsel %vm109_vm2, %v715_v17, %v12456_v44  ;;  %v645_v47 = vmul.f32 %v9228_v0, %v643_v35  ;;  %v714_v50 = vsel %vm106_vm1, %v712_v45, %v12459_v49  ;;  %v784_v54 = vsel %vm103_vm0, %v7364_v51, %v12460_v52  ;;  %v12470_v44 = vld [vmem:[#allocation30_spill] sm:$0xff]  ;;  %v12472_v43 = vld [vmem:[#allocation31_spill] sm:$0xff]  ;;  %v12474_v45 = vld [vmem:[#allocation40_spill] sm:$0xff] }
 0x3ab   :  { %v783_v53 = vsel %vm103_vm0, %v7365_v28, %v12461_v15  ;;  %v719_v3 = vmul.f32 %v9247_v22, %v717_v25  ;;  %v716_v2 = vsel %vm109_vm2, %v714_v50, %v12463_v58  ;;  %v786_v55 = vsel %vm106_vm1, %v784_v54, %v12464_v30  ;;  %v12476_v50 = vld [vmem:[#allocation35_spill] sm:$0xff]  ;;  %v9323_v52 = vld [vmem:[%s12019_s1 + $0xa] ss:$0 sm:$0xff]  ;;  %v12477_v54 = vld [vmem:[#allocation36_spill] sm:$0xff] }
 0x3ac   :  { %1822 = vrot.lane.b32.xlu1 %v9104_v38, %s7476_s30  ;;  %1820 = vrot.lane.b32.xlu0 %v9109_v5, %s7476_s30  ;;  %v785_v57 = vsel %vm106_vm1, %v783_v53, %v12465_v7  ;;  %v574_v4 = vadd.f32 %v572_v20, %v505_v19  ;;  %v788_v9 = vsel %vm109_vm2, %v786_v55, %v12466_v60  ;;  %v12469_v20 = vld [vmem:[#allocation32_spill] sm:$0xff]  ;;  %v12471_v19 = vld [vmem:[#allocation33_spill] sm:$0xff]  ;;  %v12479_v53 = vld [vmem:[#allocation39_spill] sm:$0xff] }
 0x3ad   :  { %v787_v33 = vsel %vm109_vm2, %v785_v57, %v12467_v11  ;;  %v648_v59 = vadd.f32 %v646_v41, %v575_v37  ;;  %v718_v1 = vmul.f32 %v9247_v22, %v716_v2  ;;  %v790_v42 = vmul.f32 %v9286_v32, %v788_v9  ;;  %v12473_v41 = vld [vmem:[#allocation34_spill] sm:$0xff]  ;;  %v12478_v15 = vld [vmem:[#allocation41_spill] sm:$0xff]  ;;  %v12482_v57 = vld [vmem:[#allocation43_spill] sm:$0xff] }
 0x3ae   :  { %v9235_v16 = vpop.permute.xlu1 %1299  ;;  %v9237_v61 = vpop.permute.xlu0 %1297  ;;  %v647_v13 = vadd.f32 %v645_v47, %v574_v4  ;;  %v789_v17 = vmul.f32 %v9286_v32, %v787_v33  ;;  %v857_v25 = vsel %vm103_vm0, %v12470_v44, %v12469_v20  ;;  %v856_v37 = vsel %vm103_vm0, %v12472_v43, %v12471_v19  ;;  %v12475_v47 = vld [vmem:[#allocation38_spill] sm:$0xff]  ;;  %v12481_v55 = vld [vmem:[#allocation37_spill] sm:$0xff]  ;;  %v12483_v9 = vld [vmem:[#allocation44_spill] sm:$0xff] }
 0x3af   :  { %12453 = vst [vmem:[#allocation12_spill] sm:$0xff] %v9237_v61  ;;  %v721_v35 = vadd.f32 %v719_v3, %v648_v59  ;;  %v859_v48 = vsel %vm106_vm1, %v857_v25, %v12473_v41  ;;  %v930_v49 = vsel %vm103_vm0, %v12475_v47, %v12474_v45  ;;  %v858_v51 = vsel %vm106_vm1, %v856_v37, %v12476_v50  ;;  %v12480_v58 = vld [vmem:[#allocation42_spill] sm:$0xff]  ;;  %v9339_v60 = vld [vmem:[%s12019_s1 + $0xb] ss:$0 sm:$0xff]  ;;  %v7366_v37 = vld [vmem:[%s12018_s0 + $0x81] sm:$0xff] }
 0x3b0   :  { %1873 = vrot.lane.b32.xlu1 %v9104_v38, %s7471_s23  ;;  %1871 = vrot.lane.b32.xlu0 %v9109_v5, %s7471_s23  ;;  %v861_v28 = vsel %vm109_vm2, %v859_v48, %v12477_v54  ;;  %v929_v3 = vsel %vm103_vm0, %v12479_v53, %v12478_v15  ;;  %v932_v2 = vsel %vm106_vm1, %v930_v49, %v12480_v58  ;;  %v12485_v20 = vld [vmem:[#allocation45_spill] sm:$0xff]  ;;  %v12486_v41 = vld [vmem:[#allocation46_spill] sm:$0xff]  ;;  %v12488_v47 = vld [vmem:[#allocation48_spill] sm:$0xff] }
 0x3b1   :  { %v720_v30 = vadd.f32 %v718_v1, %v647_v13  ;;  %v860_v7 = vsel %vm109_vm2, %v858_v51, %v12481_v55  ;;  %v931_v4 = vsel %vm106_vm1, %v929_v3, %v12482_v57  ;;  %v934_v11 = vsel %vm109_vm2, %v932_v2, %v12483_v9  ;;  %v12489_v50 = vld [vmem:[#allocation49_spill] sm:$0xff]  ;;  %v12490_v54 = vld [vmem:[#allocation54_spill] sm:$0xff]  ;;  %v12494_v55 = vld [vmem:[#allocation51_spill] sm:$0xff] }
 0x3b2   :  { %v9272_v56 = vpop.permute.xlu1 %1305  ;;  %v9274_v29 = vpop.permute.xlu0 %1303  ;;  %v933_v13 = vsel %vm109_vm2, %v931_v4, %v12485_v20  ;;  %v792_v1 = vadd.f32 %v790_v42, %v721_v35  ;;  %v863_v25 = vmul.f32 %v9323_v52, %v861_v28  ;;  %v862_v19 = vmul.f32 %v9323_v52, %v860_v7  ;;  %v7367_v42 = vld [vmem:[%s12018_s0 + $0x79] sm:$0xff]  ;;  %v9381_v58 = vld [vmem:[%s12019_s1 + $0xc] ss:$0 sm:$0xff]  ;;  %v12493_v2 = vld [vmem:[#allocation50_spill] sm:$0xff] }
 0x3b3   :  { %12462 = vst [vmem:[#allocation13_spill] sm:$0xff] %v9274_v29  ;;  %v791_v44 = vadd.f32 %v789_v17, %v720_v30  ;;  %v936_v43 = vmul.f32 %v9339_v60, %v934_v11  ;;  %v999_v35 = vsel %vm103_vm0, %v7366_v37, %v12486_v41  ;;  %v12487_v17 = vld [vmem:[#allocation47_spill] sm:$0xff]  ;;  %v935_v45 = vmul.f32 %v9339_v60, %v933_v13  ;;  %v12491_v28 = vld [vmem:[#allocation52_spill] sm:$0xff]  ;;  %v12496_v4 = vld [vmem:[#allocation53_spill] sm:$0xff] }
 0x3b4   :  { %1879 = vrot.lane.b32.xlu1 %v9104_v38, %s7473_s27  ;;  %1877 = vrot.lane.b32.xlu0 %v9109_v5, %s7473_s27  ;;  %v998_v48 = vsel %vm103_vm0, %v7367_v42, %v12487_v17  ;;  %v1001_v49 = vsel %vm106_vm1, %v999_v35, %v12488_v47  ;;  %v1072_v15 = vsel %vm103_vm0, %v12491_v28, %v12490_v54  ;;  %v12495_v57 = vld [vmem:[#allocation55_spill] sm:$0xff]  ;;  %v12497_v11 = vld [vmem:[#allocation56_spill] sm:$0xff]  ;;  %v12498_v13 = vld [vmem:[#allocation57_spill] sm:$0xff] }
 0x3b5   :  { %v1000_v51 = vsel %vm106_vm1, %v998_v48, %v12489_v50  ;;  %v1003_v30 = vsel %vm109_vm2, %v1001_v49, %v12493_v2  ;;  %v1071_v9 = vsel %vm103_vm0, %v12496_v4, %v12495_v57  ;;  %v1074_v20 = vsel %vm106_vm1, %v1072_v15, %v12497_v11  ;;  %v9397_v41 = vld [vmem:[%s12019_s1 + $0xd] ss:$0 sm:$0xff]  ;;  %v12499_v35 = vld [vmem:[#allocation58_spill] sm:$0xff]  ;;  %v12500_v47 = vld [vmem:[#allocation59_spill] sm:$0xff] }
 0x3b6   :  { %v9297_v36 = vpop.permute.xlu1 %1311  ;;  %v9299_v40 = vpop.permute.xlu0 %1309  ;;  %v1002_v7 = vsel %vm109_vm2, %v1000_v51, %v12494_v55  ;;  %v1073_v37 = vsel %vm106_vm1, %v1071_v9, %v12498_v13  ;;  %v1076_v42 = vsel %vm109_vm2, %v1074_v20, %v12499_v35  ;;  %v865_v17 = vadd.f32 %v863_v25, %v792_v1  ;;  %v12502_v4 = vld [vmem:[#allocation62_spill] sm:$0xff]  ;;  %v12503_v1 = vld [vmem:[#allocation60_spill] sm:$0xff]  ;;  %v12504_v25 = vld [vmem:[#allocation63_spill] sm:$0xff] }
 0x3b7   :  { %12468 = vst [vmem:[#allocation14_spill] sm:$0xff] %v9299_v40  ;;  %v864_v48 = vadd.f32 %v862_v19, %v791_v44  ;;  %v1075_v49 = vsel %vm109_vm2, %v1073_v37, %v12500_v47  ;;  %v1005_v50 = vmul.f32 %v9381_v58, %v1003_v30  ;;  %v1004_v51 = vmul.f32 %v9381_v58, %v1002_v7  ;;  %v12505_v19 = vld [vmem:[#allocation61_spill] sm:$0xff]  ;;  %v12508_v37 = vld [vmem:[#allocation66_spill] sm:$0xff] }
 0x3b8   :  { %1885 = vrot.lane.b32.xlu1 %v9104_v38, %s7475_s29  ;;  %1883 = vrot.lane.b32.xlu0 %v9109_v5, %s7475_s29  ;;  %v938_v15 = vadd.f32 %v936_v43, %v865_v17  ;;  %v1078_v55 = vmul.f32 %v9397_v41, %v1076_v42  ;;  %v1077_v57 = vmul.f32 %v9397_v41, %v1075_v49  ;;  %v12506_v43 = vld [vmem:[#allocation64_spill] sm:$0xff]  ;;  %v12507_v7 = vld [vmem:[#allocation65_spill] sm:$0xff]  ;;  %v12509_v42 = vld [vmem:[#allocation67_spill] sm:$0xff] }
 0x3b9   :  { %v937_v2 = vadd.f32 %v935_v45, %v864_v48  ;;  %v1145_v44 = vsel %vm103_vm0, %v12503_v1, %v12502_v4  ;;  %v1144_v30 = vsel %vm103_vm0, %v12505_v19, %v12504_v25  ;;  %v9432_v13 = vld [vmem:[%s12019_s1 + $0xe] ss:$0 sm:$0xff]  ;;  %v12513_v25 = vld [vmem:[#allocation70_spill] sm:$0xff] }
 0x3ba   :  { %v9343_v33 = vpop.permute.xlu1 %1317  ;;  %v9345_v59 = vpop.permute.xlu0 %1315  ;;  %v1147_v45 = vsel %vm106_vm1, %v1145_v44, %v12506_v43  ;;  %v1146_v9 = vsel %vm106_vm1, %v1144_v30, %v12507_v7  ;;  %v1007_v11 = vadd.f32 %v1005_v50, %v938_v15  ;;  %v7368_v15 = vld [vmem:[%s12018_s0 + $0x82] sm:$0xff]  ;;  %v12514_v30 = vld [vmem:[#allocation71_spill] sm:$0xff]  ;;  %v12516_v7 = vld [vmem:[#allocation74_spill] sm:$0xff] }
 0x3bb   :  { %12484 = vst [vmem:[#allocation18_spill] sm:$0xff] %v9345_v59  ;;  %v1006_v20 = vadd.f32 %v1004_v51, %v937_v2  ;;  %v1149_v35 = vsel %vm109_vm2, %v1147_v45, %v12508_v37  ;;  %v1148_v17 = vsel %vm109_vm2, %v1146_v9, %v12509_v42  ;;  %v12511_v2 = vld [vmem:[#allocation68_spill] sm:$0xff]  ;;  %v12579_v61 = vld [vmem:[#allocation118_spill] sm:$0xff] }
 0x3bc   :  { %1891 = vrot.lane.b32.xlu1 %v9104_v38, %s7477_s9  ;;  %1889 = vrot.lane.b32.xlu0 %v9109_v5, %s7477_s9  ;;  %v1080_v49 = vadd.f32 %v1078_v55, %v1007_v11  ;;  %v1151_v50 = vmul.f32 %v9432_v13, %v1149_v35  ;;  %v1150_v51 = vmul.f32 %v9432_v13, %v1148_v17  ;;  %v7369_v55 = vld [vmem:[%s12018_s0 + $0x7a] sm:$0xff]  ;;  %v12517_v11 = vld [vmem:[#allocation77_spill] sm:$0xff] }
 0x3bd   :  { %v1079_v4 = vadd.f32 %v1077_v57, %v1006_v20  ;;  %v1214_v1 = vsel %vm103_vm0, %v7368_v15, %v12511_v2  ;;  %v12512_v57 = vld [vmem:[#allocation69_spill] sm:$0xff]  ;;  %v12515_v45 = vld [vmem:[#allocation76_spill] sm:$0xff]  ;;  %v12518_v20 = vld [vmem:[#allocation75_spill] sm:$0xff] }
 0x3be   :  { %v9374_v53 = vpop.permute.xlu1 %1380  ;;  %v9376_v3 = vpop.permute.xlu0 %1378  ;;  %v1213_v44 = vsel %vm103_vm0, %v7369_v55, %v12512_v57  ;;  %v1216_v19 = vsel %vm106_vm1, %v1214_v1, %v12513_v25  ;;  %v1287_v9 = vsel %vm103_vm0, %v12516_v7, %v12515_v45  ;;  %v1286_v37 = vsel %vm103_vm0, %v12518_v20, %v12517_v11  ;;  %v9475_v17 = vld [vmem:[%s12019_s1 + $0xf] ss:$0 sm:$0xff]  ;;  %v12521_v15 = vld [vmem:[#allocation72_spill] sm:$0xff]  ;;  %v12523_v57 = vld [vmem:[#allocation78_spill] sm:$0xff] }
 0x3bf   :  { %12492 = vst [vmem:[#allocation16_spill] sm:$0xff] %v9376_v3  ;;  %v1215_v43 = vsel %vm106_vm1, %v1213_v44, %v12514_v30  ;;  %v1218_v2 = vsel %vm109_vm2, %v1216_v19, %v12521_v15  ;;  %v12522_v1 = vld [vmem:[#allocation73_spill] sm:$0xff]  ;;  %v1289_v44 = vsel %vm106_vm1, %v1287_v9, %v12523_v57  ;;  %v12524_v25 = vld [vmem:[#allocation79_spill] sm:$0xff]  ;;  %v9488_v45 = vld [vmem:[%s12019_s1 + $0x10] ss:$0 sm:$0xff]  ;;  %v1152_v9 = vadd.f32 %v1150_v51, %v1079_v4 }
 0x3c0   :  { %1946 = vrot.lane.b32.xlu1 %v9104_v38, %s7478_s10  ;;  %1944 = vrot.lane.b32.xlu0 %v9109_v5, %s7478_s10  ;;  %v1217_v55 = vsel %vm109_vm2, %v1215_v43, %v12522_v1  ;;  %v1288_v30 = vsel %vm106_vm1, %v1286_v37, %v12524_v25  ;;  %v12525_v7 = vld [vmem:[#allocation80_spill] sm:$0xff]  ;;  %v12526_v20 = vld [vmem:[#allocation81_spill] sm:$0xff]  ;;  %v1153_v43 = vadd.f32 %v1151_v50, %v1080_v49  ;;  %v12528_v15 = vld [vmem:[#allocation82_spill] sm:$0xff] }
 0x3c1   :  { %v1291_v11 = vsel %vm109_vm2, %v1289_v44, %v12525_v7  ;;  %v1290_v19 = vsel %vm109_vm2, %v1288_v30, %v12526_v20  ;;  %v12527_v37 = vld [vmem:[#allocation84_spill] sm:$0xff]  ;;  %v9504_v57 = vld [vmem:[%s12018_s0 + $0x50] sm:$0xff]  ;;  %v9509_v44 = vld [vmem:[%s12018_s0 + $0x48] sm:$0xff] }
 0x3c2   :  { %v9409_v54 = vpop.permute.xlu1 %1386  ;;  %v9411_v28 = vpop.permute.xlu0 %1384  ;;  %v1360_v1 = vsel %vm103_vm0, %v12528_v15, %v12527_v37  ;;  %v12529_v49 = vld [vmem:[#allocation85_spill] sm:$0xff]  ;;  %v12530_v4 = vld [vmem:[#allocation83_spill] sm:$0xff]  ;;  %v12531_v51 = vld [vmem:[#allocation86_spill] sm:$0xff]  ;;  %v1293_v20 = vmul.f32 %v9488_v45, %v1291_v11  ;;  %v1292_v37 = vmul.f32 %v9488_v45, %v1290_v19 }
 0x3c3   :  { %12501 = vst [vmem:[#allocation15_spill] sm:$0xff] %v9411_v28  ;;  %v1359_v50 = vsel %vm103_vm0, %v12530_v4, %v12529_v49  ;;  %v1362_v25 = vsel %vm106_vm1, %v1360_v1, %v12531_v51  ;;  %v12534_v15 = vld [vmem:[#allocation87_spill] sm:$0xff]  ;;  %v9531_v49 = vld [vmem:[%s12019_s1 + $0x11] ss:$0 sm:$0xff]  ;;  %v12537_v1 = vld [vmem:[#allocation89_spill] sm:$0xff] }
 0x3c4   :  { %1952 = vrot.lane.b32.xlu1 %v9104_v38, %s7479_s11  ;;  %1950 = vrot.lane.b32.xlu0 %v9109_v5, %s7479_s11  ;;  %12536 = vst [vmem:[#allocation24_spill] sm:$0xff] %v9531_v49  ;;  %v7370_v11 = vld [vmem:[%s12018_s0 + $0x98] sm:$0xff]  ;;  %v12538_v51 = vld [vmem:[#allocation90_spill] sm:$0xff] }
 0x3c5   :  { %v1431_v19 = vsel %vm103_vm0, %v7370_v11, %v12538_v51  ;;  %v12544_v28 = vld [vmem:[#allocation95_spill] sm:$0xff] }
 0x3c6   :  { %v9438_v48 = vpop.permute.xlu1 %1392  ;;  %v9440_v47 = vpop.permute.xlu0 %1390 }
 0x3c7   :  { %12510 = vst [vmem:[#allocation20_spill] sm:$0xff] %v9440_v47  ;;  %v12535_v47 = vld [vmem:[#allocation88_spill] sm:$0xff] }
 0x3c8   :  { %1958 = vrot.lane.b32.xlu1 %v9104_v38, %s7480_s12  ;;  %1956 = vrot.lane.b32.xlu0 %v9109_v5, %s7480_s12 }
 0x3ca   :  { %v9468_v35 = vpop.permute.xlu1 %1443  ;;  %v9470_v42 = vpop.permute.xlu0 %1441 }
 0x3cb   :  { %12519 = vst [vmem:[#allocation22_spill] sm:$0xff] %v9468_v35  ;;  %12520 = vst [vmem:[#allocation19_spill] sm:$0xff] %v9470_v42 }
 0x3cc   :  { %1964 = vrot.lane.b32.xlu1 %v9104_v38, %s7481_s13  ;;  %1962 = vrot.lane.b32.xlu0 %v9109_v5, %s7481_s13  ;;  %v1220_v38 = vmul.f32 %v9475_v17, %v1218_v2  ;;  %v1219_v5 = vmul.f32 %v9475_v17, %v1217_v55  ;;  %v1361_v2 = vsel %vm106_vm1, %v1359_v50, %v12534_v15  ;;  %v7371_v50 = vld [vmem:[%s12018_s0 + $0x90] sm:$0xff]  ;;  %v12540_v15 = vld [vmem:[#allocation92_spill] sm:$0xff] }
 0x3cd   :  { %v1364_v55 = vsel %vm109_vm2, %v1362_v25, %v12535_v47  ;;  %v1363_v4 = vsel %vm109_vm2, %v1361_v2, %v12537_v1  ;;  %v12539_v47 = vld [vmem:[#allocation91_spill] sm:$0xff]  ;;  %v1433_v2 = vsel %vm106_vm1, %v1431_v19, %v12540_v15  ;;  %v12541_v1 = vld [vmem:[#allocation93_spill] sm:$0xff] }
 0x3ce   :  { %v9518_v30 = vpop.permute.xlu1 %1449  ;;  %v9520_v7 = vpop.permute.xlu0 %1447  ;;  %v1430_v25 = vsel %vm103_vm0, %v7371_v50, %v12539_v47  ;;  %v1222_v11 = vadd.f32 %v1220_v38, %v1153_v43  ;;  %v1221_v51 = vadd.f32 %v1219_v5, %v1152_v9  ;;  %v12543_v50 = vld [vmem:[#allocation94_spill] sm:$0xff]  ;;  %v1366_v19 = vmul.f32 %v9531_v49, %v1364_v55  ;;  %v12550_v55 = vld [vmem:[#allocation97_spill] sm:$0xff] }
 0x3cf   :  { %12532 = vst [vmem:[#allocation17_spill] sm:$0xff] %v9518_v30  ;;  %12533 = vst [vmem:[#allocation21_spill] sm:$0xff] %v9520_v7  ;;  %v1432_v42 = vsel %vm106_vm1, %v1430_v25, %v12541_v1  ;;  %v9556_v7 = vld [vmem:[%s12019_s1 + $0x12] ss:$0 sm:$0xff]  ;;  %v1435_v47 = vsel %vm109_vm2, %v1433_v2, %v12543_v50  ;;  %v1365_v43 = vmul.f32 %v9531_v49, %v1363_v4  ;;  %v12548_v25 = vld [vmem:[#allocation96_spill] sm:$0xff] }
 0x3d0   :  { %2027 = vrot.lane.b32.xlu1 %v9504_v57, %s7472_s24  ;;  %2025 = vrot.lane.b32.xlu0 %v9509_v44, %s7472_s24  ;;  %12542 = vst [vmem:[#allocation25_spill] sm:$0xff] %v9556_v7  ;;  %v1434_v3 = vsel %vm109_vm2, %v1432_v42, %v12544_v28  ;;  %v1295_v9 = vadd.f32 %v1293_v20, %v1222_v11  ;;  %v12547_v5 = vld [vmem:[#allocation98_spill] sm:$0xff]  ;;  %v12549_v2 = vld [vmem:[#allocation99_spill] sm:$0xff]  ;;  %v12551_v20 = vld [vmem:[#allocation100_spill] sm:$0xff] }
 0x3d1   :  { %v1294_v38 = vadd.f32 %v1292_v37, %v1221_v51  ;;  %v1504_v15 = vsel %vm103_vm0, %v12548_v25, %v12547_v5  ;;  %v1437_v28 = vmul.f32 %v9556_v7, %v1435_v47  ;;  %v1436_v42 = vmul.f32 %v9556_v7, %v1434_v3  ;;  %v12552_v1 = vld [vmem:[#allocation101_spill] sm:$0xff]  ;;  %v9587_v51 = vld [vmem:[%s12019_s1 + $0x13] ss:$0 sm:$0xff] }
 0x3d2   :  { %v9562_v59 = vpop.permute.xlu1 %1455  ;;  %v9564_v40 = vpop.permute.xlu0 %1453  ;;  %v1503_v4 = vsel %vm103_vm0, %v12550_v55, %v12549_v2  ;;  %v1506_v37 = vsel %vm106_vm1, %v1504_v15, %v12551_v20  ;;  %12553 = vst [vmem:[#allocation27_spill] sm:$0xff] %v9587_v51  ;;  %v12554_v50 = vld [vmem:[#allocation102_spill] sm:$0xff]  ;;  %v1368_v25 = vadd.f32 %v1366_v19, %v1295_v9  ;;  %v12557_v55 = vld [vmem:[#allocation103_spill] sm:$0xff]  ;;  %v12561_v9 = vld [vmem:[#allocation105_spill] sm:$0xff] }
 0x3d3   :  { %12545 = vst [vmem:[#allocation23_spill] sm:$0xff] %v9562_v59  ;;  %12546 = vst [vmem:[#allocation26_spill] sm:$0xff] %v9564_v40  ;;  %v1505_v11 = vsel %vm106_vm1, %v1503_v4, %v12552_v1  ;;  %v1508_v47 = vsel %vm109_vm2, %v1506_v37, %v12554_v50  ;;  %v1367_v2 = vadd.f32 %v1365_v43, %v1294_v38  ;;  %v12558_v37 = vld [vmem:[#allocation106_spill] sm:$0xff]  ;;  %v12559_v50 = vld [vmem:[#allocation104_spill] sm:$0xff] }
 0x3d4   :  { %2033 = vrot.lane.b32.xlu1 %v9504_v57, %s7474_s28  ;;  %2031 = vrot.lane.b32.xlu0 %v9509_v44, %s7474_s28  ;;  %v1507_v15 = vsel %vm109_vm2, %v1505_v11, %v12557_v55  ;;  %v1439_v4 = vadd.f32 %v1437_v28, %v1368_v25  ;;  %v1510_v1 = vmul.f32 %v9587_v51, %v1508_v47  ;;  %v12560_v43 = vld [vmem:[#allocation107_spill] sm:$0xff]  ;;  %v12562_v11 = vld [vmem:[#allocation108_spill] sm:$0xff] }
 0x3d5   :  { %v1438_v20 = vadd.f32 %v1436_v42, %v1367_v2  ;;  %v1577_v40 = vsel %vm103_vm0, %v12559_v50, %v12558_v37  ;;  %v1509_v19 = vmul.f32 %v9587_v51, %v1507_v15  ;;  %v1576_v38 = vsel %vm103_vm0, %v12561_v9, %v12560_v43  ;;  %v7372_v28 = vld [vmem:[%s12018_s0 + $0x99] sm:$0xff]  ;;  %v12566_v37 = vld [vmem:[#allocation109_spill] sm:$0xff]  ;;  %v9625_v50 = vld [vmem:[%s12019_s1 + $0x14] ss:$0 sm:$0xff] }
 0x3d6   :  { %v9591_v5 = vpop.permute.xlu1 %1461  ;;  %v9593_v3 = vpop.permute.xlu0 %1459  ;;  %v1579_v55 = vsel %vm106_vm1, %v1577_v40, %v12562_v11  ;;  %v12563_v42 = vld [vmem:[#allocation112_spill] sm:$0xff]  ;;  %v1578_v15 = vsel %vm106_vm1, %v1576_v38, %v12566_v37  ;;  %12567 = vst [vmem:[#allocation33_spill] sm:$0xff] %v9625_v50  ;;  %v12568_v40 = vld [vmem:[#allocation110_spill] sm:$0xff]  ;;  %v12569_v11 = vld [vmem:[#allocation113_spill] sm:$0xff] }
 0x3d7   :  { %12555 = vst [vmem:[#allocation28_spill] sm:$0xff] %v9591_v5  ;;  %12556 = vst [vmem:[#allocation29_spill] sm:$0xff] %v9593_v3  ;;  %v1646_v47 = vsel %vm103_vm0, %v7372_v28, %v12563_v42  ;;  %v1581_v43 = vsel %vm109_vm2, %v1579_v55, %v12568_v40  ;;  %v7373_v9 = vld [vmem:[%s12018_s0 + $0x91] sm:$0xff]  ;;  %v12574_v40 = vld [vmem:[#allocation116_spill] sm:$0xff] }
 0x3d8   :  { %2039 = vrot.lane.b32.xlu1 %v9504_v57, %s7476_s30  ;;  %2037 = vrot.lane.b32.xlu0 %v9509_v44, %s7476_s30  ;;  %v1645_v28 = vsel %vm103_vm0, %v7373_v9, %v12569_v11  ;;  %v12570_v42 = vld [vmem:[#allocation114_spill] sm:$0xff]  ;;  %v12571_v3 = vld [vmem:[#allocation111_spill] sm:$0xff]  ;;  %v1511_v9 = vadd.f32 %v1509_v19, %v1438_v20  ;;  %v1583_v11 = vmul.f32 %v9625_v50, %v1581_v43 }
 0x3d9   :  { %v1580_v38 = vsel %vm109_vm2, %v1578_v15, %v12571_v3  ;;  %v12572_v37 = vld [vmem:[#allocation115_spill] sm:$0xff]  ;;  %v9643_v55 = vld [vmem:[%s12019_s1 + $0x15] ss:$0 sm:$0xff]  ;;  %v1512_v15 = vadd.f32 %v1510_v1, %v1439_v4 }
 0x3da   :  { %v9616_v25 = vpop.permute.xlu1 %1516  ;;  %v9618_v2 = vpop.permute.xlu0 %1514  ;;  %v1647_v51 = vsel %vm106_vm1, %v1645_v28, %v12572_v37  ;;  %12573 = vst [vmem:[#allocation31_spill] sm:$0xff] %v9643_v55  ;;  %v1582_v37 = vmul.f32 %v9625_v50, %v1580_v38  ;;  %v12581_v5 = vld [vmem:[#allocation119_spill] sm:$0xff]  ;;  %v12582_v20 = vld [vmem:[#allocation122_spill] sm:$0xff]  ;;  %v12587_v38 = vld [vmem:[#allocation128_spill] sm:$0xff] }
 0x3db   :  { %12564 = vst [vmem:[#allocation32_spill] sm:$0xff] %v9616_v25  ;;  %12565 = vst [vmem:[#allocation30_spill] sm:$0xff] %v9618_v2  ;;  %v1648_v2 = vsel %vm106_vm1, %v1646_v47, %v12570_v42  ;;  %v12575_v47 = vld [vmem:[#allocation117_spill] sm:$0xff]  ;;  %v12583_v19 = vld [vmem:[#allocation123_spill] sm:$0xff] }
 0x3dc   :  { %v1650_v7 = vsel %vm109_vm2, %v1648_v2, %v12574_v40  ;;  %2090 = vrot.lane.b32.xlu1 %v9504_v57, %s7471_s23  ;;  %2088 = vrot.lane.b32.xlu0 %v9509_v44, %s7471_s23  ;;  %v1649_v3 = vsel %vm109_vm2, %v1647_v51, %v12575_v47  ;;  %v12578_v40 = vld [vmem:[#allocation120_spill] sm:$0xff]  ;;  %v12580_v25 = vld [vmem:[#allocation121_spill] sm:$0xff]  ;;  %v12588_v47 = vld [vmem:[#allocation126_spill] sm:$0xff] }
 0x3dd   :  { %v1652_v2 = vmul.f32 %v9643_v55, %v1650_v7  ;;  %v1719_v29 = vsel %vm103_vm0, %v12579_v61, %v12578_v40  ;;  %v1718_v51 = vsel %vm103_vm0, %v12581_v5, %v12580_v25  ;;  %v1651_v4 = vmul.f32 %v9643_v55, %v1649_v3  ;;  %v9678_v61 = vld [vmem:[%s12019_s1 + $0x16] ss:$0 sm:$0xff]  ;;  %v12585_v7 = vld [vmem:[#allocation124_spill] sm:$0xff]  ;;  %v12586_v25 = vld [vmem:[#allocation125_spill] sm:$0xff] }
 0x3de   :  { %v9654_v28 = vpop.permute.xlu1 %1522  ;;  %v9656_v42 = vpop.permute.xlu0 %1520  ;;  %v1721_v1 = vsel %vm106_vm1, %v1719_v29, %v12582_v20  ;;  %v1720_v43 = vsel %vm106_vm1, %v1718_v51, %v12583_v19  ;;  %12584 = vst [vmem:[#allocation38_spill] sm:$0xff] %v9678_v61  ;;  %v1792_v3 = vsel %vm103_vm0, %v12588_v47, %v12587_v38  ;;  %v12589_v40 = vld [vmem:[#allocation129_spill] sm:$0xff]  ;;  %v12590_v51 = vld [vmem:[#allocation127_spill] sm:$0xff]  ;;  %v12591_v19 = vld [vmem:[#allocation130_spill] sm:$0xff] }
 0x3df   :  { %12576 = vst [vmem:[#allocation34_spill] sm:$0xff] %v9654_v28  ;;  %12577 = vst [vmem:[#allocation40_spill] sm:$0xff] %v9656_v42  ;;  %v1723_v5 = vsel %vm109_vm2, %v1721_v1, %v12585_v7  ;;  %v1722_v29 = vsel %vm109_vm2, %v1720_v43, %v12586_v25  ;;  %v1791_v20 = vsel %vm103_vm0, %v12590_v51, %v12589_v40  ;;  %v12592_v55 = vld [vmem:[#allocation131_spill] sm:$0xff]  ;;  %v9701_v25 = vld [vmem:[%s12019_s1 + $0x17] ss:$0 sm:$0xff] }
 0x3e0   :  { %2096 = vrot.lane.b32.xlu1 %v9504_v57, %s7473_s27  ;;  %2094 = vrot.lane.b32.xlu0 %v9509_v44, %s7473_s27  ;;  %v1794_v42 = vsel %vm106_vm1, %v1792_v3, %v12591_v19  ;;  %v1793_v50 = vsel %vm106_vm1, %v1791_v20, %v12592_v55  ;;  %v1585_v7 = vadd.f32 %v1583_v11, %v1512_v15  ;;  %v12596_v38 = vld [vmem:[#allocation132_spill] sm:$0xff]  ;;  %v12597_v40 = vld [vmem:[#allocation133_spill] sm:$0xff]  ;;  %v7375_v19 = vld [vmem:[%s12018_s0 + $0x92] sm:$0xff] }
 0x3e1   :  { %v1584_v43 = vadd.f32 %v1582_v37, %v1511_v9  ;;  %12595 = vst [vmem:[#allocation41_spill] sm:$0xff] %v9701_v25  ;;  %v1796_v47 = vsel %vm109_vm2, %v1794_v42, %v12596_v38  ;;  %v1795_v3 = vsel %vm109_vm2, %v1793_v50, %v12597_v40  ;;  %v1725_v51 = vmul.f32 %v9678_v61, %v1723_v5  ;;  %v7374_v15 = vld [vmem:[%s12018_s0 + $0x9a] sm:$0xff]  ;;  %v12598_v9 = vld [vmem:[#allocation134_spill] sm:$0xff] }
 0x3e2   :  { %v9694_v28 = vpop.permute.xlu1 %1528  ;;  %v9696_v1 = vpop.permute.xlu0 %1526  ;;  %v1724_v55 = vmul.f32 %v9678_v61, %v1722_v29  ;;  %v1861_v11 = vsel %vm103_vm0, %v7374_v15, %v12598_v9  ;;  %v1654_v42 = vadd.f32 %v1652_v2, %v1585_v7  ;;  %v12599_v50 = vld [vmem:[#allocation136_spill] sm:$0xff]  ;;  %v1798_v29 = vmul.f32 %v9701_v25, %v1796_v47  ;;  %v12600_v38 = vld [vmem:[#allocation135_spill] sm:$0xff]  ;;  %v12602_v2 = vld [vmem:[#allocation138_spill] sm:$0xff] }
 0x3e3   :  { %12593 = vst [vmem:[#allocation35_spill] sm:$0xff] %v9694_v28  ;;  %12594 = vst [vmem:[#allocation36_spill] sm:$0xff] %v9696_v1  ;;  %v1653_v37 = vadd.f32 %v1651_v4, %v1584_v43  ;;  %v1863_v5 = vsel %vm106_vm1, %v1861_v11, %v12599_v50  ;;  %v1797_v20 = vmul.f32 %v9701_v25, %v1795_v3  ;;  %v9730_v15 = vld [vmem:[%s12019_s1 + $0x18] ss:$0 sm:$0xff]  ;;  %v12605_v47 = vld [vmem:[#allocation137_spill] sm:$0xff] }
 0x3e4   :  { %2102 = vrot.lane.b32.xlu1 %v9504_v57, %s7475_s29  ;;  %2100 = vrot.lane.b32.xlu0 %v9509_v44, %s7475_s29  ;;  %v1860_v40 = vsel %vm103_vm0, %v7375_v19, %v12600_v38  ;;  %12601 = vst [vmem:[#allocation39_spill] sm:$0xff] %v9730_v15  ;;  %v1865_v4 = vsel %vm109_vm2, %v1863_v5, %v12602_v2  ;;  %v12606_v50 = vld [vmem:[#allocation139_spill] sm:$0xff]  ;;  %v12607_v38 = vld [vmem:[#allocation142_spill] sm:$0xff]  ;;  %v12608_v2 = vld [vmem:[#allocation140_spill] sm:$0xff] }
 0x3e5   :  { %v1862_v3 = vsel %vm106_vm1, %v1860_v40, %v12605_v47  ;;  %v1727_v9 = vadd.f32 %v1725_v51, %v1654_v42  ;;  %v1726_v11 = vadd.f32 %v1724_v55, %v1653_v37  ;;  %v1867_v5 = vmul.f32 %v9730_v15, %v1865_v4  ;;  %v12609_v40 = vld [vmem:[#allocation143_spill] sm:$0xff]  ;;  %v12610_v51 = vld [vmem:[#allocation141_spill] sm:$0xff]  ;;  %v12611_v42 = vld [vmem:[#allocation144_spill] sm:$0xff] }
 0x3e6   :  { %v9734_v7 = vpop.permute.xlu1 %1534  ;;  %v9736_v43 = vpop.permute.xlu0 %1532  ;;  %v1864_v19 = vsel %vm109_vm2, %v1862_v3, %v12606_v50  ;;  %v1933_v55 = vsel %vm103_vm0, %v12610_v51, %v12609_v40  ;;  %v12614_v4 = vld [vmem:[#allocation145_spill] sm:$0xff]  ;;  %v12620_v51 = vld [vmem:[#allocation151_spill] sm:$0xff] }
 0x3e7   :  { %12603 = vst [vmem:[#allocation42_spill] sm:$0xff] %v9734_v7  ;;  %12604 = vst [vmem:[#allocation37_spill] sm:$0xff] %v9736_v43  ;;  %v1934_v43 = vsel %vm103_vm0, %v12608_v2, %v12607_v38  ;;  %v1800_v1 = vadd.f32 %v1798_v29, %v1727_v9  ;;  %v1799_v25 = vadd.f32 %v1797_v20, %v1726_v11  ;;  %v9765_v29 = vld [vmem:[%s12019_s1 + $0x19] ss:$0 sm:$0xff]  ;;  %v12616_v20 = vld [vmem:[#allocation146_spill] sm:$0xff] }
 0x3e8   :  { %2108 = vrot.lane.b32.xlu1 %v9504_v57, %s7477_s9  ;;  %2106 = vrot.lane.b32.xlu0 %v9509_v44, %s7477_s9  ;;  %v1936_v37 = vsel %vm106_vm1, %v1934_v43, %v12611_v42  ;;  %v1866_v50 = vmul.f32 %v9730_v15, %v1864_v19  ;;  %v1935_v61 = vsel %vm106_vm1, %v1933_v55, %v12614_v4  ;;  %v12617_v11 = vld [vmem:[#allocation150_spill] sm:$0xff]  ;;  %v12618_v38 = vld [vmem:[#allocation148_spill] sm:$0xff]  ;;  %v12619_v2 = vld [vmem:[#allocation147_spill] sm:$0xff] }
 0x3e9   :  { %12615 = vst [vmem:[#allocation45_spill] sm:$0xff] %v9765_v29  ;;  %v1938_v9 = vsel %vm109_vm2, %v1936_v37, %v12616_v20  ;;  %v2007_v43 = vsel %vm103_vm0, %v12618_v38, %v12617_v11  ;;  %v1937_v40 = vsel %vm109_vm2, %v1935_v61, %v12619_v2  ;;  %v12621_v19 = vld [vmem:[#allocation149_spill] sm:$0xff]  ;;  %v12622_v55 = vld [vmem:[#allocation152_spill] sm:$0xff]  ;;  %v1869_v37 = vadd.f32 %v1867_v5, %v1800_v1  ;;  %v9788_v61 = vld [vmem:[%s12019_s1 + $0x1a] ss:$0 sm:$0xff] }
 0x3ea   :  { %v9755_v47 = vpop.permute.xlu1 %1595  ;;  %v9757_v3 = vpop.permute.xlu0 %1593  ;;  %v2006_v42 = vsel %vm103_vm0, %v12621_v19, %v12620_v51  ;;  %v2009_v4 = vsel %vm106_vm1, %v2007_v43, %v12622_v55  ;;  %v12623_v20 = vld [vmem:[#allocation153_spill] sm:$0xff]  ;;  %12624 = vst [vmem:[#allocation46_spill] sm:$0xff] %v9788_v61  ;;  %v12625_v38 = vld [vmem:[#allocation154_spill] sm:$0xff]  ;;  %v12626_v51 = vld [vmem:[#allocation156_spill] sm:$0xff]  ;;  %v1940_v1 = vmul.f32 %v9765_v29, %v1938_v9 }
 0x3eb   :  { %12612 = vst [vmem:[#allocation43_spill] sm:$0xff] %v9755_v47  ;;  %12613 = vst [vmem:[#allocation44_spill] sm:$0xff] %v9757_v3  ;;  %v2008_v11 = vsel %vm106_vm1, %v2006_v42, %v12623_v20  ;;  %v2011_v2 = vsel %vm109_vm2, %v2009_v4, %v12625_v38  ;;  %v7376_v43 = vld [vmem:[%s12018_s0 + $0xb0] sm:$0xff]  ;;  %v12627_v5 = vld [vmem:[#allocation155_spill] sm:$0xff] }
 0x3ec   :  { %2163 = vrot.lane.b32.xlu1 %v9504_v57, %s7478_s10  ;;  %2161 = vrot.lane.b32.xlu0 %v9509_v44, %s7478_s10  ;;  %v2078_v19 = vsel %vm103_vm0, %v7376_v43, %v12626_v51  ;;  %v2010_v42 = vsel %vm109_vm2, %v2008_v11, %v12627_v5  ;;  %v7377_v55 = vld [vmem:[%s12018_s0 + $0xa8] sm:$0xff]  ;;  %v12629_v4 = vld [vmem:[#allocation158_spill] sm:$0xff]  ;;  %v1939_v43 = vmul.f32 %v9765_v29, %v1937_v40  ;;  %v12632_v9 = vld [vmem:[#allocation159_spill] sm:$0xff] }
 0x3ed   :  { %v12628_v20 = vld [vmem:[#allocation157_spill] sm:$0xff]  ;;  %v2080_v38 = vsel %vm106_vm1, %v2078_v19, %v12629_v4  ;;  %v9817_v11 = vld [vmem:[%s12019_s1 + $0x1b] ss:$0 sm:$0xff]  ;;  %v12634_v5 = vld [vmem:[#allocation160_spill] sm:$0xff]  ;;  %v2013_v4 = vmul.f32 %v9788_v61, %v2011_v2 }
 0x3ee   :  { %v2077_v3 = vsel %vm103_vm0, %v7377_v55, %v12628_v20  ;;  %v9807_v15 = vpop.permute.xlu1 %1601  ;;  %v9809_v47 = vpop.permute.xlu0 %1599  ;;  %12633 = vst [vmem:[#allocation49_spill] sm:$0xff] %v9817_v11  ;;  %v2082_v55 = vsel %vm109_vm2, %v2080_v38, %v12634_v5  ;;  %v12635_v20 = vld [vmem:[#allocation164_spill] sm:$0xff]  ;;  %v12636_v7 = vld [vmem:[#allocation162_spill] sm:$0xff]  ;;  %v2012_v38 = vmul.f32 %v9788_v61, %v2010_v42  ;;  %v12641_v5 = vld [vmem:[#allocation165_spill] sm:$0xff] }
 0x3ef   :  { %12630 = vst [vmem:[#allocation47_spill] sm:$0xff] %v9807_v15  ;;  %12631 = vst [vmem:[#allocation48_spill] sm:$0xff] %v9809_v47  ;;  %v2079_v51 = vsel %vm106_vm1, %v2077_v3, %v12632_v9  ;;  %v2151_v19 = vsel %vm103_vm0, %v12636_v7, %v12635_v20  ;;  %v12637_v47 = vld [vmem:[#allocation161_spill] sm:$0xff]  ;;  %v12638_v29 = vld [vmem:[#allocation166_spill] sm:$0xff]  ;;  %v1868_v9 = vadd.f32 %v1866_v50, %v1799_v25 }
 0x3f0   :  { %v2081_v40 = vsel %vm109_vm2, %v2079_v51, %v12637_v47  ;;  %v2153_v3 = vsel %vm106_vm1, %v2151_v19, %v12638_v29  ;;  %2169 = vrot.lane.b32.xlu1 %v9504_v57, %s7479_s11  ;;  %2167 = vrot.lane.b32.xlu0 %v9509_v44, %s7479_s11  ;;  %v9837_v7 = vld [vmem:[%s12019_s1 + $0x1c] ss:$0 sm:$0xff]  ;;  %v12640_v2 = vld [vmem:[#allocation168_spill] sm:$0xff]  ;;  %v1942_v51 = vadd.f32 %v1940_v1, %v1869_v37  ;;  %v12646_v37 = vld [vmem:[#allocation169_spill] sm:$0xff] }
 0x3f1   :  { %12639 = vst [vmem:[#allocation54_spill] sm:$0xff] %v9837_v7  ;;  %v2155_v47 = vsel %vm109_vm2, %v2153_v3, %v12640_v2  ;;  %v2084_v29 = vmul.f32 %v9817_v11, %v2082_v55  ;;  %v12642_v20 = vld [vmem:[#allocation163_spill] sm:$0xff]  ;;  %v1941_v50 = vadd.f32 %v1939_v43, %v1868_v9  ;;  %v2083_v42 = vmul.f32 %v9817_v11, %v2081_v40  ;;  %v12647_v2 = vld [vmem:[#allocation172_spill] sm:$0xff]  ;;  %v12648_v43 = vld [vmem:[#allocation170_spill] sm:$0xff] }
 0x3f2   :  { %v2150_v19 = vsel %vm103_vm0, %v12642_v20, %v12641_v5  ;;  %v9845_v15 = vpop.permute.xlu1 %1607  ;;  %v9847_v25 = vpop.permute.xlu0 %1605  ;;  %v12645_v61 = vld [vmem:[#allocation167_spill] sm:$0xff]  ;;  %v2015_v59 = vadd.f32 %v2013_v4, %v1942_v51  ;;  %v2157_v3 = vmul.f32 %v9837_v7, %v2155_v47  ;;  %v2224_v40 = vsel %vm103_vm0, %v12648_v43, %v12647_v2  ;;  %v12649_v5 = vld [vmem:[#allocation174_spill] sm:$0xff]  ;;  %v12652_v20 = vld [vmem:[#allocation173_spill] sm:$0xff] }
 0x3f3   :  { %12643 = vst [vmem:[#allocation52_spill] sm:$0xff] %v9845_v15  ;;  %12644 = vst [vmem:[#allocation50_spill] sm:$0xff] %v9847_v25  ;;  %v2152_v28 = vsel %vm106_vm1, %v2150_v19, %v12645_v61  ;;  %v2014_v55 = vadd.f32 %v2012_v38, %v1941_v50  ;;  %v2226_v61 = vsel %vm106_vm1, %v2224_v40, %v12649_v5  ;;  %v12653_v19 = vld [vmem:[#allocation171_spill] sm:$0xff]  ;;  %v12658_v40 = vld [vmem:[#allocation177_spill] sm:$0xff] }
 0x3f4   :  { %v2154_v1 = vsel %vm109_vm2, %v2152_v28, %v12646_v37  ;;  %2175 = vrot.lane.b32.xlu1 %v9504_v57, %s7480_s12  ;;  %2173 = vrot.lane.b32.xlu0 %v9509_v44, %s7480_s12  ;;  %v2086_v9 = vadd.f32 %v2084_v29, %v2015_v59  ;;  %v2223_v37 = vsel %vm103_vm0, %v12653_v19, %v12652_v20  ;;  %v9875_v38 = vld [vmem:[%s12019_s1 + $0x1d] ss:$0 sm:$0xff]  ;;  %v12655_v59 = vld [vmem:[#allocation182_spill] sm:$0xff]  ;;  %v12659_v5 = vld [vmem:[#allocation180_spill] sm:$0xff] }
 0x3f5   :  { %v2085_v28 = vadd.f32 %v2083_v42, %v2014_v55  ;;  %v2156_v51 = vmul.f32 %v9837_v7, %v2154_v1  ;;  %12654 = vst [vmem:[#allocation53_spill] sm:$0xff] %v9875_v38  ;;  %v2228_v29 = vsel %vm109_vm2, %v2226_v61, %v12655_v59  ;;  %v12656_v2 = vld [vmem:[#allocation175_spill] sm:$0xff]  ;;  %v7378_v42 = vld [vmem:[%s12018_s0 + $0x8] sm:$0xff]  ;;  %v12657_v1 = vld [vmem:[#allocation176_spill] sm:$0xff] }
 0x3f6   :  { %v9864_v4 = vpop.permute.xlu1 %1658  ;;  %v9866_v47 = vpop.permute.xlu0 %1656  ;;  %v2159_v50 = vadd.f32 %v2157_v3, %v2086_v9  ;;  %v2225_v43 = vsel %vm106_vm1, %v2223_v37, %v12656_v2  ;;  %v105_v55 = vsel %vm103_vm0, %v7378_v42, %v12657_v1  ;;  %v7379_v3 = vld [vmem:[%s12018_s0] sm:$0xff]  ;;  %v12660_v61 = vld [vmem:[#allocation178_spill] sm:$0xff]  ;;  %v12661_v19 = vld [vmem:[#allocation181_spill] sm:$0xff]  ;;  %v2230_v1 = vmul.f32 %v9875_v38, %v2228_v29 }
 0x3f7   :  { %12650 = vst [vmem:[#allocation51_spill] sm:$0xff] %v9864_v4  ;;  %12651 = vst [vmem:[#allocation55_spill] sm:$0xff] %v9866_v47  ;;  %v104_v9 = vsel %vm103_vm0, %v7379_v3, %v12658_v40  ;;  %v172_v20 = vsel %vm103_vm0, %v12660_v61, %v12659_v5  ;;  %v12662_v37 = vld [vmem:[#allocation179_spill] sm:$0xff]  ;;  %v9911_v42 = vld [vmem:[%s12018_s0 + $0x49] sm:$0xff] }
 0x3f8   :  { %2181 = vrot.lane.b32.xlu1 %v9504_v57, %s7481_s13  ;;  %2179 = vrot.lane.b32.xlu0 %v9509_v44, %s7481_s13  ;;  %v171_v59 = vsel %vm103_vm0, %v12662_v37, %v12661_v19  ;;  %v12663_v2 = vld [vmem:[#allocation183_spill] sm:$0xff]  ;;  %12665 = vst [vmem:[#allocation57_spill] sm:$0xff] %v9911_v42  ;;  %v12666_v40 = vld [vmem:[#allocation184_spill] sm:$0xff]  ;;  %v12672_v47 = vld [vmem:[#allocation189_spill] sm:$0xff] }
 0x3f9   :  { %v2227_v57 = vsel %vm109_vm2, %v2225_v43, %v12663_v2  ;;  %v9906_v44 = vld [vmem:[%s12018_s0 + $0x51] sm:$0xff]  ;;  %v12671_v11 = vld [vmem:[#allocation188_spill] sm:$0xff]  ;;  %v173_v25 = vsel %vm106_vm1, %v171_v59, %v12672_v47 }
 0x3fa   :  { %12664 = vst [vmem:[#allocation56_spill] sm:$0xff] %v9906_v44  ;;  %v7380_v3 = vld [vmem:[%s12018_s0 + $0xb1] sm:$0xff]  ;;  %v9923_v2 = vpop.permute.xlu1 %1664  ;;  %v9925_v7 = vpop.permute.xlu0 %1662  ;;  %v174_v29 = vsel %vm106_vm1, %v172_v20, %v12671_v11  ;;  %v7381_v11 = vld [vmem:[%s12018_s0 + $0xa9] sm:$0xff]  ;;  %v9953_v20 = vld [vmem:[%s12019_s1 + $0x1e] ss:$0 sm:$0xff] }
 0x3fb   :  { %v2293_v5 = vsel %vm103_vm0, %v7380_v3, %v12666_v40  ;;  %v12667_v43 = vld [vmem:[#allocation186_spill] sm:$0xff]  ;;  %v12668_v19 = vld [vmem:[#allocation187_spill] sm:$0xff]  ;;  %12669 = vst [vmem:[#allocation58_spill] sm:$0xff] %v9923_v2  ;;  %12670 = vst [vmem:[#allocation59_spill] sm:$0xff] %v9925_v7 }
 0x3fc   :  { %v108_v61 = vsel %vm106_vm1, %v105_v55, %v12667_v43  ;;  %v107_v37 = vsel %vm106_vm1, %v104_v9, %v12668_v19  ;;  %v12673_v4 = vld [vmem:[#allocation190_spill] sm:$0xff]  ;;  %v12674_v3 = vld [vmem:[#allocation192_spill] sm:$0xff]  ;;  %v12675_v55 = vld [vmem:[#allocation193_spill] sm:$0xff]  ;;  %2242 = vrot.lane.b32.xlu1 %v9906_v44, %s7472_s24  ;;  %2240 = vrot.lane.b32.xlu0 %v9911_v42, %s7472_s24  ;;  %12679 = vst [vmem:[#allocation62_spill] sm:$0xff] %v9953_v20 }
 0x3fd   :  { %v2295_v15 = vsel %vm106_vm1, %v2293_v5, %v12673_v4  ;;  %v111_v40 = vsel %vm109_vm2, %v108_v61, %v12674_v3  ;;  %v110_v43 = vsel %vm109_vm2, %v107_v37, %v12675_v55  ;;  %v12676_v9 = vld [vmem:[#allocation194_spill] sm:$0xff]  ;;  %v12677_v2 = vld [vmem:[#allocation195_spill] sm:$0xff]  ;;  %v12678_v4 = vld [vmem:[#allocation185_spill] sm:$0xff]  ;;  %v2158_v5 = vadd.f32 %v2156_v51, %v2085_v28 }
 0x3fe   :  { %v176_v19 = vsel %vm109_vm2, %v174_v29, %v12676_v9  ;;  %v175_v7 = vsel %vm109_vm2, %v173_v25, %v12677_v2  ;;  %v2292_v47 = vsel %vm103_vm0, %v7381_v11, %v12678_v4  ;;  %v12680_v59 = vld [vmem:[#allocation200_spill] sm:$0xff]  ;;  %v2232_v61 = vadd.f32 %v2230_v1, %v2159_v50  ;;  %v12681_v2 = vld [vmem:[#allocation191_spill] sm:$0xff]  ;;  %v9960_v3 = vpop.permute.xlu1 %1670  ;;  %v9962_v55 = vpop.permute.xlu0 %1668 }
 0x3ff   :  { %v2297_v25 = vsel %vm109_vm2, %v2295_v15, %v12680_v59  ;;  %v2229_v37 = vmul.f32 %v9875_v38, %v2227_v57  ;;  %v2294_v29 = vsel %vm106_vm1, %v2292_v47, %v12681_v2  ;;  %12682 = vst [vmem:[#allocation60_spill] sm:$0xff] %v9960_v3  ;;  %12683 = vst [vmem:[#allocation63_spill] sm:$0xff] %v9962_v55  ;;  %v12684_v15 = vld [vmem:[#allocation198_spill] sm:$0xff]  ;;  %v12685_v28 = vld [vmem:[#allocation196_spill] sm:$0xff] }
 0x400   :  { %v117_v9 = vmul.f32 %v9052_v12, %v111_v40  ;;  %v116_v11 = vmul.f32 %v9052_v12, %v110_v43  ;;  %v182_v4 = vmul.f32 %v9038_v10, %v176_v19  ;;  %v181_v49 = vmul.f32 %v9038_v10, %v175_v7  ;;  %v12686_v50 = vld [vmem:[#allocation199_spill] sm:$0xff]  ;;  %v12687_v57 = vld [vmem:[#allocation197_spill] sm:$0xff]  ;;  %2248 = vrot.lane.b32.xlu1 %v9906_v44, %s7474_s28  ;;  %v12689_v10 = vld [vmem:[#allocation204_spill] sm:$0xff] }
 0x401   :  { %v245_v51 = vsel %vm103_vm0, %v12685_v28, %v12684_v15  ;;  %v244_v1 = vsel %vm103_vm0, %v12687_v57, %v12686_v50  ;;  %v2299_v47 = vmul.f32 %v9953_v20, %v2297_v25  ;;  %2246 = vrot.lane.b32.xlu0 %v9911_v42, %s7474_s28  ;;  %v12688_v12 = vld [vmem:[#allocation201_spill] sm:$0xff]  ;;  %v12690_v7 = vld [vmem:[#allocation202_spill] sm:$0xff]  ;;  %v12692_v2 = vld [vmem:[#allocation207_spill] sm:$0xff]  ;;  %v2231_v25 = vadd.f32 %v2229_v37, %v2158_v5 }
 0x402   :  { %v2296_v40 = vsel %vm109_vm2, %v2294_v29, %v12688_v12  ;;  %v2366_v43 = vsel %vm103_vm0, %v12690_v7, %v12689_v10  ;;  %v12691_v19 = vld [vmem:[#allocation206_spill] sm:$0xff]  ;;  %v246_v15 = vsel %vm106_vm1, %v244_v1, %v12692_v2  ;;  %v12693_v28 = vld [vmem:[#allocation208_spill] sm:$0xff]  ;;  %v12695_v55 = vld [vmem:[#allocation211_spill] sm:$0xff]  ;;  %v9994_v12 = vpop.permute.xlu1 %1676  ;;  %v9996_v3 = vpop.permute.xlu0 %1674  ;;  %v184_v10 = vadd.f32 %v182_v4, %v117_v9 }
 0x403   :  { %v247_v59 = vsel %vm106_vm1, %v245_v51, %v12691_v19  ;;  %v2368_v50 = vsel %vm106_vm1, %v2366_v43, %v12693_v28  ;;  %v12694_v57 = vld [vmem:[#allocation210_spill] sm:$0xff]  ;;  %v248_v29 = vsel %vm109_vm2, %v246_v15, %v12695_v55  ;;  %12696 = vst [vmem:[#allocation61_spill] sm:$0xff] %v9994_v12  ;;  %12697 = vst [vmem:[#allocation64_spill] sm:$0xff] %v9996_v3  ;;  %v12698_v51 = vld [vmem:[#allocation205_spill] sm:$0xff] }
 0x404   :  { %v249_v38 = vsel %vm109_vm2, %v247_v59, %v12694_v57  ;;  %v183_v7 = vadd.f32 %v181_v49, %v116_v11  ;;  %v12699_v19 = vld [vmem:[#allocation203_spill] sm:$0xff]  ;;  %v12701_v37 = vld [vmem:[#allocation214_spill] sm:$0xff]  ;;  %v2301_v59 = vadd.f32 %v2299_v47, %v2232_v61  ;;  %v2298_v55 = vmul.f32 %v9953_v20, %v2296_v40  ;;  %v12702_v2 = vld [vmem:[#allocation209_spill] sm:$0xff]  ;;  %2254 = vrot.lane.b32.xlu1 %v9906_v44, %s7476_s30 }
 0x405   :  { %v2365_v1 = vsel %vm103_vm0, %v12699_v19, %v12698_v51  ;;  %v10004_v5 = vld [vmem:[%s12019_s1 + $0x1f] ss:$0 sm:$0xff]  ;;  %v2370_v43 = vsel %vm109_vm2, %v2368_v50, %v12701_v37  ;;  %2252 = vrot.lane.b32.xlu0 %v9911_v42, %s7476_s30  ;;  %v255_v49 = vmul.f32 %v9070_v18, %v249_v38  ;;  %v254_v9 = vmul.f32 %v9070_v18, %v248_v29  ;;  %v7382_v11 = vld [vmem:[%s12018_s0 + $0x9] sm:$0xff]  ;;  %v12703_v61 = vld [vmem:[#allocation212_spill] sm:$0xff] }
 0x406   :  { %12700 = vst [vmem:[#allocation65_spill] sm:$0xff] %v10004_v5  ;;  %v2367_v15 = vsel %vm106_vm1, %v2365_v1, %v12702_v2  ;;  %v318_v4 = vsel %vm103_vm0, %v7382_v11, %v12703_v61  ;;  %v7383_v47 = vld [vmem:[%s12018_s0 + $0x1] sm:$0xff]  ;;  %v2372_v50 = vmul.f32 %v10004_v5, %v2370_v43  ;;  %v12705_v57 = vld [vmem:[#allocation215_spill] sm:$0xff]  ;;  %v12706_v18 = vld [vmem:[#allocation218_spill] sm:$0xff]  ;;  %v10036_v2 = vpop.permute.xlu1 %1731  ;;  %v10038_v11 = vpop.permute.xlu0 %1729 }
 0x407   :  { %v12704_v40 = vld [vmem:[#allocation213_spill] sm:$0xff]  ;;  %v2369_v38 = vsel %vm109_vm2, %v2367_v15, %v12705_v57  ;;  %v12707_v29 = vld [vmem:[#allocation216_spill] sm:$0xff]  ;;  %v12708_v19 = vld [vmem:[#allocation219_spill] sm:$0xff]  ;;  %12710 = vst [vmem:[#allocation66_spill] sm:$0xff] %v10036_v2 }
 0x408   :  { %v317_v28 = vsel %vm103_vm0, %v7383_v47, %v12704_v40  ;;  %v2439_v51 = vsel %vm103_vm0, %v12707_v29, %v12706_v18  ;;  %v12709_v1 = vld [vmem:[#allocation217_spill] sm:$0xff]  ;;  %12711 = vst [vmem:[#allocation67_spill] sm:$0xff] %v10038_v11  ;;  %v12712_v61 = vld [vmem:[#allocation220_spill] sm:$0xff]  ;;  %v12714_v20 = vld [vmem:[#allocation222_spill] sm:$0xff]  ;;  %2305 = vrot.lane.b32.xlu1 %v9906_v44, %s7471_s23 }
 0x409   :  { %v2438_v37 = vsel %vm103_vm0, %v12709_v1, %v12708_v19  ;;  %v320_v47 = vsel %vm106_vm1, %v318_v4, %v12712_v61  ;;  %v12713_v40 = vld [vmem:[#allocation221_spill] sm:$0xff]  ;;  %v2441_v15 = vsel %vm106_vm1, %v2439_v51, %v12714_v20  ;;  %v12715_v57 = vld [vmem:[#allocation223_spill] sm:$0xff]  ;;  %v12716_v29 = vld [vmem:[#allocation224_spill] sm:$0xff]  ;;  %2303 = vrot.lane.b32.xlu0 %v9911_v42, %s7471_s23 }
 0x40a   :  { %v319_v43 = vsel %vm106_vm1, %v317_v28, %v12713_v40  ;;  %v2440_v18 = vsel %vm106_vm1, %v2438_v37, %v12715_v57  ;;  %v322_v3 = vsel %vm109_vm2, %v320_v47, %v12716_v29  ;;  %v12717_v19 = vld [vmem:[#allocation225_spill] sm:$0xff]  ;;  %v12718_v2 = vld [vmem:[#allocation228_spill] sm:$0xff]  ;;  %v12719_v11 = vld [vmem:[#allocation226_spill] sm:$0xff]  ;;  %v2371_v57 = vmul.f32 %v10004_v5, %v2369_v38  ;;  %v10078_v35 = vpop.permute.xlu1 %1737  ;;  %v10080_v30 = vpop.permute.xlu0 %1735 }
 0x40b   :  { %v321_v1 = vsel %vm109_vm2, %v319_v43, %v12717_v19  ;;  %v387_v12 = vsel %vm103_vm0, %v12719_v11, %v12718_v2  ;;  %v12720_v20 = vld [vmem:[#allocation229_spill] sm:$0xff]  ;;  %v12721_v4 = vld [vmem:[#allocation227_spill] sm:$0xff]  ;;  %v10065_v51 = vld [vmem:[%s12019_s1 + $0x20] ss:$0 sm:$0xff]  ;;  %v2300_v43 = vadd.f32 %v2298_v55, %v2231_v25 }
 0x40c   :  { %v386_v28 = vsel %vm103_vm0, %v12721_v4, %v12720_v20  ;;  %12722 = vst [vmem:[#allocation68_spill] sm:$0xff] %v10065_v51  ;;  %v12723_v37 = vld [vmem:[#allocation230_spill] sm:$0xff]  ;;  %v12724_v47 = vld [vmem:[#allocation231_spill] sm:$0xff]  ;;  %2311 = vrot.lane.b32.xlu1 %v9906_v44, %s7473_s27  ;;  %v12767_v5 = vld [vmem:[#allocation280_spill] sm:$0xff] }
 0x40d   :  { %v2443_v61 = vsel %vm109_vm2, %v2441_v15, %v12723_v37  ;;  %v2442_v2 = vsel %vm109_vm2, %v2440_v18, %v12724_v47  ;;  %v12725_v11 = vld [vmem:[#allocation234_spill] sm:$0xff]  ;;  %v12726_v29 = vld [vmem:[#allocation235_spill] sm:$0xff]  ;;  %v257_v15 = vadd.f32 %v255_v49, %v184_v10  ;;  %v328_v37 = vmul.f32 %v9117_v31, %v322_v3  ;;  %2309 = vrot.lane.b32.xlu0 %v9911_v42, %s7473_s27  ;;  %v12730_v10 = vld [vmem:[#allocation236_spill] sm:$0xff] }
 0x40e   :  { %v389_v40 = vsel %vm106_vm1, %v387_v12, %v12725_v11  ;;  %v388_v19 = vsel %vm106_vm1, %v386_v28, %v12726_v29  ;;  %v12727_v20 = vld [vmem:[#allocation238_spill] sm:$0xff]  ;;  %v327_v18 = vmul.f32 %v9117_v31, %v321_v1  ;;  %v12728_v47 = vld [vmem:[#allocation239_spill] sm:$0xff]  ;;  %v2445_v12 = vmul.f32 %v10065_v51, %v2443_v61  ;;  %v12729_v28 = vld [vmem:[#allocation232_spill] sm:$0xff] }
 0x40f   :  { %v391_v4 = vsel %vm109_vm2, %v389_v40, %v12727_v20  ;;  %v390_v25 = vsel %vm109_vm2, %v388_v19, %v12728_v47  ;;  %v2444_v55 = vmul.f32 %v10065_v51, %v2442_v2  ;;  %v7384_v38 = vld [vmem:[%s12018_s0 + $0xb2] sm:$0xff]  ;;  %v256_v31 = vadd.f32 %v254_v9, %v183_v7  ;;  %v7385_v2 = vld [vmem:[%s12018_s0 + $0xaa] sm:$0xff]  ;;  %v10109_v7 = vld [vmem:[%s12019_s1 + $0x21] ss:$0 sm:$0xff] }
 0x410   :  { %v2508_v11 = vsel %vm103_vm0, %v7384_v38, %v12729_v28  ;;  %v2374_v3 = vadd.f32 %v2372_v50, %v2301_v59  ;;  %v397_v1 = vmul.f32 %v9135_v34, %v391_v4  ;;  %v2373_v61 = vadd.f32 %v2371_v57, %v2300_v43  ;;  %v12731_v40 = vld [vmem:[#allocation233_spill] sm:$0xff]  ;;  %12732 = vst [vmem:[#allocation69_spill] sm:$0xff] %v10109_v7  ;;  %v12733_v59 = vld [vmem:[#allocation244_spill] sm:$0xff]  ;;  %v10113_v50 = vpop.permute.xlu1 %1743  ;;  %v10115_v43 = vpop.permute.xlu0 %1741  ;;  %v12766_v51 = vld [vmem:[#allocation282_spill] sm:$0xff] }
 0x411   :  { %v2510_v49 = vsel %vm106_vm1, %v2508_v11, %v12730_v10  ;;  %v2507_v29 = vsel %vm103_vm0, %v7385_v2, %v12731_v40  ;;  %v396_v19 = vmul.f32 %v9135_v34, %v390_v25  ;;  %v330_v57 = vadd.f32 %v328_v37, %v257_v15  ;;  %v12734_v4 = vld [vmem:[#allocation237_spill] sm:$0xff]  ;;  %2317 = vrot.lane.b32.xlu1 %v9906_v44, %s7475_s29  ;;  %v12736_v10 = vld [vmem:[#allocation242_spill] sm:$0xff]  ;;  %v12738_v37 = vld [vmem:[#allocation243_spill] sm:$0xff] }
 0x412   :  { %v2512_v9 = vsel %vm109_vm2, %v2510_v49, %v12733_v59  ;;  %v329_v20 = vadd.f32 %v327_v18, %v256_v31  ;;  %v2509_v47 = vsel %vm106_vm1, %v2507_v29, %v12734_v4  ;;  %v2447_v38 = vadd.f32 %v2445_v12, %v2374_v3  ;;  %v12735_v34 = vld [vmem:[#allocation245_spill] sm:$0xff]  ;;  %2315 = vrot.lane.b32.xlu0 %v9911_v42, %s7475_s29  ;;  %v12737_v49 = vld [vmem:[#allocation240_spill] sm:$0xff]  ;;  %v12740_v3 = vld [vmem:[#allocation250_spill] sm:$0xff] }
 0x413   :  { %v10119_v28 = vadd.f32 %v2444_v55, %v2373_v61  ;;  %v2511_v25 = vsel %vm109_vm2, %v2509_v47, %v12735_v34  ;;  %v399_v11 = vadd.f32 %v397_v1, %v330_v57  ;;  %v460_v15 = vsel %vm103_vm0, %v12737_v49, %v12736_v10  ;;  %v12739_v18 = vld [vmem:[#allocation241_spill] sm:$0xff]  ;;  %v12741_v2 = vld [vmem:[#allocation251_spill] sm:$0xff]  ;;  %v12742_v29 = vld [vmem:[#allocation256_spill] sm:$0xff] }
 0x414   :  { %v459_v12 = vsel %vm103_vm0, %v12739_v18, %v12738_v37  ;;  %v2514_v55 = vmul.f32 %v10109_v7, %v2512_v9  ;;  %v398_v31 = vadd.f32 %v396_v19, %v329_v20  ;;  %v462_v61 = vsel %vm106_vm1, %v460_v15, %v12740_v3  ;;  %v7386_v1 = vld [vmem:[%s12018_s0 + $0xa] sm:$0xff]  ;;  %v10143_v57 = vpop.permute.xlu1 %1749  ;;  %v10145_v4 = vpop.permute.xlu0 %1747  ;;  %v12745_v47 = vld [vmem:[#allocation255_spill] sm:$0xff]  ;;  %v12746_v10 = vld [vmem:[#allocation264_spill] sm:$0xff] }
 0x415   :  { %v461_v40 = vsel %vm106_vm1, %v459_v12, %v12741_v2  ;;  %v533_v59 = vsel %vm103_vm0, %v7386_v1, %v12742_v29  ;;  %12743 = vst [vmem:[#allocation70_spill] sm:$0xff] %v10145_v4  ;;  %v2513_v9 = vmul.f32 %v10109_v7, %v2511_v25  ;;  %v12744_v19 = vld [vmem:[#allocation254_spill] sm:$0xff]  ;;  %v12747_v15 = vld [vmem:[#allocation248_spill] sm:$0xff]  ;;  %v12749_v3 = vld [vmem:[#allocation257_spill] sm:$0xff]  ;;  %2323 = vrot.lane.b32.xlu1 %v9906_v44, %s7477_s9 }
 0x416   :  { %v464_v20 = vsel %vm109_vm2, %v462_v61, %v12744_v19  ;;  %v463_v34 = vsel %vm109_vm2, %v461_v40, %v12745_v47  ;;  %v535_v49 = vsel %vm106_vm1, %v533_v59, %v12746_v10  ;;  %v12748_v37 = vld [vmem:[#allocation246_spill] sm:$0xff]  ;;  %v7387_v12 = vld [vmem:[%s12018_s0 + $0x2] sm:$0xff]  ;;  %2321 = vrot.lane.b32.xlu0 %v9911_v42, %s7477_s9  ;;  %v10168_v40 = vadd.f32 %v2514_v55, %v2447_v38  ;;  %v12753_v29 = vld [vmem:[#allocation247_spill] sm:$0xff] }
 0x417   :  { %v2581_v18 = vsel %vm103_vm0, %v12748_v37, %v12747_v15  ;;  %v532_v25 = vsel %vm103_vm0, %v7387_v12, %v12749_v3  ;;  %v12750_v2 = vld [vmem:[#allocation268_spill] sm:$0xff]  ;;  %v12752_v1 = vld [vmem:[#allocation249_spill] sm:$0xff]  ;;  %v469_v37 = vmul.f32 %v9170_v46, %v463_v34  ;;  %v12758_v38 = vld [vmem:[#allocation270_spill] sm:$0xff] }
 0x418   :  { %v537_v61 = vsel %vm109_vm2, %v535_v49, %v12750_v2  ;;  %12751 = vst [vmem:[#allocation71_spill] sm:$0xff] %v10168_v40  ;;  %v2580_v59 = vsel %vm103_vm0, %v12753_v29, %v12752_v1  ;;  %v12754_v19 = vld [vmem:[#allocation252_spill] sm:$0xff]  ;;  %v12755_v10 = vld [vmem:[#allocation265_spill] sm:$0xff]  ;;  %v470_v49 = vmul.f32 %v9170_v46, %v464_v20  ;;  %v10184_v7 = vpop.permute.xlu1 %1810  ;;  %v10186_v1 = vpop.permute.xlu0 %1808  ;;  %v12762_v20 = vld [vmem:[#allocation271_spill] sm:$0xff]  ;;  %v675_v40 = vsel %vm103_vm0, %v12767_v5, %v12766_v51 }
 0x419   :  { %v2583_v47 = vsel %vm106_vm1, %v2581_v18, %v12754_v19  ;;  %v534_v15 = vsel %vm106_vm1, %v532_v25, %v12755_v10  ;;  %v12756_v12 = vld [vmem:[#allocation269_spill] sm:$0xff]  ;;  %v12757_v2 = vld [vmem:[#allocation272_spill] sm:$0xff]  ;;  %12759 = vst [vmem:[#allocation76_spill] sm:$0xff] %v10186_v1  ;;  %v543_v25 = vmul.f32 %v9190_v26, %v537_v61  ;;  %2378 = vrot.lane.b32.xlu1 %v9906_v44, %s7478_s10 }
 0x41a   :  { %v536_v3 = vsel %vm109_vm2, %v534_v15, %v12756_v12  ;;  %v602_v55 = vsel %vm103_vm0, %v12758_v38, %v12757_v2  ;;  %v12760_v29 = vld [vmem:[#allocation253_spill] sm:$0xff]  ;;  %v12763_v34 = vld [vmem:[#allocation276_spill] sm:$0xff]  ;;  %v12765_v2 = vld [vmem:[#allocation278_spill] sm:$0xff]  ;;  %2376 = vrot.lane.b32.xlu0 %v9911_v42, %s7478_s10  ;;  %v471_v5 = vadd.f32 %v469_v37, %v398_v31 }
 0x41b   :  { %v2582_v18 = vsel %vm106_vm1, %v2580_v59, %v12760_v29  ;;  %v12761_v19 = vld [vmem:[#allocation273_spill] sm:$0xff]  ;;  %v604_v10 = vsel %vm106_vm1, %v602_v55, %v12763_v34  ;;  %v542_v61 = vmul.f32 %v9190_v26, %v536_v3  ;;  %v12768_v59 = vld [vmem:[#allocation279_spill] sm:$0xff]  ;;  %v12774_v3 = vld [vmem:[#allocation258_spill] sm:$0xff] }
 0x41c   :  { %v601_v46 = vsel %vm103_vm0, %v12762_v20, %v12761_v19  ;;  %v12764_v15 = vld [vmem:[#allocation277_spill] sm:$0xff]  ;;  %v606_v38 = vsel %vm109_vm2, %v604_v10, %v12765_v2  ;;  %v12769_v29 = vld [vmem:[#allocation283_spill] sm:$0xff]  ;;  %v472_v10 = vadd.f32 %v470_v49, %v399_v11  ;;  %v12773_v2 = vld [vmem:[#allocation286_spill] sm:$0xff]  ;;  %v10219_v4 = vpop.permute.xlu1 %1816  ;;  %v10221_v26 = vpop.permute.xlu0 %1814 }
 0x41d   :  { %v603_v12 = vsel %vm106_vm1, %v601_v46, %v12764_v15  ;;  %v12770_v19 = vld [vmem:[#allocation281_spill] sm:$0xff]  ;;  %v12771_v46 = vld [vmem:[#allocation284_spill] sm:$0xff]  ;;  %v12776_v11 = vld [vmem:[#allocation287_spill] sm:$0xff]  ;;  %2384 = vrot.lane.b32.xlu1 %v9906_v44, %s7479_s11 }
 0x41e   :  { %v605_v55 = vsel %vm109_vm2, %v603_v12, %v12768_v59  ;;  %v674_v20 = vsel %vm103_vm0, %v12770_v19, %v12769_v29  ;;  %v677_v34 = vsel %vm106_vm1, %v675_v40, %v12771_v46  ;;  %v12772_v51 = vld [vmem:[#allocation285_spill] sm:$0xff]  ;;  %v2585_v12 = vsel %vm109_vm2, %v2583_v47, %v12774_v3  ;;  %v12775_v59 = vld [vmem:[#allocation259_spill] sm:$0xff]  ;;  %v7388_v19 = vld [vmem:[%s12018_s0 + $0x20] sm:$0xff]  ;;  %2382 = vrot.lane.b32.xlu0 %v9911_v42, %s7479_s11 }
 0x41f   :  { %v676_v15 = vsel %vm106_vm1, %v674_v20, %v12772_v51  ;;  %v679_v1 = vsel %vm109_vm2, %v677_v34, %v12773_v2  ;;  %v2584_v29 = vsel %vm109_vm2, %v2582_v18, %v12775_v59  ;;  %v612_v40 = vmul.f32 %v9228_v0, %v606_v38  ;;  %v12777_v20 = vld [vmem:[#allocation288_spill] sm:$0xff]  ;;  %v12779_v38 = vld [vmem:[#allocation289_spill] sm:$0xff]  ;;  %v12780_v34 = vld [vmem:[#allocation290_spill] sm:$0xff] }
 0x420   :  { %v678_v31 = vsel %vm109_vm2, %v676_v15, %v12776_v11  ;;  %v545_v49 = vadd.f32 %v543_v25, %v472_v10  ;;  %v611_v37 = vmul.f32 %v9228_v0, %v605_v55  ;;  %v750_v46 = vsel %vm103_vm0, %v7388_v19, %v12777_v20  ;;  %v10243_v47 = vld [vmem:[%s12019_s1 + $0x22] ss:$0 sm:$0xff]  ;;  %v7389_v25 = vld [vmem:[%s12018_s0 + $0x18] sm:$0xff]  ;;  %v10261_v11 = vpop.permute.xlu1 %1822  ;;  %v10263_v19 = vpop.permute.xlu0 %1820 }
 0x421   :  { %12778 = vst [vmem:[#allocation74_spill] sm:$0xff] %v10243_v47  ;;  %v544_v18 = vadd.f32 %v542_v61, %v471_v5  ;;  %v685_v0 = vmul.f32 %v9247_v22, %v679_v1  ;;  %v749_v55 = vsel %vm103_vm0, %v7389_v25, %v12779_v38  ;;  %v752_v10 = vsel %vm106_vm1, %v750_v46, %v12780_v34  ;;  %v12781_v15 = vld [vmem:[#allocation291_spill] sm:$0xff]  ;;  %v12782_v3 = vld [vmem:[#allocation292_spill] sm:$0xff]  ;;  %v12784_v1 = vld [vmem:[#allocation294_spill] sm:$0xff] }
 0x422   :  { %v684_v51 = vmul.f32 %v9247_v22, %v678_v31  ;;  %v751_v2 = vsel %vm106_vm1, %v749_v55, %v12781_v15  ;;  %v754_v61 = vsel %vm109_vm2, %v752_v10, %v12782_v3  ;;  %v12783_v5 = vld [vmem:[#allocation296_spill] sm:$0xff]  ;;  %12785 = vst [vmem:[#allocation77_spill] sm:$0xff] %v10263_v19  ;;  %v10266_v20 = vadd.f32 %v2513_v9, %v10119_v28  ;;  %v12786_v25 = vld [vmem:[#allocation293_spill] sm:$0xff]  ;;  %v12787_v31 = vld [vmem:[#allocation298_spill] sm:$0xff] }
 0x423   :  { %v819_v59 = vsel %vm103_vm0, %v12784_v1, %v12783_v5  ;;  %v614_v46 = vadd.f32 %v612_v40, %v545_v49  ;;  %v753_v22 = vsel %vm109_vm2, %v751_v2, %v12786_v25  ;;  %v10273_v55 = vmul.f32 %v10243_v47, %v2585_v12  ;;  %v12788_v10 = vld [vmem:[#allocation300_spill] sm:$0xff]  ;;  %2390 = vrot.lane.b32.xlu1 %v9906_v44, %s7480_s12  ;;  %v12789_v49 = vld [vmem:[#allocation297_spill] sm:$0xff]  ;;  %v12790_v2 = vld [vmem:[#allocation295_spill] sm:$0xff] }
 0x424   :  { %v821_v38 = vsel %vm106_vm1, %v819_v59, %v12787_v31  ;;  %v613_v34 = vadd.f32 %v611_v37, %v544_v18  ;;  %2388 = vrot.lane.b32.xlu0 %v9911_v42, %s7480_s12  ;;  %v10282_v28 = vmul.f32 %v10243_v47, %v2584_v29  ;;  %v760_v40 = vmul.f32 %v9286_v32, %v754_v61  ;;  %v12791_v3 = vld [vmem:[#allocation299_spill] sm:$0xff]  ;;  %v12792_v1 = vld [vmem:[#allocation304_spill] sm:$0xff]  ;;  %v12793_v59 = vld [vmem:[#allocation302_spill] sm:$0xff]  ;;  %v10294_v31 = vpop.permute.xlu1 %1873  ;;  %v10296_v29 = vpop.permute.xlu0 %1871 }
 0x425   :  { %v823_v15 = vsel %vm109_vm2, %v821_v38, %v12788_v10  ;;  %v687_v9 = vadd.f32 %v685_v0, %v614_v46  ;;  %v818_v12 = vsel %vm103_vm0, %v12790_v2, %v12789_v49  ;;  %v759_v18 = vmul.f32 %v9286_v32, %v753_v22  ;;  %12794 = vst [vmem:[#allocation75_spill] sm:$0xff] %v10296_v29  ;;  %v12795_v61 = vld [vmem:[#allocation301_spill] sm:$0xff]  ;;  %v12798_v22 = vld [vmem:[#allocation306_spill] sm:$0xff]  ;;  %v12799_v10 = vld [vmem:[#allocation307_spill] sm:$0xff] }
 0x426   :  { %v686_v37 = vadd.f32 %v684_v51, %v613_v34  ;;  %v820_v5 = vsel %vm106_vm1, %v818_v12, %v12791_v3  ;;  %v892_v25 = vsel %vm103_vm0, %v12793_v59, %v12792_v1  ;;  %v829_v0 = vmul.f32 %v9323_v52, %v823_v15  ;;  %v12796_v38 = vld [vmem:[#allocation305_spill] sm:$0xff]  ;;  %v12797_v51 = vld [vmem:[#allocation303_spill] sm:$0xff]  ;;  %v12800_v2 = vld [vmem:[#allocation308_spill] sm:$0xff] }
 0x427   :  { %v822_v46 = vsel %vm109_vm2, %v820_v5, %v12795_v61  ;;  %v891_v32 = vsel %vm103_vm0, %v12797_v51, %v12796_v38  ;;  %v894_v34 = vsel %vm106_vm1, %v892_v25, %v12798_v22  ;;  %v7390_v15 = vld [vmem:[%s12018_s0 + $0x21] sm:$0xff]  ;;  %v12801_v3 = vld [vmem:[#allocation310_spill] sm:$0xff]  ;;  %2396 = vrot.lane.b32.xlu1 %v9906_v44, %s7481_s13  ;;  %v762_v61 = vadd.f32 %v760_v40, %v687_v9  ;;  %v7391_v9 = vld [vmem:[%s12018_s0 + $0x19] sm:$0xff] }
 0x428   :  { %v893_v49 = vsel %vm106_vm1, %v891_v32, %v12799_v10  ;;  %v896_v12 = vsel %vm109_vm2, %v894_v34, %v12800_v2  ;;  %v965_v5 = vsel %vm103_vm0, %v7390_v15, %v12801_v3  ;;  %2394 = vrot.lane.b32.xlu0 %v9911_v42, %s7481_s13  ;;  %v12802_v1 = vld [vmem:[#allocation262_spill] sm:$0xff]  ;;  %v12803_v59 = vld [vmem:[#allocation260_spill] sm:$0xff]  ;;  %v12804_v38 = vld [vmem:[#allocation309_spill] sm:$0xff]  ;;  %v761_v2 = vadd.f32 %v759_v18, %v686_v37 }
 0x429   :  { %v2654_v25 = vsel %vm103_vm0, %v12803_v59, %v12802_v1  ;;  %v895_v51 = vsel %vm109_vm2, %v893_v49, %v12804_v38  ;;  %v12805_v32 = vld [vmem:[#allocation312_spill] sm:$0xff]  ;;  %v10329_v34 = vld [vmem:[%s12018_s0 + $0x52] sm:$0xff]  ;;  %v10334_v10 = vld [vmem:[%s12018_s0 + $0x4a] sm:$0xff]  ;;  %v828_v15 = vmul.f32 %v9323_v52, %v822_v46  ;;  %v10344_v1 = vpop.permute.xlu1 %1879  ;;  %v10346_v59 = vpop.permute.xlu0 %1877  ;;  %v831_v38 = vadd.f32 %v829_v0, %v762_v61 }
 0x42a   :  { %v967_v22 = vsel %vm106_vm1, %v965_v5, %v12805_v32  ;;  %v12806_v40 = vld [vmem:[#allocation311_spill] sm:$0xff]  ;;  %v12807_v3 = vld [vmem:[#allocation314_spill] sm:$0xff]  ;;  %12808 = vst [vmem:[#allocation72_spill] sm:$0xff] %v10346_v59  ;;  %v902_v32 = vmul.f32 %v9339_v60, %v896_v12  ;;  %v12809_v37 = vld [vmem:[#allocation313_spill] sm:$0xff]  ;;  %v901_v42 = vmul.f32 %v9339_v60, %v895_v51 }
 0x42b   :  { %v964_v49 = vsel %vm103_vm0, %v7391_v9, %v12806_v40  ;;  %v969_v5 = vsel %vm109_vm2, %v967_v22, %v12807_v3  ;;  %v12810_v18 = vld [vmem:[#allocation318_spill] sm:$0xff]  ;;  %v12811_v46 = vld [vmem:[#allocation316_spill] sm:$0xff]  ;;  %v12812_v9 = vld [vmem:[#allocation315_spill] sm:$0xff]  ;;  %2457 = vrot.lane.b32.xlu1 %v10329_v34, %s7472_s24 }
 0x42c   :  { %v966_v52 = vsel %vm106_vm1, %v964_v49, %v12809_v37  ;;  %v1034_v47 = vsel %vm103_vm0, %v12811_v46, %v12810_v18  ;;  %v12813_v22 = vld [vmem:[#allocation320_spill] sm:$0xff]  ;;  %2455 = vrot.lane.b32.xlu0 %v10334_v10, %s7472_s24  ;;  %v975_v0 = vmul.f32 %v9381_v58, %v969_v5  ;;  %v12814_v12 = vld [vmem:[#allocation319_spill] sm:$0xff]  ;;  %v12815_v61 = vld [vmem:[#allocation317_spill] sm:$0xff] }
 0x42d   :  { %v968_v40 = vsel %vm109_vm2, %v966_v52, %v12812_v9  ;;  %v1036_v3 = vsel %vm106_vm1, %v1034_v47, %v12813_v22  ;;  %v1033_v49 = vsel %vm103_vm0, %v12815_v61, %v12814_v12  ;;  %v12816_v37 = vld [vmem:[#allocation322_spill] sm:$0xff]  ;;  %v12818_v52 = vld [vmem:[#allocation324_spill] sm:$0xff]  ;;  %v12819_v47 = vld [vmem:[#allocation263_spill] sm:$0xff]  ;;  %v830_v22 = vadd.f32 %v828_v15, %v761_v2  ;;  %v10379_v19 = vpop.permute.xlu1 %1885  ;;  %v10381_v12 = vpop.permute.xlu0 %1883 }
 0x42e   :  { %v1038_v60 = vsel %vm109_vm2, %v1036_v3, %v12816_v37  ;;  %v12817_v51 = vld [vmem:[#allocation326_spill] sm:$0xff]  ;;  %v12820_v46 = vld [vmem:[#allocation261_spill] sm:$0xff]  ;;  %v12822_v5 = vld [vmem:[#allocation328_spill] sm:$0xff]  ;;  %v904_v3 = vadd.f32 %v902_v32, %v831_v38  ;;  %v974_v61 = vmul.f32 %v9381_v58, %v968_v40 }
 0x42f   :  { %v1107_v18 = vsel %vm103_vm0, %v12818_v52, %v12817_v51  ;;  %v2653_v9 = vsel %vm103_vm0, %v12820_v46, %v12819_v47  ;;  %v12821_v44 = vld [vmem:[#allocation321_spill] sm:$0xff]  ;;  %v12823_v37 = vld [vmem:[#allocation323_spill] sm:$0xff]  ;;  %v12824_v52 = vld [vmem:[#allocation330_spill] sm:$0xff]  ;;  %v1044_v2 = vmul.f32 %v9397_v41, %v1038_v60  ;;  %2463 = vrot.lane.b32.xlu1 %v10329_v34, %s7474_s28  ;;  %v903_v58 = vadd.f32 %v901_v42, %v830_v22 }
 0x430   :  { %v1035_v29 = vsel %vm106_vm1, %v1033_v49, %v12821_v44  ;;  %v1109_v59 = vsel %vm106_vm1, %v1107_v18, %v12822_v5  ;;  %v12825_v15 = vld [vmem:[#allocation327_spill] sm:$0xff]  ;;  %v12826_v44 = vld [vmem:[#allocation325_spill] sm:$0xff]  ;;  %v12827_v46 = vld [vmem:[#allocation332_spill] sm:$0xff]  ;;  %2461 = vrot.lane.b32.xlu0 %v10334_v10, %s7474_s28 }
 0x431   :  { %v1037_v51 = vsel %vm109_vm2, %v1035_v29, %v12823_v37  ;;  %v1111_v47 = vsel %vm109_vm2, %v1109_v59, %v12824_v52  ;;  %v1106_v49 = vsel %vm103_vm0, %v12826_v44, %v12825_v15  ;;  %v7392_v18 = vld [vmem:[%s12018_s0 + $0x22] sm:$0xff]  ;;  %v977_v29 = vadd.f32 %v975_v0, %v904_v3  ;;  %v12829_v40 = vld [vmem:[#allocation334_spill] sm:$0xff]  ;;  %v12830_v37 = vld [vmem:[#allocation331_spill] sm:$0xff]  ;;  %v10413_v42 = vpop.permute.xlu1 %1891  ;;  %v10415_v0 = vpop.permute.xlu0 %1889 }
 0x432   :  { %v1180_v38 = vsel %vm103_vm0, %v7392_v18, %v12827_v46  ;;  %v12828_v59 = vld [vmem:[#allocation329_spill] sm:$0xff]  ;;  %v1117_v5 = vmul.f32 %v9432_v13, %v1111_v47  ;;  %v1249_v44 = vsel %vm103_vm0, %v9074_v62, %v9124_v8  ;;  %v12831_v22 = vld [vmem:[#allocation266_spill] sm:$0xff]  ;;  %v1043_v47 = vmul.f32 %v9397_v41, %v1037_v51 }
 0x433   :  { %v1108_v32 = vsel %vm106_vm1, %v1106_v49, %v12828_v59  ;;  %v1182_v60 = vsel %vm106_vm1, %v1180_v38, %v12829_v40  ;;  %v10419_v3 = vsel %vm106_vm1, %v2654_v25, %v12831_v22  ;;  %v976_v49 = vadd.f32 %v974_v61, %v903_v58  ;;  %v12832_v62 = vld [vmem:[#allocation333_spill] sm:$0xff]  ;;  %2469 = vrot.lane.b32.xlu1 %v10329_v34, %s7476_s30  ;;  %v12838_v22 = vld [vmem:[#allocation23_spill] sm:$0xff] }
 0x434   :  { %v1110_v52 = vsel %vm109_vm2, %v1108_v32, %v12830_v37  ;;  %v1184_v15 = vsel %vm109_vm2, %v1182_v60, %v9020_v14  ;;  %v1251_v18 = vsel %vm106_vm1, %v1249_v44, %v9153_v24  ;;  %v1046_v46 = vadd.f32 %v1044_v2, %v977_v29  ;;  %v7393_v14 = vld [vmem:[%s12018_s0 + $0x1a] sm:$0xff]  ;;  %2467 = vrot.lane.b32.xlu0 %v10334_v10, %s7476_s30 }
 0x435   :  { %v1179_v8 = vsel %vm103_vm0, %v7393_v14, %v12832_v62  ;;  %v1253_v38 = vsel %vm109_vm2, %v1251_v18, %v9194_v27  ;;  %v1116_v41 = vmul.f32 %v9432_v13, %v1110_v52  ;;  %v12833_v24 = vld [vmem:[#allocation335_spill] sm:$0xff]  ;;  %v1190_v61 = vmul.f32 %v9475_v17, %v1184_v15  ;;  %v10449_v29 = vpop.permute.xlu1 %1946  ;;  %v10451_v59 = vpop.permute.xlu0 %1944  ;;  %v12837_v15 = vld [vmem:[#allocation24_spill] sm:$0xff]  ;;  %v12840_v62 = vld [vmem:[#allocation34_spill] sm:$0xff] }
 0x436   :  { %v1181_v25 = vsel %vm106_vm1, %v1179_v8, %v12833_v24  ;;  %v1322_v51 = vsel %vm103_vm0, %v9235_v16, %v9272_v56  ;;  %v1119_v2 = vadd.f32 %v1117_v5, %v1046_v46  ;;  %v1248_v58 = vsel %vm103_vm0, %v9076_v23, %v9126_v6  ;;  %v12835_v5 = vld [vmem:[#allocation22_spill] sm:$0xff]  ;;  %v12839_v46 = vld [vmem:[#allocation28_spill] sm:$0xff] }
 0x437   :  { %v1183_v27 = vsel %vm109_vm2, %v1181_v25, %v9022_v63  ;;  %v1324_v13 = vsel %vm106_vm1, %v1322_v51, %v9297_v36  ;;  %v1250_v32 = vsel %vm106_vm1, %v1248_v58, %v9155_v21  ;;  %v1259_v16 = vmul.f32 %v9488_v45, %v1253_v38  ;;  %v7394_v63 = vld [vmem:[%s12018_s0 + $0x38] sm:$0xff]  ;;  %2520 = vrot.lane.b32.xlu1 %v10329_v34, %s7471_s23  ;;  %v12841_v8 = vld [vmem:[#allocation32_spill] sm:$0xff]  ;;  %v12842_v38 = vld [vmem:[#allocation13_spill] sm:$0xff] }
 0x438   :  { %v1326_v56 = vsel %vm109_vm2, %v1324_v13, %v9343_v33  ;;  %v1397_v23 = vsel %vm103_vm0, %v7394_v63, %v9374_v53  ;;  %v1045_v6 = vadd.f32 %v1043_v47, %v976_v49  ;;  %v1252_v36 = vsel %vm109_vm2, %v1250_v32, %v9196_v39  ;;  %2518 = vrot.lane.b32.xlu0 %v10334_v10, %s7471_s23  ;;  %v12834_v53 = vld [vmem:[#allocation17_spill] sm:$0xff]  ;;  %v12836_v39 = vld [vmem:[#allocation267_spill] sm:$0xff]  ;;  %v12847_v13 = vld [vmem:[#allocation42_spill] sm:$0xff]  ;;  %s5712_s23 = sld [smem:[#allocation4 + $0x3]] }
 0x439   :  { %v1399_v40 = vsel %vm106_vm1, %v1397_v23, %v9409_v54  ;;  %v1192_v21 = vadd.f32 %v1190_v61, %v1119_v2  ;;  %v1189_v33 = vmul.f32 %v9475_v17, %v1183_v27  ;;  %v1466_v37 = vsel %vm103_vm0, %v12835_v5, %v12834_v53  ;;  %v10484_v47 = vpop.permute.xlu1 %1952  ;;  %v10486_v17 = vpop.permute.xlu0 %1950  ;;  %v12844_v25 = vld [vmem:[#allocation25_spill] sm:$0xff]  ;;  %v12845_v51 = vld [vmem:[#allocation35_spill] sm:$0xff]  ;;  %v12846_v27 = vld [vmem:[#allocation14_spill] sm:$0xff] }
 0x43a   :  { %v1401_v60 = vsel %vm109_vm2, %v1399_v40, %v9438_v48  ;;  %v10479_v52 = vsel %vm106_vm1, %v2653_v9, %v12836_v39  ;;  %v1118_v54 = vadd.f32 %v1116_v41, %v1045_v6  ;;  %v1332_v44 = vmul.f32 %v12837_v15, %v1326_v56  ;;  %v12843_v41 = vld [vmem:[#allocation12_spill] sm:$0xff]  ;;  %v12848_v56 = vld [vmem:[#allocation43_spill] sm:$0xff]  ;;  %v12849_v6 = vld [vmem:[#allocation18_spill] sm:$0xff] }
 0x43b   :  { %v1468_v49 = vsel %vm106_vm1, %v1466_v37, %v12838_v22  ;;  %v1261_v18 = vadd.f32 %v1259_v16, %v1192_v21  ;;  %v1258_v48 = vmul.f32 %v9488_v45, %v1252_v36  ;;  %v1539_v9 = vsel %vm103_vm0, %v12841_v8, %v12840_v62  ;;  %2526 = vrot.lane.b32.xlu1 %v10329_v34, %s7473_s27  ;;  %v7395_v16 = vld [vmem:[%s12018_s0 + $0x39] sm:$0xff]  ;;  %v7396_v39 = vld [vmem:[%s12018_s0 + $0x30] sm:$0xff]  ;;  %v12856_v8 = vld [vmem:[#allocation33_spill] sm:$0xff] }
 0x43c   :  { %v1470_v14 = vsel %vm109_vm2, %v1468_v49, %v12839_v46  ;;  %v1321_v24 = vsel %vm103_vm0, %v12843_v41, %v12842_v38  ;;  %v1407_v61 = vmul.f32 %v12844_v25, %v1401_v60  ;;  %v1541_v2 = vsel %vm106_vm1, %v1539_v9, %v12845_v51  ;;  %2524 = vrot.lane.b32.xlu0 %v10334_v10, %s7473_s27  ;;  %v12850_v40 = vld [vmem:[#allocation27_spill] sm:$0xff]  ;;  %v12857_v38 = vld [vmem:[#allocation60_spill] sm:$0xff]  ;;  %v12859_v51 = vld [vmem:[#allocation61_spill] sm:$0xff]  ;;  %s7484_s27 = smov 96  }
 0x43d   :  { %v1191_v45 = vadd.f32 %v1189_v33, %v1118_v54  ;;  %v1323_v58 = vsel %vm106_vm1, %v1321_v24, %v12846_v27  ;;  %v1543_v32 = vsel %vm109_vm2, %v1541_v2, %v12847_v13  ;;  %v1612_v63 = vsel %vm103_vm0, %v7395_v16, %v12848_v56  ;;  %v12851_v33 = vld [vmem:[#allocation47_spill] sm:$0xff]  ;;  %v1959_v53 = vpop.permute.xlu1 %1958  ;;  %v10518_v5 = vpop.permute.xlu0 %1956  ;;  %v12852_v54 = vld [vmem:[#allocation16_spill] sm:$0xff]  ;;  %v12861_v27 = vld [vmem:[#allocation21_spill] sm:$0xff] }
 0x43e   :  { %v1334_v23 = vadd.f32 %v1332_v44, %v1261_v18  ;;  %v1325_v36 = vsel %vm109_vm2, %v1323_v58, %v12849_v6  ;;  %v1476_v21 = vmul.f32 %v12850_v40, %v1470_v14  ;;  %v1614_v60 = vsel %vm106_vm1, %v1612_v63, %v12851_v33  ;;  %v12853_v44 = vld [vmem:[#allocation52_spill] sm:$0xff]  ;;  %v12854_v18 = vld [vmem:[#allocation58_spill] sm:$0xff]  ;;  %v12855_v46 = vld [vmem:[#allocation51_spill] sm:$0xff] }
 0x43f   :  { %v1260_v37 = vadd.f32 %v1258_v48, %v1191_v45  ;;  %v1396_v22 = vsel %vm103_vm0, %v7396_v39, %v12852_v54  ;;  %v1616_v49 = vsel %vm109_vm2, %v1614_v60, %v12853_v44  ;;  %v1681_v14 = vsel %vm103_vm0, %v12855_v46, %v12854_v18  ;;  %2532 = vrot.lane.b32.xlu1 %v10329_v34, %s7475_s29  ;;  %v12858_v24 = vld [vmem:[#allocation15_spill] sm:$0xff]  ;;  %v12864_v6 = vld [vmem:[#allocation20_spill] sm:$0xff]  ;;  %v12865_v40 = vld [vmem:[#allocation26_spill] sm:$0xff] }
 0x440   :  { %v1409_v62 = vadd.f32 %v1407_v61, %v1334_v23  ;;  %v1549_v9 = vmul.f32 %v12856_v8, %v1543_v32  ;;  %v1683_v48 = vsel %vm106_vm1, %v1681_v14, %v12857_v38  ;;  %2530 = vrot.lane.b32.xlu0 %v10334_v10, %s7475_s29  ;;  %v1331_v41 = vmul.f32 %v12837_v15, %v1325_v36  ;;  %v12860_v61 = vld [vmem:[#allocation66_spill] sm:$0xff]  ;;  %v12862_v58 = vld [vmem:[#allocation19_spill] sm:$0xff]  ;;  %v12867_v44 = vld [vmem:[#allocation29_spill] sm:$0xff] }
 0x441   :  { %v1398_v25 = vsel %vm106_vm1, %v1396_v22, %v12858_v24  ;;  %v1685_v2 = vsel %vm109_vm2, %v1683_v48, %v12859_v51  ;;  %v1754_v45 = vsel %vm103_vm0, %v12860_v61, %v10078_v35  ;;  %v1465_v13 = vsel %vm103_vm0, %v12862_v58, %v12861_v27  ;;  %v12863_v16 = vld [vmem:[#allocation31_spill] sm:$0xff]  ;;  %v1965_v63 = vpop.permute.xlu1 %1964  ;;  %v10551_v23 = vpop.permute.xlu0 %1962  ;;  %v12866_v39 = vld [vmem:[#allocation38_spill] sm:$0xff]  ;;  %v12868_v46 = vld [vmem:[#allocation40_spill] sm:$0xff] }
 0x442   :  { %v1478_v32 = vadd.f32 %v1476_v21, %v1409_v62  ;;  %v1622_v56 = vmul.f32 %v12863_v16, %v1616_v49  ;;  %v1756_v15 = vsel %vm106_vm1, %v1754_v45, %v10113_v50  ;;  %v1400_v36 = vsel %vm109_vm2, %v1398_v25, %v12864_v6  ;;  %v7397_v21 = vld [vmem:[%s12018_s0 + $0x3a] sm:$0xff]  ;;  %v12869_v14 = vld [vmem:[#allocation30_spill] sm:$0xff]  ;;  %v12870_v8 = vld [vmem:[#allocation41_spill] sm:$0xff] }
 0x443   :  { %v1467_v33 = vsel %vm106_vm1, %v1465_v13, %v12865_v40  ;;  %v1758_v35 = vsel %vm109_vm2, %v1756_v15, %v10143_v57  ;;  %v1827_v60 = vsel %vm103_vm0, %v7397_v21, %v10184_v7  ;;  %v1691_v54 = vmul.f32 %v12866_v39, %v1685_v2  ;;  %2538 = vrot.lane.b32.xlu1 %v10329_v34, %s7477_s9  ;;  %v12871_v24 = vld [vmem:[#allocation36_spill] sm:$0xff]  ;;  %v12872_v2 = vld [vmem:[#allocation39_spill] sm:$0xff]  ;;  %v7399_v45 = vld [vmem:[%s12019_s1 + $0x13] ss:$0 sm:$0xff] }
 0x444   :  { %v1551_v50 = vadd.f32 %v1549_v9, %v1478_v32  ;;  %v1829_v22 = vsel %vm106_vm1, %v1827_v60, %v10219_v4  ;;  %2536 = vrot.lane.b32.xlu0 %v10334_v10, %s7477_s9  ;;  %v1333_v57 = vadd.f32 %v1331_v41, %v1260_v37  ;;  %v1469_v49 = vsel %vm109_vm2, %v1467_v33, %v12867_v44  ;;  %v12873_v27 = vld [vmem:[#allocation37_spill] sm:$0xff]  ;;  %v12875_v32 = vld [vmem:[#allocation48_spill] sm:$0xff]  ;;  %v12877_v21 = vld [vmem:[#allocation274_spill] sm:$0xff] }
 0x445   :  { %v1831_v18 = vsel %vm109_vm2, %v1829_v22, %v10261_v11  ;;  %v1896_v7 = vsel %vm103_vm0, %v10294_v31, %v10344_v1  ;;  %v1538_v4 = vsel %vm103_vm0, %v12869_v14, %v12868_v46  ;;  %v1764_v9 = vmul.f32 %v12870_v8, %v1758_v35  ;;  %v2028_v38 = vpop.permute.xlu1 %2027  ;;  %v2026_v48 = vpop.permute.xlu0 %2025  ;;  %v7398_v11 = vld [vmem:[%s12019_s1 + $0x12] ss:$0 sm:$0xff]  ;;  %v12876_v15 = vld [vmem:[#allocation45_spill] sm:$0xff]  ;;  %v12879_v22 = vld [vmem:[#allocation275_spill] sm:$0xff] }
 0x446   :  { %v1624_v62 = vadd.f32 %v1622_v56, %v1551_v50  ;;  %v1898_v37 = vsel %vm106_vm1, %v1896_v7, %v10379_v19  ;;  %v1406_v41 = vmul.f32 %v7398_v11, %v1400_v36  ;;  %v1540_v31 = vsel %vm106_vm1, %v1538_v4, %v12871_v24  ;;  %v7401_v36 = vld [vmem:[%s12018_s0 + $0x50] sm:$0xff]  ;;  %v12881_v14 = vld [vmem:[#allocation59_spill] sm:$0xff] }
 0x447   :  { %v1900_v1 = vsel %vm109_vm2, %v1898_v37, %v10413_v42  ;;  %v1969_v25 = vsel %vm103_vm0, %v10449_v29, %v10484_v47  ;;  %v1837_v19 = vmul.f32 %v12872_v2, %v1831_v18  ;;  %2593 = vrot.lane.b32.xlu1 %v10329_v34, %s7478_s10  ;;  %v1475_v42 = vmul.f32 %v7399_v45, %v1469_v49  ;;  %v7400_v29 = vld [vmem:[%s12018_s0 + $0x31] sm:$0xff]  ;;  %v12874_v47 = vld [vmem:[#allocation44_spill] sm:$0xff] }
 0x448   :  { %v1693_v51 = vadd.f32 %v1691_v54, %v1624_v62  ;;  %v1971_v61 = vsel %vm106_vm1, %v1969_v25, %v1959_v53  ;;  %2591 = vrot.lane.b32.xlu0 %v10334_v10, %s7478_s10  ;;  %v1542_v58 = vsel %vm109_vm2, %v1540_v31, %v12873_v27  ;;  %v1611_v53 = vsel %vm103_vm0, %v7400_v29, %v12874_v47  ;;  %v12880_v18 = vld [vmem:[#allocation46_spill] sm:$0xff]  ;;  %v12882_v4 = vld [vmem:[#allocation55_spill] sm:$0xff]  ;;  %s5716_s10 = sld [smem:[#allocation7 + $0x2]] }
 0x449   :  { %v1973_v13 = vsel %vm109_vm2, %v1971_v61, %v1965_v63  ;;  %v1613_v16 = vsel %vm106_vm1, %v1611_v53, %v12875_v32  ;;  %v1906_v6 = vmul.f32 %v12876_v15, %v1900_v1  ;;  %v2044_v40 = vsel %vm103_vm0, %v7401_v36, %v2028_v38  ;;  %v2034_v33 = vpop.permute.xlu1 %2033  ;;  %v2032_v35 = vpop.permute.xlu0 %2031  ;;  %v12878_v63 = vld [vmem:[#allocation50_spill] sm:$0xff]  ;;  %v12883_v11 = vld [vmem:[#allocation63_spill] sm:$0xff]  ;;  %v12888_v32 = vld [vmem:[#allocation76_spill] sm:$0xff] }
 0x44a   :  { %v1766_v56 = vadd.f32 %v1764_v9, %v1693_v51  ;;  %v2658_v60 = vsel %vm109_vm2, %v10419_v3, %v12877_v21  ;;  %v1408_v50 = vadd.f32 %v1406_v41, %v1333_v57  ;;  %v1615_v39 = vsel %vm109_vm2, %v1613_v16, %v12878_v63  ;;  %v7402_v57 = vld [vmem:[%s12019_s1 + $0x14] ss:$0 sm:$0xff]  ;;  %v10645_v9 = vld [vmem:[%s12019_s1 + $0x23] ss:$0 sm:$0xff]  ;;  %v7404_v37 = vld [vmem:[%s12019_s1 + $0x15] ss:$0 sm:$0xff] }
 0x44b   :  { %v2046_v54 = vsel %vm106_vm1, %v2044_v40, %v2034_v33  ;;  %v2657_v44 = vsel %vm109_vm2, %v10479_v52, %v12879_v22  ;;  %v1979_v7 = vmul.f32 %v12880_v18, %v1973_v13  ;;  %2599 = vrot.lane.b32.xlu1 %v10329_v34, %s7479_s11  ;;  %v1548_v46 = vmul.f32 %v7402_v57, %v1542_v58  ;;  %v7403_v52 = vld [vmem:[%s12018_s0 + $0x48] sm:$0xff]  ;;  %v12884_v51 = vld [vmem:[#allocation64_spill] sm:$0xff]  ;;  %v12885_v2 = vld [vmem:[#allocation67_spill] sm:$0xff] }
 0x44c   :  { %v1839_v49 = vadd.f32 %v1837_v19, %v1766_v56  ;;  %2597 = vrot.lane.b32.xlu0 %v10334_v10, %s7479_s11  ;;  %v1477_v3 = vadd.f32 %v1475_v42, %v1408_v50  ;;  %v1680_v62 = vsel %vm103_vm0, %v12882_v4, %v12881_v14  ;;  %v2043_v8 = vsel %vm103_vm0, %v7403_v52, %v2026_v48  ;;  %v12886_v58 = vld [vmem:[#allocation49_spill] sm:$0xff]  ;;  %v12887_v53 = vld [vmem:[#allocation70_spill] sm:$0xff]  ;;  %v12891_v22 = vld [vmem:[#allocation72_spill] sm:$0xff]  ;;  %s5711_s11 = sld [smem:[#allocation2 + $0x3]] }
 0x44d   :  { %v1621_v38 = vmul.f32 %v7404_v37, %v1615_v39  ;;  %v1682_v41 = vsel %vm106_vm1, %v1680_v62, %v12883_v11  ;;  %v2045_v31 = vsel %vm106_vm1, %v2043_v8, %v2032_v35  ;;  %v2040_v1 = vpop.permute.xlu1 %2039  ;;  %v2038_v25 = vpop.permute.xlu0 %2037  ;;  %v1753_v19 = vsel %vm103_vm0, %v12885_v2, %v10080_v30  ;;  %v12890_v39 = vld [vmem:[#allocation77_spill] sm:$0xff] }
 0x44e   :  { %v1908_v24 = vadd.f32 %v1906_v6, %v1839_v49  ;;  %v1684_v48 = vsel %vm109_vm2, %v1682_v41, %v12884_v51  ;;  %v2048_v61 = vsel %vm109_vm2, %v2046_v54, %v2040_v1  ;;  %v2047_v45 = vsel %vm109_vm2, %v2045_v31, %v2038_v25  ;;  %v7406_v6 = vld [vmem:[%s12019_s1 + $0x16] ss:$0 sm:$0xff] }
 0x44f   :  { %v1755_v42 = vsel %vm106_vm1, %v1753_v19, %v10115_v43  ;;  %v2054_v29 = vmul.f32 %v12886_v58, %v2048_v61  ;;  %2605 = vrot.lane.b32.xlu1 %v10329_v34, %s7480_s12  ;;  %v2660_v47 = vmul.f32 %v10645_v9, %v2658_v60  ;;  %v2659_v30 = vmul.f32 %v10645_v9, %v2657_v44  ;;  %v7405_v43 = vld [vmem:[%s12018_s0 + $0x32] sm:$0xff] }
 0x450   :  { %v1981_v27 = vadd.f32 %v1979_v7, %v1908_v24  ;;  %2603 = vrot.lane.b32.xlu0 %v10334_v10, %s7480_s12  ;;  %v1757_v13 = vsel %vm109_vm2, %v1755_v42, %v12887_v53  ;;  %v1826_v16 = vsel %vm103_vm0, %v7405_v43, %v12888_v32  ;;  %v1550_v56 = vadd.f32 %v1548_v46, %v1477_v3  ;;  %v12889_v60 = vld [vmem:[#allocation71_spill] sm:$0xff]  ;;  %v12893_v42 = vld [vmem:[#allocation54_spill] sm:$0xff] }
 0x451   :  { %v1690_v36 = vmul.f32 %v7406_v6, %v1684_v48  ;;  %v1828_v40 = vsel %vm106_vm1, %v1826_v16, %v10221_v26  ;;  %v2091_v35 = vpop.permute.xlu1 %2090  ;;  %v2089_v21 = vpop.permute.xlu0 %2088  ;;  %v2589_v50 = vadd.f32 %v10273_v55, %v12889_v60  ;;  %v2588_v63 = vadd.f32 %v10282_v28, %v10266_v20  ;;  %v12892_v44 = vld [vmem:[#allocation75_spill] sm:$0xff]  ;;  %v7407_v26 = vld [vmem:[%s12019_s1 + $0x17] ss:$0 sm:$0xff] }
 0x452   :  { %v2056_v33 = vadd.f32 %v2054_v29, %v1981_v27  ;;  %v1830_v54 = vsel %vm109_vm2, %v1828_v40, %v12890_v39  ;;  %v1895_v49 = vsel %vm103_vm0, %v12892_v44, %v12891_v22  ;;  %v1623_v7 = vadd.f32 %v1621_v38, %v1550_v56  ;;  %v12895_v44 = vld [vmem:[#allocation56_spill] sm:$0xff] }
 0x453   :  { %v1763_v3 = vmul.f32 %v7407_v26, %v1757_v13  ;;  %v1897_v57 = vsel %vm106_vm1, %v1895_v49, %v10381_v12  ;;  %2611 = vrot.lane.b32.xlu1 %v10329_v34, %s7481_s13  ;;  %v2662_v20 = vadd.f32 %v2660_v47, %v2589_v50  ;;  %v1968_v28 = vsel %vm103_vm0, %v10451_v59, %v10486_v17  ;;  %v7408_v12 = vld [vmem:[%s12019_s1 + $0x18] ss:$0 sm:$0xff] }
 0x454   :  { %2609 = vrot.lane.b32.xlu0 %v10334_v10, %s7481_s13  ;;  %v1899_v55 = vsel %vm109_vm2, %v1897_v57, %v10415_v0  ;;  %v2661_v46 = vadd.f32 %v2659_v30, %v2588_v63  ;;  %v1692_v14 = vadd.f32 %v1690_v36, %v1623_v7  ;;  %v1836_v4 = vmul.f32 %v7408_v12, %v1830_v54  ;;  %s7482_s13 = smov 64   ;;  %v12896_v7 = vld [vmem:[#allocation57_spill] sm:$0xff] }
 0x455   :  { %v1970_v62 = vsel %vm106_vm1, %v1968_v28, %v10518_v5  ;;  %v2097_v52 = vpop.permute.xlu1 %2096  ;;  %v2095_v8 = vpop.permute.xlu0 %2094  ;;  %v1905_v17 = vmul.f32 %v12876_v15, %v1899_v55  ;;  %v2053_v25 = vmul.f32 %v12886_v58, %v2047_v45 }
 0x456   :  { %v1972_v37 = vsel %vm109_vm2, %v1970_v62, %v10551_v23  ;;  %v2113_v0 = vsel %vm103_vm0, %v2091_v35, %v2097_v52  ;;  %v2112_v38 = vsel %vm103_vm0, %v2089_v21, %v2095_v8  ;;  %v1765_v59 = vadd.f32 %v1763_v3, %v1692_v14  ;;  %v12894_v21 = vld [vmem:[#allocation53_spill] sm:$0xff] }
 0x457   :  { %2667 = vrot.lane.b32.xlu1 %v2662_v20, %s7482_s13  ;;  %v1978_v5 = vmul.f32 %v12880_v18, %v1972_v37 }
 0x458   :  { %2665 = vrot.lane.b32.xlu0 %v2661_v46, %s7482_s13  ;;  %v1838_v11 = vadd.f32 %v1836_v4, %v1765_v59  ;;  %v12897_v4 = vld [vmem:[#allocation62_spill] sm:$0xff] }
 0x459   :  { %v2103_v41 = vpop.permute.xlu1 %2102  ;;  %v2101_v24 = vpop.permute.xlu0 %2100 }
 0x45a   :  { %v2115_v31 = vsel %vm106_vm1, %v2113_v0, %v2103_v41  ;;  %v2114_v23 = vsel %vm106_vm1, %v2112_v38, %v2101_v24  ;;  %v1907_v1 = vadd.f32 %v1905_v17, %v1838_v11 }
 0x45c   :  { %v1980_v51 = vadd.f32 %v1978_v5, %v1907_v1 }
 0x45d   :  { %v2109_v48 = vpop.permute.xlu1 %2108  ;;  %v2107_v15 = vpop.permute.xlu0 %2106 }
 0x45e   :  { %v2117_v2 = vsel %vm109_vm2, %v2115_v31, %v2109_v48  ;;  %v2116_v19 = vsel %vm109_vm2, %v2114_v23, %v2107_v15  ;;  %v2055_v61 = vadd.f32 %v2053_v25, %v1980_v51 }
 0x45f   :  { %v2123_v27 = vmul.f32 %v12893_v42, %v2117_v2  ;;  %v2122_v18 = vmul.f32 %v12893_v42, %v2116_v19 }
 0x461   :  { %v2125_v29 = vadd.f32 %v2123_v27, %v2056_v33  ;;  %v2124_v47 = vadd.f32 %v2122_v18, %v2055_v61  ;;  %v2164_v30 = vpop.permute.xlu1 %2163  ;;  %v2162_v53 = vpop.permute.xlu0 %2161 }
 0x465   :  { %v2170_v13 = vpop.permute.xlu1 %2169  ;;  %v2168_v43 = vpop.permute.xlu0 %2167 }
 0x466   :  { %v2186_v45 = vsel %vm103_vm0, %v2164_v30, %v2170_v13  ;;  %v2185_v58 = vsel %vm103_vm0, %v2162_v53, %v2168_v43 }
 0x469   :  { %v2176_v32 = vpop.permute.xlu1 %2175  ;;  %v2174_v16 = vpop.permute.xlu0 %2173 }
 0x46a   :  { %v2188_v56 = vsel %vm106_vm1, %v2186_v45, %v2176_v32  ;;  %v2187_v6 = vsel %vm106_vm1, %v2185_v58, %v2174_v16 }
 0x46d   :  { %v2182_v36 = vpop.permute.xlu1 %2181  ;;  %v2180_v40 = vpop.permute.xlu0 %2179 }
 0x46e   :  { %v2190_v35 = vsel %vm109_vm2, %v2188_v56, %v2182_v36  ;;  %v2189_v33 = vsel %vm109_vm2, %v2187_v6, %v2180_v40 }
 0x46f   :  { %v2196_v60 = vmul.f32 %v12894_v21, %v2190_v35  ;;  %v2195_v50 = vmul.f32 %v12894_v21, %v2189_v33 }
 0x471   :  { %v2198_v63 = vadd.f32 %v2196_v60, %v2125_v29  ;;  %v2197_v39 = vadd.f32 %v2195_v50, %v2124_v47  ;;  %v2243_v54 = vpop.permute.xlu1 %2242  ;;  %v2241_v22 = vpop.permute.xlu0 %2240 }
 0x472   :  { %v2259_v49 = vsel %vm103_vm0, %v12895_v44, %v2243_v54  ;;  %v2258_v26 = vsel %vm103_vm0, %v12896_v7, %v2241_v22  ;;  %v12898_v7 = vld [vmem:[#allocation65_spill] sm:$0xff] }
 0x475   :  { %v2249_v3 = vpop.permute.xlu1 %2248  ;;  %v2247_v57 = vpop.permute.xlu0 %2246 }
 0x476   :  { %v2261_v20 = vsel %vm106_vm1, %v2259_v49, %v2249_v3  ;;  %v2260_v55 = vsel %vm106_vm1, %v2258_v26, %v2247_v57 }
 0x479   :  { %v2255_v28 = vpop.permute.xlu1 %2254  ;;  %v2253_v46 = vpop.permute.xlu0 %2252 }
 0x47a   :  { %v2263_v14 = vsel %vm109_vm2, %v2261_v20, %v2255_v28  ;;  %v2262_v12 = vsel %vm109_vm2, %v2260_v55, %v2253_v46 }
 0x47b   :  { %v2269_v62 = vmul.f32 %v12897_v4, %v2263_v14  ;;  %v2268_v52 = vmul.f32 %v12897_v4, %v2262_v12  ;;  %v12899_v4 = vld [vmem:[#allocation68_spill] sm:$0xff] }
 0x47d   :  { %v10742_v8 = vadd.f32 %v2269_v62, %v2198_v63  ;;  %v10744_v37 = vadd.f32 %v2268_v52, %v2197_v39  ;;  %v2306_v0 = vpop.permute.xlu1 %2305  ;;  %v2304_v38 = vpop.permute.xlu0 %2303 }
 0x481   :  { %v2312_v59 = vpop.permute.xlu1 %2311  ;;  %v2310_v17 = vpop.permute.xlu0 %2309 }
 0x482   :  { %v2328_v16 = vsel %vm103_vm0, %v2306_v0, %v2312_v59  ;;  %v2327_v56 = vsel %vm103_vm0, %v2304_v38, %v2310_v17 }
 0x485   :  { %v2318_v11 = vpop.permute.xlu1 %2317  ;;  %v2316_v5 = vpop.permute.xlu0 %2315 }
 0x486   :  { %v2330_v6 = vsel %vm106_vm1, %v2328_v16, %v2318_v11  ;;  %v2329_v36 = vsel %vm106_vm1, %v2327_v56, %v2316_v5  ;;  %v12900_v5 = vld [vmem:[#allocation69_spill] sm:$0xff] }
 0x489   :  { %v2324_v41 = vpop.permute.xlu1 %2323  ;;  %v2322_v24 = vpop.permute.xlu0 %2321 }
 0x48a   :  { %v2332_v33 = vsel %vm109_vm2, %v2330_v6, %v2324_v41  ;;  %v2331_v21 = vsel %vm109_vm2, %v2329_v36, %v2322_v24 }
 0x48b   :  { %v2338_v26 = vmul.f32 %v12898_v7, %v2332_v33  ;;  %v2337_v3 = vmul.f32 %v12898_v7, %v2331_v21  ;;  %v10810_v7 = vld [vmem:[%s12020_s2] sm:$0x1] }
 0x48d   :  { %v2379_v31 = vpop.permute.xlu1 %2378  ;;  %v2377_v23 = vpop.permute.xlu0 %2376  ;;  %v2340_v17 = vadd.f32 %v2338_v26, %v10742_v8  ;;  %v2339_v11 = vadd.f32 %v2337_v3, %v10744_v37 }
 0x491   :  { %v2385_v1 = vpop.permute.xlu1 %2384  ;;  %v2383_v25 = vpop.permute.xlu0 %2382 }
 0x492   :  { %v2401_v60 = vsel %vm103_vm0, %v2379_v31, %v2385_v1  ;;  %v2400_v50 = vsel %vm103_vm0, %v2377_v23, %v2383_v25 }
 0x495   :  { %v2391_v51 = vpop.permute.xlu1 %2390 }
 0x496   :  { %v2389_v48 = vpop.permute.xlu0 %2388  ;;  %v2403_v63 = vsel %vm106_vm1, %v2401_v60, %v2391_v51  ;;  %v12901_v51 = vld [vmem:[#allocation74_spill] sm:$0xff] }
 0x497   :  { %v2402_v39 = vsel %vm106_vm1, %v2400_v50, %v2389_v48 }
 0x499   :  { %v2397_v15 = vpop.permute.xlu1 %2396 }
 0x49a   :  { %v2395_v2 = vpop.permute.xlu0 %2394  ;;  %v2405_v54 = vsel %vm109_vm2, %v2403_v63, %v2397_v15 }
 0x49b   :  { %v2404_v22 = vsel %vm109_vm2, %v2402_v39, %v2395_v2 }
 0x49c   :  { %v2410_v62 = vmul.f32 %v12899_v4, %v2404_v22 }
 0x49d   :  { %v2458_v19 = vpop.permute.xlu1 %2457 }
 0x49e   :  { %v2456_v61 = vpop.permute.xlu0 %2455  ;;  %v2474_v44 = vsel %vm103_vm0, %v10329_v34, %v2458_v19  ;;  %v2412_v25 = vadd.f32 %v2410_v62, %v2339_v11 }
 0x49f   :  { %v2473_v49 = vsel %vm103_vm0, %v10334_v10, %v2456_v61  ;;  %v2411_v10 = vmul.f32 %v12899_v4, %v2405_v54  ;;  %v10826_v4 = vld [vmem:[%s12020_s2 + $0x3] sm:$0x1] }
 0x4a1   :  { %v2464_v42 = vpop.permute.xlu1 %2463  ;;  %v2413_v1 = vadd.f32 %v2411_v10, %v2340_v17 }
 0x4a2   :  { %v2462_v27 = vpop.permute.xlu0 %2461  ;;  %v2476_v57 = vsel %vm106_vm1, %v2474_v44, %v2464_v42 }
 0x4a3   :  { %v2475_v20 = vsel %vm106_vm1, %v2473_v49, %v2462_v27  ;;  %v10805_v49 = vld [vmem:[%s12020_s2 + $0x1] sm:$0x1] }
 0x4a5   :  { %v2470_v18 = vpop.permute.xlu1 %2469 }
 0x4a6   :  { %v2468_v29 = vpop.permute.xlu0 %2467  ;;  %v2478_v46 = vsel %vm109_vm2, %v2476_v57, %v2470_v18  ;;  %v10815_v57 = vld [vmem:[%s12020_s2 + $0x2] sm:$0x1] }
 0x4a7   :  { %v2477_v14 = vsel %vm109_vm2, %v2475_v20, %v2468_v29  ;;  %v2484_v41 = vmul.f32 %v12900_v5, %v2478_v46 }
 0x4a8   :  { %v2483_v24 = vmul.f32 %v12900_v5, %v2477_v14 }
 0x4a9   :  { %v2521_v47 = vpop.permute.xlu1 %2520  ;;  %v2486_v61 = vadd.f32 %v2484_v41, %v2413_v1 }
 0x4aa   :  { %v2519_v30 = vpop.permute.xlu0 %2518  ;;  %v2485_v8 = vadd.f32 %v2483_v24, %v2412_v25 }
 0x4ad   :  { %v2527_v53 = vpop.permute.xlu1 %2526 }
 0x4ae   :  { %v2525_v13 = vpop.permute.xlu0 %2524  ;;  %v2543_v12 = vsel %vm103_vm0, %v2521_v47, %v2527_v53 }
 0x4af   :  { %v2542_v34 = vsel %vm103_vm0, %v2519_v30, %v2525_v13 }
 0x4b1   :  { %v2533_v43 = vpop.permute.xlu1 %2532 }
 0x4b2   :  { %v2531_v45 = vpop.permute.xlu0 %2530  ;;  %v2545_v52 = vsel %vm106_vm1, %v2543_v12, %v2533_v43 }
 0x4b3   :  { %v2544_v0 = vsel %vm106_vm1, %v2542_v34, %v2531_v45 }
 0x4b5   :  { %v2539_v58 = vpop.permute.xlu1 %2538 }
 0x4b6   :  { %v2537_v32 = vpop.permute.xlu0 %2536  ;;  %v2547_v38 = vsel %vm109_vm2, %v2545_v52, %v2539_v58 }
 0x4b7   :  { %v2546_v59 = vsel %vm109_vm2, %v2544_v0, %v2537_v32  ;;  %v2553_v48 = vmul.f32 %v12901_v51, %v2547_v38 }
 0x4b8   :  { %v2552_v15 = vmul.f32 %v12901_v51, %v2546_v59 }
 0x4b9   :  { %v2594_v40 = vpop.permute.xlu1 %2593  ;;  %v2555_v30 = vadd.f32 %v2553_v48, %v2486_v61 }
 0x4ba   :  { %v2592_v35 = vpop.permute.xlu0 %2591  ;;  %v2554_v53 = vadd.f32 %v2552_v15, %v2485_v8 }
 0x4bd   :  { %v2600_v55 = vpop.permute.xlu1 %2599 }
 0x4be   :  { %v2598_v28 = vpop.permute.xlu0 %2597  ;;  %v2616_v2 = vsel %vm103_vm0, %v2594_v40, %v2600_v55 }
 0x4bf   :  { %v2615_v19 = vsel %vm103_vm0, %v2592_v35, %v2598_v28 }
 0x4c1   :  { %v2606_v31 = vpop.permute.xlu1 %2605 }
 0x4c2   :  { %v2604_v23 = vpop.permute.xlu0 %2603  ;;  %v2618_v37 = vsel %vm106_vm1, %v2616_v2, %v2606_v31 }
 0x4c3   :  { %v2617_v42 = vsel %vm106_vm1, %v2615_v19, %v2604_v23 }
 0x4c5   :  { %v2612_v27 = vpop.permute.xlu1 %2611 }
 0x4c6   :  { %v2610_v18 = vpop.permute.xlu0 %2609  ;;  %v2620_v29 = vsel %vm109_vm2, %v2618_v37, %v2612_v27 }
 0x4c7   :  { %v2619_v47 = vsel %vm109_vm2, %v2617_v42, %v2610_v18  ;;  %v2626_v13 = vmul.f32 %v10645_v9, %v2620_v29 }
 0x4c8   :  { %v2625_v43 = vmul.f32 %v10645_v9, %v2619_v47 }
 0x4c9   :  { %v2628_v45 = vadd.f32 %v2626_v13, %v2555_v30  ;;  %v2668_v32 = vpop.permute.xlu1 %2667 }
 0x4ca   :  { %v2627_v58 = vadd.f32 %v2625_v43, %v2554_v53  ;;  %v2666_v16 = vpop.permute.xlu0 %2665 }
 0x4cb   :  { %v10791_v56 = vsel %vm2671_vm3, %v2628_v45, %v2668_v32 }
 0x4cc   :  { %v10794_v6 = vsel %vm2671_vm3, %v2627_v58, %v2666_v16  ;;  %v2682_v36 = vmul.f32 %v10791_v56, %v10791_v56 }
 0x4cd   :  { %v2674_v40 = vadd.f32 %v10791_v56, %v10794_v6  ;;  %v2681_v9 = vmul.f32 %v10794_v6, %v10794_v6 }
 0x4cf   :  { %v2675_v35 = vrot.slane %v2674_v40, 4  ;;  %v2683_v33 = vadd.f32 %v2682_v36, %v2681_v9 }
 0x4d1   :  { %v2676_v21 = vadd.f32 %v2675_v35, %v2674_v40  ;;  %v2684_v60 = vrot.slane %v2683_v33, 4  ;;  %v2707_v40 = vstv %s2704_s17  ;;  %s5718_s17 = sld [smem:[#allocation7 + $0x3]] }
 0x4d3   :  { %v2677_v50 = vrot.slane %v2676_v21, 2  ;;  %v2685_v63 = vadd.f32 %v2684_v60, %v2683_v33 }
 0x4d5   :  { %v2678_v39 = vadd.f32 %v2677_v50, %v2676_v21  ;;  %v2686_v54 = vrot.slane %v2685_v63, 2  ;;  %v2731_v21 = vstv %s5707_s18 }
 0x4d7   :  { %v2679_v22 = vrot.slane %v2678_v39, 1  ;;  %v2687_v44 = vadd.f32 %v2686_v54, %v2685_v63  ;;  %v2757_v54 = vstv %s5709_s20 }
 0x4d9   :  { %v2680_v26 = vadd.f32 %v2679_v22, %v2678_v39  ;;  %v2688_v3 = vrot.slane %v2687_v44, 1  ;;  %v2735_v39 = vstv %s5708_s19  ;;  %v2793_v22 = vlaneseq }
 0x4db   :  { %v2716_v20 = vmul.f32 %v10805_v49, %v2680_v26  ;;  %v2691_v55 = vmul.f32 %v10810_v7, %v2680_v26  ;;  %v2689_v28 = vadd.f32 %v2688_v3, %v2687_v44  ;;  %v2742_v12 = vmul.f32 %v10815_v57, %v2680_v26 }
 0x4dc   :  { %v2768_v52 = vmul.f32 %v10826_v4, %v2680_v26  ;;  %v2711_v44 = vstv %s2709_s21 }
 0x4dd   :  { %v2717_v46 = vsel %vm2692_vm4, %v2716_v20, 0.0  ;;  %v2693_v14 = vsel %vm2692_vm4, %v2691_v55, 0.0  ;;  %v2696_v34 = vmul.f32 %v10810_v7, %v2689_v28  ;;  %v2743_v10 = vsel %vm2692_vm4, %v2742_v12, 0.0 }
 0x4de   :  { %2718 = vadd.xlane.f32.xlu1 %v2717_v46  ;;  %2694 = vadd.xlane.f32.xlu0 %v2693_v14  ;;  %v2720_v0 = vmul.f32 %v10805_v49, %v2689_v28  ;;  %v2769_v38 = vsel %vm2692_vm4, %v2768_v52, 0.0  ;;  %v2746_v17 = vmul.f32 %v10815_v57, %v2689_v28  ;;  %v2772_v5 = vmul.f32 %v10826_v4, %v2689_v28 }
 0x4df   :  { %v2697_v62 = vsel %vm2692_vm4, %v2696_v34, 0.0  ;;  %v2761_v14 = vstv %s5710_s6  ;;  %v2783_v12 = vstv %s5711_s11  ;;  %v2794_v34 = vshrl.u32 %v2793_v22, 7 }
 0x4e0   :  { %v2721_v59 = vsel %vm2692_vm4, %v2720_v0, 0.0  ;;  %v2747_v11 = vsel %vm2692_vm4, %v2746_v17, 0.0  ;;  %v2773_v41 = vsel %vm2692_vm4, %v2772_v5, 0.0 }
 0x4e2   :  { %2744 = vadd.xlane.f32.xlu1 %v2743_v10  ;;  %2698 = vadd.xlane.f32.xlu0 %v2697_v62 }
 0x4e6   :  { %2770 = vadd.xlane.f32.xlu1 %v2769_v38  ;;  %2722 = vadd.xlane.f32.xlu0 %v2721_v59 }
 0x4ea   :  { %2748 = vadd.xlane.f32.xlu0 %v2747_v11 }
 0x4ee   :  { %2774 = vadd.xlane.f32.xlu0 %v2773_v41  ;;  %v2787_v41 = vstv %s5712_s23 }
 0x56b   :  { %v2719_v24 = vpop.xlane.xlu1 %2718  ;;  %v2695_v31 = vpop.xlane.xlu0 %2694 }
 0x56c   :  { %v2700_v23 = vmul.f32 0.001953125, %v2695_v31  ;;  %v2724_v51 = vmul.f32 0.001953125, %v2719_v24  ;;  %v10843_v24 = vsub.s32 0, %v2794_v34 }
 0x56e   :  { %v2702_v48 = vmul.f32 %v2700_v23, %v2700_v23  ;;  %v2726_v61 = vmul.f32 %v2724_v51, %v2724_v51  ;;  %12902 = vst [vmem:[#allocation73_spill] sm:$0xff] %v10843_v24 }
 0x56f   :  { %v2745_v1 = vpop.xlane.xlu1 %2744  ;;  %v2699_v25 = vpop.xlane.xlu0 %2698 }
 0x570   :  { %v2701_v15 = vmul.f32 0.001953125, %v2699_v25  ;;  %v2750_v8 = vmul.f32 0.001953125, %v2745_v1 }
 0x572   :  { %v2703_v2 = vsub.f32 %v2701_v15, %v2702_v48  ;;  %v2752_v47 = vmul.f32 %v2750_v8, %v2750_v8 }
 0x573   :  { %v2723_v19 = vpop.xlane.xlu0 %2722  ;;  %v2771_v27 = vpop.xlane.xlu1 %2770 }
 0x574   :  { %v2705_v37 = vadd.f32 1e-05, %v2703_v2  ;;  %v2725_v42 = vmul.f32 0.001953125, %v2723_v19  ;;  %v2776_v30 = vmul.f32 0.001953125, %v2771_v27 }
 0x576   :  { %7338 = vrsqrt.f32 %v2705_v37  ;;  %v2727_v18 = vsub.f32 %v2725_v42, %v2726_v61  ;;  %v2778_v58 = vmul.f32 %v2776_v30, %v2776_v30 }
 0x577   :  { %v2749_v29 = vpop.xlane.xlu0 %2748 }
 0x578   :  { %v2729_v53 = vadd.f32 1e-05, %v2727_v18  ;;  %v2751_v13 = vmul.f32 0.001953125, %v2749_v29 }
 0x57a   :  { %7340 = vrsqrt.f32 %v2729_v53  ;;  %v2753_v43 = vsub.f32 %v2751_v13, %v2752_v47 }
 0x57b   :  { %v2775_v45 = vpop.xlane.xlu0 %2774 }
 0x57c   :  { %v2755_v32 = vadd.f32 1e-05, %v2753_v43  ;;  %v2777_v16 = vmul.f32 0.001953125, %v2775_v45 }
 0x57e   :  { %7342 = vrsqrt.f32 %v2755_v32  ;;  %v2779_v36 = vsub.f32 %v2777_v16, %v2778_v58 }
 0x580   :  { %v7339_v9 = vpop.eup %7338  ;;  %v2781_v35 = vadd.f32 1e-05, %v2779_v36 }
 0x581   :  { %v2708_v33 = vmul.f32 %v7339_v9, %v2707_v40 }
 0x582   :  { %7344 = vrsqrt.f32 %v2781_v35 }
 0x583   :  { %v2710_v63 = vmul.f32 %v2708_v33, %v2700_v23  ;;  %v2713_v10 = vmul.f32 %v2708_v33, %v10810_v7 }
 0x584   :  { %v7341_v60 = vpop.eup %7340 }
 0x585   :  { %v2732_v50 = vmul.f32 %v7341_v60, %v2731_v21  ;;  %v2712_v46 = vsub.f32 %v2711_v44, %v2710_v63 }
 0x587   :  { %v2734_v26 = vmul.f32 %v2732_v50, %v2724_v51  ;;  %v2737_v55 = vmul.f32 %v2732_v50, %v10805_v49  ;;  %v2714_v5 = vmul.f32 %v2712_v46, %v10810_v7 }
 0x588   :  { %v7343_v3 = vpop.eup %7342 }
 0x589   :  { %v2736_v20 = vsub.f32 %v2735_v39, %v2734_v26  ;;  %v2758_v28 = vmul.f32 %v7343_v3, %v2757_v54  ;;  %v2738_v38 = vadd.f32 %v2737_v55, %v2713_v10 }
 0x58b   :  { %v2760_v62 = vmul.f32 %v2758_v28, %v2750_v8  ;;  %v2763_v52 = vmul.f32 %v2758_v28, %v10815_v57  ;;  %v2739_v59 = vmul.f32 %v2736_v20, %v10805_v49 }
 0x58c   :  { %v7345_v0 = vpop.eup %7344 }
 0x58d   :  { %v2762_v17 = vsub.f32 %v2761_v14, %v2760_v62  ;;  %v2784_v11 = vmul.f32 %v7345_v0, %v2783_v12  ;;  %v2764_v31 = vadd.f32 %v2763_v52, %v2738_v38  ;;  %v2740_v51 = vadd.f32 %v2739_v59, %v2714_v5 }
 0x58f   :  { %v2765_v23 = vmul.f32 %v2762_v17, %v10815_v57  ;;  %v2786_v1 = vmul.f32 %v2784_v11, %v2776_v30  ;;  %v2789_v25 = vmul.f32 %v2784_v11, %v10826_v4 }
 0x591   :  { %v2788_v48 = vsub.f32 %v2787_v41, %v2786_v1  ;;  %v2790_v15 = vadd.f32 %v2789_v25, %v2764_v31  ;;  %v2766_v2 = vadd.f32 %v2765_v23, %v2740_v51 }
 0x593   :  { %v2791_v19 = vmul.f32 %v2788_v48, %v10826_v4  ;;  %v2796_v49 = vrot.slane %v2790_v15, %v10843_v24 }
 0x595   :  { %v2792_v61 = vadd.f32 %v2791_v19, %v2766_v2  ;;  %v2797_v7 = vmul.f32 %v2796_v49, %v10794_v6  ;;  %v2798_v8 = vmul.f32 %v2796_v49, %v10791_v56 }
 0x597   :  { %v2802_v37 = vrot.slane %v2792_v61, %v10843_v24 }
 0x599   :  { %v2803_v42 = vadd.f32 %v2802_v37, %v2797_v7  ;;  %v2804_v57 = vadd.f32 %v2802_v37, %v2798_v8 }
 0x59b   :  { %v2807_v27 = vmul.f32 0.044715, %v2803_v42  ;;  %v2808_v18 = vmul.f32 0.044715, %v2804_v57  ;;  %v2805_v32 = vmul.f32 0.5, %v2803_v42  ;;  %v2806_v16 = vmul.f32 0.5, %v2804_v57 }
 0x59d   :  { %v2809_v29 = vmul.f32 %v2807_v27, %v2803_v42  ;;  %v2810_v47 = vmul.f32 %v2808_v18, %v2804_v57 }
 0x59f   :  { %v2811_v30 = vmul.f32 %v2809_v29, %v2803_v42  ;;  %v2812_v53 = vmul.f32 %v2810_v47, %v2804_v57 }
 0x5a1   :  { %v2813_v13 = vadd.f32 %v2811_v30, %v2803_v42  ;;  %v2814_v43 = vadd.f32 %v2812_v53, %v2804_v57 }
 0x5a3   :  { %v2815_v4 = vmul.f32 0.7978846, %v2813_v13  ;;  %v2816_v45 = vmul.f32 0.7978846, %v2814_v43 }
 0x5a5   :  { %7346 = vtanh.f32 %v2815_v4 }
 0x5a6   :  { %7348 = vtanh.f32 %v2816_v45 }
 0x5af   :  { %v7347_v58 = vpop.eup %7346 }
 0x5b0   :  { %v7349_v6 = vpop.eup %7348  ;;  %v2819_v56 = vadd.f32 1.0, %v7347_v58 }
 0x5b1   :  { %v2820_v36 = vadd.f32 1.0, %v7349_v6 }
 0x5b2   :  { %v10852_v40 = vmul.f32 %v2819_v56, %v2805_v32 }
 0x5b3   :  { %v10854_v9 = vmul.f32 %v2820_v36, %v2806_v16 }
 0x5b4   :  { %12903 = vst [vmem:[#allocation78_spill] sm:$0xff] %v10852_v40  ;;  %2825 = vrot.lane.b32.xlu1 %v10852_v40, %s7483_s7  ;;  %v2853_v35 = vsel %vm103_vm0, %v10852_v40, 0 }
 0x5b5   :  { %12904 = vst [vmem:[#allocation79_spill] sm:$0xff] %v10854_v9  ;;  %2827 = vrot.lane.b32.xlu0 %v10854_v9, %s7483_s7  ;;  %v10860_v33 = vand.u32 4294901760, %v2853_v35  ;;  %v2855_v21 = vsel %vm103_vm0, %v10854_v9, 0 }
 0x5b6   :  { %v10864_v60 = vand.u32 4294901760, %v2855_v21 }
 0x5b7   :  { %12905 = vst [vmem:[#allocation80_spill] sm:$0xff] %v10860_v33  ;;  %6191 = vmatprep.mubr.f32.mxu0 %v10860_v33  ;;  %v10868_v50 = vsub.f32 %v2853_v35, %v10860_v33 }
 0x5b8   :  { %2829 = vrot.lane.b32.xlu1 %v10852_v40, %s7484_s27  ;;  %v10873_v63 = vpack.c.bf16 %v10864_v60, %v10860_v33  ;;  %v10876_v39 = vsub.f32 %v2855_v21, %v10864_v60 }
 0x5b9   :  { %2833 = vrot.lane.b32.xlu0 %v10852_v40, %s7485_s22  ;;  %v10880_v54 = vand.u32 4294901760, %v10868_v50 }
 0x5ba   :  { %6776 = vmatprep.subr.bf16.mxu1 %v10873_v63  ;;  %v10884_v22 = vand.u32 4294901760, %v10876_v39 }
 0x5bb   :  { %6778 = vmatpush3.bf16.xpose.msra.mxu1 %v10873_v63  ;;  %v2969_v44 = vsub.f32 %v10868_v50, %v10880_v54 }
 0x5bc   :  { %2831 = vrot.lane.b32.xlu1 %v10854_v9, %s7484_s27  ;;  %v2979_v26 = vsub.f32 %v10876_v39, %v10884_v22 }
 0x5bd   :  { %2837 = vrot.lane.b32.xlu0 %v10852_v40, %s7482_s13  ;;  %v2970_v3 = vand.u32 4294901760, %v2969_v44 }
 0x5be   :  { %v10894_v20 = vand.u32 4294901760, %v2979_v26 }
 0x5bf   :  { %6135 = vmatprep.mubr.f32.mxu1 %v2970_v3 }
 0x5c0   :  { %2835 = vrot.lane.b32.xlu1 %v10854_v9, %s7485_s22  ;;  %v6807_v55 = vpack.c.bf16 %v10894_v20, %v2970_v3 }
 0x5c1   :  { %2841 = vrot.lane.b32.xlu0 %v10852_v40, %s7476_s30 }
 0x5c2   :  { %6808 = vmatprep.subr.bf16.mxu0 %v6807_v55 }
 0x5c3   :  { %6810 = vmatpush3.bf16.xpose.msra.mxu0 %v6807_v55 }
 0x5c4   :  { %2839 = vrot.lane.b32.xlu1 %v10854_v9, %s7482_s13 }
 0x5c5   :  { %2845 = vrot.lane.b32.xlu0 %v10852_v40, %s7474_s28 }
 0x5c8   :  { %2843 = vrot.lane.b32.xlu1 %v10854_v9, %s7476_s30 }
 0x5c9   :  { %2849 = vrot.lane.b32.xlu0 %v10852_v40, %s7472_s24 }
 0x5cc   :  { %2847 = vrot.lane.b32.xlu1 %v10854_v9, %s7474_s28 }
 0x5d0   :  { %2851 = vrot.lane.b32.xlu1 %v10854_v9, %s7472_s24 }
 0x626   :  { %v2826_v28 = vpop.permute.xlu1 %2825 }
 0x627   :  { %v2828_v46 = vpop.permute.xlu0 %2827  ;;  %v2857_v14 = vsel %vm103_vm0, %v2826_v28, 0 }
 0x628   :  { %v2859_v12 = vsel %vm103_vm0, %v2828_v46, 0  ;;  %v10914_v34 = vand.u32 4294901760, %v2857_v14 }
 0x629   :  { %v10916_v10 = vand.u32 4294901760, %v2859_v12 }
 0x62a   :  { %v10919_v62 = vsub.f32 %v2857_v14, %v10914_v34  ;;  %v2830_v52 = vpop.permute.xlu1 %2829 }
 0x62b   :  { %v10922_v0 = vsub.f32 %v2859_v12, %v10916_v10  ;;  %v10926_v38 = vpack.c.bf16 %v10916_v10, %v10914_v34  ;;  %v2834_v59 = vpop.permute.xlu0 %2833  ;;  %v2861_v17 = vsel %vm103_vm0, %v2830_v52, 0 }
 0x62c   :  { %v10930_v11 = vand.u32 4294901760, %v10919_v62  ;;  %v2865_v5 = vsel %vm103_vm0, %v2834_v59, 0  ;;  %v10933_v41 = vand.u32 4294901760, %v2861_v17 }
 0x62d   :  { %v10936_v31 = vand.u32 4294901760, %v10922_v0  ;;  %v10938_v23 = vand.u32 4294901760, %v2865_v5  ;;  %6780 = vmatprep.subr.bf16.mxu1 %v10926_v38 }
 0x62e   :  { %v10942_v1 = vsub.f32 %v2861_v17, %v10933_v41  ;;  %6782 = vmatpush3.bf16.xpose.msra.mxu1 %v10926_v38  ;;  %v2832_v25 = vpop.permute.xlu1 %2831  ;;  %v2989_v51 = vsub.f32 %v10919_v62, %v10930_v11 }
 0x62f   :  { %12906 = vst [vmem:[#allocation81_spill] sm:$0xff] %v10936_v31  ;;  %v10948_v48 = vsub.f32 %v2865_v5, %v10938_v23  ;;  %v2838_v15 = vpop.permute.xlu0 %2837  ;;  %v2863_v2 = vsel %vm103_vm0, %v2832_v25, 0  ;;  %v2999_v19 = vsub.f32 %v10922_v0, %v10936_v31 }
 0x630   :  { %v10954_v49 = vand.u32 4294901760, %v10942_v1  ;;  %v2869_v61 = vsel %vm103_vm0, %v2838_v15, 0  ;;  %v10957_v7 = vand.u32 4294901760, %v2863_v2  ;;  %v10959_v8 = vand.u32 4294901760, %v2989_v51 }
 0x631   :  { %v10961_v37 = vand.u32 4294901760, %v2999_v19  ;;  %v10971_v18 = vand.u32 4294901760, %v10948_v48  ;;  %v10973_v29 = vand.u32 4294901760, %v2869_v61 }
 0x632   :  { %12907 = vst [vmem:[#allocation84_spill] sm:$0xff] %v10954_v49  ;;  %v10965_v42 = vpack.c.bf16 %v10957_v7, %v10933_v41  ;;  %v10968_v57 = vsub.f32 %v2863_v2, %v10957_v7  ;;  %v2836_v27 = vpop.permute.xlu1 %2835  ;;  %v3009_v4 = vsub.f32 %v10942_v1, %v10954_v49 }
 0x633   :  { %12908 = vst [vmem:[#allocation82_spill] sm:$0xff] %v10971_v18  ;;  %v2867_v47 = vsel %vm103_vm0, %v2836_v27, 0  ;;  %v6811_v30 = vpack.c.bf16 %v10961_v37, %v10959_v8  ;;  %v2842_v13 = vpop.permute.xlu0 %2841  ;;  %v10997_v56 = vsub.f32 %v2869_v61, %v10973_v29  ;;  %v3029_v35 = vsub.f32 %v10948_v48, %v10971_v18 }
 0x634   :  { %v10979_v53 = vand.u32 4294901760, %v10968_v57  ;;  %v10981_v43 = vand.u32 4294901760, %v2867_v47  ;;  %6784 = vmatprep.subr.bf16.mxu1 %v10965_v42  ;;  %v2873_v16 = vsel %vm103_vm0, %v2842_v13, 0  ;;  %v11009_v26 = vand.u32 4294901760, %v3009_v4 }
 0x635   :  { %6812 = vmatprep.subr.bf16.mxu0 %v6811_v30  ;;  %v11021_v12 = vand.u32 4294901760, %v10997_v56  ;;  %v11023_v52 = vand.u32 4294901760, %v2873_v16  ;;  %v11031_v25 = vand.u32 4294901760, %v3029_v35 }
 0x636   :  { %12909 = vst [vmem:[#allocation85_spill] sm:$0xff] %v10979_v53  ;;  %v10988_v45 = vpack.c.bf16 %v10981_v43, %v10938_v23  ;;  %v10991_v58 = vsub.f32 %v2867_v47, %v10981_v43  ;;  %6786 = vmatpush3.bf16.xpose.msra.mxu1 %v10965_v42  ;;  %6814 = vmatpush3.bf16.xpose.msra.mxu0 %v6811_v30  ;;  %v2840_v6 = vpop.permute.xlu1 %2839 }
 0x637   :  { %v3019_v32 = vsub.f32 %v10968_v57, %v10979_v53  ;;  %v2871_v36 = vsel %vm103_vm0, %v2840_v6, 0  ;;  %12911 = vst [vmem:[#allocation86_spill] sm:$0xff] %v11021_v12  ;;  %v2846_v15 = vpop.permute.xlu0 %2845  ;;  %v11046_v47 = vsub.f32 %v2873_v16, %v11023_v52  ;;  %v3049_v13 = vsub.f32 %v10997_v56, %v11021_v12 }
 0x638   :  { %v11004_v21 = vand.u32 4294901760, %v10991_v58  ;;  %v11006_v44 = vand.u32 4294901760, %v2871_v36  ;;  %6788 = vmatprep.subr.bf16.mxu1 %v10988_v45  ;;  %v2877_v6 = vsel %vm103_vm0, %v2846_v15, 0 }
 0x639   :  { %v11011_v3 = vand.u32 4294901760, %v3019_v32  ;;  %v11063_v35 = vand.u32 4294901760, %v11046_v47 }
 0x63a   :  { %12910 = vst [vmem:[#allocation83_spill] sm:$0xff] %v11004_v21  ;;  %v11014_v55 = vsub.f32 %v2871_v36, %v11006_v44  ;;  %v2844_v28 = vpop.permute.xlu1 %2843  ;;  %v3039_v14 = vsub.f32 %v10991_v58, %v11004_v21  ;;  %v11037_v2 = vpack.c.bf16 %v11006_v44, %v10973_v29 }
 0x63b   :  { %v6815_v46 = vpack.c.bf16 %v11011_v3, %v11009_v26  ;;  %v2875_v59 = vsel %vm103_vm0, %v2844_v28, 0  ;;  %12914 = vst [vmem:[#allocation89_spill] sm:$0xff] %v11063_v35  ;;  %v11065_v28 = vand.u32 4294901760, %v2877_v6 }
 0x63c   :  { %v11027_v17 = vand.u32 4294901760, %v11014_v55  ;;  %v11029_v5 = vand.u32 4294901760, %v2875_v59  ;;  %v11033_v51 = vand.u32 4294901760, %v3039_v14  ;;  %v11067_v14 = vand.u32 4294901760, %v3049_v13 }
 0x63d   :  { %6816 = vmatprep.subr.bf16.mxu0 %v6815_v46  ;;  %v11083_v13 = vsub.f32 %v2877_v6, %v11065_v28 }
 0x63e   :  { %12912 = vst [vmem:[#allocation87_spill] sm:$0xff] %v11027_v17  ;;  %v11040_v19 = vsub.f32 %v2875_v59, %v11029_v5  ;;  %6790 = vmatpush3.bf16.xpose.msra.mxu1 %v10988_v45  ;;  %6818 = vmatpush3.bf16.xpose.msra.mxu0 %v6815_v46  ;;  %v2848_v61 = vpop.permute.xlu1 %2847  ;;  %v6819_v27 = vpack.c.bf16 %v11033_v51, %v11031_v25  ;;  %v2850_v59 = vpop.permute.xlu0 %2849 }
 0x63f   :  { %v2879_v30 = vsel %vm103_vm0, %v2848_v61, 0  ;;  %6792 = vmatprep.subr.bf16.mxu1 %v11037_v2  ;;  %v3059_v4 = vsub.f32 %v11014_v55, %v11027_v17  ;;  %v11071_v15 = vpack.c.bf16 %v11029_v5, %v11023_v52  ;;  %v2881_v9 = vsel %vm103_vm0, %v2850_v59, 0 }
 0x640   :  { %6820 = vmatprep.subr.bf16.mxu0 %v6819_v27  ;;  %v11056_v32 = vand.u32 4294901760, %v11040_v19  ;;  %v11058_v36 = vand.u32 4294901760, %v2879_v30  ;;  %v11095_v17 = vand.u32 4294901760, %v11083_v13 }
 0x641   :  { %v11060_v16 = vand.u32 4294901760, %v3059_v4 }
 0x642   :  { %12913 = vst [vmem:[#allocation88_spill] sm:$0xff] %v11056_v32  ;;  %v2852_v46 = vpop.permute.xlu1 %2851  ;;  %v11074_v61 = vsub.f32 %v2879_v30, %v11058_v36  ;;  %v3079_v24 = vsub.f32 %v11040_v19, %v11056_v32  ;;  %v3069_v30 = vsub.f32 %v11046_v47, %v11063_v35  ;;  %12916 = vst [vmem:[#allocation91_spill] sm:$0xff] %v11095_v17 }
 0x643   :  { %v6823_v4 = vpack.c.bf16 %v11060_v16, %v11067_v14  ;;  %v2883_v40 = vsel %vm103_vm0, %v2852_v46, 0  ;;  %v11101_v12 = vpack.c.bf16 %v11058_v36, %v11065_v28 }
 0x644   :  { %v11090_v33 = vand.u32 4294901760, %v11074_v61  ;;  %v11092_v32 = vand.u32 4294901760, %v2883_v40  ;;  %v3080_v46 = vand.u32 4294901760, %v3079_v24  ;;  %v3070_v6 = vand.u32 4294901760, %v3069_v30 }
 0x645   :  { %v3089_v30 = vsub.f32 %v11083_v13, %v11095_v17 }
 0x646   :  { %6794 = vmatpush3.bf16.xpose.msra.mxu1 %v11037_v2  ;;  %6822 = vmatpush3.bf16.xpose.msra.mxu0 %v6819_v27  ;;  %12915 = vst [vmem:[#allocation90_spill] sm:$0xff] %v11090_v33  ;;  %v11097_v27 = vand.u32 4294901760, %v2881_v9  ;;  %v11104_v35 = vsub.f32 %v2883_v40, %v11092_v32  ;;  %v6827_v59 = vpack.c.bf16 %v3080_v46, %v3070_v6 }
 0x647   :  { %6796 = vmatprep.subr.bf16.mxu1 %v11071_v15  ;;  %6824 = vmatprep.subr.bf16.mxu0 %v6823_v4  ;;  %v3099_v21 = vsub.f32 %v11074_v61, %v11090_v33  ;;  %v3090_v33 = vand.u32 4294901760, %v3089_v30 }
 0x648   :  { %v11110_v24 = vsub.f32 %v2881_v9, %v11097_v27  ;;  %v11116_v18 = vand.u32 4294901760, %v11104_v35 }
 0x649   :  { %v3100_v40 = vand.u32 4294901760, %v3099_v21 }
 0x64a   :  { %12917 = vst [vmem:[#allocation92_spill] sm:$0xff] %v11116_v18  ;;  %v11119_v53 = vand.u32 4294901760, %v11110_v24  ;;  %v3119_v49 = vsub.f32 %v11104_v35, %v11116_v18  ;;  %v6839_v18 = vpack.c.bf16 %v10876_v39, %v10868_v50 }
 0x64b   :  { %v6831_v9 = vpack.c.bf16 %v3100_v40, %v3090_v33 }
 0x64c   :  { %v3109_v21 = vsub.f32 %v11110_v24, %v11119_v53  ;;  %v3120_v17 = vand.u32 4294901760, %v3119_v49  ;;  %v6847_v49 = vpack.c.bf16 %v10968_v57, %v10942_v1 }
 0x64e   :  { %6798 = vmatpush3.bf16.xpose.msra.mxu1 %v11071_v15  ;;  %6826 = vmatpush3.bf16.xpose.msra.mxu0 %v6823_v4  ;;  %v11123_v4 = vpack.c.bf16 %v11092_v32, %v11097_v27  ;;  %v3110_v31 = vand.u32 4294901760, %v3109_v21 }
 0x64f   :  { %6800 = vmatprep.subr.bf16.mxu1 %v11101_v12  ;;  %6828 = vmatprep.subr.bf16.mxu0 %v6827_v59 }
 0x650   :  { %v6835_v30 = vpack.c.bf16 %v3120_v17, %v3110_v31 }
 0x656   :  { %6802 = vmatpush3.bf16.xpose.msra.mxu1 %v11101_v12  ;;  %6830 = vmatpush3.bf16.xpose.msra.mxu0 %v6827_v59 }
 0x657   :  { %6804 = vmatprep.subr.bf16.mxu1 %v11123_v4  ;;  %6832 = vmatprep.subr.bf16.mxu0 %v6831_v9 }
 0x65e   :  { %6806 = vmatpush3.bf16.xpose.msra.mxu1 %v11123_v4  ;;  %6834 = vmatpush3.bf16.xpose.msra.mxu0 %v6831_v9 }
 0x65f   :  { %6836 = vmatprep.subr.bf16.mxu0 %v6835_v30 }
 0x665   :  { %6136 = vmatmul.mubr.f32.vlgmr.msra.gmra.mrb[0].mxu1 %v10894_v20  ;;  %v6843_v20 = vpack.c.bf16 %v10922_v0, %v10919_v62 }
 0x666   :  { %6138 = vmatprep.mubr.f32.mxu1 %v10959_v8  ;;  %6838 = vmatpush3.bf16.xpose.msra.mxu0 %v6835_v30  ;;  %v6851_v8 = vpack.c.bf16 %v10991_v58, %v10948_v48 }
 0x667   :  { %6840 = vmatprep.subr.bf16.mxu0 %v6839_v18 }
 0x669   :  { %6139 = vmatmul.mubr.f32.gmra.mrb[2].mxu1 %v10961_v37  ;;  %v6863_v37 = vpack.c.bf16 %v11074_v61, %v11083_v13 }
 0x66a   :  { %6141 = vmatprep.mubr.f32.mxu1 %v11009_v26  ;;  %v12926_v26 = vld [vmem:[#allocation88_spill] sm:$0xff] }
 0x66d   :  { %6142 = vmatmul.mubr.f32.gmra.mrb[4].mxu1 %v11011_v3  ;;  %6192 = vmatmul.mubr.f32.vlgmr.msra.gmra.mrb[0].mxu0 %v10864_v60  ;;  %v12927_v3 = vld [vmem:[#allocation91_spill] sm:$0xff] }
 0x66e   :  { %6144 = vmatprep.mubr.f32.mxu1 %v11031_v25  ;;  %6194 = vmatprep.mubr.f32.mxu0 %v10914_v34  ;;  %v12929_v25 = vld [vmem:[#allocation92_spill] sm:$0xff] }
 0x66f   :  { %6842 = vmatpush3.bf16.xpose.msra.mxu0 %v6839_v18  ;;  %v6867_v18 = vpack.c.bf16 %v11104_v35, %v11110_v24 }
 0x670   :  { %6844 = vmatprep.subr.bf16.mxu0 %v6843_v20 }
 0x671   :  { %6145 = vmatmul.mubr.f32.gmra.mrb[6].mxu1 %v11033_v51  ;;  %6195 = vmatmul.mubr.f32.gmra.mrb[2].mxu0 %v10916_v10  ;;  %v11233_v51 = vld [vmem:[%s12023_s5] sm:$0xff] }
 0x672   :  { %6147 = vmatprep.mubr.f32.mxu1 %v11067_v14  ;;  %6197 = vmatprep.mubr.f32.mxu0 %v10933_v41 }
 0x675   :  { %6148 = vmatmul.mubr.f32.gmra.mrb[8].mxu1 %v11060_v16  ;;  %6198 = vmatmul.mubr.f32.gmra.mrb[4].mxu0 %v10957_v7  ;;  %v12930_v16 = vld [vmem:[#allocation80_spill] sm:$0xff] }
 0x676   :  { %6150 = vmatprep.mubr.f32.mxu1 %v3070_v6  ;;  %6200 = vmatprep.mubr.f32.mxu0 %v10938_v23  ;;  %v11262_v6 = vld [vmem:[%s12023_s5 + $0x28] sm:$0xff] }
 0x677   :  { %6846 = vmatpush3.bf16.xpose.msra.mxu0 %v6843_v20  ;;  %v4203_v9 = vand.u32 4294901760, %v11262_v6  ;;  %v11284_v20 = vld [vmem:[%s12023_s5 + $0x30] sm:$0xff] }
 0x678   :  { %6848 = vmatprep.subr.bf16.mxu0 %v6847_v49 }
 0x679   :  { %6151 = vmatmul.mubr.f32.gmra.mrb[10].mxu1 %v3080_v46  ;;  %6201 = vmatmul.mubr.f32.gmra.mrb[6].mxu0 %v10981_v43  ;;  %v11257_v46 = vld [vmem:[%s12023_s5 + $0x20] sm:$0xff] }
 0x67a   :  { %6153 = vmatprep.mubr.f32.mxu1 %v3090_v33  ;;  %6203 = vmatprep.mubr.f32.mxu0 %v10973_v29  ;;  %v6855_v33 = vpack.c.bf16 %v11014_v55, %v10997_v56 }
 0x67d   :  { %6154 = vmatmul.mubr.f32.gmra.mrb[12].mxu1 %v3100_v40  ;;  %6204 = vmatmul.mubr.f32.gmra.mrb[8].mxu0 %v11006_v44  ;;  %v4200_v40 = vand.u32 4294901760, %v11257_v46 }
 0x67e   :  { %6156 = vmatprep.mubr.f32.mxu1 %v3110_v31  ;;  %6206 = vmatprep.mubr.f32.mxu0 %v11023_v52  ;;  %v6859_v31 = vpack.c.bf16 %v11040_v19, %v11046_v47 }
 0x67f   :  { %6850 = vmatpush3.bf16.xpose.msra.mxu0 %v6847_v49  ;;  %v11289_v49 = vld [vmem:[%s12023_s5 + $0x38] sm:$0xff] }
 0x680   :  { %6852 = vmatprep.subr.bf16.mxu0 %v6851_v8 }
 0x681   :  { %6157 = vmatmul.mubr.f32.gmra.mrb[14].mxu1 %v3120_v17  ;;  %6207 = vmatmul.mubr.f32.gmra.mrb[10].mxu0 %v11029_v5 }
 0x682   :  { %6209 = vmatprep.mubr.f32.mxu0 %v11065_v28 }
 0x685   :  { %6210 = vmatmul.mubr.f32.gmra.mrb[12].mxu0 %v11058_v36 }
 0x686   :  { %6212 = vmatprep.mubr.f32.mxu0 %v11097_v27 }
 0x687   :  { %6854 = vmatpush3.bf16.xpose.msra.mxu0 %v6851_v8  ;;  %v11298_v8 = vpack.c.bf16 %v4203_v9, %v4200_v40 }
 0x688   :  { %6856 = vmatprep.subr.bf16.mxu0 %v6855_v33 }
 0x689   :  { %6213 = vmatmul.mubr.f32.gmra.mrb[14].mxu0 %v11092_v32 }
 0x68a   :  { %6247 = vmatprep.mubr.f32.mxu0 %v10868_v50  ;;  %v6903_v50 = vpack.c.bf16 %v10884_v22, %v10880_v54 }
 0x68f   :  { %6858 = vmatpush3.bf16.xpose.msra.mxu0 %v6855_v33  ;;  %v4206_v33 = vand.u32 4294901760, %v11284_v20 }
 0x690   :  { %6860 = vmatprep.subr.bf16.mxu0 %v6859_v31 }
 0x697   :  { %6862 = vmatpush3.bf16.xpose.msra.mxu0 %v6859_v31  ;;  %v4209_v31 = vand.u32 4294901760, %v11289_v49 }
 0x698   :  { %6864 = vmatprep.subr.bf16.mxu0 %v6863_v37 }
 0x69f   :  { %6866 = vmatpush3.bf16.xpose.msra.mxu0 %v6863_v37  ;;  %v11305_v37 = vld [vmem:[%s12023_s5 + $0x40] sm:$0xff] }
 0x6a0   :  { %6868 = vmatprep.subr.bf16.mxu0 %v6867_v18 }
 0x6a7   :  { %6870 = vmatpush3.bf16.xpose.msra.mxu0 %v6867_v18  ;;  %v11310_v18 = vld [vmem:[%s12023_s5 + $0x48] sm:$0xff] }
 0x6a8   :  { %6872 = vmatprep.subr.bf16.mxu0 %v10873_v63 }
 0x6ae   :  { %6248 = vmatmul.mubr.f32.vlgmr.msra.gmra.mrb[0].mxu0 %v10876_v39  ;;  %v12918_v39 = vld [vmem:[#allocation81_spill] sm:$0xff] }
 0x6af   :  { %6250 = vmatprep.mubr.f32.mxu0 %v10919_v62  ;;  %6874 = vmatpush3.bf16.xpose.msra.mxu0 %v10873_v63  ;;  %v6907_v62 = vpack.c.bf16 %v12918_v39, %v10930_v11 }
 0x6b0   :  { %6876 = vmatprep.subr.bf16.mxu0 %v10926_v38 }
 0x6b2   :  { %6251 = vmatmul.mubr.f32.gmra.mrb[2].mxu0 %v10922_v0  ;;  %v12919_v0 = vld [vmem:[#allocation84_spill] sm:$0xff] }
 0x6b3   :  { %6253 = vmatprep.mubr.f32.mxu0 %v10942_v1  ;;  %v12920_v1 = vld [vmem:[#allocation85_spill] sm:$0xff] }
 0x6b6   :  { %6254 = vmatmul.mubr.f32.gmra.mrb[4].mxu0 %v10968_v57  ;;  %v12923_v57 = vld [vmem:[#allocation86_spill] sm:$0xff] }
 0x6b7   :  { %6256 = vmatprep.mubr.f32.mxu0 %v10948_v48  ;;  %6878 = vmatpush3.bf16.xpose.msra.mxu0 %v10926_v38  ;;  %v12921_v48 = vld [vmem:[#allocation82_spill] sm:$0xff] }
 0x6b8   :  { %6880 = vmatprep.subr.bf16.mxu0 %v10965_v42 }
 0x6ba   :  { %6257 = vmatmul.mubr.f32.gmra.mrb[6].mxu0 %v10991_v58 }
 0x6bb   :  { %6259 = vmatprep.mubr.f32.mxu0 %v10997_v56  ;;  %v12925_v56 = vld [vmem:[#allocation89_spill] sm:$0xff] }
 0x6bc   :  { %v6923_v21 = vpack.c.bf16 %v12926_v26, %v12925_v56 }
 0x6be   :  { %6260 = vmatmul.mubr.f32.gmra.mrb[8].mxu0 %v11014_v55  ;;  %v12928_v55 = vld [vmem:[#allocation90_spill] sm:$0xff] }
 0x6bf   :  { %6262 = vmatprep.mubr.f32.mxu0 %v11046_v47  ;;  %6882 = vmatpush3.bf16.xpose.msra.mxu0 %v10965_v42  ;;  %v11243_v47 = vld [vmem:[%s12023_s5 + $0x10] sm:$0xff] }
 0x6c0   :  { %6884 = vmatprep.subr.bf16.mxu0 %v10988_v45 }
 0x6c2   :  { %6263 = vmatmul.mubr.f32.gmra.mrb[10].mxu0 %v11040_v19  ;;  %v11238_v19 = vld [vmem:[%s12023_s5 + $0x8] sm:$0xff] }
 0x6c3   :  { %6265 = vmatprep.mubr.f32.mxu0 %v11083_v13  ;;  %v4191_v14 = vand.u32 4294901760, %v11238_v19  ;;  %v4194_v13 = vand.u32 4294901760, %v11243_v47 }
 0x6c6   :  { %6266 = vmatmul.mubr.f32.gmra.mrb[12].mxu0 %v11074_v61  ;;  %v11251_v61 = vld [vmem:[%s12023_s5 + $0x18] sm:$0xff] }
 0x6c7   :  { %6268 = vmatprep.mubr.f32.mxu0 %v11110_v24  ;;  %6886 = vmatpush3.bf16.xpose.msra.mxu0 %v10988_v45  ;;  %v4197_v59 = vand.u32 4294901760, %v11251_v61 }
 0x6c8   :  { %6888 = vmatprep.subr.bf16.mxu0 %v11037_v2 }
 0x6c9   :  { %v11279_v30 = vpack.c.bf16 %v4197_v59, %v4194_v13 }
 0x6ca   :  { %6269 = vmatmul.mubr.f32.gmra.mrb[14].mxu0 %v11104_v35  ;;  %v4188_v35 = vand.u32 4294901760, %v11233_v51 }
 0x6cb   :  { %6303 = vmatprep.mubr.f32.mxu0 %v10880_v54  ;;  %v6911_v54 = vpack.c.bf16 %v12920_v1, %v12919_v0 }
 0x6cc   :  { %v11269_v24 = vpack.c.bf16 %v4191_v14, %v4188_v35 }
 0x6ce   :  { %6968 = vmatprep.subr.bf16.mxu1 %v11269_v24 }
 0x6cf   :  { %6890 = vmatpush3.bf16.xpose.msra.mxu0 %v11037_v2  ;;  %6970 = vmatpush3.bf16.msra.mxu1 %v11269_v24 }
 0x6d0   :  { %6892 = vmatprep.subr.bf16.mxu0 %v11071_v15  ;;  %6972 = vmatprep.subr.bf16.mxu1 %v11279_v30 }
 0x6d3   :  { %6974 = vmatpush3.bf16.msra.mxu1 %v11279_v30 }
 0x6d4   :  { %6976 = vmatprep.subr.bf16.mxu1 %v11298_v8 }
 0x6d7   :  { %6894 = vmatpush3.bf16.xpose.msra.mxu0 %v11071_v15  ;;  %6978 = vmatpush3.bf16.msra.mxu1 %v11298_v8 }
 0x6d8   :  { %6896 = vmatprep.subr.bf16.mxu0 %v11101_v12 }
 0x6df   :  { %6898 = vmatpush3.bf16.xpose.msra.mxu0 %v11101_v12 }
 0x6e0   :  { %6900 = vmatprep.subr.bf16.mxu0 %v11123_v4 }
 0x6e7   :  { %6902 = vmatpush3.bf16.xpose.msra.mxu0 %v11123_v4 }
 0x6e8   :  { %6904 = vmatprep.subr.bf16.mxu0 %v6903_v50 }
 0x6ee   :  { %6304 = vmatmul.mubr.f32.vlgmr.msra.gmra.mrb[0].mxu0 %v10884_v22  ;;  %v12922_v22 = vld [vmem:[#allocation83_spill] sm:$0xff] }
 0x6ef   :  { %6306 = vmatprep.mubr.f32.mxu0 %v10930_v11  ;;  %6906 = vmatpush3.bf16.xpose.msra.mxu0 %v6903_v50  ;;  %v12924_v11 = vld [vmem:[#allocation87_spill] sm:$0xff]  ;;  %v6915_v58 = vpack.c.bf16 %v12922_v22, %v12921_v48  ;;  %v11318_v50 = vpack.c.bf16 %v4209_v31, %v4206_v33 }
 0x6f0   :  { %6908 = vmatprep.subr.bf16.mxu0 %v6907_v62  ;;  %v6919_v17 = vpack.c.bf16 %v12924_v11, %v12923_v57 }
 0x6f1   :  { %6980 = vmatprep.subr.bf16.mxu1 %v11318_v50 }
 0x6f2   :  { %6307 = vmatmul.mubr.f32.gmra.mrb[2].mxu0 %v12918_v39  ;;  %v12100_v39 = vand.u32 4294901760, %v11305_v37  ;;  %6982 = vmatpush3.bf16.msra.mxu1 %v11318_v50 }
 0x6f3   :  { %6309 = vmatprep.mubr.f32.mxu0 %v12919_v0  ;;  %v6927_v0 = vpack.c.bf16 %v12928_v55, %v12927_v3 }
 0x6f6   :  { %6310 = vmatmul.mubr.f32.gmra.mrb[4].mxu0 %v12920_v1 }
 0x6f7   :  { %6312 = vmatprep.mubr.f32.mxu0 %v12921_v48  ;;  %6910 = vmatpush3.bf16.xpose.msra.mxu0 %v6907_v62  ;;  %v12097_v62 = vand.u32 4294901760, %v11310_v18 }
 0x6f8   :  { %6912 = vmatprep.subr.bf16.mxu0 %v6911_v54 }
 0x6f9   :  { %v11330_v1 = vpack.c.bf16 %v12097_v62, %v12100_v39 }
 0x6fa   :  { %6313 = vmatmul.mubr.f32.gmra.mrb[6].mxu0 %v12922_v22 }
 0x6fb   :  { %6315 = vmatprep.mubr.f32.mxu0 %v12923_v57  ;;  %12931 = vst [vmem:[#allocation93_spill] sm:$0xff] %v11330_v1  ;;  %6984 = vmatprep.subr.bf16.mxu1 %v11330_v1 }
 0x6fc   :  { %6986 = vmatpush3.bf16.msra.mxu1 %v11330_v1 }
 0x6fe   :  { %6316 = vmatmul.mubr.f32.gmra.mrb[8].mxu0 %v12924_v11 }
 0x6ff   :  { %6318 = vmatprep.mubr.f32.mxu0 %v12925_v56  ;;  %6914 = vmatpush3.bf16.xpose.msra.mxu0 %v6911_v54  ;;  %v6931_v54 = vpack.c.bf16 %v12929_v25, %v11119_v53 }
 0x700   :  { %6916 = vmatprep.subr.bf16.mxu0 %v6915_v58 }
 0x702   :  { %6319 = vmatmul.mubr.f32.gmra.mrb[10].mxu0 %v12926_v26 }
 0x703   :  { %6321 = vmatprep.mubr.f32.mxu0 %v12927_v3 }
 0x706   :  { %6322 = vmatmul.mubr.f32.gmra.mrb[12].mxu0 %v12928_v55 }
 0x707   :  { %6324 = vmatprep.mubr.f32.mxu0 %v11119_v53  ;;  %6918 = vmatpush3.bf16.xpose.msra.mxu0 %v6915_v58 }
 0x708   :  { %6920 = vmatprep.subr.bf16.mxu0 %v6919_v17 }
 0x70a   :  { %6325 = vmatmul.mubr.f32.gmra.mrb[14].mxu0 %v12929_v25 }
 0x70b   :  { %6359 = vmatprep.mubr.f32.mxu0 %v12930_v16 }
 0x70f   :  { %6922 = vmatpush3.bf16.xpose.msra.mxu0 %v6919_v17 }
 0x710   :  { %6924 = vmatprep.subr.bf16.mxu0 %v6923_v21 }
 0x717   :  { %6926 = vmatpush3.bf16.xpose.msra.mxu0 %v6923_v21 }
 0x718   :  { %6928 = vmatprep.subr.bf16.mxu0 %v6927_v0 }
 0x71f   :  { %6930 = vmatpush3.bf16.xpose.msra.mxu0 %v6927_v0 }
 0x720   :  { %6932 = vmatprep.subr.bf16.mxu0 %v6931_v54 }
 0x727   :  { %6934 = vmatpush3.bf16.xpose.msra.mxu0 %v6931_v54 }
 0x728   :  { %6936 = vmatprep.subr.bf16.mxu0 %v10873_v63 }
 0x72e   :  { %6360 = vmatmul.mubr.f32.vlgmr.msra.gmra.mrb[0].mxu0 %v10864_v60 }
 0x72f   :  { %6362 = vmatprep.mubr.f32.mxu0 %v10914_v34  ;;  %6938 = vmatpush3.bf16.xpose.msra.mxu0 %v10873_v63 }
 0x730   :  { %6940 = vmatprep.subr.bf16.mxu0 %v10926_v38 }
 0x732   :  { %6363 = vmatmul.mubr.f32.gmra.mrb[2].mxu0 %v10916_v10 }
 0x733   :  { %6365 = vmatprep.mubr.f32.mxu0 %v10933_v41 }
 0x736   :  { %6366 = vmatmul.mubr.f32.gmra.mrb[4].mxu0 %v10957_v7 }
 0x737   :  { %6368 = vmatprep.mubr.f32.mxu0 %v10938_v23  ;;  %6942 = vmatpush3.bf16.xpose.msra.mxu0 %v10926_v38 }
 0x738   :  { %6944 = vmatprep.subr.bf16.mxu0 %v10965_v42  ;;  %v11348_v53 = vpop.f32.mrb[0].mxu1 }
 0x739   :  { %v11350_v48 = vpop.f32.mrb[1].mxu1 }
 0x73a   :  { %6369 = vmatmul.mubr.f32.gmra.mrb[6].mxu0 %v10981_v43 }
 0x73b   :  { %6371 = vmatprep.mubr.f32.mxu0 %v10973_v29 }
 0x73c   :  { %v11354_v63 = vpop.f32.mrb[2].mxu1 }
 0x73d   :  { %v11356_v22 = vpop.f32.mrb[3].mxu1 }
 0x73e   :  { %6372 = vmatmul.mubr.f32.gmra.mrb[8].mxu0 %v11006_v44 }
 0x73f   :  { %6374 = vmatprep.mubr.f32.mxu0 %v11023_v52  ;;  %6946 = vmatpush3.bf16.xpose.msra.mxu0 %v10965_v42 }
 0x740   :  { %6948 = vmatprep.subr.bf16.mxu0 %v10988_v45  ;;  %v11362_v38 = vpop.f32.mrb[4].mxu1 }
 0x741   :  { %v11364_v57 = vpop.f32.mrb[5].mxu1 }
 0x742   :  { %6375 = vmatmul.mubr.f32.gmra.mrb[10].mxu0 %v11029_v5 }
 0x743   :  { %6377 = vmatprep.mubr.f32.mxu0 %v11065_v28 }
 0x744   :  { %v11368_v11 = vpop.f32.mrb[6].mxu1 }
 0x745   :  { %v11370_v58 = vpop.f32.mrb[7].mxu1 }
 0x746   :  { %6378 = vmatmul.mubr.f32.gmra.mrb[12].mxu0 %v11058_v36 }
 0x747   :  { %6380 = vmatprep.mubr.f32.mxu0 %v11097_v27  ;;  %6950 = vmatpush3.bf16.xpose.msra.mxu0 %v10988_v45 }
 0x748   :  { %6952 = vmatprep.subr.bf16.mxu0 %v11037_v2  ;;  %v11376_v42 = vpop.f32.mrb[8].mxu1 }
 0x749   :  { %v11378_v56 = vpop.f32.mrb[9].mxu1 }
 0x74a   :  { %6381 = vmatmul.mubr.f32.gmra.mrb[14].mxu0 %v11092_v32 }
 0x74b   :  { %6415 = vmatprep.mubr.f32.mxu0 %v12930_v16 }
 0x74c   :  { %v11382_v26 = vpop.f32.mrb[10].mxu1 }
 0x74d   :  { %v11384_v3 = vpop.f32.mrb[11].mxu1 }
 0x74f   :  { %6954 = vmatpush3.bf16.xpose.msra.mxu0 %v11037_v2  ;;  %v4185_v2 = vld [vmem:[%s12023_s5 + $0x70] sm:$0xff] }
 0x750   :  { %6956 = vmatprep.subr.bf16.mxu0 %v11071_v15  ;;  %v11388_v55 = vpop.f32.mrb[12].mxu1 }
 0x751   :  { %v11390_v45 = vpop.f32.mrb[13].mxu1 }
 0x754   :  { %v11392_v17 = vpop.f32.mrb[14].mxu1 }
 0x755   :  { %v11394_v25 = vpop.f32.mrb[15].mxu1 }
 0x757   :  { %6958 = vmatpush3.bf16.xpose.msra.mxu0 %v11071_v15 }
 0x758   :  { %6960 = vmatprep.subr.bf16.mxu0 %v11101_v12 }
 0x75f   :  { %6962 = vmatpush3.bf16.xpose.msra.mxu0 %v11101_v12 }
 0x760   :  { %6964 = vmatprep.subr.bf16.mxu0 %v11123_v4 }
 0x767   :  { %6966 = vmatpush3.bf16.xpose.msra.mxu0 %v11123_v4 }
 0x76e   :  { %6416 = vmatmul.mubr.f32.vlgmr.msra.gmra.mrb[0].mxu0 %v10864_v60  ;;  %v4181_v60 = vld [vmem:[%s12023_s5 + $0x50] sm:$0xff] }
 0x76f   :  { %6418 = vmatprep.mubr.f32.mxu0 %v10914_v34  ;;  %v4182_v34 = vld [vmem:[%s12023_s5 + $0x58] sm:$0xff] }
 0x772   :  { %6419 = vmatmul.mubr.f32.gmra.mrb[2].mxu0 %v10916_v10  ;;  %v4218_v10 = vand.u32 4294901760, %v4181_v60 }
 0x773   :  { %6421 = vmatprep.mubr.f32.mxu0 %v10933_v41  ;;  %v4221_v41 = vand.u32 4294901760, %v4182_v34 }
 0x774   :  { %v11467_v21 = vsub.f32 %v4181_v60, %v4218_v10 }
 0x775   :  { %v11469_v0 = vsub.f32 %v4182_v34, %v4221_v41 }
 0x776   :  { %6422 = vmatmul.mubr.f32.gmra.mrb[4].mxu0 %v10957_v7  ;;  %v4183_v7 = vld [vmem:[%s12023_s5 + $0x60] sm:$0xff]  ;;  %12937 = vst [vmem:[#allocation97_spill] sm:$0xff] %v11467_v21  ;;  %v12090_v54 = vand.u32 4294901760, %v11467_v21 }
 0x777   :  { %6424 = vmatprep.mubr.f32.mxu0 %v10938_v23  ;;  %v11422_v23 = vpack.c.bf16 %v4221_v41, %v4218_v10  ;;  %12938 = vst [vmem:[#allocation100_spill] sm:$0xff] %v11469_v0 }
 0x779   :  { %12932 = vst [vmem:[#allocation94_spill] sm:$0xff] %v11422_v23  ;;  %6988 = vmatprep.subr.bf16.mxu1 %v11422_v23 }
 0x77a   :  { %6425 = vmatmul.mubr.f32.gmra.mrb[6].mxu0 %v10981_v43  ;;  %v4224_v43 = vand.u32 4294901760, %v4183_v7  ;;  %6990 = vmatpush3.bf16.msra.mxu1 %v11422_v23 }
 0x77b   :  { %6427 = vmatprep.mubr.f32.mxu0 %v10973_v29  ;;  %v4184_v29 = vld [vmem:[%s12023_s5 + $0x68] sm:$0xff] }
 0x77e   :  { %6428 = vmatmul.mubr.f32.gmra.mrb[8].mxu0 %v11006_v44  ;;  %v4227_v44 = vand.u32 4294901760, %v4184_v29 }
 0x77f   :  { %6430 = vmatprep.mubr.f32.mxu0 %v11023_v52  ;;  %v11437_v52 = vsub.f32 %v11233_v51, %v4188_v35 }
 0x780   :  { %v11432_v12 = vpack.c.bf16 %v4227_v44, %v4224_v43 }
 0x781   :  { %12934 = vst [vmem:[#allocation98_spill] sm:$0xff] %v11437_v52  ;;  %v12088_v15 = vand.u32 4294901760, %v11437_v52 }
 0x782   :  { %6431 = vmatmul.mubr.f32.gmra.mrb[10].mxu0 %v11029_v5  ;;  %12933 = vst [vmem:[#allocation95_spill] sm:$0xff] %v11432_v12  ;;  %v11442_v5 = vsub.f32 %v11238_v19, %v4191_v14  ;;  %6992 = vmatprep.subr.bf16.mxu1 %v11432_v12 }
 0x783   :  { %6433 = vmatprep.mubr.f32.mxu0 %v11065_v28  ;;  %6994 = vmatpush3.bf16.msra.mxu1 %v11432_v12  ;;  %v4432_v51 = vsub.f32 %v11437_v52, %v12088_v15  ;;  %v12091_v15 = vand.u32 4294901760, %v11469_v0 }
 0x784   :  { %12935 = vst [vmem:[#allocation96_spill] sm:$0xff] %v11442_v5 }
 0x785   :  { %v4433_v16 = vand.u32 4294901760, %v4432_v51  ;;  %v4509_v51 = vsub.f32 %v11469_v0, %v12091_v15 }
 0x786   :  { %6434 = vmatmul.mubr.f32.gmra.mrb[12].mxu0 %v11058_v36  ;;  %v4230_v36 = vand.u32 4294901760, %v4185_v2 }
 0x787   :  { %6436 = vmatprep.mubr.f32.mxu0 %v11097_v27  ;;  %v12089_v27 = vand.u32 4294901760, %v11442_v5  ;;  %v4510_v10 = vand.u32 4294901760, %v4509_v51 }
 0x789   :  { %v4439_v19 = vsub.f32 %v11442_v5, %v12089_v27  ;;  %v4502_v27 = vsub.f32 %v11467_v21, %v12090_v54 }
 0x78a   :  { %6437 = vmatmul.mubr.f32.gmra.mrb[14].mxu0 %v11092_v32  ;;  %v4186_v32 = vld [vmem:[%s12023_s5 + $0x78] sm:$0xff] }
 0x78b   :  { %v4233_v28 = vand.u32 4294901760, %v4186_v32  ;;  %v4440_v35 = vand.u32 4294901760, %v4439_v19  ;;  %v11479_v19 = vsub.f32 %v4183_v7, %v4224_v43  ;;  %v4503_v60 = vand.u32 4294901760, %v4502_v27 }
 0x78c   :  { %v11493_v7 = vsub.f32 %v4185_v2, %v4230_v36 }
 0x78d   :  { %v11454_v4 = vpack.c.bf16 %v4233_v28, %v4230_v36  ;;  %v11464_v14 = vpack.c.bf16 %v4440_v35, %v4433_v16  ;;  %12939 = vst [vmem:[#allocation101_spill] sm:$0xff] %v11479_v19  ;;  %v11481_v16 = vsub.f32 %v4184_v29, %v4227_v44  ;;  %v12095_v34 = vand.u32 4294901760, %v11479_v19 }
 0x78e   :  { %v11485_v35 = vpack.c.bf16 %v4510_v10, %v4503_v60  ;;  %12941 = vst [vmem:[#allocation103_spill] sm:$0xff] %v11493_v7  ;;  %v11495_v29 = vsub.f32 %v4186_v32, %v4233_v28  ;;  %v12094_v27 = vand.u32 4294901760, %v11493_v7  ;;  %v11511_v28 = vpack.c.bf16 %v11442_v5, %v11437_v52 }
 0x78f   :  { %12936 = vst [vmem:[#allocation99_spill] sm:$0xff] %v11454_v4  ;;  %6996 = vmatprep.subr.bf16.mxu1 %v11454_v4  ;;  %12940 = vst [vmem:[#allocation102_spill] sm:$0xff] %v11481_v16  ;;  %v12092_v41 = vand.u32 4294901760, %v11481_v16  ;;  %v4516_v54 = vsub.f32 %v11479_v19, %v12095_v34 }
 0x790   :  { %6998 = vmatpush3.bf16.msra.mxu1 %v11454_v4  ;;  %12942 = vst [vmem:[#allocation106_spill] sm:$0xff] %v11495_v29  ;;  %v12093_v51 = vand.u32 4294901760, %v11495_v29  ;;  %v4530_v10 = vsub.f32 %v11493_v7, %v12094_v27 }
 0x791   :  { %7000 = vmatprep.subr.bf16.mxu1 %v11464_v14  ;;  %v4523_v15 = vsub.f32 %v11481_v16, %v12092_v41  ;;  %v4517_v43 = vand.u32 4294901760, %v4516_v54  ;;  %v11519_v54 = vpack.c.bf16 %v11481_v16, %v11479_v19 }
 0x792   :  { %v4537_v41 = vsub.f32 %v11495_v29, %v12093_v51  ;;  %v4531_v2 = vand.u32 4294901760, %v4530_v10  ;;  %v11538_v10 = vsub.f32 %v11257_v46, %v4200_v40 }
 0x793   :  { %v4524_v44 = vand.u32 4294901760, %v4523_v15  ;;  %v11515_v15 = vpack.c.bf16 %v11469_v0, %v11467_v21 }
 0x794   :  { %v4538_v36 = vand.u32 4294901760, %v4537_v41  ;;  %v11528_v41 = vsub.f32 %v11243_v47, %v4194_v13  ;;  %v12098_v13 = vand.u32 4294901760, %v11538_v10 }
 0x795   :  { %v11499_v60 = vpack.c.bf16 %v4524_v44, %v4517_v43  ;;  %v11523_v43 = vpack.c.bf16 %v11495_v29, %v11493_v7  ;;  %v11533_v44 = vsub.f32 %v11251_v61, %v4197_v59 }
 0x796   :  { %v11507_v32 = vpack.c.bf16 %v4538_v36, %v4531_v2  ;;  %v11543_v2 = vsub.f32 %v11262_v6, %v4203_v9  ;;  %v12096_v36 = vand.u32 4294901760, %v11528_v41  ;;  %v4460_v9 = vsub.f32 %v11538_v10, %v12098_v13 }
 0x797   :  { %v12099_v47 = vand.u32 4294901760, %v11533_v44 }
 0x798   :  { %v12101_v51 = vand.u32 4294901760, %v11543_v2  ;;  %v4446_v59 = vsub.f32 %v11528_v41, %v12096_v36  ;;  %v11566_v36 = vsub.f32 %v11284_v20, %v4206_v33  ;;  %v4461_v20 = vand.u32 4294901760, %v4460_v9 }
 0x799   :  { %v4453_v46 = vsub.f32 %v11533_v44, %v12099_v47 }
 0x79a   :  { %v4467_v27 = vsub.f32 %v11543_v2, %v12101_v51  ;;  %v4447_v47 = vand.u32 4294901760, %v4446_v59 }
 0x79b   :  { %v4454_v39 = vand.u32 4294901760, %v4453_v46  ;;  %v12943_v46 = vand.u32 4294901760, %v11305_v37 }
 0x79c   :  { %v4468_v33 = vand.u32 4294901760, %v4467_v27 }
 0x841   :  { %v6417_v61 = vpop.f32.mrb[0].mxu0 }
 0x842   :  { %v7159_v6 = vadd.f32 %v6417_v61, %v11348_v53  ;;  %v4077_v40 = vpop.f32.mrb[1].mxu0  ;;  %v11573_v53 = vsub.f32 %v11289_v49, %v4209_v31  ;;  %v11610_v49 = vpack.c.bf16 %v4468_v33, %v4461_v20 }
 0x843   :  { %v7160_v34 = vadd.f32 %v4077_v40, %v11350_v48 }
 0x844   :  { %v11568_v62 = vand.u32 4294901760, %v7159_v6  ;;  %v12947_v20 = vand.u32 4294901760, %v11573_v53 }
 0x845   :  { %v11575_v61 = vand.u32 4294901760, %v7160_v34  ;;  %v6420_v13 = vpop.f32.mrb[2].mxu0 }
 0x846   :  { %v11578_v51 = vsub.f32 %v7159_v6, %v11568_v62  ;;  %v7161_v48 = vadd.f32 %v6420_v13, %v11354_v63  ;;  %v4089_v40 = vpop.f32.mrb[3].mxu0  ;;  %v11593_v63 = vsub.f32 %v11305_v37, %v12943_v46  ;;  %v7003_v6 = vpack.c.bf16 %v4454_v39, %v4447_v47 }
 0x847   :  { %v11582_v29 = vsub.f32 %v7160_v34, %v11575_v61  ;;  %v7162_v7 = vadd.f32 %v4089_v40, %v11356_v22  ;;  %v12944_v22 = vand.u32 4294901760, %v11310_v18  ;;  %v4481_v33 = vsub.f32 %v11573_v53, %v12947_v20 }
 0x848   :  { %v12105_v31 = vand.u32 4294901760, %v11578_v51  ;;  %v11587_v16 = vand.u32 4294901760, %v7161_v48  ;;  %v12949_v52 = vand.u32 4294901760, %v11593_v63 }
 0x849   :  { %v11595_v13 = vand.u32 4294901760, %v7162_v7  ;;  %v6423_v27 = vpop.f32.mrb[4].mxu0  ;;  %v11601_v9 = vsub.f32 %v11310_v18, %v12944_v22  ;;  %v12945_v18 = vand.u32 4294901760, %v11582_v29  ;;  %v12946_v22 = vand.u32 4294901760, %v11566_v36 }
 0x84a   :  { %v4281_v40 = vsub.f32 %v11578_v51, %v12105_v31  ;;  %v11607_v59 = vsub.f32 %v7161_v48, %v11587_v16  ;;  %v7163_v37 = vadd.f32 %v6423_v27, %v11362_v38  ;;  %v4101_v46 = vpop.f32.mrb[5].mxu0 }
 0x84b   :  { %v11613_v34 = vsub.f32 %v7162_v7, %v11595_v13  ;;  %v7164_v39 = vadd.f32 %v4101_v46, %v11364_v57  ;;  %v4271_v47 = vsub.f32 %v11582_v29, %v12945_v18  ;;  %v4474_v31 = vsub.f32 %v11566_v36, %v12946_v22 }
 0x84c   :  { %v11622_v48 = vand.u32 4294901760, %v7163_v37  ;;  %v4282_v0 = vand.u32 4294901760, %v4281_v40  ;;  %v12948_v5 = vand.u32 4294901760, %v11607_v59 }
 0x84d   :  { %v11629_v27 = vand.u32 4294901760, %v7164_v39  ;;  %v6426_v57 = vpop.f32.mrb[6].mxu0  ;;  %v4272_v46 = vand.u32 4294901760, %v4271_v47  ;;  %v12111_v18 = vand.u32 4294901760, %v11613_v34  ;;  %v4475_v19 = vand.u32 4294901760, %v4474_v31 }
 0x84e   :  { %v11634_v22 = vsub.f32 %v7163_v37, %v11622_v48  ;;  %v7165_v38 = vadd.f32 %v6426_v57, %v11368_v11  ;;  %v4113_v21 = vpop.f32.mrb[7].mxu0  ;;  %v4301_v20 = vsub.f32 %v11607_v59, %v12948_v5  ;;  %v4482_v57 = vand.u32 4294901760, %v4481_v33 }
 0x84f   :  { %v11641_v7 = vsub.f32 %v7164_v39, %v11629_v27  ;;  %v7166_v47 = vadd.f32 %v4113_v21, %v11370_v58  ;;  %6471 = vmatprep.mubr.f32.mxu1 %v4272_v46  ;;  %v4291_v40 = vsub.f32 %v11613_v34, %v12111_v18  ;;  %v4488_v5 = vsub.f32 %v11593_v63, %v12949_v52 }
 0x850   :  { %v11647_v37 = vand.u32 4294901760, %v7165_v38  ;;  %6472 = vmatmul.mubr.f32.vlgmr.msra.gmra.mrb[16].mxu1 %v4282_v0  ;;  %v12950_v31 = vand.u32 4294901760, %v11601_v9  ;;  %v4302_v52 = vand.u32 4294901760, %v4301_v20  ;;  %v12951_v4 = vand.u32 4294901760, %v11634_v22 }
 0x851   :  { %v11653_v39 = vand.u32 4294901760, %v7166_v47  ;;  %7002 = vmatpush3.bf16.msra.mxu1 %v11464_v14  ;;  %v6429_v58 = vpop.f32.mrb[8].mxu0  ;;  %v4292_v21 = vand.u32 4294901760, %v4291_v40 }
 0x852   :  { %v4495_v18 = vsub.f32 %v11601_v9, %v12950_v31  ;;  %v11661_v0 = vsub.f32 %v7165_v38, %v11647_v37  ;;  %v7167_v33 = vadd.f32 %v6429_v58, %v11376_v42  ;;  %v4125_v11 = vpop.f32.mrb[9].mxu0  ;;  %7004 = vmatprep.subr.bf16.mxu1 %v7003_v6  ;;  %v4321_v14 = vsub.f32 %v11634_v22, %v12951_v4 }
 0x853   :  { %v11668_v40 = vsub.f32 %v7166_v47, %v11653_v39  ;;  %v7168_v46 = vadd.f32 %v4125_v11, %v11378_v56  ;;  %6474 = vmatprep.mubr.f32.mxu1 %v4292_v21  ;;  %v12952_v31 = vand.u32 4294901760, %v11641_v7  ;;  %v7011_v42 = vpack.c.bf16 %v4482_v57, %v4475_v19 }
 0x854   :  { %v11674_v12 = vand.u32 4294901760, %v7167_v33  ;;  %6475 = vmatmul.mubr.f32.gmra.mrb[18].mxu1 %v4302_v52  ;;  %v12120_v20 = vand.u32 4294901760, %v11661_v0  ;;  %v4489_v58 = vand.u32 4294901760, %v4488_v5  ;;  %v4496_v56 = vand.u32 4294901760, %v4495_v18 }
 0x855   :  { %v4311_v38 = vsub.f32 %v11641_v7, %v12952_v31  ;;  %v11677_v23 = vand.u32 4294901760, %v7168_v46  ;;  %7006 = vmatpush3.bf16.msra.mxu1 %v7003_v6  ;;  %v6432_v4 = vpop.f32.mrb[10].mxu0  ;;  %v12121_v1 = vand.u32 4294901760, %v11668_v40  ;;  %v4322_v19 = vand.u32 4294901760, %v4321_v14 }
 0x856   :  { %v11681_v11 = vsub.f32 %v7167_v33, %v11674_v12  ;;  %v7169_v21 = vadd.f32 %v6432_v4, %v11382_v26  ;;  %v4137_v31 = vpop.f32.mrb[11].mxu0  ;;  %7008 = vmatprep.subr.bf16.mxu1 %v11610_v49  ;;  %v4341_v57 = vsub.f32 %v11661_v0, %v12120_v20  ;;  %v7015_v4 = vpack.c.bf16 %v4496_v56, %v4489_v58 }
 0x857   :  { %v4312_v47 = vand.u32 4294901760, %v4311_v38  ;;  %v11689_v6 = vsub.f32 %v7168_v46, %v11677_v23  ;;  %v7170_v5 = vadd.f32 %v4137_v31, %v11384_v3  ;;  %v4331_v18 = vsub.f32 %v11668_v40, %v12121_v1 }
 0x858   :  { %v11695_v33 = vand.u32 4294901760, %v7169_v21  ;;  %v12122_v26 = vand.u32 4294901760, %v11681_v11  ;;  %v4342_v20 = vand.u32 4294901760, %v4341_v57 }
 0x859   :  { %6477 = vmatprep.mubr.f32.mxu1 %v4312_v47  ;;  %v11698_v52 = vand.u32 4294901760, %v7170_v5  ;;  %7010 = vmatpush3.bf16.msra.mxu1 %v11610_v49  ;;  %v6435_v14 = vpop.f32.mrb[12].mxu0  ;;  %v4332_v38 = vand.u32 4294901760, %v4331_v18  ;;  %v4350_v46 = vand.u32 4294901760, %v11689_v6 }
 0x85a   :  { %6478 = vmatmul.mubr.f32.gmra.mrb[20].mxu1 %v4322_v19  ;;  %v11703_v3 = vsub.f32 %v7169_v21, %v11695_v33  ;;  %v7171_v47 = vadd.f32 %v6435_v14, %v11388_v55  ;;  %v4149_v31 = vpop.f32.mrb[13].mxu0  ;;  %7012 = vmatprep.subr.bf16.mxu1 %v7011_v42  ;;  %v4361_v19 = vsub.f32 %v11681_v11, %v12122_v26 }
 0x85b   :  { %v11710_v1 = vsub.f32 %v7170_v5, %v11698_v52  ;;  %v7172_v49 = vadd.f32 %v4149_v31, %v11390_v45  ;;  %6480 = vmatprep.mubr.f32.mxu1 %v4332_v38  ;;  %v4351_v58 = vsub.f32 %v11689_v6, %v4350_v46 }
 0x85c   :  { %v11716_v56 = vand.u32 4294901760, %v7171_v47  ;;  %v12123_v55 = vand.u32 4294901760, %v11703_v3  ;;  %v4362_v31 = vand.u32 4294901760, %v4361_v19 }
 0x85d   :  { %v11719_v21 = vand.u32 4294901760, %v7172_v49  ;;  %7014 = vmatpush3.bf16.msra.mxu1 %v7011_v42  ;;  %v6438_v57 = vpop.f32.mrb[14].mxu0  ;;  %v4352_v18 = vand.u32 4294901760, %v4351_v58  ;;  %v4370_v5 = vand.u32 4294901760, %v11710_v1 }
 0x85e   :  { %6481 = vmatmul.mubr.f32.gmra.mrb[22].mxu1 %v4342_v20  ;;  %v11723_v14 = vsub.f32 %v7171_v47, %v11716_v56  ;;  %v7173_v45 = vadd.f32 %v6438_v57, %v11392_v17  ;;  %v4161_v38 = vpop.f32.mrb[15].mxu0  ;;  %7016 = vmatprep.subr.bf16.mxu1 %v7015_v4  ;;  %v4381_v20 = vsub.f32 %v11703_v3, %v12123_v55 }
 0x85f   :  { %v11730_v26 = vsub.f32 %v7172_v49, %v11719_v21  ;;  %v7174_v42 = vadd.f32 %v4161_v38, %v11394_v25  ;;  %6483 = vmatprep.mubr.f32.mxu1 %v4352_v18  ;;  %v4371_v47 = vsub.f32 %v11710_v1, %v4370_v5 }
 0x860   :  { %v11736_v58 = vand.u32 4294901760, %v7173_v45  ;;  %v4400_v17 = vand.u32 4294901760, %v11723_v14  ;;  %v4382_v25 = vand.u32 4294901760, %v4381_v20 }
 0x861   :  { %v11739_v19 = vand.u32 4294901760, %v7174_v42  ;;  %7018 = vmatpush3.bf16.msra.mxu1 %v7015_v4  ;;  %v4372_v57 = vand.u32 4294901760, %v4371_v47  ;;  %v4390_v55 = vand.u32 4294901760, %v11730_v26 }
 0x862   :  { %6484 = vmatmul.mubr.f32.gmra.mrb[24].mxu1 %v4362_v31  ;;  %v11743_v49 = vsub.f32 %v7173_v45, %v11736_v58  ;;  %7020 = vmatprep.subr.bf16.mxu1 %v11485_v35  ;;  %v4401_v18 = vsub.f32 %v11723_v14, %v4400_v17 }
 0x863   :  { %v11750_v38 = vsub.f32 %v7174_v42, %v11739_v19  ;;  %6486 = vmatprep.mubr.f32.mxu1 %v4372_v57  ;;  %v4391_v4 = vsub.f32 %v11730_v26, %v4390_v55 }
 0x864   :  { %v4420_v31 = vand.u32 4294901760, %v11743_v49  ;;  %v4402_v47 = vand.u32 4294901760, %v4401_v18  ;;  %v7035_v18 = vpack.c.bf16 %v11533_v44, %v11528_v41 }
 0x865   :  { %7022 = vmatpush3.bf16.msra.mxu1 %v11485_v35  ;;  %v4392_v45 = vand.u32 4294901760, %v4391_v4  ;;  %v4410_v20 = vand.u32 4294901760, %v11750_v38  ;;  %v12956_v4 = vld [vmem:[#allocation99_spill] sm:$0xff] }
 0x866   :  { %6487 = vmatmul.mubr.f32.gmra.mrb[26].mxu1 %v4382_v25  ;;  %7024 = vmatprep.subr.bf16.mxu1 %v11499_v60  ;;  %v4421_v42 = vsub.f32 %v11743_v49, %v4420_v31 }
 0x867   :  { %6489 = vmatprep.mubr.f32.mxu1 %v4392_v45  ;;  %v4411_v57 = vsub.f32 %v11750_v38, %v4410_v20  ;;  %v12957_v45 = vld [vmem:[#allocation98_spill] sm:$0xff] }
 0x868   :  { %v4422_v35 = vand.u32 4294901760, %v4421_v42  ;;  %v12959_v42 = vld [vmem:[#allocation96_spill] sm:$0xff] }
 0x869   :  { %7026 = vmatpush3.bf16.msra.mxu1 %v11499_v60  ;;  %v4412_v25 = vand.u32 4294901760, %v4411_v57  ;;  %v7039_v60 = vpack.c.bf16 %v11543_v2, %v11538_v10  ;;  %v12960_v57 = vand.u32 4294901760, %v12959_v42  ;;  %v12967_v42 = vand.u32 4294901760, %v11543_v2 }
 0x86a   :  { %6490 = vmatmul.mubr.f32.gmra.mrb[28].mxu1 %v4402_v47  ;;  %7028 = vmatprep.subr.bf16.mxu1 %v11507_v32  ;;  %v12958_v47 = vand.u32 4294901760, %v12957_v45  ;;  %v12965_v45 = vand.u32 4294901760, %v11613_v34  ;;  %v12974_v2 = vand.u32 4294901760, %v11593_v63 }
 0x86b   :  { %6492 = vmatprep.mubr.f32.mxu1 %v4412_v25 }
 0x86c   :  { %v7095_v25 = vpack.c.bf16 %v12960_v57, %v12958_v47  ;;  %v12966_v47 = vand.u32 4294901760, %v11538_v10  ;;  %v12968_v57 = vand.u32 4294901760, %v11607_v59  ;;  %v12973_v10 = vand.u32 4294901760, %v11668_v40 }
 0x86d   :  { %7030 = vmatpush3.bf16.msra.mxu1 %v11507_v32  ;;  %v7043_v32 = vpack.c.bf16 %v11573_v53, %v11566_v36 }
 0x86e   :  { %6493 = vmatmul.mubr.f32.gmra.mrb[30].mxu1 %v4422_v35  ;;  %7032 = vmatprep.subr.bf16.mxu1 %v11511_v28  ;;  %v12961_v35 = vand.u32 4294901760, %v11582_v29 }
 0x86f   :  { %6527 = vmatprep.mubr.f32.mxu1 %v11575_v61 }
 0x872   :  { %6528 = vmatmul.mubr.f32.vlgmr.msra.gmra.mrb[16].mxu1 %v11568_v62 }
 0x873   :  { %7034 = vmatpush3.bf16.msra.mxu1 %v11511_v28  ;;  %6530 = vmatprep.mubr.f32.mxu1 %v11595_v13  ;;  %v7047_v28 = vpack.c.bf16 %v11601_v9, %v11593_v63  ;;  %v12982_v63 = vld [vmem:[#allocation101_spill] sm:$0xff] }
 0x874   :  { %7036 = vmatprep.subr.bf16.mxu1 %v7035_v18 }
 0x876   :  { %6531 = vmatmul.mubr.f32.gmra.mrb[18].mxu1 %v11587_v16 }
 0x877   :  { %7038 = vmatpush3.bf16.msra.mxu1 %v7035_v18  ;;  %6533 = vmatprep.mubr.f32.mxu1 %v11629_v27  ;;  %v12962_v18 = vand.u32 4294901760, %v11528_v41  ;;  %v12969_v41 = vand.u32 4294901760, %v11641_v7 }
 0x878   :  { %7040 = vmatprep.subr.bf16.mxu1 %v7039_v60 }
 0x87a   :  { %6534 = vmatmul.mubr.f32.gmra.mrb[20].mxu1 %v11622_v48 }
 0x87b   :  { %7042 = vmatpush3.bf16.msra.mxu1 %v7039_v60  ;;  %6536 = vmatprep.mubr.f32.mxu1 %v11653_v39  ;;  %v12963_v60 = vand.u32 4294901760, %v11533_v44  ;;  %v12971_v44 = vand.u32 4294901760, %v11573_v53 }
 0x87c   :  { %7044 = vmatprep.subr.bf16.mxu1 %v7043_v32 }
 0x87e   :  { %6537 = vmatmul.mubr.f32.gmra.mrb[22].mxu1 %v11647_v37 }
 0x87f   :  { %7046 = vmatpush3.bf16.msra.mxu1 %v7043_v32  ;;  %6539 = vmatprep.mubr.f32.mxu1 %v11677_v23  ;;  %v7099_v32 = vpack.c.bf16 %v12963_v60, %v12962_v18  ;;  %v12981_v60 = vand.u32 4294901760, %v11681_v11 }
 0x880   :  { %7048 = vmatprep.subr.bf16.mxu1 %v7047_v28 }
 0x882   :  { %6540 = vmatmul.mubr.f32.gmra.mrb[24].mxu1 %v11674_v12 }
 0x883   :  { %7050 = vmatpush3.bf16.msra.mxu1 %v7047_v28  ;;  %6542 = vmatprep.mubr.f32.mxu1 %v11698_v52  ;;  %v12964_v28 = vand.u32 4294901760, %v11578_v51 }
 0x884   :  { %7052 = vmatprep.subr.bf16.mxu1 %v11515_v15 }
 0x886   :  { %6543 = vmatmul.mubr.f32.gmra.mrb[26].mxu1 %v11695_v33 }
 0x887   :  { %7054 = vmatpush3.bf16.msra.mxu1 %v11515_v15  ;;  %6545 = vmatprep.mubr.f32.mxu1 %v11719_v21  ;;  %v12953_v15 = vld [vmem:[#allocation93_spill] sm:$0xff] }
 0x888   :  { %7056 = vmatprep.subr.bf16.mxu1 %v11519_v54 }
 0x88a   :  { %6546 = vmatmul.mubr.f32.gmra.mrb[28].mxu1 %v11716_v56 }
 0x88b   :  { %7058 = vmatpush3.bf16.msra.mxu1 %v11519_v54  ;;  %6548 = vmatprep.mubr.f32.mxu1 %v11739_v19  ;;  %v12954_v54 = vld [vmem:[#allocation94_spill] sm:$0xff] }
 0x88c   :  { %7060 = vmatprep.subr.bf16.mxu1 %v11523_v43 }
 0x88e   :  { %6549 = vmatmul.mubr.f32.gmra.mrb[30].mxu1 %v11736_v58 }
 0x88f   :  { %7062 = vmatpush3.bf16.msra.mxu1 %v11523_v43  ;;  %6583 = vmatprep.mubr.f32.mxu1 %v11582_v29  ;;  %v12955_v43 = vld [vmem:[#allocation95_spill] sm:$0xff]  ;;  %v7103_v29 = vpack.c.bf16 %v12967_v42, %v12966_v47  ;;  %v12992_v42 = vld [vmem:[#allocation78_spill] sm:$0xff] }
 0x890   :  { %7064 = vmatprep.subr.bf16.mxu1 %v11269_v24 }
 0x892   :  { %6584 = vmatmul.mubr.f32.vlgmr.msra.gmra.mrb[16].mxu1 %v11578_v51  ;;  %v12970_v51 = vand.u32 4294901760, %v11566_v36  ;;  %v12977_v36 = vld [vmem:[#allocation97_spill] sm:$0xff] }
 0x893   :  { %7066 = vmatpush3.bf16.msra.mxu1 %v11269_v24  ;;  %6586 = vmatprep.mubr.f32.mxu1 %v11613_v34  ;;  %v12978_v53 = vand.u32 4294901760, %v12977_v36 }
 0x894   :  { %7068 = vmatprep.subr.bf16.mxu1 %v11279_v30  ;;  %v7107_v34 = vpack.c.bf16 %v12971_v44, %v12970_v51 }
 0x896   :  { %6587 = vmatmul.mubr.f32.gmra.mrb[18].mxu1 %v11607_v59  ;;  %v12975_v59 = vand.u32 4294901760, %v11601_v9  ;;  %v12983_v9 = vand.u32 4294901760, %v12982_v63  ;;  %v11973_v63 = vld [vmem:[%s12020_s2] sm:$0x1] }
 0x897   :  { %7070 = vmatpush3.bf16.msra.mxu1 %v11279_v30  ;;  %6589 = vmatprep.mubr.f32.mxu1 %v11641_v7 }
 0x898   :  { %7072 = vmatprep.subr.bf16.mxu1 %v11298_v8  ;;  %v7111_v7 = vpack.c.bf16 %v12975_v59, %v12974_v2 }
 0x89a   :  { %6590 = vmatmul.mubr.f32.gmra.mrb[20].mxu1 %v11634_v22 }
 0x89b   :  { %7074 = vmatpush3.bf16.msra.mxu1 %v11298_v8  ;;  %6592 = vmatprep.mubr.f32.mxu1 %v11668_v40 }
 0x89c   :  { %7076 = vmatprep.subr.bf16.mxu1 %v11318_v50 }
 0x89e   :  { %6593 = vmatmul.mubr.f32.gmra.mrb[22].mxu1 %v11661_v0 }
 0x89f   :  { %7078 = vmatpush3.bf16.msra.mxu1 %v11318_v50  ;;  %6595 = vmatprep.mubr.f32.mxu1 %v11689_v6 }
 0x8a0   :  { %7080 = vmatprep.subr.bf16.mxu1 %v12953_v15 }
 0x8a2   :  { %6596 = vmatmul.mubr.f32.gmra.mrb[24].mxu1 %v11681_v11  ;;  %v12987_v11 = vld [vmem:[#allocation103_spill] sm:$0xff] }
 0x8a3   :  { %7082 = vmatpush3.bf16.msra.mxu1 %v12953_v15  ;;  %6598 = vmatprep.mubr.f32.mxu1 %v11710_v1 }
 0x8a4   :  { %7084 = vmatprep.subr.bf16.mxu1 %v12954_v54 }
 0x8a6   :  { %6599 = vmatmul.mubr.f32.gmra.mrb[26].mxu1 %v11703_v3 }
 0x8a7   :  { %7086 = vmatpush3.bf16.msra.mxu1 %v12954_v54  ;;  %6601 = vmatprep.mubr.f32.mxu1 %v11730_v26 }
 0x8a8   :  { %7088 = vmatprep.subr.bf16.mxu1 %v12955_v43 }
 0x8aa   :  { %6602 = vmatmul.mubr.f32.gmra.mrb[28].mxu1 %v11723_v14 }
 0x8ab   :  { %7090 = vmatpush3.bf16.msra.mxu1 %v12955_v43  ;;  %6604 = vmatprep.mubr.f32.mxu1 %v11750_v38 }
 0x8ac   :  { %7092 = vmatprep.subr.bf16.mxu1 %v12956_v4 }
 0x8ae   :  { %6605 = vmatmul.mubr.f32.gmra.mrb[30].mxu1 %v11743_v49 }
 0x8af   :  { %7094 = vmatpush3.bf16.msra.mxu1 %v12956_v4  ;;  %6639 = vmatprep.mubr.f32.mxu1 %v12961_v35  ;;  %v12976_v35 = vand.u32 4294901760, %v11661_v0  ;;  %v12984_v0 = vld [vmem:[#allocation102_spill] sm:$0xff] }
 0x8b0   :  { %7096 = vmatprep.subr.bf16.mxu1 %v7095_v25 }
 0x8b2   :  { %6640 = vmatmul.mubr.f32.vlgmr.msra.gmra.mrb[16].mxu1 %v12964_v28  ;;  %v12988_v28 = vand.u32 4294901760, %v12987_v11 }
 0x8b3   :  { %7098 = vmatpush3.bf16.msra.mxu1 %v7095_v25  ;;  %6642 = vmatprep.mubr.f32.mxu1 %v12965_v45  ;;  %v12972_v25 = vand.u32 4294901760, %v11634_v22  ;;  %v12979_v22 = vld [vmem:[#allocation100_spill] sm:$0xff]  ;;  %v12989_v45 = vld [vmem:[#allocation106_spill] sm:$0xff] }
 0x8b4   :  { %7100 = vmatprep.subr.bf16.mxu1 %v7099_v32  ;;  %v12980_v18 = vand.u32 4294901760, %v12979_v22  ;;  %v12990_v47 = vand.u32 4294901760, %v12989_v45 }
 0x8b6   :  { %6643 = vmatmul.mubr.f32.gmra.mrb[18].mxu1 %v12968_v57  ;;  %v7115_v40 = vpack.c.bf16 %v12980_v18, %v12978_v53  ;;  %v7123_v1 = vpack.c.bf16 %v12990_v47, %v12988_v28 }
 0x8b7   :  { %7102 = vmatpush3.bf16.msra.mxu1 %v7099_v32  ;;  %6645 = vmatprep.mubr.f32.mxu1 %v12969_v41  ;;  %v12985_v32 = vand.u32 4294901760, %v12984_v0 }
 0x8b8   :  { %7104 = vmatprep.subr.bf16.mxu1 %v7103_v29 }
 0x8b9   :  { %v7119_v6 = vpack.c.bf16 %v12985_v32, %v12983_v9 }
 0x8ba   :  { %6646 = vmatmul.mubr.f32.gmra.mrb[20].mxu1 %v12972_v25 }
 0x8bb   :  { %7106 = vmatpush3.bf16.msra.mxu1 %v7103_v29  ;;  %6648 = vmatprep.mubr.f32.mxu1 %v12973_v10 }
 0x8bc   :  { %7108 = vmatprep.subr.bf16.mxu1 %v7107_v34 }
 0x8be   :  { %6649 = vmatmul.mubr.f32.gmra.mrb[22].mxu1 %v12976_v35 }
 0x8bf   :  { %7110 = vmatpush3.bf16.msra.mxu1 %v7107_v34  ;;  %6651 = vmatprep.mubr.f32.mxu1 %v4350_v46  ;;  %v12986_v46 = vand.u32 4294901760, %v11703_v3 }
 0x8c0   :  { %7112 = vmatprep.subr.bf16.mxu1 %v7111_v7 }
 0x8c2   :  { %6652 = vmatmul.mubr.f32.gmra.mrb[24].mxu1 %v12981_v60 }
 0x8c3   :  { %7114 = vmatpush3.bf16.msra.mxu1 %v7111_v7  ;;  %6654 = vmatprep.mubr.f32.mxu1 %v4370_v5 }
 0x8c4   :  { %7116 = vmatprep.subr.bf16.mxu1 %v7115_v40 }
 0x8c6   :  { %6655 = vmatmul.mubr.f32.gmra.mrb[26].mxu1 %v12986_v46  ;;  %v11981_v46 = vld [vmem:[%s12020_s2 + $0x2] sm:$0x1] }
 0x8c7   :  { %7118 = vmatpush3.bf16.msra.mxu1 %v7115_v40  ;;  %6657 = vmatprep.mubr.f32.mxu1 %v4390_v55  ;;  %v11967_v40 = vld [vmem:[%s12020_s2 + $0x1] sm:$0x1] }
 0x8c8   :  { %7120 = vmatprep.subr.bf16.mxu1 %v7119_v6 }
 0x8ca   :  { %6658 = vmatmul.mubr.f32.gmra.mrb[28].mxu1 %v4400_v17 }
 0x8cb   :  { %7122 = vmatpush3.bf16.msra.mxu1 %v7119_v6  ;;  %6660 = vmatprep.mubr.f32.mxu1 %v4410_v20 }
 0x8cc   :  { %7124 = vmatprep.subr.bf16.mxu1 %v7123_v1 }
 0x8ce   :  { %6661 = vmatmul.mubr.f32.gmra.mrb[30].mxu1 %v4420_v31 }
 0x8cf   :  { %7126 = vmatpush3.bf16.msra.mxu1 %v7123_v1  ;;  %6695 = vmatprep.mubr.f32.mxu1 %v11575_v61  ;;  %v11990_v1 = vld [vmem:[%s12020_s2 + $0x3] sm:$0x1]  ;;  %s5522_s2 = sld [smem:[#allocation6]] }
 0x8d0   :  { %7128 = vmatprep.subr.bf16.mxu1 %v11269_v24 }
 0x8d2   :  { %6696 = vmatmul.mubr.f32.vlgmr.msra.gmra.mrb[16].mxu1 %v11568_v62 }
 0x8d3   :  { %7130 = vmatpush3.bf16.msra.mxu1 %v11269_v24  ;;  %6698 = vmatprep.mubr.f32.mxu1 %v11595_v13 }
 0x8d4   :  { %7132 = vmatprep.subr.bf16.mxu1 %v11279_v30 }
 0x8d6   :  { %6699 = vmatmul.mubr.f32.gmra.mrb[18].mxu1 %v11587_v16 }
 0x8d7   :  { %7134 = vmatpush3.bf16.msra.mxu1 %v11279_v30  ;;  %6701 = vmatprep.mubr.f32.mxu1 %v11629_v27 }
 0x8d8   :  { %7136 = vmatprep.subr.bf16.mxu1 %v11298_v8 }
 0x8da   :  { %6702 = vmatmul.mubr.f32.gmra.mrb[20].mxu1 %v11622_v48 }
 0x8db   :  { %7138 = vmatpush3.bf16.msra.mxu1 %v11298_v8  ;;  %6704 = vmatprep.mubr.f32.mxu1 %v11653_v39 }
 0x8dc   :  { %7140 = vmatprep.subr.bf16.mxu1 %v11318_v50 }
 0x8de   :  { %6705 = vmatmul.mubr.f32.gmra.mrb[22].mxu1 %v11647_v37 }
 0x8df   :  { %7142 = vmatpush3.bf16.msra.mxu1 %v11318_v50  ;;  %6707 = vmatprep.mubr.f32.mxu1 %v11677_v23 }
 0x8e0   :  { %7144 = vmatprep.subr.bf16.mxu1 %v12953_v15 }
 0x8e2   :  { %6708 = vmatmul.mubr.f32.gmra.mrb[24].mxu1 %v11674_v12 }
 0x8e3   :  { %7146 = vmatpush3.bf16.msra.mxu1 %v12953_v15  ;;  %6710 = vmatprep.mubr.f32.mxu1 %v11698_v52 }
 0x8e4   :  { %7148 = vmatprep.subr.bf16.mxu1 %v12954_v54 }
 0x8e6   :  { %6711 = vmatmul.mubr.f32.gmra.mrb[26].mxu1 %v11695_v33 }
 0x8e7   :  { %7150 = vmatpush3.bf16.msra.mxu1 %v12954_v54  ;;  %6713 = vmatprep.mubr.f32.mxu1 %v11719_v21 }
 0x8e8   :  { %7152 = vmatprep.subr.bf16.mxu1 %v12955_v43 }
 0x8ea   :  { %6714 = vmatmul.mubr.f32.gmra.mrb[28].mxu1 %v11716_v56 }
 0x8eb   :  { %7154 = vmatpush3.bf16.msra.mxu1 %v12955_v43  ;;  %6716 = vmatprep.mubr.f32.mxu1 %v11739_v19  ;;  %v12991_v43 = vld [vmem:[#allocation79_spill] sm:$0xff] }
 0x8ec   :  { %7156 = vmatprep.subr.bf16.mxu1 %v12956_v4 }
 0x8ee   :  { %6717 = vmatmul.mubr.f32.gmra.mrb[30].mxu1 %v11736_v58 }
 0x8ef   :  { %7158 = vmatpush3.bf16.msra.mxu1 %v12956_v4  ;;  %6751 = vmatprep.mubr.f32.mxu1 %v11575_v61 }
 0x8f2   :  { %6752 = vmatmul.mubr.f32.vlgmr.msra.gmra.mrb[16].mxu1 %v11568_v62 }
 0x8f3   :  { %6754 = vmatprep.mubr.f32.mxu1 %v11595_v13 }
 0x8f6   :  { %6755 = vmatmul.mubr.f32.gmra.mrb[18].mxu1 %v11587_v16 }
 0x8f7   :  { %6757 = vmatprep.mubr.f32.mxu1 %v11629_v27 }
 0x8fa   :  { %6758 = vmatmul.mubr.f32.gmra.mrb[20].mxu1 %v11622_v48 }
 0x8fb   :  { %6760 = vmatprep.mubr.f32.mxu1 %v11653_v39 }
 0x8fe   :  { %6761 = vmatmul.mubr.f32.gmra.mrb[22].mxu1 %v11647_v37 }
 0x8ff   :  { %6763 = vmatprep.mubr.f32.mxu1 %v11677_v23 }
 0x902   :  { %6764 = vmatmul.mubr.f32.gmra.mrb[24].mxu1 %v11674_v12 }
 0x903   :  { %6766 = vmatprep.mubr.f32.mxu1 %v11698_v52 }
 0x906   :  { %6767 = vmatmul.mubr.f32.gmra.mrb[26].mxu1 %v11695_v33 }
 0x907   :  { %6769 = vmatprep.mubr.f32.mxu1 %v11719_v21 }
 0x90a   :  { %6770 = vmatmul.mubr.f32.gmra.mrb[28].mxu1 %v11716_v56 }
 0x90b   :  { %6772 = vmatprep.mubr.f32.mxu1 %v11739_v19 }
 0x90e   :  { %6773 = vmatmul.mubr.f32.gmra.mrb[30].mxu1 %v11736_v58 }
 0x9c5   :  { %v6753_v24 = vpop.f32.mrb[16].mxu1 }
 0x9c6   :  { %v5379_v30 = vpop.f32.mrb[17].mxu1 }
 0x9c9   :  { %v6756_v8 = vpop.f32.mrb[18].mxu1 }
 0x9ca   :  { %v5474_v50 = vsel %vm103_vm0, %v6753_v24, %v6756_v8  ;;  %v5391_v62 = vpop.f32.mrb[19].mxu1 }
 0x9cb   :  { %v5473_v23 = vsel %vm103_vm0, %v5379_v30, %v5391_v62 }
 0x9cd   :  { %v6759_v12 = vpop.f32.mrb[20].mxu1 }
 0x9ce   :  { %v5476_v16 = vsel %vm106_vm1, %v5474_v50, %v6759_v12  ;;  %v5403_v61 = vpop.f32.mrb[21].mxu1 }
 0x9cf   :  { %v5475_v13 = vsel %vm106_vm1, %v5473_v23, %v5403_v61 }
 0x9d1   :  { %v6762_v48 = vpop.f32.mrb[22].mxu1 }
 0x9d2   :  { %v5478_v27 = vsel %vm109_vm2, %v5476_v16, %v6762_v48  ;;  %v5415_v37 = vpop.f32.mrb[23].mxu1 }
 0x9d3   :  { %v5477_v39 = vsel %vm109_vm2, %v5475_v13, %v5415_v37 }
 0x9d5   :  { %v6765_v33 = vpop.f32.mrb[24].mxu1 }
 0x9d6   :  { %v5480_v26 = vsel %vm2671_vm3, %v5478_v27, %v6765_v33  ;;  %v5427_v52 = vpop.f32.mrb[25].mxu1 }
 0x9d7   :  { %v5479_v3 = vsel %vm2671_vm3, %v5477_v39, %v5427_v52 }
 0x9d9   :  { %v6768_v56 = vpop.f32.mrb[26].mxu1 }
 0x9da   :  { %v5483_v55 = vsel %vm5481_vm5, %v5480_v26, %v6768_v56  ;;  %v5439_v21 = vpop.f32.mrb[27].mxu1 }
 0x9db   :  { %v5482_v5 = vsel %vm5481_vm5, %v5479_v3, %v5439_v21 }
 0x9dd   :  { %v6771_v14 = vpop.f32.mrb[28].mxu1 }
 0x9de   :  { %v5486_v58 = vsel %vm5484_vm6, %v5483_v55, %v6771_v14  ;;  %v5451_v17 = vpop.f32.mrb[29].mxu1 }
 0x9df   :  { %v5485_v19 = vsel %vm5484_vm6, %v5482_v5, %v5451_v17 }
 0x9e1   :  { %v6774_v49 = vpop.f32.mrb[30].mxu1 }
 0x9e2   :  { %v5489_v38 = vsel %vm5487_vm7, %v5486_v58, %v6774_v49  ;;  %v5463_v31 = vpop.f32.mrb[31].mxu1 }
 0x9e3   :  { %v5491_v20 = vmul.f32 0.25, %v5489_v38  ;;  %v5488_v15 = vsel %vm5487_vm7, %v5485_v19, %v5463_v31 }
 0x9e4   :  { %v5490_v54 = vmul.f32 0.25, %v5488_v15 }
 0x9e5   :  { %v11953_v4 = vadd.f32 %v5491_v20, %v12991_v43 }
 0x9e6   :  { %v11956_v29 = vadd.f32 %v5490_v54, %v12992_v42 }
 0x9e7   :  { %v5502_v57 = vmul.f32 %v11953_v4, %v11953_v4 }
 0x9e8   :  { %v5494_v41 = vadd.f32 %v11953_v4, %v11956_v29  ;;  %v5501_v51 = vmul.f32 %v11956_v29, %v11956_v29 }
 0x9ea   :  { %v5495_v44 = vrot.slane %v5494_v41, 4  ;;  %v5503_v34 = vadd.f32 %v5502_v57, %v5501_v51 }
 0x9ec   :  { %v5496_v25 = vadd.f32 %v5495_v44, %v5494_v41  ;;  %v5504_v10 = vrot.slane %v5503_v34, 4  ;;  %v5525_v41 = vstv %s5522_s2 }
 0x9ee   :  { %v5497_v2 = vrot.slane %v5496_v25, 2  ;;  %v5505_v59 = vadd.f32 %v5504_v10, %v5503_v34 }
 0x9f0   :  { %v5498_v7 = vadd.f32 %v5497_v2, %v5496_v25  ;;  %v5506_v35 = vrot.slane %v5505_v59, 2  ;;  %v5548_v25 = vstv %s5713_s4 }
 0x9f2   :  { %v5499_v36 = vrot.slane %v5498_v7, 1  ;;  %v5507_v53 = vadd.f32 %v5506_v35, %v5505_v59  ;;  %v5573_v35 = vstv %s5715_s14 }
 0x9f4   :  { %v5500_v22 = vadd.f32 %v5499_v36, %v5498_v7  ;;  %v5508_v18 = vrot.slane %v5507_v53, 1  ;;  %v5552_v7 = vstv %s5714_s3  ;;  %v5529_v36 = vstv %s5527_s15 }
 0x9f6   :  { %v5533_v60 = vmul.f32 %v11967_v40, %v5500_v22  ;;  %v5510_v9 = vmul.f32 %v11973_v63, %v5500_v22  ;;  %v5509_v0 = vadd.f32 %v5508_v18, %v5507_v53  ;;  %v5558_v11 = vmul.f32 %v11981_v46, %v5500_v22 }
 0x9f7   :  { %v5583_v24 = vmul.f32 %v11990_v1, %v5500_v22 }
 0x9f8   :  { %v5534_v32 = vsel %vm2692_vm4, %v5533_v60, 0.0  ;;  %v5511_v6 = vsel %vm2692_vm4, %v5510_v9, 0.0  ;;  %v5514_v28 = vmul.f32 %v11973_v63, %v5509_v0  ;;  %v5559_v45 = vsel %vm2692_vm4, %v5558_v11, 0.0 }
 0x9f9   :  { %5535 = vadd.xlane.f32.xlu1 %v5534_v32  ;;  %5512 = vadd.xlane.f32.xlu0 %v5511_v6  ;;  %v5537_v30 = vmul.f32 %v11967_v40, %v5509_v0  ;;  %v5584_v8 = vsel %vm2692_vm4, %v5583_v24, 0.0  ;;  %v5562_v62 = vmul.f32 %v11981_v46, %v5509_v0  ;;  %v5587_v12 = vmul.f32 %v11990_v1, %v5509_v0 }
 0x9fa   :  { %v5515_v47 = vsel %vm2692_vm4, %v5514_v28, 0.0  ;;  %v5577_v32 = vstv %s5716_s10  ;;  %v5598_v6 = vstv %s5717_s16 }
 0x9fb   :  { %v5538_v50 = vsel %vm2692_vm4, %v5537_v30, 0.0  ;;  %v5563_v23 = vsel %vm2692_vm4, %v5562_v62, 0.0  ;;  %v5588_v16 = vsel %vm2692_vm4, %v5587_v12, 0.0 }
 0x9fd   :  { %5560 = vadd.xlane.f32.xlu1 %v5559_v45  ;;  %5516 = vadd.xlane.f32.xlu0 %v5515_v47 }
 0xa01   :  { %5585 = vadd.xlane.f32.xlu1 %v5584_v8  ;;  %5539 = vadd.xlane.f32.xlu0 %v5538_v50 }
 0xa05   :  { %5564 = vadd.xlane.f32.xlu0 %v5563_v23  ;;  %v5602_v23 = vstv %s5718_s17 }
 0xa09   :  { %5589 = vadd.xlane.f32.xlu0 %v5588_v16 }
 0xa86   :  { %v5536_v61 = vpop.xlane.xlu1 %5535  ;;  %v5513_v13 = vpop.xlane.xlu0 %5512 }
 0xa87   :  { %v5518_v48 = vmul.f32 0.001953125, %v5513_v13  ;;  %v5541_v39 = vmul.f32 0.001953125, %v5536_v61 }
 0xa89   :  { %v5520_v33 = vmul.f32 %v5518_v48, %v5518_v48  ;;  %v5543_v56 = vmul.f32 %v5541_v39, %v5541_v39 }
 0xa8a   :  { %v5561_v27 = vpop.xlane.xlu1 %5560  ;;  %v5517_v37 = vpop.xlane.xlu0 %5516 }
 0xa8b   :  { %v5519_v26 = vmul.f32 0.001953125, %v5517_v37  ;;  %v5566_v55 = vmul.f32 0.001953125, %v5561_v27 }
 0xa8d   :  { %v5521_v52 = vsub.f32 %v5519_v26, %v5520_v33  ;;  %v5568_v19 = vmul.f32 %v5566_v55, %v5566_v55  ;;  %v12993_v26 = vld [vmem:[#allocation73_spill] sm:$0xff] }
 0xa8e   :  { %v5540_v3 = vpop.xlane.xlu0 %5539  ;;  %v5586_v14 = vpop.xlane.xlu1 %5585 }
 0xa8f   :  { %v5523_v21 = vadd.f32 1e-05, %v5521_v52  ;;  %v5542_v5 = vmul.f32 0.001953125, %v5540_v3  ;;  %v5591_v49 = vmul.f32 0.001953125, %v5586_v14 }
 0xa91   :  { %7350 = vrsqrt.f32 %v5523_v21  ;;  %v5544_v58 = vsub.f32 %v5542_v5, %v5543_v56  ;;  %v5593_v54 = vmul.f32 %v5591_v49, %v5591_v49 }
 0xa92   :  { %v5565_v17 = vpop.xlane.xlu0 %5564 }
 0xa93   :  { %v5546_v38 = vadd.f32 1e-05, %v5544_v58  ;;  %v5567_v31 = vmul.f32 0.001953125, %v5565_v17 }
 0xa95   :  { %7352 = vrsqrt.f32 %v5546_v38  ;;  %v5569_v20 = vsub.f32 %v5567_v31, %v5568_v19 }
 0xa96   :  { %v5590_v15 = vpop.xlane.xlu0 %5589 }
 0xa97   :  { %v5571_v43 = vadd.f32 1e-05, %v5569_v20  ;;  %v5592_v42 = vmul.f32 0.001953125, %v5590_v15 }
 0xa99   :  { %7354 = vrsqrt.f32 %v5571_v43  ;;  %v5594_v57 = vsub.f32 %v5592_v42, %v5593_v54 }
 0xa9b   :  { %v7351_v51 = vpop.eup %7350  ;;  %v5596_v44 = vadd.f32 1e-05, %v5594_v57 }
 0xa9c   :  { %v5526_v34 = vmul.f32 %v7351_v51, %v5525_v41 }
 0xa9d   :  { %7356 = vrsqrt.f32 %v5596_v44 }
 0xa9e   :  { %v5528_v59 = vmul.f32 %v5526_v34, %v5518_v48  ;;  %v5531_v11 = vmul.f32 %v11973_v63, %v5526_v34 }
 0xa9f   :  { %v7353_v10 = vpop.eup %7352 }
 0xaa0   :  { %v5549_v2 = vmul.f32 %v7353_v10, %v5548_v25  ;;  %v5530_v0 = vsub.f32 %v5529_v36, %v5528_v59 }
 0xaa2   :  { %v5551_v53 = vmul.f32 %v5549_v2, %v5541_v39  ;;  %v5554_v60 = vmul.f32 %v11967_v40, %v5549_v2  ;;  %v5532_v62 = vmul.f32 %v11973_v63, %v5530_v0 }
 0xaa3   :  { %v7355_v22 = vpop.eup %7354 }
 0xaa4   :  { %v5553_v18 = vsub.f32 %v5552_v7, %v5551_v53  ;;  %v5574_v9 = vmul.f32 %v7355_v22, %v5573_v35  ;;  %v5555_v24 = vadd.f32 %v5554_v60, %v5531_v11 }
 0xaa6   :  { %v5576_v28 = vmul.f32 %v5574_v9, %v5566_v55  ;;  %v5579_v45 = vmul.f32 %v11981_v46, %v5574_v9  ;;  %v5556_v30 = vmul.f32 %v11967_v40, %v5553_v18 }
 0xaa7   :  { %v7357_v47 = vpop.eup %7356 }
 0xaa8   :  { %v5578_v8 = vsub.f32 %v5577_v32, %v5576_v28  ;;  %v5599_v50 = vmul.f32 %v7357_v47, %v5598_v6  ;;  %v5580_v12 = vadd.f32 %v5579_v45, %v5555_v24  ;;  %v5557_v48 = vadd.f32 %v5556_v30, %v5532_v62 }
 0xaaa   :  { %v5581_v16 = vmul.f32 %v11981_v46, %v5578_v8  ;;  %v5601_v61 = vmul.f32 %v5599_v50, %v5591_v49  ;;  %v5604_v13 = vmul.f32 %v11990_v1, %v5599_v50 }
 0xaac   :  { %v5603_v27 = vsub.f32 %v5602_v23, %v5601_v61  ;;  %v5605_v37 = vadd.f32 %v5604_v13, %v5580_v12  ;;  %v5582_v39 = vadd.f32 %v5581_v16, %v5557_v48 }
 0xaae   :  { %v5606_v33 = vmul.f32 %v11990_v1, %v5603_v27  ;;  %v5611_v52 = vrot.slane %v5605_v37, %v12993_v26 }
 0xab0   :  { %v5607_v40 = vadd.f32 %v5606_v33, %v5582_v39  ;;  %v5612_v3 = vmul.f32 %v5611_v52, %v11956_v29  ;;  %v5613_v63 = vmul.f32 %v5611_v52, %v11953_v4 }
 0xab2   :  { %v5617_v56 = vrot.slane %v5607_v40, %v12993_v26 }
 0xab4   :  { %v5618_v55 = vadd.f32 %v5617_v56, %v5612_v3  ;;  %v5619_v46 = vadd.f32 %v5617_v56, %v5613_v63 }
 0xab6   :  { %5620 = vst [vmem:[%s12026_s8] sm:$0xff] %v5618_v55  ;;  %5621 = vst [vmem:[%s12026_s8 + $0x8] sm:$0xff] %v5619_v46 }
 0xab7   :  { %5626 = vsyncpa [#allocation3], 1 }
 0xab8   :  { %5627 = vsyncpa [#allocation5], 1 }
 0xab9   :  { %5628 = vsyncpa [#allocation8], 1 }

</bundles_post_ra>
